<compile_context>
chip_gen: v7x
topology: tpu7x:2x2x1
jax: 0.10.0
libtpu: 0.0.40
codegen_flags: <defaults>
</compile_context>

<pallas_src>
import functools
import math

import jax
import jax.numpy as jnp
from jax.experimental import pallas as pl
from jax.experimental.pallas import tpu as pltpu

CFG = dict(d_model=32, n_heads=4, d_ff=64, n_layers=2, n_words=64)
MAX_LEN = 16
NEG = -1e30   # causal-mask / padded-logit value (scores stay f32)

# Weight keys that feed the MXU -> stored in bf16 (half the weight DMA bytes).
_MATMUL_WEIGHT_KEYS = {"wqkv", "wo", "w1", "w2", "wo1", "cwq", "cwkv", "wo2"}


def _ru128(n):
    return ((n + 127) // 128) * 128


# ----------------------------------------------------------------------------
# In-kernel math helpers
# ----------------------------------------------------------------------------
def _mm(a, b):
    """bf16 MXU matmul with f32 accumulation (astype is a no-op if already bf16)."""
    return jnp.dot(a.astype(jnp.bfloat16), b.astype(jnp.bfloat16),
                   preferred_element_type=jnp.float32)


def _layernorm(x, g, b):
    mu = jnp.mean(x, axis=-1, keepdims=True)
    var = jnp.mean((x - mu) ** 2, axis=-1, keepdims=True)
    return (x - mu) * jax.lax.rsqrt(var + 1e-5) * g + b


def _softmax_rows(x):
    m = jnp.max(x, axis=-1, keepdims=True)
    e = jnp.exp(x - m)
    return e * pl.reciprocal(jnp.sum(e, axis=-1, keepdims=True), approx=True)


def _embed(ids, emb_bf, pe, *, B, S, scale):
    """One-hot bf16 matmul embedding lookup + in-kernel pos-enc broadcast."""
    M, V = B * S, emb_bf.shape[0]
    D = emb_bf.shape[1]
    cols = jax.lax.broadcasted_iota(jnp.int32, (M, V), 1)
    onehot = (ids == cols).astype(jnp.bfloat16)                        # exact in bf16
    e = jnp.dot(onehot, emb_bf, preferred_element_type=jnp.float32) * scale
    e = e.reshape(B, S, D) + pe[0:S, :][None, :, :]                    # broadcast PE
    return e.reshape(M, D)


def _attend(q, k, v, wo, bo, scr, *, B, Sq, Sk, H, causal):
    """Multi-head attention.  Head contexts are assembled into `scr` (a VMEM
    scratch slab) so the output projection is ONE full-width MXU matmul instead
    of H serialized K=8 matmuls over 8-row slices of a bf16 weight."""
    D = q.shape[-1]
    dh = D // H
    M = B * Sq
    scale = 1.0 / math.sqrt(dh)

    if causal:
        r = jax.lax.broadcasted_iota(jnp.int32, (Sq, Sk), 0)
        c = jax.lax.broadcasted_iota(jnp.int32, (Sq, Sk), 1)
        mask = (c <= r)[None, :, :]                                    # [1,Sq,Sk]

    for h in range(H):                                                 # static, H=4
        sl = slice(h * dh, (h + 1) * dh)
        qh = q[:, sl].reshape(B, Sq, dh).astype(jnp.bfloat16)
        kh = k[:, sl].reshape(B, Sk, dh).astype(jnp.bfloat16)
        vh = v[:, sl].reshape(B, Sk, dh).astype(jnp.bfloat16)

        s = jnp.einsum('bqd,bkd->bqk', qh, kh,
                       preferred_element_type=jnp.float32) * scale     # [B,Sq,Sk]
        if causal:
            s = jnp.where(mask, s, NEG)
        p = _softmax_rows(s)
        oh = jnp.einsum('bqk,bkd->bqd', p.astype(jnp.bfloat16), vh,
                        preferred_element_type=jnp.float32)            # [B,Sq,dh]
        scr[0:M, sl] = oh.reshape(M, dh)                               # assemble heads

    return _mm(scr[0:M, :], wo) + bo                                   # single Wo matmul


def _ffn(x, w1, b1, w2, b2):
    h = jnp.maximum(_mm(x, w1) + b1, 0.0)
    return _mm(h, w2) + b2


def _encoder_layer(x, p, l, scr, *, B, S, H):
    D = x.shape[-1]
    qkv = _mm(x, p["wqkv"][l]) + p["bqkv"][l]            # [M, 128] (96 real cols)
    q, k, v = qkv[:, :D], qkv[:, D:2 * D], qkv[:, 2 * D:3 * D]
    a = _attend(q, k, v, p["wo"][l], p["bo"][l], scr,
                B=B, Sq=S, Sk=S, H=H, causal=False)
    x1 = _layernorm(x + a, p["ln1g"][l], p["ln1b"][l])
    f = _ffn(x1, p["w1"][l], p["b1"][l], p["w2"][l], p["b2"][l])
    return _layernorm(x1 + f, p["ln2g"][l], p["ln2b"][l])


def _decoder_layer(x, enc_bf, p, l, scr, *, B, Sq, Sk, H):
    D = x.shape[-1]
    # causal self-attention
    qkv = _mm(x, p["wqkv"][l]) + p["bqkv"][l]
    q, k, v = qkv[:, :D], qkv[:, D:2 * D], qkv[:, 2 * D:3 * D]
    a = _attend(q, k, v, p["wo1"][l], p["bo1"][l], scr,
                B=B, Sq=Sq, Sk=Sq, H=H, causal=True)
    x1 = _layernorm(x + a, p["ln1g"][l], p["ln1b"][l])
    # cross-attention against the (bf16, VMEM-resident) encoder memory
    qc = _mm(x1, p["cwq"][l]) + p["cbq"][l]
    kvc = _mm(enc_bf, p["cwkv"][l]) + p["cbkv"][l]       # [B*Sk, 128] (64 real cols)
    kc, vc = kvc[:, :D], kvc[:, D:2 * D]
    c = _attend(qc, kc, vc, p["wo2"][l], p["bo2"][l], scr,
                B=B, Sq=Sq, Sk=Sk, H=H, causal=False)
    x2 = _layernorm(x1 + c, p["ln2g"][l], p["ln2b"][l])
    # FFN
    f = _ffn(x2, p["w1"][l], p["b1"][l], p["w2"][l], p["b2"][l])
    return _layernorm(x2 + f, p["ln3g"][l], p["ln3b"][l])


# ----------------------------------------------------------------------------
# The single fused kernel (no grid: everything fits comfortably in VMEM)
# ----------------------------------------------------------------------------
def _transformer_kernel(*refs, treedef, n_in, B, S_in, S_out, H, L, emb_scale):
    in_refs = refs[:n_in]
    probs_ref = refs[n_in]
    attn_scr = refs[n_in + 1]
    (ids_in_ref, ids_out_ref, emb_in_ref, emb_out_ref, pe_ref,
     enc_p, dec_p, w_out_ref, b_out_ref) = jax.tree_util.tree_unflatten(treedef, in_refs)

    pe = pe_ref[...]

    # -------- encoder stack --------
    x = _embed(ids_in_ref[...], emb_in_ref[...], pe, B=B, S=S_in, scale=emb_scale)
    for l in range(L):                                   # static unroll (L=2)
        x = _encoder_layer(x, enc_p, l, attn_scr, B=B, S=S_in, H=H)
    enc_bf = x.astype(jnp.bfloat16)                      # cast once, reused by all layers

    # -------- decoder stack --------
    y = _embed(ids_out_ref[...], emb_out_ref[...], pe, B=B, S=S_out, scale=emb_scale)
    for l in range(L):
        y = _decoder_layer(y, enc_bf, dec_p, l, attn_scr, B=B, Sq=S_out, Sk=S_in, H=H)

    # -------- final linear + softmax (lane-dense: vocab padded to 128) --------
    logits = _mm(y, w_out_ref[...]) + b_out_ref[...]     # padded cols carry -1e30 bias
    probs_ref[...] = _softmax_rows(logits)


# ----------------------------------------------------------------------------
# Wrapper
# ----------------------------------------------------------------------------
def transformer_forward(params, x_in, x_out):
    B, S_in = x_in.shape
    _, S_out = x_out.shape
    D, V, H, L = CFG["d_model"], CFG["n_words"], CFG["n_heads"], CFG["n_layers"]

    ids_in = x_in.reshape(B * S_in, 1).astype(jnp.int32)
    ids_out = x_out.reshape(B * S_out, 1).astype(jnp.int32)

    tree = (ids_in, ids_out, params["emb_in"], params["emb_out"], params["pe"],
            params["enc_stack"], params["dec_stack"],
            params["w_out"], params["b_out"])
    flat, treedef = jax.tree_util.tree_flatten(tree)

    v_pad = params["w_out"].shape[1]
    kern = functools.partial(
        _transformer_kernel, treedef=treedef, n_in=len(flat),
        B=B, S_in=S_in, S_out=S_out, H=H, L=L, emb_scale=math.sqrt(D))

    probs_pad = pl.pallas_call(
        kern,
        out_shape=jax.ShapeDtypeStruct((B * S_out, v_pad), jnp.float32),
        scratch_shapes=[pltpu.VMEM((max(B * S_in, B * S_out), D), jnp.float32)],
    )(*flat)
    return probs_pad[:, :V].reshape(B, S_out, V)


# ----------------------------------------------------------------------------
# Deterministic parameter init (stacked per-layer weights; matmul weights bf16;
# fused-QKV / cross-KV / output-linear column dims padded to 128 lanes)
# ----------------------------------------------------------------------------
def sinusoidal_pe(max_len, d):
    pos = jnp.arange(max_len, dtype=jnp.float32)[:, None]
    i = jnp.arange(0, d, 2, dtype=jnp.float32)
    angle = pos / jnp.power(10000.0, i / d)
    pe = jnp.zeros((max_len, d), jnp.float32)
    pe = pe.at[:, 0::2].set(jnp.sin(angle))
    pe = pe.at[:, 1::2].set(jnp.cos(angle))
    return pe


def init_params(key, cfg):
    d, f, L, V = cfg["d_model"], cfg["d_ff"], cfg["n_layers"], cfg["n_words"]
    keys = iter(jax.random.split(key, 512))

    def dense(nin, nout):
        return (0.02 * jax.random.normal(next(keys), (nin, nout), jnp.float32),
                jnp.zeros((1, nout), jnp.float32))

    def pad_cols(w, b, n, bias_pad=0.0):
        extra = n - w.shape[1]
        return (jnp.pad(w, ((0, 0), (0, extra))),
                jnp.pad(b, ((0, 0), (0, extra)), constant_values=bias_pad))

    ones_d = jnp.ones((1, d), jnp.float32)
    zeros_d = jnp.zeros((1, d), jnp.float32)

    def self_attn_fused():
        wq, bq = dense(d, d); wk, bk = dense(d, d)
        wv, bv = dense(d, d); wo, bo = dense(d, d)
        wqkv, bqkv = pad_cols(jnp.concatenate([wq, wk, wv], axis=1),
                              jnp.concatenate([bq, bk, bv], axis=1), _ru128(3 * d))
        return wqkv, bqkv, wo, bo

    def cross_attn_fused():
        wq, bq = dense(d, d); wk, bk = dense(d, d)
        wv, bv = dense(d, d); wo, bo = dense(d, d)
        wkv, bkv = pad_cols(jnp.concatenate([wk, wv], axis=1),
                            jnp.concatenate([bk, bv], axis=1), _ru128(2 * d))
        return wq, bq, wkv, bkv, wo, bo

    enc_layers, dec_layers = [], []
    for _ in range(L):
        wqkv, bqkv, wo, bo = self_attn_fused()
        w1, b1 = dense(d, f); w2, b2 = dense(f, d)
        enc_layers.append(dict(wqkv=wqkv, bqkv=bqkv, wo=wo, bo=bo,
                               ln1g=ones_d, ln1b=zeros_d,
                               w1=w1, b1=b1, w2=w2, b2=b2,
                               ln2g=ones_d, ln2b=zeros_d))
    for _ in range(L):
        wqkv, bqkv, wo1, bo1 = self_attn_fused()
        cwq, cbq, cwkv, cbkv, wo2, bo2 = cross_attn_fused()
        w1, b1 = dense(d, f); w2, b2 = dense(f, d)
        dec_layers.append(dict(wqkv=wqkv, bqkv=bqkv, wo1=wo1, bo1=bo1,
                               ln1g=ones_d, ln1b=zeros_d,
                               cwq=cwq, cbq=cbq, cwkv=cwkv, cbkv=cbkv,
                               wo2=wo2, bo2=bo2,
                               ln2g=ones_d, ln2b=zeros_d,
                               w1=w1, b1=b1, w2=w2, b2=b2,
                               ln3g=ones_d, ln3b=zeros_d))

    def stack(layers):
        out = {}
        for k in layers[0]:
            a = jnp.stack([lp[k] for lp in layers], axis=0)
            if k in _MATMUL_WEIGHT_KEYS:
                a = a.astype(jnp.bfloat16)
            out[k] = a
        return out

    # Final linear padded to 128 lanes; padded logits get a -1e30 bias so the
    # in-kernel softmax ignores them (their probabilities are exactly 0).
    w_out, b_out = dense(d, V)
    w_out, b_out = pad_cols(w_out, b_out, _ru128(V), bias_pad=NEG)

    return dict(
        emb_in=(0.02 * jax.random.normal(next(keys), (V, d))).astype(jnp.bfloat16),
        emb_out=(0.02 * jax.random.normal(next(keys), (V, d))).astype(jnp.bfloat16),
        pe=sinusoidal_pe(MAX_LEN, d),
        enc_stack=stack(enc_layers),
        dec_stack=stack(dec_layers),
        w_out=w_out.astype(jnp.bfloat16), b_out=b_out)


# ----------------------------------------------------------------------------
if __name__ == "__main__":
    key = jax.random.PRNGKey(0)
    kp, ki, ko = jax.random.split(key, 3)
    params = init_params(kp, CFG)

    B, S_in, S_out = 2, 8, 8
    x_in = jax.random.randint(ki, (B, S_in), 0, CFG["n_words"], dtype=jnp.int32)
    x_out = jax.random.randint(ko, (B, S_out), 0, CFG["n_words"], dtype=jnp.int32)

    fwd = jax.jit(transformer_forward)
    probs = fwd(params, x_in, x_out)
    jax.block_until_ready(probs)

    assert probs.shape == (B, S_out, CFG["n_words"])
    assert bool(jnp.all(jnp.isfinite(probs)))
    assert bool(jnp.all(jnp.abs(jnp.sum(probs, axis=-1) - 1.0) < 5e-2))
    print("KERNEL_OK")
</pallas_src>

<mosaic_0001>
module attributes {stable_mosaic.version = 11 : i64} {
  func.func @_transformer_kernel(%arg0: memref<16x1xi32, #tpu.memory_space<vmem>>, %arg1: memref<16x1xi32, #tpu.memory_space<vmem>>, %arg2: memref<64x32xbf16, #tpu.memory_space<vmem>>, %arg3: memref<64x32xbf16, #tpu.memory_space<vmem>>, %arg4: memref<16x32xf32, #tpu.memory_space<vmem>>, %arg5: memref<2x1x64xf32, #tpu.memory_space<vmem>>, %arg6: memref<2x1x32xf32, #tpu.memory_space<vmem>>, %arg7: memref<2x1x32xf32, #tpu.memory_space<vmem>>, %arg8: memref<2x1x128xf32, #tpu.memory_space<vmem>>, %arg9: memref<2x1x32xf32, #tpu.memory_space<vmem>>, %arg10: memref<2x1x32xf32, #tpu.memory_space<vmem>>, %arg11: memref<2x1x32xf32, #tpu.memory_space<vmem>>, %arg12: memref<2x1x32xf32, #tpu.memory_space<vmem>>, %arg13: memref<2x32x64xbf16, #tpu.memory_space<vmem>>, %arg14: memref<2x64x32xbf16, #tpu.memory_space<vmem>>, %arg15: memref<2x32x32xbf16, #tpu.memory_space<vmem>>, %arg16: memref<2x32x128xbf16, #tpu.memory_space<vmem>>, %arg17: memref<2x1x64xf32, #tpu.memory_space<vmem>>, %arg18: memref<2x1x32xf32, #tpu.memory_space<vmem>>, %arg19: memref<2x1x32xf32, #tpu.memory_space<vmem>>, %arg20: memref<2x1x32xf32, #tpu.memory_space<vmem>>, %arg21: memref<2x1x128xf32, #tpu.memory_space<vmem>>, %arg22: memref<2x1x128xf32, #tpu.memory_space<vmem>>, %arg23: memref<2x1x32xf32, #tpu.memory_space<vmem>>, %arg24: memref<2x32x128xbf16, #tpu.memory_space<vmem>>, %arg25: memref<2x32x32xbf16, #tpu.memory_space<vmem>>, %arg26: memref<2x1x32xf32, #tpu.memory_space<vmem>>, %arg27: memref<2x1x32xf32, #tpu.memory_space<vmem>>, %arg28: memref<2x1x32xf32, #tpu.memory_space<vmem>>, %arg29: memref<2x1x32xf32, #tpu.memory_space<vmem>>, %arg30: memref<2x1x32xf32, #tpu.memory_space<vmem>>, %arg31: memref<2x1x32xf32, #tpu.memory_space<vmem>>, %arg32: memref<2x32x64xbf16, #tpu.memory_space<vmem>>, %arg33: memref<2x64x32xbf16, #tpu.memory_space<vmem>>, %arg34: memref<2x32x32xbf16, #tpu.memory_space<vmem>>, %arg35: memref<2x32x32xbf16, #tpu.memory_space<vmem>>, %arg36: memref<2x32x128xbf16, #tpu.memory_space<vmem>>, %arg37: memref<32x128xbf16, #tpu.memory_space<vmem>>, %arg38: memref<1x128xf32, #tpu.memory_space<vmem>>, %arg39: memref<16x128xf32, #tpu.memory_space<vmem>>, %arg40: memref<16x32xf32, #tpu.memory_space<vmem>>) attributes {dimension_semantics = [], scalar_prefetch = 0 : i64, scratch_operands = 1 : i64, tpu.core_type = #tpu.core_type<tc>} {
    %c0 = arith.constant 0 : index
    %c0_0 = arith.constant 0 : index
    %0 = vector.load %arg4[%c0, %c0_0] : memref<16x32xf32, #tpu.memory_space<vmem>>, vector<16x32xf32>
    %c0_1 = arith.constant 0 : index
    %c0_2 = arith.constant 0 : index
    %1 = vector.load %arg0[%c0_1, %c0_2] : memref<16x1xi32, #tpu.memory_space<vmem>>, vector<16x1xi32>
    %c0_3 = arith.constant 0 : index
    %c0_4 = arith.constant 0 : index
    %2 = vector.load %arg2[%c0_3, %c0_4] : memref<64x32xbf16, #tpu.memory_space<vmem>>, vector<64x32xbf16>
    %3 = tpu.iota {dimensions = array<i32: 1>} : vector<16x64xi32>
    %4 = vector.broadcast %1 : vector<16x1xi32> to vector<16x64xi32>
    %5 = arith.cmpi eq, %4, %3 : vector<16x64xi32>
    %6 = arith.extui %5 : vector<16x64xi1> to vector<16x64xi32>
    %7 = arith.sitofp %6 : vector<16x64xi32> to vector<16x64xf32>
    %8 = arith.truncf %7 : vector<16x64xf32> to vector<16x64xbf16>
    %cst = arith.constant dense<0.000000e+00> : vector<16x32xf32>
    %9 = tpu.matmul %8, %2, %cst {dimension_numbers = #tpu.dot_dimension_numbers<[1], [0], [0], [1], [0, 0, 1, 1], [], []>} : vector<16x64xbf16>, vector<64x32xbf16>, vector<16x32xf32> -> vector<16x32xf32>
    %cst_5 = arith.constant 5.65685415 : f32
    %10 = vector.broadcast %cst_5 : f32 to vector<16x32xf32>
    %11 = arith.mulf %9, %10 : vector<16x32xf32>
    %12 = vector.shape_cast %11 : vector<16x32xf32> to vector<2x8x32xf32>
    %13 = vector.extract_strided_slice %0 {offsets = [0, 0], sizes = [8, 32], strides = [1, 1]} : vector<16x32xf32> to vector<8x32xf32>
    %14 = vector.shape_cast %13 : vector<8x32xf32> to vector<1x8x32xf32>
    %15 = vector.broadcast %14 : vector<1x8x32xf32> to vector<2x8x32xf32>
    %16 = arith.addf %12, %15 : vector<2x8x32xf32>
    %17 = vector.shape_cast %16 : vector<2x8x32xf32> to vector<16x32xf32>
    %c0_6 = arith.constant 0 : index
    %c0_7 = arith.constant 0 : index
    %c0_8 = arith.constant 0 : index
    %18 = vector.load %arg16[%c0_6, %c0_7, %c0_8] : memref<2x32x128xbf16, #tpu.memory_space<vmem>>, vector<1x32x128xbf16>
    %19 = vector.shape_cast %18 : vector<1x32x128xbf16> to vector<32x128xbf16>
    %20 = arith.truncf %17 : vector<16x32xf32> to vector<16x32xbf16>
    %cst_9 = arith.constant dense<0.000000e+00> : vector<16x128xf32>
    %21 = tpu.matmul %20, %19, %cst_9 {dimension_numbers = #tpu.dot_dimension_numbers<[1], [0], [0], [1], [0, 0, 1, 1], [], []>} : vector<16x32xbf16>, vector<32x128xbf16>, vector<16x128xf32> -> vector<16x128xf32>
    %c0_10 = arith.constant 0 : index
    %c0_11 = arith.constant 0 : index
    %c0_12 = arith.constant 0 : index
    %22 = vector.load %arg8[%c0_10, %c0_11, %c0_12] : memref<2x1x128xf32, #tpu.memory_space<vmem>>, vector<1x1x128xf32>
    %23 = vector.shape_cast %22 : vector<1x1x128xf32> to vector<1x128xf32>
    %24 = vector.broadcast %23 : vector<1x128xf32> to vector<16x128xf32>
    %25 = arith.addf %21, %24 : vector<16x128xf32>
    %26 = vector.extract_strided_slice %25 {offsets = [0, 0], sizes = [16, 32], strides = [1, 1]} : vector<16x128xf32> to vector<16x32xf32>
    %27 = vector.extract_strided_slice %25 {offsets = [0, 32], sizes = [16, 32], strides = [1, 1]} : vector<16x128xf32> to vector<16x32xf32>
    %28 = vector.extract_strided_slice %25 {offsets = [0, 64], sizes = [16, 32], strides = [1, 1]} : vector<16x128xf32> to vector<16x32xf32>
    %c0_13 = arith.constant 0 : index
    %c0_14 = arith.constant 0 : index
    %c0_15 = arith.constant 0 : index
    %29 = vector.load %arg15[%c0_13, %c0_14, %c0_15] : memref<2x32x32xbf16, #tpu.memory_space<vmem>>, vector<1x32x32xbf16>
    %30 = vector.shape_cast %29 : vector<1x32x32xbf16> to vector<32x32xbf16>
    %c0_16 = arith.constant 0 : index
    %c0_17 = arith.constant 0 : index
    %c0_18 = arith.constant 0 : index
    %31 = vector.load %arg7[%c0_16, %c0_17, %c0_18] : memref<2x1x32xf32, #tpu.memory_space<vmem>>, vector<1x1x32xf32>
    %32 = vector.shape_cast %31 : vector<1x1x32xf32> to vector<1x32xf32>
    %33 = vector.extract_strided_slice %26 {offsets = [0, 0], sizes = [16, 8], strides = [1, 1]} : vector<16x32xf32> to vector<16x8xf32>
    %34 = vector.shape_cast %33 : vector<16x8xf32> to vector<2x8x8xf32>
    %35 = arith.truncf %34 : vector<2x8x8xf32> to vector<2x8x8xbf16>
    %36 = vector.extract_strided_slice %27 {offsets = [0, 0], sizes = [16, 8], strides = [1, 1]} : vector<16x32xf32> to vector<16x8xf32>
    %37 = vector.shape_cast %36 : vector<16x8xf32> to vector<2x8x8xf32>
    %38 = arith.truncf %37 : vector<2x8x8xf32> to vector<2x8x8xbf16>
    %39 = vector.extract_strided_slice %28 {offsets = [0, 0], sizes = [16, 8], strides = [1, 1]} : vector<16x32xf32> to vector<16x8xf32>
    %40 = vector.shape_cast %39 : vector<16x8xf32> to vector<2x8x8xf32>
    %41 = arith.truncf %40 : vector<2x8x8xf32> to vector<2x8x8xbf16>
    "tpu.trace_start"() <{level = 10 : i32, message = "bqd,bkd->bqk"}> : () -> ()
    %cst_19 = arith.constant dense<0.000000e+00> : vector<2x8x8xf32>
    %42 = tpu.matmul %35, %38, %cst_19 {dimension_numbers = #tpu.dot_dimension_numbers<[2], [2], [1], [1], [0, 0, 0, 1, 1, 1], [0], [0]>} : vector<2x8x8xbf16>, vector<2x8x8xbf16>, vector<2x8x8xf32> -> vector<2x8x8xf32>
    "tpu.trace_stop"() : () -> ()
    %cst_20 = arith.constant 0.353553385 : f32
    %43 = vector.broadcast %cst_20 : f32 to vector<2x8x8xf32>
    %44 = arith.mulf %42, %43 : vector<2x8x8xf32>
    %cst_21 = arith.constant dense<0xFF800000> : vector<2x8xf32>
    %45 = vector.multi_reduction <maximumf>, %44, %cst_21 [2] : vector<2x8x8xf32> to vector<2x8xf32>
    %46 = vector.shape_cast %45 : vector<2x8xf32> to vector<2x8x1xf32>
    %47 = vector.broadcast %46 : vector<2x8x1xf32> to vector<2x8x8xf32>
    %48 = arith.subf %44, %47 : vector<2x8x8xf32>
    %49 = math.exp %48 : vector<2x8x8xf32>
    %cst_22 = arith.constant dense<0.000000e+00> : vector<2x8xf32>
    %50 = vector.multi_reduction <add>, %49, %cst_22 [2] : vector<2x8x8xf32> to vector<2x8xf32>
    %51 = vector.shape_cast %50 : vector<2x8xf32> to vector<2x8x1xf32>
    %52 = tpu.reciprocal %51 {approx = true} : vector<2x8x1xf32> -> vector<2x8x1xf32>
    %53 = vector.broadcast %52 : vector<2x8x1xf32> to vector<2x8x8xf32>
    %54 = arith.mulf %49, %53 : vector<2x8x8xf32>
    %55 = arith.truncf %54 : vector<2x8x8xf32> to vector<2x8x8xbf16>
    "tpu.trace_start"() <{level = 10 : i32, message = "bqk,bkd->bqd"}> : () -> ()
    %cst_23 = arith.constant dense<0.000000e+00> : vector<2x8x8xf32>
    %56 = tpu.matmul %55, %41, %cst_23 {dimension_numbers = #tpu.dot_dimension_numbers<[2], [1], [1], [2], [0, 0, 0, 1, 1, 2], [0], [0]>} : vector<2x8x8xbf16>, vector<2x8x8xbf16>, vector<2x8x8xf32> -> vector<2x8x8xf32>
    "tpu.trace_stop"() : () -> ()
    %57 = vector.shape_cast %56 : vector<2x8x8xf32> to vector<16x8xf32>
    %c0_24 = arith.constant 0 : index
    %c0_25 = arith.constant 0 : index
    %58 = vector.load %arg40[%c0_24, %c0_25] : memref<16x32xf32, #tpu.memory_space<vmem>>, vector<16x8xf32>
    tpu.vector_store %arg40[%c0_24, %c0_25], %57 {strides = array<i32>} : memref<16x32xf32, #tpu.memory_space<vmem>>, vector<16x8xf32>,
    %59 = vector.extract_strided_slice %26 {offsets = [0, 8], sizes = [16, 8], strides = [1, 1]} : vector<16x32xf32> to vector<16x8xf32>
    %60 = vector.shape_cast %59 : vector<16x8xf32> to vector<2x8x8xf32>
    %61 = arith.truncf %60 : vector<2x8x8xf32> to vector<2x8x8xbf16>
    %62 = vector.extract_strided_slice %27 {offsets = [0, 8], sizes = [16, 8], strides = [1, 1]} : vector<16x32xf32> to vector<16x8xf32>
    %63 = vector.shape_cast %62 : vector<16x8xf32> to vector<2x8x8xf32>
    %64 = arith.truncf %63 : vector<2x8x8xf32> to vector<2x8x8xbf16>
    %65 = vector.extract_strided_slice %28 {offsets = [0, 8], sizes = [16, 8], strides = [1, 1]} : vector<16x32xf32> to vector<16x8xf32>
    %66 = vector.shape_cast %65 : vector<16x8xf32> to vector<2x8x8xf32>
    %67 = arith.truncf %66 : vector<2x8x8xf32> to vector<2x8x8xbf16>
    "tpu.trace_start"() <{level = 10 : i32, message = "bqd,bkd->bqk"}> : () -> ()
    %cst_26 = arith.constant dense<0.000000e+00> : vector<2x8x8xf32>
    %68 = tpu.matmul %61, %64, %cst_26 {dimension_numbers = #tpu.dot_dimension_numbers<[2], [2], [1], [1], [0, 0, 0, 1, 1, 1], [0], [0]>} : vector<2x8x8xbf16>, vector<2x8x8xbf16>, vector<2x8x8xf32> -> vector<2x8x8xf32>
    "tpu.trace_stop"() : () -> ()
    %cst_27 = arith.constant 0.353553385 : f32
    %69 = vector.broadcast %cst_27 : f32 to vector<2x8x8xf32>
    %70 = arith.mulf %68, %69 : vector<2x8x8xf32>
    %cst_28 = arith.constant dense<0xFF800000> : vector<2x8xf32>
    %71 = vector.multi_reduction <maximumf>, %70, %cst_28 [2] : vector<2x8x8xf32> to vector<2x8xf32>
    %72 = vector.shape_cast %71 : vector<2x8xf32> to vector<2x8x1xf32>
    %73 = vector.broadcast %72 : vector<2x8x1xf32> to vector<2x8x8xf32>
    %74 = arith.subf %70, %73 : vector<2x8x8xf32>
    %75 = math.exp %74 : vector<2x8x8xf32>
    %cst_29 = arith.constant dense<0.000000e+00> : vector<2x8xf32>
    %76 = vector.multi_reduction <add>, %75, %cst_29 [2] : vector<2x8x8xf32> to vector<2x8xf32>
    %77 = vector.shape_cast %76 : vector<2x8xf32> to vector<2x8x1xf32>
    %78 = tpu.reciprocal %77 {approx = true} : vector<2x8x1xf32> -> vector<2x8x1xf32>
    %79 = vector.broadcast %78 : vector<2x8x1xf32> to vector<2x8x8xf32>
    %80 = arith.mulf %75, %79 : vector<2x8x8xf32>
    %81 = arith.truncf %80 : vector<2x8x8xf32> to vector<2x8x8xbf16>
    "tpu.trace_start"() <{level = 10 : i32, message = "bqk,bkd->bqd"}> : () -> ()
    %cst_30 = arith.constant dense<0.000000e+00> : vector<2x8x8xf32>
    %82 = tpu.matmul %81, %67, %cst_30 {dimension_numbers = #tpu.dot_dimension_numbers<[2], [1], [1], [2], [0, 0, 0, 1, 1, 2], [0], [0]>} : vector<2x8x8xbf16>, vector<2x8x8xbf16>, vector<2x8x8xf32> -> vector<2x8x8xf32>
    "tpu.trace_stop"() : () -> ()
    %83 = vector.shape_cast %82 : vector<2x8x8xf32> to vector<16x8xf32>
    %c0_31 = arith.constant 0 : index
    %c8 = arith.constant 8 : index
    %84 = vector.load %arg40[%c0_31, %c8] : memref<16x32xf32, #tpu.memory_space<vmem>>, vector<16x8xf32>
    tpu.vector_store %arg40[%c0_31, %c8], %83 {strides = array<i32>} : memref<16x32xf32, #tpu.memory_space<vmem>>, vector<16x8xf32>,
    %85 = vector.extract_strided_slice %26 {offsets = [0, 16], sizes = [16, 8], strides = [1, 1]} : vector<16x32xf32> to vector<16x8xf32>
    %86 = vector.shape_cast %85 : vector<16x8xf32> to vector<2x8x8xf32>
    %87 = arith.truncf %86 : vector<2x8x8xf32> to vector<2x8x8xbf16>
    %88 = vector.extract_strided_slice %27 {offsets = [0, 16], sizes = [16, 8], strides = [1, 1]} : vector<16x32xf32> to vector<16x8xf32>
    %89 = vector.shape_cast %88 : vector<16x8xf32> to vector<2x8x8xf32>
    %90 = arith.truncf %89 : vector<2x8x8xf32> to vector<2x8x8xbf16>
    %91 = vector.extract_strided_slice %28 {offsets = [0, 16], sizes = [16, 8], strides = [1, 1]} : vector<16x32xf32> to vector<16x8xf32>
    %92 = vector.shape_cast %91 : vector<16x8xf32> to vector<2x8x8xf32>
    %93 = arith.truncf %92 : vector<2x8x8xf32> to vector<2x8x8xbf16>
    "tpu.trace_start"() <{level = 10 : i32, message = "bqd,bkd->bqk"}> : () -> ()
    %cst_32 = arith.constant dense<0.000000e+00> : vector<2x8x8xf32>
    %94 = tpu.matmul %87, %90, %cst_32 {dimension_numbers = #tpu.dot_dimension_numbers<[2], [2], [1], [1], [0, 0, 0, 1, 1, 1], [0], [0]>} : vector<2x8x8xbf16>, vector<2x8x8xbf16>, vector<2x8x8xf32> -> vector<2x8x8xf32>
    "tpu.trace_stop"() : () -> ()
    %cst_33 = arith.constant 0.353553385 : f32
    %95 = vector.broadcast %cst_33 : f32 to vector<2x8x8xf32>
    %96 = arith.mulf %94, %95 : vector<2x8x8xf32>
    %cst_34 = arith.constant dense<0xFF800000> : vector<2x8xf32>
    %97 = vector.multi_reduction <maximumf>, %96, %cst_34 [2] : vector<2x8x8xf32> to vector<2x8xf32>
    %98 = vector.shape_cast %97 : vector<2x8xf32> to vector<2x8x1xf32>
    %99 = vector.broadcast %98 : vector<2x8x1xf32> to vector<2x8x8xf32>
    %100 = arith.subf %96, %99 : vector<2x8x8xf32>
    %101 = math.exp %100 : vector<2x8x8xf32>
    %cst_35 = arith.constant dense<0.000000e+00> : vector<2x8xf32>
    %102 = vector.multi_reduction <add>, %101, %cst_35 [2] : vector<2x8x8xf32> to vector<2x8xf32>
    %103 = vector.shape_cast %102 : vector<2x8xf32> to vector<2x8x1xf32>
    %104 = tpu.reciprocal %103 {approx = true} : vector<2x8x1xf32> -> vector<2x8x1xf32>
    %105 = vector.broadcast %104 : vector<2x8x1xf32> to vector<2x8x8xf32>
    %106 = arith.mulf %101, %105 : vector<2x8x8xf32>
    %107 = arith.truncf %106 : vector<2x8x8xf32> to vector<2x8x8xbf16>
    "tpu.trace_start"() <{level = 10 : i32, message = "bqk,bkd->bqd"}> : () -> ()
    %cst_36 = arith.constant dense<0.000000e+00> : vector<2x8x8xf32>
    %108 = tpu.matmul %107, %93, %cst_36 {dimension_numbers = #tpu.dot_dimension_numbers<[2], [1], [1], [2], [0, 0, 0, 1, 1, 2], [0], [0]>} : vector<2x8x8xbf16>, vector<2x8x8xbf16>, vector<2x8x8xf32> -> vector<2x8x8xf32>
    "tpu.trace_stop"() : () -> ()
    %109 = vector.shape_cast %108 : vector<2x8x8xf32> to vector<16x8xf32>
    %c0_37 = arith.constant 0 : index
    %c16 = arith.constant 16 : index
    %110 = vector.load %arg40[%c0_37, %c16] : memref<16x32xf32, #tpu.memory_space<vmem>>, vector<16x8xf32>
    tpu.vector_store %arg40[%c0_37, %c16], %109 {strides = array<i32>} : memref<16x32xf32, #tpu.memory_space<vmem>>, vector<16x8xf32>,
    %111 = vector.extract_strided_slice %26 {offsets = [0, 24], sizes = [16, 8], strides = [1, 1]} : vector<16x32xf32> to vector<16x8xf32>
    %112 = vector.shape_cast %111 : vector<16x8xf32> to vector<2x8x8xf32>
    %113 = arith.truncf %112 : vector<2x8x8xf32> to vector<2x8x8xbf16>
    %114 = vector.extract_strided_slice %27 {offsets = [0, 24], sizes = [16, 8], strides = [1, 1]} : vector<16x32xf32> to vector<16x8xf32>
    %115 = vector.shape_cast %114 : vector<16x8xf32> to vector<2x8x8xf32>
    %116 = arith.truncf %115 : vector<2x8x8xf32> to vector<2x8x8xbf16>
    %117 = vector.extract_strided_slice %28 {offsets = [0, 24], sizes = [16, 8], strides = [1, 1]} : vector<16x32xf32> to vector<16x8xf32>
    %118 = vector.shape_cast %117 : vector<16x8xf32> to vector<2x8x8xf32>
    %119 = arith.truncf %118 : vector<2x8x8xf32> to vector<2x8x8xbf16>
    "tpu.trace_start"() <{level = 10 : i32, message = "bqd,bkd->bqk"}> : () -> ()
    %cst_38 = arith.constant dense<0.000000e+00> : vector<2x8x8xf32>
    %120 = tpu.matmul %113, %116, %cst_38 {dimension_numbers = #tpu.dot_dimension_numbers<[2], [2], [1], [1], [0, 0, 0, 1, 1, 1], [0], [0]>} : vector<2x8x8xbf16>, vector<2x8x8xbf16>, vector<2x8x8xf32> -> vector<2x8x8xf32>
    "tpu.trace_stop"() : () -> ()
    %cst_39 = arith.constant 0.353553385 : f32
    %121 = vector.broadcast %cst_39 : f32 to vector<2x8x8xf32>
    %122 = arith.mulf %120, %121 : vector<2x8x8xf32>
    %cst_40 = arith.constant dense<0xFF800000> : vector<2x8xf32>
    %123 = vector.multi_reduction <maximumf>, %122, %cst_40 [2] : vector<2x8x8xf32> to vector<2x8xf32>
    %124 = vector.shape_cast %123 : vector<2x8xf32> to vector<2x8x1xf32>
    %125 = vector.broadcast %124 : vector<2x8x1xf32> to vector<2x8x8xf32>
    %126 = arith.subf %122, %125 : vector<2x8x8xf32>
    %127 = math.exp %126 : vector<2x8x8xf32>
    %cst_41 = arith.constant dense<0.000000e+00> : vector<2x8xf32>
    %128 = vector.multi_reduction <add>, %127, %cst_41 [2] : vector<2x8x8xf32> to vector<2x8xf32>
    %129 = vector.shape_cast %128 : vector<2x8xf32> to vector<2x8x1xf32>
    %130 = tpu.reciprocal %129 {approx = true} : vector<2x8x1xf32> -> vector<2x8x1xf32>
    %131 = vector.broadcast %130 : vector<2x8x1xf32> to vector<2x8x8xf32>
    %132 = arith.mulf %127, %131 : vector<2x8x8xf32>
    %133 = arith.truncf %132 : vector<2x8x8xf32> to vector<2x8x8xbf16>
    "tpu.trace_start"() <{level = 10 : i32, message = "bqk,bkd->bqd"}> : () -> ()
    %cst_42 = arith.constant dense<0.000000e+00> : vector<2x8x8xf32>
    %134 = tpu.matmul %133, %119, %cst_42 {dimension_numbers = #tpu.dot_dimension_numbers<[2], [1], [1], [2], [0, 0, 0, 1, 1, 2], [0], [0]>} : vector<2x8x8xbf16>, vector<2x8x8xbf16>, vector<2x8x8xf32> -> vector<2x8x8xf32>
    "tpu.trace_stop"() : () -> ()
    %135 = vector.shape_cast %134 : vector<2x8x8xf32> to vector<16x8xf32>
    %c0_43 = arith.constant 0 : index
    %c24 = arith.constant 24 : index
    %136 = vector.load %arg40[%c0_43, %c24] : memref<16x32xf32, #tpu.memory_space<vmem>>, vector<16x8xf32>
    tpu.vector_store %arg40[%c0_43, %c24], %135 {strides = array<i32>} : memref<16x32xf32, #tpu.memory_space<vmem>>, vector<16x8xf32>,
    %c0_44 = arith.constant 0 : index
    %c0_45 = arith.constant 0 : index
    %137 = vector.load %arg40[%c0_44, %c0_45] : memref<16x32xf32, #tpu.memory_space<vmem>>, vector<16x32xf32>
    %138 = arith.truncf %137 : vector<16x32xf32> to vector<16x32xbf16>
    %cst_46 = arith.constant dense<0.000000e+00> : vector<16x32xf32>
    %139 = tpu.matmul %138, %30, %cst_46 {dimension_numbers = #tpu.dot_dimension_numbers<[1], [0], [0], [1], [0, 0, 1, 1], [], []>} : vector<16x32xbf16>, vector<32x32xbf16>, vector<16x32xf32> -> vector<16x32xf32>
    %140 = vector.broadcast %32 : vector<1x32xf32> to vector<16x32xf32>
    %141 = arith.addf %139, %140 : vector<16x32xf32>
    %142 = arith.addf %17, %141 : vector<16x32xf32>
    %c0_47 = arith.constant 0 : index
    %c0_48 = arith.constant 0 : index
    %c0_49 = arith.constant 0 : index
    %143 = vector.load %arg10[%c0_47, %c0_48, %c0_49] : memref<2x1x32xf32, #tpu.memory_space<vmem>>, vector<1x1x32xf32>
    %144 = vector.shape_cast %143 : vector<1x1x32xf32> to vector<1x32xf32>
    %c0_50 = arith.constant 0 : index
    %c0_51 = arith.constant 0 : index
    %c0_52 = arith.constant 0 : index
    %145 = vector.load %arg9[%c0_50, %c0_51, %c0_52] : memref<2x1x32xf32, #tpu.memory_space<vmem>>, vector<1x1x32xf32>
    %146 = vector.shape_cast %145 : vector<1x1x32xf32> to vector<1x32xf32>
    %cst_53 = arith.constant dense<0.000000e+00> : vector<16xf32>
    %147 = vector.multi_reduction <add>, %142, %cst_53 [1] : vector<16x32xf32> to vector<16xf32>
    %148 = vector.shape_cast %147 : vector<16xf32> to vector<16x1xf32>
    %cst_54 = arith.constant 3.200000e+01 : f32
    %149 = vector.broadcast %cst_54 : f32 to vector<16x1xf32>
    %150 = arith.divf %148, %149 : vector<16x1xf32>
    %151 = vector.broadcast %150 : vector<16x1xf32> to vector<16x32xf32>
    %152 = arith.subf %142, %151 : vector<16x32xf32>
    %153 = arith.mulf %152, %152 : vector<16x32xf32>
    %cst_55 = arith.constant dense<0.000000e+00> : vector<16xf32>
    %154 = vector.multi_reduction <add>, %153, %cst_55 [1] : vector<16x32xf32> to vector<16xf32>
    %155 = vector.shape_cast %154 : vector<16xf32> to vector<16x1xf32>
    %cst_56 = arith.constant 3.200000e+01 : f32
    %156 = vector.broadcast %cst_56 : f32 to vector<16x1xf32>
    %157 = arith.divf %155, %156 : vector<16x1xf32>
    %158 = vector.broadcast %150 : vector<16x1xf32> to vector<16x32xf32>
    %159 = arith.subf %142, %158 : vector<16x32xf32>
    %cst_57 = arith.constant 9.99999974E-6 : f32
    %160 = vector.broadcast %cst_57 : f32 to vector<16x1xf32>
    %161 = arith.addf %157, %160 : vector<16x1xf32>
    %162 = math.rsqrt %161 : vector<16x1xf32>
    %163 = vector.broadcast %162 : vector<16x1xf32> to vector<16x32xf32>
    %164 = arith.mulf %159, %163 : vector<16x32xf32>
    %165 = vector.broadcast %144 : vector<1x32xf32> to vector<16x32xf32>
    %166 = arith.mulf %164, %165 : vector<16x32xf32>
    %167 = vector.broadcast %146 : vector<1x32xf32> to vector<16x32xf32>
    %168 = arith.addf %166, %167 : vector<16x32xf32>
    %c0_58 = arith.constant 0 : index
    %c0_59 = arith.constant 0 : index
    %c0_60 = arith.constant 0 : index
    %169 = vector.load %arg13[%c0_58, %c0_59, %c0_60] : memref<2x32x64xbf16, #tpu.memory_space<vmem>>, vector<1x32x64xbf16>
    %170 = vector.shape_cast %169 : vector<1x32x64xbf16> to vector<32x64xbf16>
    %c0_61 = arith.constant 0 : index
    %c0_62 = arith.constant 0 : index
    %c0_63 = arith.constant 0 : index
    %171 = vector.load %arg5[%c0_61, %c0_62, %c0_63] : memref<2x1x64xf32, #tpu.memory_space<vmem>>, vector<1x1x64xf32>
    %172 = vector.shape_cast %171 : vector<1x1x64xf32> to vector<1x64xf32>
    %c0_64 = arith.constant 0 : index
    %c0_65 = arith.constant 0 : index
    %c0_66 = arith.constant 0 : index
    %173 = vector.load %arg14[%c0_64, %c0_65, %c0_66] : memref<2x64x32xbf16, #tpu.memory_space<vmem>>, vector<1x64x32xbf16>
    %174 = vector.shape_cast %173 : vector<1x64x32xbf16> to vector<64x32xbf16>
    %c0_67 = arith.constant 0 : index
    %c0_68 = arith.constant 0 : index
    %c0_69 = arith.constant 0 : index
    %175 = vector.load %arg6[%c0_67, %c0_68, %c0_69] : memref<2x1x32xf32, #tpu.memory_space<vmem>>, vector<1x1x32xf32>
    %176 = vector.shape_cast %175 : vector<1x1x32xf32> to vector<1x32xf32>
    %177 = arith.truncf %168 : vector<16x32xf32> to vector<16x32xbf16>
    %cst_70 = arith.constant dense<0.000000e+00> : vector<16x64xf32>
    %178 = tpu.matmul %177, %170, %cst_70 {dimension_numbers = #tpu.dot_dimension_numbers<[1], [0], [0], [1], [0, 0, 1, 1], [], []>} : vector<16x32xbf16>, vector<32x64xbf16>, vector<16x64xf32> -> vector<16x64xf32>
    %179 = vector.broadcast %172 : vector<1x64xf32> to vector<16x64xf32>
    %180 = arith.addf %178, %179 : vector<16x64xf32>
    %cst_71 = arith.constant 0.000000e+00 : f32
    %181 = vector.broadcast %cst_71 : f32 to vector<16x64xf32>
    %182 = arith.maximumf %180, %181 : vector<16x64xf32>
    %183 = arith.truncf %182 : vector<16x64xf32> to vector<16x64xbf16>
    %cst_72 = arith.constant dense<0.000000e+00> : vector<16x32xf32>
    %184 = tpu.matmul %183, %174, %cst_72 {dimension_numbers = #tpu.dot_dimension_numbers<[1], [0], [0], [1], [0, 0, 1, 1], [], []>} : vector<16x64xbf16>, vector<64x32xbf16>, vector<16x32xf32> -> vector<16x32xf32>
    %185 = vector.broadcast %176 : vector<1x32xf32> to vector<16x32xf32>
    %186 = arith.addf %184, %185 : vector<16x32xf32>
    %187 = arith.addf %168, %186 : vector<16x32xf32>
    %c0_73 = arith.constant 0 : index
    %c0_74 = arith.constant 0 : index
    %c0_75 = arith.constant 0 : index
    %188 = vector.load %arg12[%c0_73, %c0_74, %c0_75] : memref<2x1x32xf32, #tpu.memory_space<vmem>>, vector<1x1x32xf32>
    %189 = vector.shape_cast %188 : vector<1x1x32xf32> to vector<1x32xf32>
    %c0_76 = arith.constant 0 : index
    %c0_77 = arith.constant 0 : index
    %c0_78 = arith.constant 0 : index
    %190 = vector.load %arg11[%c0_76, %c0_77, %c0_78] : memref<2x1x32xf32, #tpu.memory_space<vmem>>, vector<1x1x32xf32>
    %191 = vector.shape_cast %190 : vector<1x1x32xf32> to vector<1x32xf32>
    %cst_79 = arith.constant dense<0.000000e+00> : vector<16xf32>
    %192 = vector.multi_reduction <add>, %187, %cst_79 [1] : vector<16x32xf32> to vector<16xf32>
    %193 = vector.shape_cast %192 : vector<16xf32> to vector<16x1xf32>
    %cst_80 = arith.constant 3.200000e+01 : f32
    %194 = vector.broadcast %cst_80 : f32 to vector<16x1xf32>
    %195 = arith.divf %193, %194 : vector<16x1xf32>
    %196 = vector.broadcast %195 : vector<16x1xf32> to vector<16x32xf32>
    %197 = arith.subf %187, %196 : vector<16x32xf32>
    %198 = arith.mulf %197, %197 : vector<16x32xf32>
    %cst_81 = arith.constant dense<0.000000e+00> : vector<16xf32>
    %199 = vector.multi_reduction <add>, %198, %cst_81 [1] : vector<16x32xf32> to vector<16xf32>
    %200 = vector.shape_cast %199 : vector<16xf32> to vector<16x1xf32>
    %cst_82 = arith.constant 3.200000e+01 : f32
    %201 = vector.broadcast %cst_82 : f32 to vector<16x1xf32>
    %202 = arith.divf %200, %201 : vector<16x1xf32>
    %203 = vector.broadcast %195 : vector<16x1xf32> to vector<16x32xf32>
    %204 = arith.subf %187, %203 : vector<16x32xf32>
    %cst_83 = arith.constant 9.99999974E-6 : f32
    %205 = vector.broadcast %cst_83 : f32 to vector<16x1xf32>
    %206 = arith.addf %202, %205 : vector<16x1xf32>
    %207 = math.rsqrt %206 : vector<16x1xf32>
    %208 = vector.broadcast %207 : vector<16x1xf32> to vector<16x32xf32>
    %209 = arith.mulf %204, %208 : vector<16x32xf32>
    %210 = vector.broadcast %189 : vector<1x32xf32> to vector<16x32xf32>
    %211 = arith.mulf %209, %210 : vector<16x32xf32>
    %212 = vector.broadcast %191 : vector<1x32xf32> to vector<16x32xf32>
    %213 = arith.addf %211, %212 : vector<16x32xf32>
    %c1 = arith.constant 1 : index
    %c0_84 = arith.constant 0 : index
    %c0_85 = arith.constant 0 : index
    %214 = vector.load %arg16[%c1, %c0_84, %c0_85] : memref<2x32x128xbf16, #tpu.memory_space<vmem>>, vector<1x32x128xbf16>
    %215 = vector.shape_cast %214 : vector<1x32x128xbf16> to vector<32x128xbf16>
    %216 = arith.truncf %213 : vector<16x32xf32> to vector<16x32xbf16>
    %cst_86 = arith.constant dense<0.000000e+00> : vector<16x128xf32>
    %217 = tpu.matmul %216, %215, %cst_86 {dimension_numbers = #tpu.dot_dimension_numbers<[1], [0], [0], [1], [0, 0, 1, 1], [], []>} : vector<16x32xbf16>, vector<32x128xbf16>, vector<16x128xf32> -> vector<16x128xf32>
    %c1_87 = arith.constant 1 : index
    %c0_88 = arith.constant 0 : index
    %c0_89 = arith.constant 0 : index
    %218 = vector.load %arg8[%c1_87, %c0_88, %c0_89] : memref<2x1x128xf32, #tpu.memory_space<vmem>>, vector<1x1x128xf32>
    %219 = vector.shape_cast %218 : vector<1x1x128xf32> to vector<1x128xf32>
    %220 = vector.broadcast %219 : vector<1x128xf32> to vector<16x128xf32>
    %221 = arith.addf %217, %220 : vector<16x128xf32>
    %222 = vector.extract_strided_slice %221 {offsets = [0, 0], sizes = [16, 32], strides = [1, 1]} : vector<16x128xf32> to vector<16x32xf32>
    %223 = vector.extract_strided_slice %221 {offsets = [0, 32], sizes = [16, 32], strides = [1, 1]} : vector<16x128xf32> to vector<16x32xf32>
    %224 = vector.extract_strided_slice %221 {offsets = [0, 64], sizes = [16, 32], strides = [1, 1]} : vector<16x128xf32> to vector<16x32xf32>
    %c1_90 = arith.constant 1 : index
    %c0_91 = arith.constant 0 : index
    %c0_92 = arith.constant 0 : index
    %225 = vector.load %arg15[%c1_90, %c0_91, %c0_92] : memref<2x32x32xbf16, #tpu.memory_space<vmem>>, vector<1x32x32xbf16>
    %226 = vector.shape_cast %225 : vector<1x32x32xbf16> to vector<32x32xbf16>
    %c1_93 = arith.constant 1 : index
    %c0_94 = arith.constant 0 : index
    %c0_95 = arith.constant 0 : index
    %227 = vector.load %arg7[%c1_93, %c0_94, %c0_95] : memref<2x1x32xf32, #tpu.memory_space<vmem>>, vector<1x1x32xf32>
    %228 = vector.shape_cast %227 : vector<1x1x32xf32> to vector<1x32xf32>
    %229 = vector.extract_strided_slice %222 {offsets = [0, 0], sizes = [16, 8], strides = [1, 1]} : vector<16x32xf32> to vector<16x8xf32>
    %230 = vector.shape_cast %229 : vector<16x8xf32> to vector<2x8x8xf32>
    %231 = arith.truncf %230 : vector<2x8x8xf32> to vector<2x8x8xbf16>
    %232 = vector.extract_strided_slice %223 {offsets = [0, 0], sizes = [16, 8], strides = [1, 1]} : vector<16x32xf32> to vector<16x8xf32>
    %233 = vector.shape_cast %232 : vector<16x8xf32> to vector<2x8x8xf32>
    %234 = arith.truncf %233 : vector<2x8x8xf32> to vector<2x8x8xbf16>
    %235 = vector.extract_strided_slice %224 {offsets = [0, 0], sizes = [16, 8], strides = [1, 1]} : vector<16x32xf32> to vector<16x8xf32>
    %236 = vector.shape_cast %235 : vector<16x8xf32> to vector<2x8x8xf32>
    %237 = arith.truncf %236 : vector<2x8x8xf32> to vector<2x8x8xbf16>
    "tpu.trace_start"() <{level = 10 : i32, message = "bqd,bkd->bqk"}> : () -> ()
    %cst_96 = arith.constant dense<0.000000e+00> : vector<2x8x8xf32>
    %238 = tpu.matmul %231, %234, %cst_96 {dimension_numbers = #tpu.dot_dimension_numbers<[2], [2], [1], [1], [0, 0, 0, 1, 1, 1], [0], [0]>} : vector<2x8x8xbf16>, vector<2x8x8xbf16>, vector<2x8x8xf32> -> vector<2x8x8xf32>
    "tpu.trace_stop"() : () -> ()
    %cst_97 = arith.constant 0.353553385 : f32
    %239 = vector.broadcast %cst_97 : f32 to vector<2x8x8xf32>
    %240 = arith.mulf %238, %239 : vector<2x8x8xf32>
    %cst_98 = arith.constant dense<0xFF800000> : vector<2x8xf32>
    %241 = vector.multi_reduction <maximumf>, %240, %cst_98 [2] : vector<2x8x8xf32> to vector<2x8xf32>
    %242 = vector.shape_cast %241 : vector<2x8xf32> to vector<2x8x1xf32>
    %243 = vector.broadcast %242 : vector<2x8x1xf32> to vector<2x8x8xf32>
    %244 = arith.subf %240, %243 : vector<2x8x8xf32>
    %245 = math.exp %244 : vector<2x8x8xf32>
    %cst_99 = arith.constant dense<0.000000e+00> : vector<2x8xf32>
    %246 = vector.multi_reduction <add>, %245, %cst_99 [2] : vector<2x8x8xf32> to vector<2x8xf32>
    %247 = vector.shape_cast %246 : vector<2x8xf32> to vector<2x8x1xf32>
    %248 = tpu.reciprocal %247 {approx = true} : vector<2x8x1xf32> -> vector<2x8x1xf32>
    %249 = vector.broadcast %248 : vector<2x8x1xf32> to vector<2x8x8xf32>
    %250 = arith.mulf %245, %249 : vector<2x8x8xf32>
    %251 = arith.truncf %250 : vector<2x8x8xf32> to vector<2x8x8xbf16>
    "tpu.trace_start"() <{level = 10 : i32, message = "bqk,bkd->bqd"}> : () -> ()
    %cst_100 = arith.constant dense<0.000000e+00> : vector<2x8x8xf32>
    %252 = tpu.matmul %251, %237, %cst_100 {dimension_numbers = #tpu.dot_dimension_numbers<[2], [1], [1], [2], [0, 0, 0, 1, 1, 2], [0], [0]>} : vector<2x8x8xbf16>, vector<2x8x8xbf16>, vector<2x8x8xf32> -> vector<2x8x8xf32>
    "tpu.trace_stop"() : () -> ()
    %253 = vector.shape_cast %252 : vector<2x8x8xf32> to vector<16x8xf32>
    %c0_101 = arith.constant 0 : index
    %c0_102 = arith.constant 0 : index
    %254 = vector.load %arg40[%c0_101, %c0_102] : memref<16x32xf32, #tpu.memory_space<vmem>>, vector<16x8xf32>
    tpu.vector_store %arg40[%c0_101, %c0_102], %253 {strides = array<i32>} : memref<16x32xf32, #tpu.memory_space<vmem>>, vector<16x8xf32>,
    %255 = vector.extract_strided_slice %222 {offsets = [0, 8], sizes = [16, 8], strides = [1, 1]} : vector<16x32xf32> to vector<16x8xf32>
    %256 = vector.shape_cast %255 : vector<16x8xf32> to vector<2x8x8xf32>
    %257 = arith.truncf %256 : vector<2x8x8xf32> to vector<2x8x8xbf16>
    %258 = vector.extract_strided_slice %223 {offsets = [0, 8], sizes = [16, 8], strides = [1, 1]} : vector<16x32xf32> to vector<16x8xf32>
    %259 = vector.shape_cast %258 : vector<16x8xf32> to vector<2x8x8xf32>
    %260 = arith.truncf %259 : vector<2x8x8xf32> to vector<2x8x8xbf16>
    %261 = vector.extract_strided_slice %224 {offsets = [0, 8], sizes = [16, 8], strides = [1, 1]} : vector<16x32xf32> to vector<16x8xf32>
    %262 = vector.shape_cast %261 : vector<16x8xf32> to vector<2x8x8xf32>
    %263 = arith.truncf %262 : vector<2x8x8xf32> to vector<2x8x8xbf16>
    "tpu.trace_start"() <{level = 10 : i32, message = "bqd,bkd->bqk"}> : () -> ()
    %cst_103 = arith.constant dense<0.000000e+00> : vector<2x8x8xf32>
    %264 = tpu.matmul %257, %260, %cst_103 {dimension_numbers = #tpu.dot_dimension_numbers<[2], [2], [1], [1], [0, 0, 0, 1, 1, 1], [0], [0]>} : vector<2x8x8xbf16>, vector<2x8x8xbf16>, vector<2x8x8xf32> -> vector<2x8x8xf32>
    "tpu.trace_stop"() : () -> ()
    %cst_104 = arith.constant 0.353553385 : f32
    %265 = vector.broadcast %cst_104 : f32 to vector<2x8x8xf32>
    %266 = arith.mulf %264, %265 : vector<2x8x8xf32>
    %cst_105 = arith.constant dense<0xFF800000> : vector<2x8xf32>
    %267 = vector.multi_reduction <maximumf>, %266, %cst_105 [2] : vector<2x8x8xf32> to vector<2x8xf32>
    %268 = vector.shape_cast %267 : vector<2x8xf32> to vector<2x8x1xf32>
    %269 = vector.broadcast %268 : vector<2x8x1xf32> to vector<2x8x8xf32>
    %270 = arith.subf %266, %269 : vector<2x8x8xf32>
    %271 = math.exp %270 : vector<2x8x8xf32>
    %cst_106 = arith.constant dense<0.000000e+00> : vector<2x8xf32>
    %272 = vector.multi_reduction <add>, %271, %cst_106 [2] : vector<2x8x8xf32> to vector<2x8xf32>
    %273 = vector.shape_cast %272 : vector<2x8xf32> to vector<2x8x1xf32>
    %274 = tpu.reciprocal %273 {approx = true} : vector<2x8x1xf32> -> vector<2x8x1xf32>
    %275 = vector.broadcast %274 : vector<2x8x1xf32> to vector<2x8x8xf32>
    %276 = arith.mulf %271, %275 : vector<2x8x8xf32>
    %277 = arith.truncf %276 : vector<2x8x8xf32> to vector<2x8x8xbf16>
    "tpu.trace_start"() <{level = 10 : i32, message = "bqk,bkd->bqd"}> : () -> ()
    %cst_107 = arith.constant dense<0.000000e+00> : vector<2x8x8xf32>
    %278 = tpu.matmul %277, %263, %cst_107 {dimension_numbers = #tpu.dot_dimension_numbers<[2], [1], [1], [2], [0, 0, 0, 1, 1, 2], [0], [0]>} : vector<2x8x8xbf16>, vector<2x8x8xbf16>, vector<2x8x8xf32> -> vector<2x8x8xf32>
    "tpu.trace_stop"() : () -> ()
    %279 = vector.shape_cast %278 : vector<2x8x8xf32> to vector<16x8xf32>
    %c0_108 = arith.constant 0 : index
    %c8_109 = arith.constant 8 : index
    %280 = vector.load %arg40[%c0_108, %c8_109] : memref<16x32xf32, #tpu.memory_space<vmem>>, vector<16x8xf32>
    tpu.vector_store %arg40[%c0_108, %c8_109], %279 {strides = array<i32>} : memref<16x32xf32, #tpu.memory_space<vmem>>, vector<16x8xf32>,
    %281 = vector.extract_strided_slice %222 {offsets = [0, 16], sizes = [16, 8], strides = [1, 1]} : vector<16x32xf32> to vector<16x8xf32>
    %282 = vector.shape_cast %281 : vector<16x8xf32> to vector<2x8x8xf32>
    %283 = arith.truncf %282 : vector<2x8x8xf32> to vector<2x8x8xbf16>
    %284 = vector.extract_strided_slice %223 {offsets = [0, 16], sizes = [16, 8], strides = [1, 1]} : vector<16x32xf32> to vector<16x8xf32>
    %285 = vector.shape_cast %284 : vector<16x8xf32> to vector<2x8x8xf32>
    %286 = arith.truncf %285 : vector<2x8x8xf32> to vector<2x8x8xbf16>
    %287 = vector.extract_strided_slice %224 {offsets = [0, 16], sizes = [16, 8], strides = [1, 1]} : vector<16x32xf32> to vector<16x8xf32>
    %288 = vector.shape_cast %287 : vector<16x8xf32> to vector<2x8x8xf32>
    %289 = arith.truncf %288 : vector<2x8x8xf32> to vector<2x8x8xbf16>
    "tpu.trace_start"() <{level = 10 : i32, message = "bqd,bkd->bqk"}> : () -> ()
    %cst_110 = arith.constant dense<0.000000e+00> : vector<2x8x8xf32>
    %290 = tpu.matmul %283, %286, %cst_110 {dimension_numbers = #tpu.dot_dimension_numbers<[2], [2], [1], [1], [0, 0, 0, 1, 1, 1], [0], [0]>} : vector<2x8x8xbf16>, vector<2x8x8xbf16>, vector<2x8x8xf32> -> vector<2x8x8xf32>
    "tpu.trace_stop"() : () -> ()
    %cst_111 = arith.constant 0.353553385 : f32
    %291 = vector.broadcast %cst_111 : f32 to vector<2x8x8xf32>
    %292 = arith.mulf %290, %291 : vector<2x8x8xf32>
    %cst_112 = arith.constant dense<0xFF800000> : vector<2x8xf32>
    %293 = vector.multi_reduction <maximumf>, %292, %cst_112 [2] : vector<2x8x8xf32> to vector<2x8xf32>
    %294 = vector.shape_cast %293 : vector<2x8xf32> to vector<2x8x1xf32>
    %295 = vector.broadcast %294 : vector<2x8x1xf32> to vector<2x8x8xf32>
    %296 = arith.subf %292, %295 : vector<2x8x8xf32>
    %297 = math.exp %296 : vector<2x8x8xf32>
    %cst_113 = arith.constant dense<0.000000e+00> : vector<2x8xf32>
    %298 = vector.multi_reduction <add>, %297, %cst_113 [2] : vector<2x8x8xf32> to vector<2x8xf32>
    %299 = vector.shape_cast %298 : vector<2x8xf32> to vector<2x8x1xf32>
    %300 = tpu.reciprocal %299 {approx = true} : vector<2x8x1xf32> -> vector<2x8x1xf32>
    %301 = vector.broadcast %300 : vector<2x8x1xf32> to vector<2x8x8xf32>
    %302 = arith.mulf %297, %301 : vector<2x8x8xf32>
    %303 = arith.truncf %302 : vector<2x8x8xf32> to vector<2x8x8xbf16>
    "tpu.trace_start"() <{level = 10 : i32, message = "bqk,bkd->bqd"}> : () -> ()
    %cst_114 = arith.constant dense<0.000000e+00> : vector<2x8x8xf32>
    %304 = tpu.matmul %303, %289, %cst_114 {dimension_numbers = #tpu.dot_dimension_numbers<[2], [1], [1], [2], [0, 0, 0, 1, 1, 2], [0], [0]>} : vector<2x8x8xbf16>, vector<2x8x8xbf16>, vector<2x8x8xf32> -> vector<2x8x8xf32>
    "tpu.trace_stop"() : () -> ()
    %305 = vector.shape_cast %304 : vector<2x8x8xf32> to vector<16x8xf32>
    %c0_115 = arith.constant 0 : index
    %c16_116 = arith.constant 16 : index
    %306 = vector.load %arg40[%c0_115, %c16_116] : memref<16x32xf32, #tpu.memory_space<vmem>>, vector<16x8xf32>
    tpu.vector_store %arg40[%c0_115, %c16_116], %305 {strides = array<i32>} : memref<16x32xf32, #tpu.memory_space<vmem>>, vector<16x8xf32>,
    %307 = vector.extract_strided_slice %222 {offsets = [0, 24], sizes = [16, 8], strides = [1, 1]} : vector<16x32xf32> to vector<16x8xf32>
    %308 = vector.shape_cast %307 : vector<16x8xf32> to vector<2x8x8xf32>
    %309 = arith.truncf %308 : vector<2x8x8xf32> to vector<2x8x8xbf16>
    %310 = vector.extract_strided_slice %223 {offsets = [0, 24], sizes = [16, 8], strides = [1, 1]} : vector<16x32xf32> to vector<16x8xf32>
    %311 = vector.shape_cast %310 : vector<16x8xf32> to vector<2x8x8xf32>
    %312 = arith.truncf %311 : vector<2x8x8xf32> to vector<2x8x8xbf16>
    %313 = vector.extract_strided_slice %224 {offsets = [0, 24], sizes = [16, 8], strides = [1, 1]} : vector<16x32xf32> to vector<16x8xf32>
    %314 = vector.shape_cast %313 : vector<16x8xf32> to vector<2x8x8xf32>
    %315 = arith.truncf %314 : vector<2x8x8xf32> to vector<2x8x8xbf16>
    "tpu.trace_start"() <{level = 10 : i32, message = "bqd,bkd->bqk"}> : () -> ()
    %cst_117 = arith.constant dense<0.000000e+00> : vector<2x8x8xf32>
    %316 = tpu.matmul %309, %312, %cst_117 {dimension_numbers = #tpu.dot_dimension_numbers<[2], [2], [1], [1], [0, 0, 0, 1, 1, 1], [0], [0]>} : vector<2x8x8xbf16>, vector<2x8x8xbf16>, vector<2x8x8xf32> -> vector<2x8x8xf32>
    "tpu.trace_stop"() : () -> ()
    %cst_118 = arith.constant 0.353553385 : f32
    %317 = vector.broadcast %cst_118 : f32 to vector<2x8x8xf32>
    %318 = arith.mulf %316, %317 : vector<2x8x8xf32>
    %cst_119 = arith.constant dense<0xFF800000> : vector<2x8xf32>
    %319 = vector.multi_reduction <maximumf>, %318, %cst_119 [2] : vector<2x8x8xf32> to vector<2x8xf32>
    %320 = vector.shape_cast %319 : vector<2x8xf32> to vector<2x8x1xf32>
    %321 = vector.broadcast %320 : vector<2x8x1xf32> to vector<2x8x8xf32>
    %322 = arith.subf %318, %321 : vector<2x8x8xf32>
    %323 = math.exp %322 : vector<2x8x8xf32>
    %cst_120 = arith.constant dense<0.000000e+00> : vector<2x8xf32>
    %324 = vector.multi_reduction <add>, %323, %cst_120 [2] : vector<2x8x8xf32> to vector<2x8xf32>
    %325 = vector.shape_cast %324 : vector<2x8xf32> to vector<2x8x1xf32>
    %326 = tpu.reciprocal %325 {approx = true} : vector<2x8x1xf32> -> vector<2x8x1xf32>
    %327 = vector.broadcast %326 : vector<2x8x1xf32> to vector<2x8x8xf32>
    %328 = arith.mulf %323, %327 : vector<2x8x8xf32>
    %329 = arith.truncf %328 : vector<2x8x8xf32> to vector<2x8x8xbf16>
    "tpu.trace_start"() <{level = 10 : i32, message = "bqk,bkd->bqd"}> : () -> ()
    %cst_121 = arith.constant dense<0.000000e+00> : vector<2x8x8xf32>
    %330 = tpu.matmul %329, %315, %cst_121 {dimension_numbers = #tpu.dot_dimension_numbers<[2], [1], [1], [2], [0, 0, 0, 1, 1, 2], [0], [0]>} : vector<2x8x8xbf16>, vector<2x8x8xbf16>, vector<2x8x8xf32> -> vector<2x8x8xf32>
    "tpu.trace_stop"() : () -> ()
    %331 = vector.shape_cast %330 : vector<2x8x8xf32> to vector<16x8xf32>
    %c0_122 = arith.constant 0 : index
    %c24_123 = arith.constant 24 : index
    %332 = vector.load %arg40[%c0_122, %c24_123] : memref<16x32xf32, #tpu.memory_space<vmem>>, vector<16x8xf32>
    tpu.vector_store %arg40[%c0_122, %c24_123], %331 {strides = array<i32>} : memref<16x32xf32, #tpu.memory_space<vmem>>, vector<16x8xf32>,
    %c0_124 = arith.constant 0 : index
    %c0_125 = arith.constant 0 : index
    %333 = vector.load %arg40[%c0_124, %c0_125] : memref<16x32xf32, #tpu.memory_space<vmem>>, vector<16x32xf32>
    %334 = arith.truncf %333 : vector<16x32xf32> to vector<16x32xbf16>
    %cst_126 = arith.constant dense<0.000000e+00> : vector<16x32xf32>
    %335 = tpu.matmul %334, %226, %cst_126 {dimension_numbers = #tpu.dot_dimension_numbers<[1], [0], [0], [1], [0, 0, 1, 1], [], []>} : vector<16x32xbf16>, vector<32x32xbf16>, vector<16x32xf32> -> vector<16x32xf32>
    %336 = vector.broadcast %228 : vector<1x32xf32> to vector<16x32xf32>
    %337 = arith.addf %335, %336 : vector<16x32xf32>
    %338 = arith.addf %213, %337 : vector<16x32xf32>
    %c1_127 = arith.constant 1 : index
    %c0_128 = arith.constant 0 : index
    %c0_129 = arith.constant 0 : index
    %339 = vector.load %arg10[%c1_127, %c0_128, %c0_129] : memref<2x1x32xf32, #tpu.memory_space<vmem>>, vector<1x1x32xf32>
    %340 = vector.shape_cast %339 : vector<1x1x32xf32> to vector<1x32xf32>
    %c1_130 = arith.constant 1 : index
    %c0_131 = arith.constant 0 : index
    %c0_132 = arith.constant 0 : index
    %341 = vector.load %arg9[%c1_130, %c0_131, %c0_132] : memref<2x1x32xf32, #tpu.memory_space<vmem>>, vector<1x1x32xf32>
    %342 = vector.shape_cast %341 : vector<1x1x32xf32> to vector<1x32xf32>
    %cst_133 = arith.constant dense<0.000000e+00> : vector<16xf32>
    %343 = vector.multi_reduction <add>, %338, %cst_133 [1] : vector<16x32xf32> to vector<16xf32>
    %344 = vector.shape_cast %343 : vector<16xf32> to vector<16x1xf32>
    %cst_134 = arith.constant 3.200000e+01 : f32
    %345 = vector.broadcast %cst_134 : f32 to vector<16x1xf32>
    %346 = arith.divf %344, %345 : vector<16x1xf32>
    %347 = vector.broadcast %346 : vector<16x1xf32> to vector<16x32xf32>
    %348 = arith.subf %338, %347 : vector<16x32xf32>
    %349 = arith.mulf %348, %348 : vector<16x32xf32>
    %cst_135 = arith.constant dense<0.000000e+00> : vector<16xf32>
    %350 = vector.multi_reduction <add>, %349, %cst_135 [1] : vector<16x32xf32> to vector<16xf32>
    %351 = vector.shape_cast %350 : vector<16xf32> to vector<16x1xf32>
    %cst_136 = arith.constant 3.200000e+01 : f32
    %352 = vector.broadcast %cst_136 : f32 to vector<16x1xf32>
    %353 = arith.divf %351, %352 : vector<16x1xf32>
    %354 = vector.broadcast %346 : vector<16x1xf32> to vector<16x32xf32>
    %355 = arith.subf %338, %354 : vector<16x32xf32>
    %cst_137 = arith.constant 9.99999974E-6 : f32
    %356 = vector.broadcast %cst_137 : f32 to vector<16x1xf32>
    %357 = arith.addf %353, %356 : vector<16x1xf32>
    %358 = math.rsqrt %357 : vector<16x1xf32>
    %359 = vector.broadcast %358 : vector<16x1xf32> to vector<16x32xf32>
    %360 = arith.mulf %355, %359 : vector<16x32xf32>
    %361 = vector.broadcast %340 : vector<1x32xf32> to vector<16x32xf32>
    %362 = arith.mulf %360, %361 : vector<16x32xf32>
    %363 = vector.broadcast %342 : vector<1x32xf32> to vector<16x32xf32>
    %364 = arith.addf %362, %363 : vector<16x32xf32>
    %c1_138 = arith.constant 1 : index
    %c0_139 = arith.constant 0 : index
    %c0_140 = arith.constant 0 : index
    %365 = vector.load %arg13[%c1_138, %c0_139, %c0_140] : memref<2x32x64xbf16, #tpu.memory_space<vmem>>, vector<1x32x64xbf16>
    %366 = vector.shape_cast %365 : vector<1x32x64xbf16> to vector<32x64xbf16>
    %c1_141 = arith.constant 1 : index
    %c0_142 = arith.constant 0 : index
    %c0_143 = arith.constant 0 : index
    %367 = vector.load %arg5[%c1_141, %c0_142, %c0_143] : memref<2x1x64xf32, #tpu.memory_space<vmem>>, vector<1x1x64xf32>
    %368 = vector.shape_cast %367 : vector<1x1x64xf32> to vector<1x64xf32>
    %c1_144 = arith.constant 1 : index
    %c0_145 = arith.constant 0 : index
    %c0_146 = arith.constant 0 : index
    %369 = vector.load %arg14[%c1_144, %c0_145, %c0_146] : memref<2x64x32xbf16, #tpu.memory_space<vmem>>, vector<1x64x32xbf16>
    %370 = vector.shape_cast %369 : vector<1x64x32xbf16> to vector<64x32xbf16>
    %c1_147 = arith.constant 1 : index
    %c0_148 = arith.constant 0 : index
    %c0_149 = arith.constant 0 : index
    %371 = vector.load %arg6[%c1_147, %c0_148, %c0_149] : memref<2x1x32xf32, #tpu.memory_space<vmem>>, vector<1x1x32xf32>
    %372 = vector.shape_cast %371 : vector<1x1x32xf32> to vector<1x32xf32>
    %373 = arith.truncf %364 : vector<16x32xf32> to vector<16x32xbf16>
    %cst_150 = arith.constant dense<0.000000e+00> : vector<16x64xf32>
    %374 = tpu.matmul %373, %366, %cst_150 {dimension_numbers = #tpu.dot_dimension_numbers<[1], [0], [0], [1], [0, 0, 1, 1], [], []>} : vector<16x32xbf16>, vector<32x64xbf16>, vector<16x64xf32> -> vector<16x64xf32>
    %375 = vector.broadcast %368 : vector<1x64xf32> to vector<16x64xf32>
    %376 = arith.addf %374, %375 : vector<16x64xf32>
    %cst_151 = arith.constant 0.000000e+00 : f32
    %377 = vector.broadcast %cst_151 : f32 to vector<16x64xf32>
    %378 = arith.maximumf %376, %377 : vector<16x64xf32>
    %379 = arith.truncf %378 : vector<16x64xf32> to vector<16x64xbf16>
    %cst_152 = arith.constant dense<0.000000e+00> : vector<16x32xf32>
    %380 = tpu.matmul %379, %370, %cst_152 {dimension_numbers = #tpu.dot_dimension_numbers<[1], [0], [0], [1], [0, 0, 1, 1], [], []>} : vector<16x64xbf16>, vector<64x32xbf16>, vector<16x32xf32> -> vector<16x32xf32>
    %381 = vector.broadcast %372 : vector<1x32xf32> to vector<16x32xf32>
    %382 = arith.addf %380, %381 : vector<16x32xf32>
    %383 = arith.addf %364, %382 : vector<16x32xf32>
    %c1_153 = arith.constant 1 : index
    %c0_154 = arith.constant 0 : index
    %c0_155 = arith.constant 0 : index
    %384 = vector.load %arg12[%c1_153, %c0_154, %c0_155] : memref<2x1x32xf32, #tpu.memory_space<vmem>>, vector<1x1x32xf32>
    %385 = vector.shape_cast %384 : vector<1x1x32xf32> to vector<1x32xf32>
    %c1_156 = arith.constant 1 : index
    %c0_157 = arith.constant 0 : index
    %c0_158 = arith.constant 0 : index
    %386 = vector.load %arg11[%c1_156, %c0_157, %c0_158] : memref<2x1x32xf32, #tpu.memory_space<vmem>>, vector<1x1x32xf32>
    %387 = vector.shape_cast %386 : vector<1x1x32xf32> to vector<1x32xf32>
    %cst_159 = arith.constant dense<0.000000e+00> : vector<16xf32>
    %388 = vector.multi_reduction <add>, %383, %cst_159 [1] : vector<16x32xf32> to vector<16xf32>
    %389 = vector.shape_cast %388 : vector<16xf32> to vector<16x1xf32>
    %cst_160 = arith.constant 3.200000e+01 : f32
    %390 = vector.broadcast %cst_160 : f32 to vector<16x1xf32>
    %391 = arith.divf %389, %390 : vector<16x1xf32>
    %392 = vector.broadcast %391 : vector<16x1xf32> to vector<16x32xf32>
    %393 = arith.subf %383, %392 : vector<16x32xf32>
    %394 = arith.mulf %393, %393 : vector<16x32xf32>
    %cst_161 = arith.constant dense<0.000000e+00> : vector<16xf32>
    %395 = vector.multi_reduction <add>, %394, %cst_161 [1] : vector<16x32xf32> to vector<16xf32>
    %396 = vector.shape_cast %395 : vector<16xf32> to vector<16x1xf32>
    %cst_162 = arith.constant 3.200000e+01 : f32
    %397 = vector.broadcast %cst_162 : f32 to vector<16x1xf32>
    %398 = arith.divf %396, %397 : vector<16x1xf32>
    %399 = vector.broadcast %391 : vector<16x1xf32> to vector<16x32xf32>
    %400 = arith.subf %383, %399 : vector<16x32xf32>
    %cst_163 = arith.constant 9.99999974E-6 : f32
    %401 = vector.broadcast %cst_163 : f32 to vector<16x1xf32>
    %402 = arith.addf %398, %401 : vector<16x1xf32>
    %403 = math.rsqrt %402 : vector<16x1xf32>
    %404 = vector.broadcast %403 : vector<16x1xf32> to vector<16x32xf32>
    %405 = arith.mulf %400, %404 : vector<16x32xf32>
    %406 = vector.broadcast %385 : vector<1x32xf32> to vector<16x32xf32>
    %407 = arith.mulf %405, %406 : vector<16x32xf32>
    %408 = vector.broadcast %387 : vector<1x32xf32> to vector<16x32xf32>
    %409 = arith.addf %407, %408 : vector<16x32xf32>
    %410 = arith.truncf %409 : vector<16x32xf32> to vector<16x32xbf16>
    %c0_164 = arith.constant 0 : index
    %c0_165 = arith.constant 0 : index
    %411 = vector.load %arg1[%c0_164, %c0_165] : memref<16x1xi32, #tpu.memory_space<vmem>>, vector<16x1xi32>
    %c0_166 = arith.constant 0 : index
    %c0_167 = arith.constant 0 : index
    %412 = vector.load %arg3[%c0_166, %c0_167] : memref<64x32xbf16, #tpu.memory_space<vmem>>, vector<64x32xbf16>
    %413 = tpu.iota {dimensions = array<i32: 1>} : vector<16x64xi32>
    %414 = vector.broadcast %411 : vector<16x1xi32> to vector<16x64xi32>
    %415 = arith.cmpi eq, %414, %413 : vector<16x64xi32>
    %416 = arith.extui %415 : vector<16x64xi1> to vector<16x64xi32>
    %417 = arith.sitofp %416 : vector<16x64xi32> to vector<16x64xf32>
    %418 = arith.truncf %417 : vector<16x64xf32> to vector<16x64xbf16>
    %cst_168 = arith.constant dense<0.000000e+00> : vector<16x32xf32>
    %419 = tpu.matmul %418, %412, %cst_168 {dimension_numbers = #tpu.dot_dimension_numbers<[1], [0], [0], [1], [0, 0, 1, 1], [], []>} : vector<16x64xbf16>, vector<64x32xbf16>, vector<16x32xf32> -> vector<16x32xf32>
    %cst_169 = arith.constant 5.65685415 : f32
    %420 = vector.broadcast %cst_169 : f32 to vector<16x32xf32>
    %421 = arith.mulf %419, %420 : vector<16x32xf32>
    %422 = vector.shape_cast %421 : vector<16x32xf32> to vector<2x8x32xf32>
    %423 = vector.extract_strided_slice %0 {offsets = [0, 0], sizes = [8, 32], strides = [1, 1]} : vector<16x32xf32> to vector<8x32xf32>
    %424 = vector.shape_cast %423 : vector<8x32xf32> to vector<1x8x32xf32>
    %425 = vector.broadcast %424 : vector<1x8x32xf32> to vector<2x8x32xf32>
    %426 = arith.addf %422, %425 : vector<2x8x32xf32>
    %427 = vector.shape_cast %426 : vector<2x8x32xf32> to vector<16x32xf32>
    %c0_170 = arith.constant 0 : index
    %c0_171 = arith.constant 0 : index
    %c0_172 = arith.constant 0 : index
    %428 = vector.load %arg36[%c0_170, %c0_171, %c0_172] : memref<2x32x128xbf16, #tpu.memory_space<vmem>>, vector<1x32x128xbf16>
    %429 = vector.shape_cast %428 : vector<1x32x128xbf16> to vector<32x128xbf16>
    %430 = arith.truncf %427 : vector<16x32xf32> to vector<16x32xbf16>
    %cst_173 = arith.constant dense<0.000000e+00> : vector<16x128xf32>
    %431 = tpu.matmul %430, %429, %cst_173 {dimension_numbers = #tpu.dot_dimension_numbers<[1], [0], [0], [1], [0, 0, 1, 1], [], []>} : vector<16x32xbf16>, vector<32x128xbf16>, vector<16x128xf32> -> vector<16x128xf32>
    %c0_174 = arith.constant 0 : index
    %c0_175 = arith.constant 0 : index
    %c0_176 = arith.constant 0 : index
    %432 = vector.load %arg21[%c0_174, %c0_175, %c0_176] : memref<2x1x128xf32, #tpu.memory_space<vmem>>, vector<1x1x128xf32>
    %433 = vector.shape_cast %432 : vector<1x1x128xf32> to vector<1x128xf32>
    %434 = vector.broadcast %433 : vector<1x128xf32> to vector<16x128xf32>
    %435 = arith.addf %431, %434 : vector<16x128xf32>
    %436 = vector.extract_strided_slice %435 {offsets = [0, 0], sizes = [16, 32], strides = [1, 1]} : vector<16x128xf32> to vector<16x32xf32>
    %437 = vector.extract_strided_slice %435 {offsets = [0, 32], sizes = [16, 32], strides = [1, 1]} : vector<16x128xf32> to vector<16x32xf32>
    %438 = vector.extract_strided_slice %435 {offsets = [0, 64], sizes = [16, 32], strides = [1, 1]} : vector<16x128xf32> to vector<16x32xf32>
    %c0_177 = arith.constant 0 : index
    %c0_178 = arith.constant 0 : index
    %c0_179 = arith.constant 0 : index
    %439 = vector.load %arg34[%c0_177, %c0_178, %c0_179] : memref<2x32x32xbf16, #tpu.memory_space<vmem>>, vector<1x32x32xbf16>
    %440 = vector.shape_cast %439 : vector<1x32x32xbf16> to vector<32x32xbf16>
    %c0_180 = arith.constant 0 : index
    %c0_181 = arith.constant 0 : index
    %c0_182 = arith.constant 0 : index
    %441 = vector.load %arg19[%c0_180, %c0_181, %c0_182] : memref<2x1x32xf32, #tpu.memory_space<vmem>>, vector<1x1x32xf32>
    %442 = vector.shape_cast %441 : vector<1x1x32xf32> to vector<1x32xf32>
    %443 = tpu.iota {dimensions = array<i32: 0>} : vector<8x8xi32>
    %444 = tpu.iota {dimensions = array<i32: 1>} : vector<8x8xi32>
    %445 = arith.cmpi sle, %444, %443 : vector<8x8xi32>
    %446 = vector.shape_cast %445 : vector<8x8xi1> to vector<1x8x8xi1>
    %447 = vector.extract_strided_slice %436 {offsets = [0, 0], sizes = [16, 8], strides = [1, 1]} : vector<16x32xf32> to vector<16x8xf32>
    %448 = vector.shape_cast %447 : vector<16x8xf32> to vector<2x8x8xf32>
    %449 = arith.truncf %448 : vector<2x8x8xf32> to vector<2x8x8xbf16>
    %450 = vector.extract_strided_slice %437 {offsets = [0, 0], sizes = [16, 8], strides = [1, 1]} : vector<16x32xf32> to vector<16x8xf32>
    %451 = vector.shape_cast %450 : vector<16x8xf32> to vector<2x8x8xf32>
    %452 = arith.truncf %451 : vector<2x8x8xf32> to vector<2x8x8xbf16>
    %453 = vector.extract_strided_slice %438 {offsets = [0, 0], sizes = [16, 8], strides = [1, 1]} : vector<16x32xf32> to vector<16x8xf32>
    %454 = vector.shape_cast %453 : vector<16x8xf32> to vector<2x8x8xf32>
    %455 = arith.truncf %454 : vector<2x8x8xf32> to vector<2x8x8xbf16>
    "tpu.trace_start"() <{level = 10 : i32, message = "bqd,bkd->bqk"}> : () -> ()
    %cst_183 = arith.constant dense<0.000000e+00> : vector<2x8x8xf32>
    %456 = tpu.matmul %449, %452, %cst_183 {dimension_numbers = #tpu.dot_dimension_numbers<[2], [2], [1], [1], [0, 0, 0, 1, 1, 1], [0], [0]>} : vector<2x8x8xbf16>, vector<2x8x8xbf16>, vector<2x8x8xf32> -> vector<2x8x8xf32>
    "tpu.trace_stop"() : () -> ()
    %cst_184 = arith.constant 0.353553385 : f32
    %457 = vector.broadcast %cst_184 : f32 to vector<2x8x8xf32>
    %458 = arith.mulf %456, %457 : vector<2x8x8xf32>
    %cst_185 = arith.constant -1.000000e+30 : f32
    %459 = vector.shape_cast %446 : vector<1x8x8xi1> to vector<1x8x8xi1>
    %460 = vector.broadcast %459 : vector<1x8x8xi1> to vector<2x8x8xi1>
    %461 = vector.broadcast %cst_185 : f32 to vector<2x8x8xf32>
    %462 = arith.select %460, %458, %461 : vector<2x8x8xi1>, vector<2x8x8xf32>
    %cst_186 = arith.constant dense<0xFF800000> : vector<2x8xf32>
    %463 = vector.multi_reduction <maximumf>, %462, %cst_186 [2] : vector<2x8x8xf32> to vector<2x8xf32>
    %464 = vector.shape_cast %463 : vector<2x8xf32> to vector<2x8x1xf32>
    %465 = vector.broadcast %464 : vector<2x8x1xf32> to vector<2x8x8xf32>
    %466 = arith.subf %462, %465 : vector<2x8x8xf32>
    %467 = math.exp %466 : vector<2x8x8xf32>
    %cst_187 = arith.constant dense<0.000000e+00> : vector<2x8xf32>
    %468 = vector.multi_reduction <add>, %467, %cst_187 [2] : vector<2x8x8xf32> to vector<2x8xf32>
    %469 = vector.shape_cast %468 : vector<2x8xf32> to vector<2x8x1xf32>
    %470 = tpu.reciprocal %469 {approx = true} : vector<2x8x1xf32> -> vector<2x8x1xf32>
    %471 = vector.broadcast %470 : vector<2x8x1xf32> to vector<2x8x8xf32>
    %472 = arith.mulf %467, %471 : vector<2x8x8xf32>
    %473 = arith.truncf %472 : vector<2x8x8xf32> to vector<2x8x8xbf16>
    "tpu.trace_start"() <{level = 10 : i32, message = "bqk,bkd->bqd"}> : () -> ()
    %cst_188 = arith.constant dense<0.000000e+00> : vector<2x8x8xf32>
    %474 = tpu.matmul %473, %455, %cst_188 {dimension_numbers = #tpu.dot_dimension_numbers<[2], [1], [1], [2], [0, 0, 0, 1, 1, 2], [0], [0]>} : vector<2x8x8xbf16>, vector<2x8x8xbf16>, vector<2x8x8xf32> -> vector<2x8x8xf32>
    "tpu.trace_stop"() : () -> ()
    %475 = vector.shape_cast %474 : vector<2x8x8xf32> to vector<16x8xf32>
    %c0_189 = arith.constant 0 : index
    %c0_190 = arith.constant 0 : index
    %476 = vector.load %arg40[%c0_189, %c0_190] : memref<16x32xf32, #tpu.memory_space<vmem>>, vector<16x8xf32>
    tpu.vector_store %arg40[%c0_189, %c0_190], %475 {strides = array<i32>} : memref<16x32xf32, #tpu.memory_space<vmem>>, vector<16x8xf32>,
    %477 = vector.extract_strided_slice %436 {offsets = [0, 8], sizes = [16, 8], strides = [1, 1]} : vector<16x32xf32> to vector<16x8xf32>
    %478 = vector.shape_cast %477 : vector<16x8xf32> to vector<2x8x8xf32>
    %479 = arith.truncf %478 : vector<2x8x8xf32> to vector<2x8x8xbf16>
    %480 = vector.extract_strided_slice %437 {offsets = [0, 8], sizes = [16, 8], strides = [1, 1]} : vector<16x32xf32> to vector<16x8xf32>
    %481 = vector.shape_cast %480 : vector<16x8xf32> to vector<2x8x8xf32>
    %482 = arith.truncf %481 : vector<2x8x8xf32> to vector<2x8x8xbf16>
    %483 = vector.extract_strided_slice %438 {offsets = [0, 8], sizes = [16, 8], strides = [1, 1]} : vector<16x32xf32> to vector<16x8xf32>
    %484 = vector.shape_cast %483 : vector<16x8xf32> to vector<2x8x8xf32>
    %485 = arith.truncf %484 : vector<2x8x8xf32> to vector<2x8x8xbf16>
    "tpu.trace_start"() <{level = 10 : i32, message = "bqd,bkd->bqk"}> : () -> ()
    %cst_191 = arith.constant dense<0.000000e+00> : vector<2x8x8xf32>
    %486 = tpu.matmul %479, %482, %cst_191 {dimension_numbers = #tpu.dot_dimension_numbers<[2], [2], [1], [1], [0, 0, 0, 1, 1, 1], [0], [0]>} : vector<2x8x8xbf16>, vector<2x8x8xbf16>, vector<2x8x8xf32> -> vector<2x8x8xf32>
    "tpu.trace_stop"() : () -> ()
    %cst_192 = arith.constant 0.353553385 : f32
    %487 = vector.broadcast %cst_192 : f32 to vector<2x8x8xf32>
    %488 = arith.mulf %486, %487 : vector<2x8x8xf32>
    %cst_193 = arith.constant -1.000000e+30 : f32
    %489 = vector.shape_cast %446 : vector<1x8x8xi1> to vector<1x8x8xi1>
    %490 = vector.broadcast %489 : vector<1x8x8xi1> to vector<2x8x8xi1>
    %491 = vector.broadcast %cst_193 : f32 to vector<2x8x8xf32>
    %492 = arith.select %490, %488, %491 : vector<2x8x8xi1>, vector<2x8x8xf32>
    %cst_194 = arith.constant dense<0xFF800000> : vector<2x8xf32>
    %493 = vector.multi_reduction <maximumf>, %492, %cst_194 [2] : vector<2x8x8xf32> to vector<2x8xf32>
    %494 = vector.shape_cast %493 : vector<2x8xf32> to vector<2x8x1xf32>
    %495 = vector.broadcast %494 : vector<2x8x1xf32> to vector<2x8x8xf32>
    %496 = arith.subf %492, %495 : vector<2x8x8xf32>
    %497 = math.exp %496 : vector<2x8x8xf32>
    %cst_195 = arith.constant dense<0.000000e+00> : vector<2x8xf32>
    %498 = vector.multi_reduction <add>, %497, %cst_195 [2] : vector<2x8x8xf32> to vector<2x8xf32>
    %499 = vector.shape_cast %498 : vector<2x8xf32> to vector<2x8x1xf32>
    %500 = tpu.reciprocal %499 {approx = true} : vector<2x8x1xf32> -> vector<2x8x1xf32>
    %501 = vector.broadcast %500 : vector<2x8x1xf32> to vector<2x8x8xf32>
    %502 = arith.mulf %497, %501 : vector<2x8x8xf32>
    %503 = arith.truncf %502 : vector<2x8x8xf32> to vector<2x8x8xbf16>
    "tpu.trace_start"() <{level = 10 : i32, message = "bqk,bkd->bqd"}> : () -> ()
    %cst_196 = arith.constant dense<0.000000e+00> : vector<2x8x8xf32>
    %504 = tpu.matmul %503, %485, %cst_196 {dimension_numbers = #tpu.dot_dimension_numbers<[2], [1], [1], [2], [0, 0, 0, 1, 1, 2], [0], [0]>} : vector<2x8x8xbf16>, vector<2x8x8xbf16>, vector<2x8x8xf32> -> vector<2x8x8xf32>
    "tpu.trace_stop"() : () -> ()
    %505 = vector.shape_cast %504 : vector<2x8x8xf32> to vector<16x8xf32>
    %c0_197 = arith.constant 0 : index
    %c8_198 = arith.constant 8 : index
    %506 = vector.load %arg40[%c0_197, %c8_198] : memref<16x32xf32, #tpu.memory_space<vmem>>, vector<16x8xf32>
    tpu.vector_store %arg40[%c0_197, %c8_198], %505 {strides = array<i32>} : memref<16x32xf32, #tpu.memory_space<vmem>>, vector<16x8xf32>,
    %507 = vector.extract_strided_slice %436 {offsets = [0, 16], sizes = [16, 8], strides = [1, 1]} : vector<16x32xf32> to vector<16x8xf32>
    %508 = vector.shape_cast %507 : vector<16x8xf32> to vector<2x8x8xf32>
    %509 = arith.truncf %508 : vector<2x8x8xf32> to vector<2x8x8xbf16>
    %510 = vector.extract_strided_slice %437 {offsets = [0, 16], sizes = [16, 8], strides = [1, 1]} : vector<16x32xf32> to vector<16x8xf32>
    %511 = vector.shape_cast %510 : vector<16x8xf32> to vector<2x8x8xf32>
    %512 = arith.truncf %511 : vector<2x8x8xf32> to vector<2x8x8xbf16>
    %513 = vector.extract_strided_slice %438 {offsets = [0, 16], sizes = [16, 8], strides = [1, 1]} : vector<16x32xf32> to vector<16x8xf32>
    %514 = vector.shape_cast %513 : vector<16x8xf32> to vector<2x8x8xf32>
    %515 = arith.truncf %514 : vector<2x8x8xf32> to vector<2x8x8xbf16>
    "tpu.trace_start"() <{level = 10 : i32, message = "bqd,bkd->bqk"}> : () -> ()
    %cst_199 = arith.constant dense<0.000000e+00> : vector<2x8x8xf32>
    %516 = tpu.matmul %509, %512, %cst_199 {dimension_numbers = #tpu.dot_dimension_numbers<[2], [2], [1], [1], [0, 0, 0, 1, 1, 1], [0], [0]>} : vector<2x8x8xbf16>, vector<2x8x8xbf16>, vector<2x8x8xf32> -> vector<2x8x8xf32>
    "tpu.trace_stop"() : () -> ()
    %cst_200 = arith.constant 0.353553385 : f32
    %517 = vector.broadcast %cst_200 : f32 to vector<2x8x8xf32>
    %518 = arith.mulf %516, %517 : vector<2x8x8xf32>
    %cst_201 = arith.constant -1.000000e+30 : f32
    %519 = vector.shape_cast %446 : vector<1x8x8xi1> to vector<1x8x8xi1>
    %520 = vector.broadcast %519 : vector<1x8x8xi1> to vector<2x8x8xi1>
    %521 = vector.broadcast %cst_201 : f32 to vector<2x8x8xf32>
    %522 = arith.select %520, %518, %521 : vector<2x8x8xi1>, vector<2x8x8xf32>
    %cst_202 = arith.constant dense<0xFF800000> : vector<2x8xf32>
    %523 = vector.multi_reduction <maximumf>, %522, %cst_202 [2] : vector<2x8x8xf32> to vector<2x8xf32>
    %524 = vector.shape_cast %523 : vector<2x8xf32> to vector<2x8x1xf32>
    %525 = vector.broadcast %524 : vector<2x8x1xf32> to vector<2x8x8xf32>
    %526 = arith.subf %522, %525 : vector<2x8x8xf32>
    %527 = math.exp %526 : vector<2x8x8xf32>
    %cst_203 = arith.constant dense<0.000000e+00> : vector<2x8xf32>
    %528 = vector.multi_reduction <add>, %527, %cst_203 [2] : vector<2x8x8xf32> to vector<2x8xf32>
    %529 = vector.shape_cast %528 : vector<2x8xf32> to vector<2x8x1xf32>
    %530 = tpu.reciprocal %529 {approx = true} : vector<2x8x1xf32> -> vector<2x8x1xf32>
    %531 = vector.broadcast %530 : vector<2x8x1xf32> to vector<2x8x8xf32>
    %532 = arith.mulf %527, %531 : vector<2x8x8xf32>
    %533 = arith.truncf %532 : vector<2x8x8xf32> to vector<2x8x8xbf16>
    "tpu.trace_start"() <{level = 10 : i32, message = "bqk,bkd->bqd"}> : () -> ()
    %cst_204 = arith.constant dense<0.000000e+00> : vector<2x8x8xf32>
    %534 = tpu.matmul %533, %515, %cst_204 {dimension_numbers = #tpu.dot_dimension_numbers<[2], [1], [1], [2], [0, 0, 0, 1, 1, 2], [0], [0]>} : vector<2x8x8xbf16>, vector<2x8x8xbf16>, vector<2x8x8xf32> -> vector<2x8x8xf32>
    "tpu.trace_stop"() : () -> ()
    %535 = vector.shape_cast %534 : vector<2x8x8xf32> to vector<16x8xf32>
    %c0_205 = arith.constant 0 : index
    %c16_206 = arith.constant 16 : index
    %536 = vector.load %arg40[%c0_205, %c16_206] : memref<16x32xf32, #tpu.memory_space<vmem>>, vector<16x8xf32>
    tpu.vector_store %arg40[%c0_205, %c16_206], %535 {strides = array<i32>} : memref<16x32xf32, #tpu.memory_space<vmem>>, vector<16x8xf32>,
    %537 = vector.extract_strided_slice %436 {offsets = [0, 24], sizes = [16, 8], strides = [1, 1]} : vector<16x32xf32> to vector<16x8xf32>
    %538 = vector.shape_cast %537 : vector<16x8xf32> to vector<2x8x8xf32>
    %539 = arith.truncf %538 : vector<2x8x8xf32> to vector<2x8x8xbf16>
    %540 = vector.extract_strided_slice %437 {offsets = [0, 24], sizes = [16, 8], strides = [1, 1]} : vector<16x32xf32> to vector<16x8xf32>
    %541 = vector.shape_cast %540 : vector<16x8xf32> to vector<2x8x8xf32>
    %542 = arith.truncf %541 : vector<2x8x8xf32> to vector<2x8x8xbf16>
    %543 = vector.extract_strided_slice %438 {offsets = [0, 24], sizes = [16, 8], strides = [1, 1]} : vector<16x32xf32> to vector<16x8xf32>
    %544 = vector.shape_cast %543 : vector<16x8xf32> to vector<2x8x8xf32>
    %545 = arith.truncf %544 : vector<2x8x8xf32> to vector<2x8x8xbf16>
    "tpu.trace_start"() <{level = 10 : i32, message = "bqd,bkd->bqk"}> : () -> ()
    %cst_207 = arith.constant dense<0.000000e+00> : vector<2x8x8xf32>
    %546 = tpu.matmul %539, %542, %cst_207 {dimension_numbers = #tpu.dot_dimension_numbers<[2], [2], [1], [1], [0, 0, 0, 1, 1, 1], [0], [0]>} : vector<2x8x8xbf16>, vector<2x8x8xbf16>, vector<2x8x8xf32> -> vector<2x8x8xf32>
    "tpu.trace_stop"() : () -> ()
    %cst_208 = arith.constant 0.353553385 : f32
    %547 = vector.broadcast %cst_208 : f32 to vector<2x8x8xf32>
    %548 = arith.mulf %546, %547 : vector<2x8x8xf32>
    %cst_209 = arith.constant -1.000000e+30 : f32
    %549 = vector.shape_cast %446 : vector<1x8x8xi1> to vector<1x8x8xi1>
    %550 = vector.broadcast %549 : vector<1x8x8xi1> to vector<2x8x8xi1>
    %551 = vector.broadcast %cst_209 : f32 to vector<2x8x8xf32>
    %552 = arith.select %550, %548, %551 : vector<2x8x8xi1>, vector<2x8x8xf32>
    %cst_210 = arith.constant dense<0xFF800000> : vector<2x8xf32>
    %553 = vector.multi_reduction <maximumf>, %552, %cst_210 [2] : vector<2x8x8xf32> to vector<2x8xf32>
    %554 = vector.shape_cast %553 : vector<2x8xf32> to vector<2x8x1xf32>
    %555 = vector.broadcast %554 : vector<2x8x1xf32> to vector<2x8x8xf32>
    %556 = arith.subf %552, %555 : vector<2x8x8xf32>
    %557 = math.exp %556 : vector<2x8x8xf32>
    %cst_211 = arith.constant dense<0.000000e+00> : vector<2x8xf32>
    %558 = vector.multi_reduction <add>, %557, %cst_211 [2] : vector<2x8x8xf32> to vector<2x8xf32>
    %559 = vector.shape_cast %558 : vector<2x8xf32> to vector<2x8x1xf32>
    %560 = tpu.reciprocal %559 {approx = true} : vector<2x8x1xf32> -> vector<2x8x1xf32>
    %561 = vector.broadcast %560 : vector<2x8x1xf32> to vector<2x8x8xf32>
    %562 = arith.mulf %557, %561 : vector<2x8x8xf32>
    %563 = arith.truncf %562 : vector<2x8x8xf32> to vector<2x8x8xbf16>
    "tpu.trace_start"() <{level = 10 : i32, message = "bqk,bkd->bqd"}> : () -> ()
    %cst_212 = arith.constant dense<0.000000e+00> : vector<2x8x8xf32>
    %564 = tpu.matmul %563, %545, %cst_212 {dimension_numbers = #tpu.dot_dimension_numbers<[2], [1], [1], [2], [0, 0, 0, 1, 1, 2], [0], [0]>} : vector<2x8x8xbf16>, vector<2x8x8xbf16>, vector<2x8x8xf32> -> vector<2x8x8xf32>
    "tpu.trace_stop"() : () -> ()
    %565 = vector.shape_cast %564 : vector<2x8x8xf32> to vector<16x8xf32>
    %c0_213 = arith.constant 0 : index
    %c24_214 = arith.constant 24 : index
    %566 = vector.load %arg40[%c0_213, %c24_214] : memref<16x32xf32, #tpu.memory_space<vmem>>, vector<16x8xf32>
    tpu.vector_store %arg40[%c0_213, %c24_214], %565 {strides = array<i32>} : memref<16x32xf32, #tpu.memory_space<vmem>>, vector<16x8xf32>,
    %c0_215 = arith.constant 0 : index
    %c0_216 = arith.constant 0 : index
    %567 = vector.load %arg40[%c0_215, %c0_216] : memref<16x32xf32, #tpu.memory_space<vmem>>, vector<16x32xf32>
    %568 = arith.truncf %567 : vector<16x32xf32> to vector<16x32xbf16>
    %cst_217 = arith.constant dense<0.000000e+00> : vector<16x32xf32>
    %569 = tpu.matmul %568, %440, %cst_217 {dimension_numbers = #tpu.dot_dimension_numbers<[1], [0], [0], [1], [0, 0, 1, 1], [], []>} : vector<16x32xbf16>, vector<32x32xbf16>, vector<16x32xf32> -> vector<16x32xf32>
    %570 = vector.broadcast %442 : vector<1x32xf32> to vector<16x32xf32>
    %571 = arith.addf %569, %570 : vector<16x32xf32>
    %572 = arith.addf %427, %571 : vector<16x32xf32>
    %c0_218 = arith.constant 0 : index
    %c0_219 = arith.constant 0 : index
    %c0_220 = arith.constant 0 : index
    %573 = vector.load %arg27[%c0_218, %c0_219, %c0_220] : memref<2x1x32xf32, #tpu.memory_space<vmem>>, vector<1x1x32xf32>
    %574 = vector.shape_cast %573 : vector<1x1x32xf32> to vector<1x32xf32>
    %c0_221 = arith.constant 0 : index
    %c0_222 = arith.constant 0 : index
    %c0_223 = arith.constant 0 : index
    %575 = vector.load %arg26[%c0_221, %c0_222, %c0_223] : memref<2x1x32xf32, #tpu.memory_space<vmem>>, vector<1x1x32xf32>
    %576 = vector.shape_cast %575 : vector<1x1x32xf32> to vector<1x32xf32>
    %cst_224 = arith.constant dense<0.000000e+00> : vector<16xf32>
    %577 = vector.multi_reduction <add>, %572, %cst_224 [1] : vector<16x32xf32> to vector<16xf32>
    %578 = vector.shape_cast %577 : vector<16xf32> to vector<16x1xf32>
    %cst_225 = arith.constant 3.200000e+01 : f32
    %579 = vector.broadcast %cst_225 : f32 to vector<16x1xf32>
    %580 = arith.divf %578, %579 : vector<16x1xf32>
    %581 = vector.broadcast %580 : vector<16x1xf32> to vector<16x32xf32>
    %582 = arith.subf %572, %581 : vector<16x32xf32>
    %583 = arith.mulf %582, %582 : vector<16x32xf32>
    %cst_226 = arith.constant dense<0.000000e+00> : vector<16xf32>
    %584 = vector.multi_reduction <add>, %583, %cst_226 [1] : vector<16x32xf32> to vector<16xf32>
    %585 = vector.shape_cast %584 : vector<16xf32> to vector<16x1xf32>
    %cst_227 = arith.constant 3.200000e+01 : f32
    %586 = vector.broadcast %cst_227 : f32 to vector<16x1xf32>
    %587 = arith.divf %585, %586 : vector<16x1xf32>
    %588 = vector.broadcast %580 : vector<16x1xf32> to vector<16x32xf32>
    %589 = arith.subf %572, %588 : vector<16x32xf32>
    %cst_228 = arith.constant 9.99999974E-6 : f32
    %590 = vector.broadcast %cst_228 : f32 to vector<16x1xf32>
    %591 = arith.addf %587, %590 : vector<16x1xf32>
    %592 = math.rsqrt %591 : vector<16x1xf32>
    %593 = vector.broadcast %592 : vector<16x1xf32> to vector<16x32xf32>
    %594 = arith.mulf %589, %593 : vector<16x32xf32>
    %595 = vector.broadcast %574 : vector<1x32xf32> to vector<16x32xf32>
    %596 = arith.mulf %594, %595 : vector<16x32xf32>
    %597 = vector.broadcast %576 : vector<1x32xf32> to vector<16x32xf32>
    %598 = arith.addf %596, %597 : vector<16x32xf32>
    %c0_229 = arith.constant 0 : index
    %c0_230 = arith.constant 0 : index
    %c0_231 = arith.constant 0 : index
    %599 = vector.load %arg25[%c0_229, %c0_230, %c0_231] : memref<2x32x32xbf16, #tpu.memory_space<vmem>>, vector<1x32x32xbf16>
    %600 = vector.shape_cast %599 : vector<1x32x32xbf16> to vector<32x32xbf16>
    %601 = arith.truncf %598 : vector<16x32xf32> to vector<16x32xbf16>
    %cst_232 = arith.constant dense<0.000000e+00> : vector<16x32xf32>
    %602 = tpu.matmul %601, %600, %cst_232 {dimension_numbers = #tpu.dot_dimension_numbers<[1], [0], [0], [1], [0, 0, 1, 1], [], []>} : vector<16x32xbf16>, vector<32x32xbf16>, vector<16x32xf32> -> vector<16x32xf32>
    %c0_233 = arith.constant 0 : index
    %c0_234 = arith.constant 0 : index
    %c0_235 = arith.constant 0 : index
    %603 = vector.load %arg23[%c0_233, %c0_234, %c0_235] : memref<2x1x32xf32, #tpu.memory_space<vmem>>, vector<1x1x32xf32>
    %604 = vector.shape_cast %603 : vector<1x1x32xf32> to vector<1x32xf32>
    %605 = vector.broadcast %604 : vector<1x32xf32> to vector<16x32xf32>
    %606 = arith.addf %602, %605 : vector<16x32xf32>
    %c0_236 = arith.constant 0 : index
    %c0_237 = arith.constant 0 : index
    %c0_238 = arith.constant 0 : index
    %607 = vector.load %arg24[%c0_236, %c0_237, %c0_238] : memref<2x32x128xbf16, #tpu.memory_space<vmem>>, vector<1x32x128xbf16>
    %608 = vector.shape_cast %607 : vector<1x32x128xbf16> to vector<32x128xbf16>
    %cst_239 = arith.constant dense<0.000000e+00> : vector<16x128xf32>
    %609 = tpu.matmul %410, %608, %cst_239 {dimension_numbers = #tpu.dot_dimension_numbers<[1], [0], [0], [1], [0, 0, 1, 1], [], []>} : vector<16x32xbf16>, vector<32x128xbf16>, vector<16x128xf32> -> vector<16x128xf32>
    %c0_240 = arith.constant 0 : index
    %c0_241 = arith.constant 0 : index
    %c0_242 = arith.constant 0 : index
    %610 = vector.load %arg22[%c0_240, %c0_241, %c0_242] : memref<2x1x128xf32, #tpu.memory_space<vmem>>, vector<1x1x128xf32>
    %611 = vector.shape_cast %610 : vector<1x1x128xf32> to vector<1x128xf32>
    %612 = vector.broadcast %611 : vector<1x128xf32> to vector<16x128xf32>
    %613 = arith.addf %609, %612 : vector<16x128xf32>
    %614 = vector.extract_strided_slice %613 {offsets = [0, 0], sizes = [16, 32], strides = [1, 1]} : vector<16x128xf32> to vector<16x32xf32>
    %615 = vector.extract_strided_slice %613 {offsets = [0, 32], sizes = [16, 32], strides = [1, 1]} : vector<16x128xf32> to vector<16x32xf32>
    %c0_243 = arith.constant 0 : index
    %c0_244 = arith.constant 0 : index
    %c0_245 = arith.constant 0 : index
    %616 = vector.load %arg35[%c0_243, %c0_244, %c0_245] : memref<2x32x32xbf16, #tpu.memory_space<vmem>>, vector<1x32x32xbf16>
    %617 = vector.shape_cast %616 : vector<1x32x32xbf16> to vector<32x32xbf16>
    %c0_246 = arith.constant 0 : index
    %c0_247 = arith.constant 0 : index
    %c0_248 = arith.constant 0 : index
    %618 = vector.load %arg20[%c0_246, %c0_247, %c0_248] : memref<2x1x32xf32, #tpu.memory_space<vmem>>, vector<1x1x32xf32>
    %619 = vector.shape_cast %618 : vector<1x1x32xf32> to vector<1x32xf32>
    %620 = vector.extract_strided_slice %606 {offsets = [0, 0], sizes = [16, 8], strides = [1, 1]} : vector<16x32xf32> to vector<16x8xf32>
    %621 = vector.shape_cast %620 : vector<16x8xf32> to vector<2x8x8xf32>
    %622 = arith.truncf %621 : vector<2x8x8xf32> to vector<2x8x8xbf16>
    %623 = vector.extract_strided_slice %614 {offsets = [0, 0], sizes = [16, 8], strides = [1, 1]} : vector<16x32xf32> to vector<16x8xf32>
    %624 = vector.shape_cast %623 : vector<16x8xf32> to vector<2x8x8xf32>
    %625 = arith.truncf %624 : vector<2x8x8xf32> to vector<2x8x8xbf16>
    %626 = vector.extract_strided_slice %615 {offsets = [0, 0], sizes = [16, 8], strides = [1, 1]} : vector<16x32xf32> to vector<16x8xf32>
    %627 = vector.shape_cast %626 : vector<16x8xf32> to vector<2x8x8xf32>
    %628 = arith.truncf %627 : vector<2x8x8xf32> to vector<2x8x8xbf16>
    "tpu.trace_start"() <{level = 10 : i32, message = "bqd,bkd->bqk"}> : () -> ()
    %cst_249 = arith.constant dense<0.000000e+00> : vector<2x8x8xf32>
    %629 = tpu.matmul %622, %625, %cst_249 {dimension_numbers = #tpu.dot_dimension_numbers<[2], [2], [1], [1], [0, 0, 0, 1, 1, 1], [0], [0]>} : vector<2x8x8xbf16>, vector<2x8x8xbf16>, vector<2x8x8xf32> -> vector<2x8x8xf32>
    "tpu.trace_stop"() : () -> ()
    %cst_250 = arith.constant 0.353553385 : f32
    %630 = vector.broadcast %cst_250 : f32 to vector<2x8x8xf32>
    %631 = arith.mulf %629, %630 : vector<2x8x8xf32>
    %cst_251 = arith.constant dense<0xFF800000> : vector<2x8xf32>
    %632 = vector.multi_reduction <maximumf>, %631, %cst_251 [2] : vector<2x8x8xf32> to vector<2x8xf32>
    %633 = vector.shape_cast %632 : vector<2x8xf32> to vector<2x8x1xf32>
    %634 = vector.broadcast %633 : vector<2x8x1xf32> to vector<2x8x8xf32>
    %635 = arith.subf %631, %634 : vector<2x8x8xf32>
    %636 = math.exp %635 : vector<2x8x8xf32>
    %cst_252 = arith.constant dense<0.000000e+00> : vector<2x8xf32>
    %637 = vector.multi_reduction <add>, %636, %cst_252 [2] : vector<2x8x8xf32> to vector<2x8xf32>
    %638 = vector.shape_cast %637 : vector<2x8xf32> to vector<2x8x1xf32>
    %639 = tpu.reciprocal %638 {approx = true} : vector<2x8x1xf32> -> vector<2x8x1xf32>
    %640 = vector.broadcast %639 : vector<2x8x1xf32> to vector<2x8x8xf32>
    %641 = arith.mulf %636, %640 : vector<2x8x8xf32>
    %642 = arith.truncf %641 : vector<2x8x8xf32> to vector<2x8x8xbf16>
    "tpu.trace_start"() <{level = 10 : i32, message = "bqk,bkd->bqd"}> : () -> ()
    %cst_253 = arith.constant dense<0.000000e+00> : vector<2x8x8xf32>
    %643 = tpu.matmul %642, %628, %cst_253 {dimension_numbers = #tpu.dot_dimension_numbers<[2], [1], [1], [2], [0, 0, 0, 1, 1, 2], [0], [0]>} : vector<2x8x8xbf16>, vector<2x8x8xbf16>, vector<2x8x8xf32> -> vector<2x8x8xf32>
    "tpu.trace_stop"() : () -> ()
    %644 = vector.shape_cast %643 : vector<2x8x8xf32> to vector<16x8xf32>
    %c0_254 = arith.constant 0 : index
    %c0_255 = arith.constant 0 : index
    %645 = vector.load %arg40[%c0_254, %c0_255] : memref<16x32xf32, #tpu.memory_space<vmem>>, vector<16x8xf32>
    tpu.vector_store %arg40[%c0_254, %c0_255], %644 {strides = array<i32>} : memref<16x32xf32, #tpu.memory_space<vmem>>, vector<16x8xf32>,
    %646 = vector.extract_strided_slice %606 {offsets = [0, 8], sizes = [16, 8], strides = [1, 1]} : vector<16x32xf32> to vector<16x8xf32>
    %647 = vector.shape_cast %646 : vector<16x8xf32> to vector<2x8x8xf32>
    %648 = arith.truncf %647 : vector<2x8x8xf32> to vector<2x8x8xbf16>
    %649 = vector.extract_strided_slice %614 {offsets = [0, 8], sizes = [16, 8], strides = [1, 1]} : vector<16x32xf32> to vector<16x8xf32>
    %650 = vector.shape_cast %649 : vector<16x8xf32> to vector<2x8x8xf32>
    %651 = arith.truncf %650 : vector<2x8x8xf32> to vector<2x8x8xbf16>
    %652 = vector.extract_strided_slice %615 {offsets = [0, 8], sizes = [16, 8], strides = [1, 1]} : vector<16x32xf32> to vector<16x8xf32>
    %653 = vector.shape_cast %652 : vector<16x8xf32> to vector<2x8x8xf32>
    %654 = arith.truncf %653 : vector<2x8x8xf32> to vector<2x8x8xbf16>
    "tpu.trace_start"() <{level = 10 : i32, message = "bqd,bkd->bqk"}> : () -> ()
    %cst_256 = arith.constant dense<0.000000e+00> : vector<2x8x8xf32>
    %655 = tpu.matmul %648, %651, %cst_256 {dimension_numbers = #tpu.dot_dimension_numbers<[2], [2], [1], [1], [0, 0, 0, 1, 1, 1], [0], [0]>} : vector<2x8x8xbf16>, vector<2x8x8xbf16>, vector<2x8x8xf32> -> vector<2x8x8xf32>
    "tpu.trace_stop"() : () -> ()
    %cst_257 = arith.constant 0.353553385 : f32
    %656 = vector.broadcast %cst_257 : f32 to vector<2x8x8xf32>
    %657 = arith.mulf %655, %656 : vector<2x8x8xf32>
    %cst_258 = arith.constant dense<0xFF800000> : vector<2x8xf32>
    %658 = vector.multi_reduction <maximumf>, %657, %cst_258 [2] : vector<2x8x8xf32> to vector<2x8xf32>
    %659 = vector.shape_cast %658 : vector<2x8xf32> to vector<2x8x1xf32>
    %660 = vector.broadcast %659 : vector<2x8x1xf32> to vector<2x8x8xf32>
    %661 = arith.subf %657, %660 : vector<2x8x8xf32>
    %662 = math.exp %661 : vector<2x8x8xf32>
    %cst_259 = arith.constant dense<0.000000e+00> : vector<2x8xf32>
    %663 = vector.multi_reduction <add>, %662, %cst_259 [2] : vector<2x8x8xf32> to vector<2x8xf32>
    %664 = vector.shape_cast %663 : vector<2x8xf32> to vector<2x8x1xf32>
    %665 = tpu.reciprocal %664 {approx = true} : vector<2x8x1xf32> -> vector<2x8x1xf32>
    %666 = vector.broadcast %665 : vector<2x8x1xf32> to vector<2x8x8xf32>
    %667 = arith.mulf %662, %666 : vector<2x8x8xf32>
    %668 = arith.truncf %667 : vector<2x8x8xf32> to vector<2x8x8xbf16>
    "tpu.trace_start"() <{level = 10 : i32, message = "bqk,bkd->bqd"}> : () -> ()
    %cst_260 = arith.constant dense<0.000000e+00> : vector<2x8x8xf32>
    %669 = tpu.matmul %668, %654, %cst_260 {dimension_numbers = #tpu.dot_dimension_numbers<[2], [1], [1], [2], [0, 0, 0, 1, 1, 2], [0], [0]>} : vector<2x8x8xbf16>, vector<2x8x8xbf16>, vector<2x8x8xf32> -> vector<2x8x8xf32>
    "tpu.trace_stop"() : () -> ()
    %670 = vector.shape_cast %669 : vector<2x8x8xf32> to vector<16x8xf32>
    %c0_261 = arith.constant 0 : index
    %c8_262 = arith.constant 8 : index
    %671 = vector.load %arg40[%c0_261, %c8_262] : memref<16x32xf32, #tpu.memory_space<vmem>>, vector<16x8xf32>
    tpu.vector_store %arg40[%c0_261, %c8_262], %670 {strides = array<i32>} : memref<16x32xf32, #tpu.memory_space<vmem>>, vector<16x8xf32>,
    %672 = vector.extract_strided_slice %606 {offsets = [0, 16], sizes = [16, 8], strides = [1, 1]} : vector<16x32xf32> to vector<16x8xf32>
    %673 = vector.shape_cast %672 : vector<16x8xf32> to vector<2x8x8xf32>
    %674 = arith.truncf %673 : vector<2x8x8xf32> to vector<2x8x8xbf16>
    %675 = vector.extract_strided_slice %614 {offsets = [0, 16], sizes = [16, 8], strides = [1, 1]} : vector<16x32xf32> to vector<16x8xf32>
    %676 = vector.shape_cast %675 : vector<16x8xf32> to vector<2x8x8xf32>
    %677 = arith.truncf %676 : vector<2x8x8xf32> to vector<2x8x8xbf16>
    %678 = vector.extract_strided_slice %615 {offsets = [0, 16], sizes = [16, 8], strides = [1, 1]} : vector<16x32xf32> to vector<16x8xf32>
    %679 = vector.shape_cast %678 : vector<16x8xf32> to vector<2x8x8xf32>
    %680 = arith.truncf %679 : vector<2x8x8xf32> to vector<2x8x8xbf16>
    "tpu.trace_start"() <{level = 10 : i32, message = "bqd,bkd->bqk"}> : () -> ()
    %cst_263 = arith.constant dense<0.000000e+00> : vector<2x8x8xf32>
    %681 = tpu.matmul %674, %677, %cst_263 {dimension_numbers = #tpu.dot_dimension_numbers<[2], [2], [1], [1], [0, 0, 0, 1, 1, 1], [0], [0]>} : vector<2x8x8xbf16>, vector<2x8x8xbf16>, vector<2x8x8xf32> -> vector<2x8x8xf32>
    "tpu.trace_stop"() : () -> ()
    %cst_264 = arith.constant 0.353553385 : f32
    %682 = vector.broadcast %cst_264 : f32 to vector<2x8x8xf32>
    %683 = arith.mulf %681, %682 : vector<2x8x8xf32>
    %cst_265 = arith.constant dense<0xFF800000> : vector<2x8xf32>
    %684 = vector.multi_reduction <maximumf>, %683, %cst_265 [2] : vector<2x8x8xf32> to vector<2x8xf32>
    %685 = vector.shape_cast %684 : vector<2x8xf32> to vector<2x8x1xf32>
    %686 = vector.broadcast %685 : vector<2x8x1xf32> to vector<2x8x8xf32>
    %687 = arith.subf %683, %686 : vector<2x8x8xf32>
    %688 = math.exp %687 : vector<2x8x8xf32>
    %cst_266 = arith.constant dense<0.000000e+00> : vector<2x8xf32>
    %689 = vector.multi_reduction <add>, %688, %cst_266 [2] : vector<2x8x8xf32> to vector<2x8xf32>
    %690 = vector.shape_cast %689 : vector<2x8xf32> to vector<2x8x1xf32>
    %691 = tpu.reciprocal %690 {approx = true} : vector<2x8x1xf32> -> vector<2x8x1xf32>
    %692 = vector.broadcast %691 : vector<2x8x1xf32> to vector<2x8x8xf32>
    %693 = arith.mulf %688, %692 : vector<2x8x8xf32>
    %694 = arith.truncf %693 : vector<2x8x8xf32> to vector<2x8x8xbf16>
    "tpu.trace_start"() <{level = 10 : i32, message = "bqk,bkd->bqd"}> : () -> ()
    %cst_267 = arith.constant dense<0.000000e+00> : vector<2x8x8xf32>
    %695 = tpu.matmul %694, %680, %cst_267 {dimension_numbers = #tpu.dot_dimension_numbers<[2], [1], [1], [2], [0, 0, 0, 1, 1, 2], [0], [0]>} : vector<2x8x8xbf16>, vector<2x8x8xbf16>, vector<2x8x8xf32> -> vector<2x8x8xf32>
    "tpu.trace_stop"() : () -> ()
    %696 = vector.shape_cast %695 : vector<2x8x8xf32> to vector<16x8xf32>
    %c0_268 = arith.constant 0 : index
    %c16_269 = arith.constant 16 : index
    %697 = vector.load %arg40[%c0_268, %c16_269] : memref<16x32xf32, #tpu.memory_space<vmem>>, vector<16x8xf32>
    tpu.vector_store %arg40[%c0_268, %c16_269], %696 {strides = array<i32>} : memref<16x32xf32, #tpu.memory_space<vmem>>, vector<16x8xf32>,
    %698 = vector.extract_strided_slice %606 {offsets = [0, 24], sizes = [16, 8], strides = [1, 1]} : vector<16x32xf32> to vector<16x8xf32>
    %699 = vector.shape_cast %698 : vector<16x8xf32> to vector<2x8x8xf32>
    %700 = arith.truncf %699 : vector<2x8x8xf32> to vector<2x8x8xbf16>
    %701 = vector.extract_strided_slice %614 {offsets = [0, 24], sizes = [16, 8], strides = [1, 1]} : vector<16x32xf32> to vector<16x8xf32>
    %702 = vector.shape_cast %701 : vector<16x8xf32> to vector<2x8x8xf32>
    %703 = arith.truncf %702 : vector<2x8x8xf32> to vector<2x8x8xbf16>
    %704 = vector.extract_strided_slice %615 {offsets = [0, 24], sizes = [16, 8], strides = [1, 1]} : vector<16x32xf32> to vector<16x8xf32>
    %705 = vector.shape_cast %704 : vector<16x8xf32> to vector<2x8x8xf32>
    %706 = arith.truncf %705 : vector<2x8x8xf32> to vector<2x8x8xbf16>
    "tpu.trace_start"() <{level = 10 : i32, message = "bqd,bkd->bqk"}> : () -> ()
    %cst_270 = arith.constant dense<0.000000e+00> : vector<2x8x8xf32>
    %707 = tpu.matmul %700, %703, %cst_270 {dimension_numbers = #tpu.dot_dimension_numbers<[2], [2], [1], [1], [0, 0, 0, 1, 1, 1], [0], [0]>} : vector<2x8x8xbf16>, vector<2x8x8xbf16>, vector<2x8x8xf32> -> vector<2x8x8xf32>
    "tpu.trace_stop"() : () -> ()
    %cst_271 = arith.constant 0.353553385 : f32
    %708 = vector.broadcast %cst_271 : f32 to vector<2x8x8xf32>
    %709 = arith.mulf %707, %708 : vector<2x8x8xf32>
    %cst_272 = arith.constant dense<0xFF800000> : vector<2x8xf32>
    %710 = vector.multi_reduction <maximumf>, %709, %cst_272 [2] : vector<2x8x8xf32> to vector<2x8xf32>
    %711 = vector.shape_cast %710 : vector<2x8xf32> to vector<2x8x1xf32>
    %712 = vector.broadcast %711 : vector<2x8x1xf32> to vector<2x8x8xf32>
    %713 = arith.subf %709, %712 : vector<2x8x8xf32>
    %714 = math.exp %713 : vector<2x8x8xf32>
    %cst_273 = arith.constant dense<0.000000e+00> : vector<2x8xf32>
    %715 = vector.multi_reduction <add>, %714, %cst_273 [2] : vector<2x8x8xf32> to vector<2x8xf32>
    %716 = vector.shape_cast %715 : vector<2x8xf32> to vector<2x8x1xf32>
    %717 = tpu.reciprocal %716 {approx = true} : vector<2x8x1xf32> -> vector<2x8x1xf32>
    %718 = vector.broadcast %717 : vector<2x8x1xf32> to vector<2x8x8xf32>
    %719 = arith.mulf %714, %718 : vector<2x8x8xf32>
    %720 = arith.truncf %719 : vector<2x8x8xf32> to vector<2x8x8xbf16>
    "tpu.trace_start"() <{level = 10 : i32, message = "bqk,bkd->bqd"}> : () -> ()
    %cst_274 = arith.constant dense<0.000000e+00> : vector<2x8x8xf32>
    %721 = tpu.matmul %720, %706, %cst_274 {dimension_numbers = #tpu.dot_dimension_numbers<[2], [1], [1], [2], [0, 0, 0, 1, 1, 2], [0], [0]>} : vector<2x8x8xbf16>, vector<2x8x8xbf16>, vector<2x8x8xf32> -> vector<2x8x8xf32>
    "tpu.trace_stop"() : () -> ()
    %722 = vector.shape_cast %721 : vector<2x8x8xf32> to vector<16x8xf32>
    %c0_275 = arith.constant 0 : index
    %c24_276 = arith.constant 24 : index
    %723 = vector.load %arg40[%c0_275, %c24_276] : memref<16x32xf32, #tpu.memory_space<vmem>>, vector<16x8xf32>
    tpu.vector_store %arg40[%c0_275, %c24_276], %722 {strides = array<i32>} : memref<16x32xf32, #tpu.memory_space<vmem>>, vector<16x8xf32>,
    %c0_277 = arith.constant 0 : index
    %c0_278 = arith.constant 0 : index
    %724 = vector.load %arg40[%c0_277, %c0_278] : memref<16x32xf32, #tpu.memory_space<vmem>>, vector<16x32xf32>
    %725 = arith.truncf %724 : vector<16x32xf32> to vector<16x32xbf16>
    %cst_279 = arith.constant dense<0.000000e+00> : vector<16x32xf32>
    %726 = tpu.matmul %725, %617, %cst_279 {dimension_numbers = #tpu.dot_dimension_numbers<[1], [0], [0], [1], [0, 0, 1, 1], [], []>} : vector<16x32xbf16>, vector<32x32xbf16>, vector<16x32xf32> -> vector<16x32xf32>
    %727 = vector.broadcast %619 : vector<1x32xf32> to vector<16x32xf32>
    %728 = arith.addf %726, %727 : vector<16x32xf32>
    %729 = arith.addf %598, %728 : vector<16x32xf32>
    %c0_280 = arith.constant 0 : index
    %c0_281 = arith.constant 0 : index
    %c0_282 = arith.constant 0 : index
    %730 = vector.load %arg29[%c0_280, %c0_281, %c0_282] : memref<2x1x32xf32, #tpu.memory_space<vmem>>, vector<1x1x32xf32>
    %731 = vector.shape_cast %730 : vector<1x1x32xf32> to vector<1x32xf32>
    %c0_283 = arith.constant 0 : index
    %c0_284 = arith.constant 0 : index
    %c0_285 = arith.constant 0 : index
    %732 = vector.load %arg28[%c0_283, %c0_284, %c0_285] : memref<2x1x32xf32, #tpu.memory_space<vmem>>, vector<1x1x32xf32>
    %733 = vector.shape_cast %732 : vector<1x1x32xf32> to vector<1x32xf32>
    %cst_286 = arith.constant dense<0.000000e+00> : vector<16xf32>
    %734 = vector.multi_reduction <add>, %729, %cst_286 [1] : vector<16x32xf32> to vector<16xf32>
    %735 = vector.shape_cast %734 : vector<16xf32> to vector<16x1xf32>
    %cst_287 = arith.constant 3.200000e+01 : f32
    %736 = vector.broadcast %cst_287 : f32 to vector<16x1xf32>
    %737 = arith.divf %735, %736 : vector<16x1xf32>
    %738 = vector.broadcast %737 : vector<16x1xf32> to vector<16x32xf32>
    %739 = arith.subf %729, %738 : vector<16x32xf32>
    %740 = arith.mulf %739, %739 : vector<16x32xf32>
    %cst_288 = arith.constant dense<0.000000e+00> : vector<16xf32>
    %741 = vector.multi_reduction <add>, %740, %cst_288 [1] : vector<16x32xf32> to vector<16xf32>
    %742 = vector.shape_cast %741 : vector<16xf32> to vector<16x1xf32>
    %cst_289 = arith.constant 3.200000e+01 : f32
    %743 = vector.broadcast %cst_289 : f32 to vector<16x1xf32>
    %744 = arith.divf %742, %743 : vector<16x1xf32>
    %745 = vector.broadcast %737 : vector<16x1xf32> to vector<16x32xf32>
    %746 = arith.subf %729, %745 : vector<16x32xf32>
    %cst_290 = arith.constant 9.99999974E-6 : f32
    %747 = vector.broadcast %cst_290 : f32 to vector<16x1xf32>
    %748 = arith.addf %744, %747 : vector<16x1xf32>
    %749 = math.rsqrt %748 : vector<16x1xf32>
    %750 = vector.broadcast %749 : vector<16x1xf32> to vector<16x32xf32>
    %751 = arith.mulf %746, %750 : vector<16x32xf32>
    %752 = vector.broadcast %731 : vector<1x32xf32> to vector<16x32xf32>
    %753 = arith.mulf %751, %752 : vector<16x32xf32>
    %754 = vector.broadcast %733 : vector<1x32xf32> to vector<16x32xf32>
    %755 = arith.addf %753, %754 : vector<16x32xf32>
    %c0_291 = arith.constant 0 : index
    %c0_292 = arith.constant 0 : index
    %c0_293 = arith.constant 0 : index
    %756 = vector.load %arg32[%c0_291, %c0_292, %c0_293] : memref<2x32x64xbf16, #tpu.memory_space<vmem>>, vector<1x32x64xbf16>
    %757 = vector.shape_cast %756 : vector<1x32x64xbf16> to vector<32x64xbf16>
    %c0_294 = arith.constant 0 : index
    %c0_295 = arith.constant 0 : index
    %c0_296 = arith.constant 0 : index
    %758 = vector.load %arg17[%c0_294, %c0_295, %c0_296] : memref<2x1x64xf32, #tpu.memory_space<vmem>>, vector<1x1x64xf32>
    %759 = vector.shape_cast %758 : vector<1x1x64xf32> to vector<1x64xf32>
    %c0_297 = arith.constant 0 : index
    %c0_298 = arith.constant 0 : index
    %c0_299 = arith.constant 0 : index
    %760 = vector.load %arg33[%c0_297, %c0_298, %c0_299] : memref<2x64x32xbf16, #tpu.memory_space<vmem>>, vector<1x64x32xbf16>
    %761 = vector.shape_cast %760 : vector<1x64x32xbf16> to vector<64x32xbf16>
    %c0_300 = arith.constant 0 : index
    %c0_301 = arith.constant 0 : index
    %c0_302 = arith.constant 0 : index
    %762 = vector.load %arg18[%c0_300, %c0_301, %c0_302] : memref<2x1x32xf32, #tpu.memory_space<vmem>>, vector<1x1x32xf32>
    %763 = vector.shape_cast %762 : vector<1x1x32xf32> to vector<1x32xf32>
    %764 = arith.truncf %755 : vector<16x32xf32> to vector<16x32xbf16>
    %cst_303 = arith.constant dense<0.000000e+00> : vector<16x64xf32>
    %765 = tpu.matmul %764, %757, %cst_303 {dimension_numbers = #tpu.dot_dimension_numbers<[1], [0], [0], [1], [0, 0, 1, 1], [], []>} : vector<16x32xbf16>, vector<32x64xbf16>, vector<16x64xf32> -> vector<16x64xf32>
    %766 = vector.broadcast %759 : vector<1x64xf32> to vector<16x64xf32>
    %767 = arith.addf %765, %766 : vector<16x64xf32>
    %cst_304 = arith.constant 0.000000e+00 : f32
    %768 = vector.broadcast %cst_304 : f32 to vector<16x64xf32>
    %769 = arith.maximumf %767, %768 : vector<16x64xf32>
    %770 = arith.truncf %769 : vector<16x64xf32> to vector<16x64xbf16>
    %cst_305 = arith.constant dense<0.000000e+00> : vector<16x32xf32>
    %771 = tpu.matmul %770, %761, %cst_305 {dimension_numbers = #tpu.dot_dimension_numbers<[1], [0], [0], [1], [0, 0, 1, 1], [], []>} : vector<16x64xbf16>, vector<64x32xbf16>, vector<16x32xf32> -> vector<16x32xf32>
    %772 = vector.broadcast %763 : vector<1x32xf32> to vector<16x32xf32>
    %773 = arith.addf %771, %772 : vector<16x32xf32>
    %774 = arith.addf %755, %773 : vector<16x32xf32>
    %c0_306 = arith.constant 0 : index
    %c0_307 = arith.constant 0 : index
    %c0_308 = arith.constant 0 : index
    %775 = vector.load %arg31[%c0_306, %c0_307, %c0_308] : memref<2x1x32xf32, #tpu.memory_space<vmem>>, vector<1x1x32xf32>
    %776 = vector.shape_cast %775 : vector<1x1x32xf32> to vector<1x32xf32>
    %c0_309 = arith.constant 0 : index
    %c0_310 = arith.constant 0 : index
    %c0_311 = arith.constant 0 : index
    %777 = vector.load %arg30[%c0_309, %c0_310, %c0_311] : memref<2x1x32xf32, #tpu.memory_space<vmem>>, vector<1x1x32xf32>
    %778 = vector.shape_cast %777 : vector<1x1x32xf32> to vector<1x32xf32>
    %cst_312 = arith.constant dense<0.000000e+00> : vector<16xf32>
    %779 = vector.multi_reduction <add>, %774, %cst_312 [1] : vector<16x32xf32> to vector<16xf32>
    %780 = vector.shape_cast %779 : vector<16xf32> to vector<16x1xf32>
    %cst_313 = arith.constant 3.200000e+01 : f32
    %781 = vector.broadcast %cst_313 : f32 to vector<16x1xf32>
    %782 = arith.divf %780, %781 : vector<16x1xf32>
    %783 = vector.broadcast %782 : vector<16x1xf32> to vector<16x32xf32>
    %784 = arith.subf %774, %783 : vector<16x32xf32>
    %785 = arith.mulf %784, %784 : vector<16x32xf32>
    %cst_314 = arith.constant dense<0.000000e+00> : vector<16xf32>
    %786 = vector.multi_reduction <add>, %785, %cst_314 [1] : vector<16x32xf32> to vector<16xf32>
    %787 = vector.shape_cast %786 : vector<16xf32> to vector<16x1xf32>
    %cst_315 = arith.constant 3.200000e+01 : f32
    %788 = vector.broadcast %cst_315 : f32 to vector<16x1xf32>
    %789 = arith.divf %787, %788 : vector<16x1xf32>
    %790 = vector.broadcast %782 : vector<16x1xf32> to vector<16x32xf32>
    %791 = arith.subf %774, %790 : vector<16x32xf32>
    %cst_316 = arith.constant 9.99999974E-6 : f32
    %792 = vector.broadcast %cst_316 : f32 to vector<16x1xf32>
    %793 = arith.addf %789, %792 : vector<16x1xf32>
    %794 = math.rsqrt %793 : vector<16x1xf32>
    %795 = vector.broadcast %794 : vector<16x1xf32> to vector<16x32xf32>
    %796 = arith.mulf %791, %795 : vector<16x32xf32>
    %797 = vector.broadcast %776 : vector<1x32xf32> to vector<16x32xf32>
    %798 = arith.mulf %796, %797 : vector<16x32xf32>
    %799 = vector.broadcast %778 : vector<1x32xf32> to vector<16x32xf32>
    %800 = arith.addf %798, %799 : vector<16x32xf32>
    %c1_317 = arith.constant 1 : index
    %c0_318 = arith.constant 0 : index
    %c0_319 = arith.constant 0 : index
    %801 = vector.load %arg36[%c1_317, %c0_318, %c0_319] : memref<2x32x128xbf16, #tpu.memory_space<vmem>>, vector<1x32x128xbf16>
    %802 = vector.shape_cast %801 : vector<1x32x128xbf16> to vector<32x128xbf16>
    %803 = arith.truncf %800 : vector<16x32xf32> to vector<16x32xbf16>
    %cst_320 = arith.constant dense<0.000000e+00> : vector<16x128xf32>
    %804 = tpu.matmul %803, %802, %cst_320 {dimension_numbers = #tpu.dot_dimension_numbers<[1], [0], [0], [1], [0, 0, 1, 1], [], []>} : vector<16x32xbf16>, vector<32x128xbf16>, vector<16x128xf32> -> vector<16x128xf32>
    %c1_321 = arith.constant 1 : index
    %c0_322 = arith.constant 0 : index
    %c0_323 = arith.constant 0 : index
    %805 = vector.load %arg21[%c1_321, %c0_322, %c0_323] : memref<2x1x128xf32, #tpu.memory_space<vmem>>, vector<1x1x128xf32>
    %806 = vector.shape_cast %805 : vector<1x1x128xf32> to vector<1x128xf32>
    %807 = vector.broadcast %806 : vector<1x128xf32> to vector<16x128xf32>
    %808 = arith.addf %804, %807 : vector<16x128xf32>
    %809 = vector.extract_strided_slice %808 {offsets = [0, 0], sizes = [16, 32], strides = [1, 1]} : vector<16x128xf32> to vector<16x32xf32>
    %810 = vector.extract_strided_slice %808 {offsets = [0, 32], sizes = [16, 32], strides = [1, 1]} : vector<16x128xf32> to vector<16x32xf32>
    %811 = vector.extract_strided_slice %808 {offsets = [0, 64], sizes = [16, 32], strides = [1, 1]} : vector<16x128xf32> to vector<16x32xf32>
    %c1_324 = arith.constant 1 : index
    %c0_325 = arith.constant 0 : index
    %c0_326 = arith.constant 0 : index
    %812 = vector.load %arg34[%c1_324, %c0_325, %c0_326] : memref<2x32x32xbf16, #tpu.memory_space<vmem>>, vector<1x32x32xbf16>
    %813 = vector.shape_cast %812 : vector<1x32x32xbf16> to vector<32x32xbf16>
    %c1_327 = arith.constant 1 : index
    %c0_328 = arith.constant 0 : index
    %c0_329 = arith.constant 0 : index
    %814 = vector.load %arg19[%c1_327, %c0_328, %c0_329] : memref<2x1x32xf32, #tpu.memory_space<vmem>>, vector<1x1x32xf32>
    %815 = vector.shape_cast %814 : vector<1x1x32xf32> to vector<1x32xf32>
    %816 = tpu.iota {dimensions = array<i32: 0>} : vector<8x8xi32>
    %817 = tpu.iota {dimensions = array<i32: 1>} : vector<8x8xi32>
    %818 = arith.cmpi sle, %817, %816 : vector<8x8xi32>
    %819 = vector.shape_cast %818 : vector<8x8xi1> to vector<1x8x8xi1>
    %820 = vector.extract_strided_slice %809 {offsets = [0, 0], sizes = [16, 8], strides = [1, 1]} : vector<16x32xf32> to vector<16x8xf32>
    %821 = vector.shape_cast %820 : vector<16x8xf32> to vector<2x8x8xf32>
    %822 = arith.truncf %821 : vector<2x8x8xf32> to vector<2x8x8xbf16>
    %823 = vector.extract_strided_slice %810 {offsets = [0, 0], sizes = [16, 8], strides = [1, 1]} : vector<16x32xf32> to vector<16x8xf32>
    %824 = vector.shape_cast %823 : vector<16x8xf32> to vector<2x8x8xf32>
    %825 = arith.truncf %824 : vector<2x8x8xf32> to vector<2x8x8xbf16>
    %826 = vector.extract_strided_slice %811 {offsets = [0, 0], sizes = [16, 8], strides = [1, 1]} : vector<16x32xf32> to vector<16x8xf32>
    %827 = vector.shape_cast %826 : vector<16x8xf32> to vector<2x8x8xf32>
    %828 = arith.truncf %827 : vector<2x8x8xf32> to vector<2x8x8xbf16>
    "tpu.trace_start"() <{level = 10 : i32, message = "bqd,bkd->bqk"}> : () -> ()
    %cst_330 = arith.constant dense<0.000000e+00> : vector<2x8x8xf32>
    %829 = tpu.matmul %822, %825, %cst_330 {dimension_numbers = #tpu.dot_dimension_numbers<[2], [2], [1], [1], [0, 0, 0, 1, 1, 1], [0], [0]>} : vector<2x8x8xbf16>, vector<2x8x8xbf16>, vector<2x8x8xf32> -> vector<2x8x8xf32>
    "tpu.trace_stop"() : () -> ()
    %cst_331 = arith.constant 0.353553385 : f32
    %830 = vector.broadcast %cst_331 : f32 to vector<2x8x8xf32>
    %831 = arith.mulf %829, %830 : vector<2x8x8xf32>
    %cst_332 = arith.constant -1.000000e+30 : f32
    %832 = vector.shape_cast %819 : vector<1x8x8xi1> to vector<1x8x8xi1>
    %833 = vector.broadcast %832 : vector<1x8x8xi1> to vector<2x8x8xi1>
    %834 = vector.broadcast %cst_332 : f32 to vector<2x8x8xf32>
    %835 = arith.select %833, %831, %834 : vector<2x8x8xi1>, vector<2x8x8xf32>
    %cst_333 = arith.constant dense<0xFF800000> : vector<2x8xf32>
    %836 = vector.multi_reduction <maximumf>, %835, %cst_333 [2] : vector<2x8x8xf32> to vector<2x8xf32>
    %837 = vector.shape_cast %836 : vector<2x8xf32> to vector<2x8x1xf32>
    %838 = vector.broadcast %837 : vector<2x8x1xf32> to vector<2x8x8xf32>
    %839 = arith.subf %835, %838 : vector<2x8x8xf32>
    %840 = math.exp %839 : vector<2x8x8xf32>
    %cst_334 = arith.constant dense<0.000000e+00> : vector<2x8xf32>
    %841 = vector.multi_reduction <add>, %840, %cst_334 [2] : vector<2x8x8xf32> to vector<2x8xf32>
    %842 = vector.shape_cast %841 : vector<2x8xf32> to vector<2x8x1xf32>
    %843 = tpu.reciprocal %842 {approx = true} : vector<2x8x1xf32> -> vector<2x8x1xf32>
    %844 = vector.broadcast %843 : vector<2x8x1xf32> to vector<2x8x8xf32>
    %845 = arith.mulf %840, %844 : vector<2x8x8xf32>
    %846 = arith.truncf %845 : vector<2x8x8xf32> to vector<2x8x8xbf16>
    "tpu.trace_start"() <{level = 10 : i32, message = "bqk,bkd->bqd"}> : () -> ()
    %cst_335 = arith.constant dense<0.000000e+00> : vector<2x8x8xf32>
    %847 = tpu.matmul %846, %828, %cst_335 {dimension_numbers = #tpu.dot_dimension_numbers<[2], [1], [1], [2], [0, 0, 0, 1, 1, 2], [0], [0]>} : vector<2x8x8xbf16>, vector<2x8x8xbf16>, vector<2x8x8xf32> -> vector<2x8x8xf32>
    "tpu.trace_stop"() : () -> ()
    %848 = vector.shape_cast %847 : vector<2x8x8xf32> to vector<16x8xf32>
    %c0_336 = arith.constant 0 : index
    %c0_337 = arith.constant 0 : index
    %849 = vector.load %arg40[%c0_336, %c0_337] : memref<16x32xf32, #tpu.memory_space<vmem>>, vector<16x8xf32>
    tpu.vector_store %arg40[%c0_336, %c0_337], %848 {strides = array<i32>} : memref<16x32xf32, #tpu.memory_space<vmem>>, vector<16x8xf32>,
    %850 = vector.extract_strided_slice %809 {offsets = [0, 8], sizes = [16, 8], strides = [1, 1]} : vector<16x32xf32> to vector<16x8xf32>
    %851 = vector.shape_cast %850 : vector<16x8xf32> to vector<2x8x8xf32>
    %852 = arith.truncf %851 : vector<2x8x8xf32> to vector<2x8x8xbf16>
    %853 = vector.extract_strided_slice %810 {offsets = [0, 8], sizes = [16, 8], strides = [1, 1]} : vector<16x32xf32> to vector<16x8xf32>
    %854 = vector.shape_cast %853 : vector<16x8xf32> to vector<2x8x8xf32>
    %855 = arith.truncf %854 : vector<2x8x8xf32> to vector<2x8x8xbf16>
    %856 = vector.extract_strided_slice %811 {offsets = [0, 8], sizes = [16, 8], strides = [1, 1]} : vector<16x32xf32> to vector<16x8xf32>
    %857 = vector.shape_cast %856 : vector<16x8xf32> to vector<2x8x8xf32>
    %858 = arith.truncf %857 : vector<2x8x8xf32> to vector<2x8x8xbf16>
    "tpu.trace_start"() <{level = 10 : i32, message = "bqd,bkd->bqk"}> : () -> ()
    %cst_338 = arith.constant dense<0.000000e+00> : vector<2x8x8xf32>
    %859 = tpu.matmul %852, %855, %cst_338 {dimension_numbers = #tpu.dot_dimension_numbers<[2], [2], [1], [1], [0, 0, 0, 1, 1, 1], [0], [0]>} : vector<2x8x8xbf16>, vector<2x8x8xbf16>, vector<2x8x8xf32> -> vector<2x8x8xf32>
    "tpu.trace_stop"() : () -> ()
    %cst_339 = arith.constant 0.353553385 : f32
    %860 = vector.broadcast %cst_339 : f32 to vector<2x8x8xf32>
    %861 = arith.mulf %859, %860 : vector<2x8x8xf32>
    %cst_340 = arith.constant -1.000000e+30 : f32
    %862 = vector.shape_cast %819 : vector<1x8x8xi1> to vector<1x8x8xi1>
    %863 = vector.broadcast %862 : vector<1x8x8xi1> to vector<2x8x8xi1>
    %864 = vector.broadcast %cst_340 : f32 to vector<2x8x8xf32>
    %865 = arith.select %863, %861, %864 : vector<2x8x8xi1>, vector<2x8x8xf32>
    %cst_341 = arith.constant dense<0xFF800000> : vector<2x8xf32>
    %866 = vector.multi_reduction <maximumf>, %865, %cst_341 [2] : vector<2x8x8xf32> to vector<2x8xf32>
    %867 = vector.shape_cast %866 : vector<2x8xf32> to vector<2x8x1xf32>
    %868 = vector.broadcast %867 : vector<2x8x1xf32> to vector<2x8x8xf32>
    %869 = arith.subf %865, %868 : vector<2x8x8xf32>
    %870 = math.exp %869 : vector<2x8x8xf32>
    %cst_342 = arith.constant dense<0.000000e+00> : vector<2x8xf32>
    %871 = vector.multi_reduction <add>, %870, %cst_342 [2] : vector<2x8x8xf32> to vector<2x8xf32>
    %872 = vector.shape_cast %871 : vector<2x8xf32> to vector<2x8x1xf32>
    %873 = tpu.reciprocal %872 {approx = true} : vector<2x8x1xf32> -> vector<2x8x1xf32>
    %874 = vector.broadcast %873 : vector<2x8x1xf32> to vector<2x8x8xf32>
    %875 = arith.mulf %870, %874 : vector<2x8x8xf32>
    %876 = arith.truncf %875 : vector<2x8x8xf32> to vector<2x8x8xbf16>
    "tpu.trace_start"() <{level = 10 : i32, message = "bqk,bkd->bqd"}> : () -> ()
    %cst_343 = arith.constant dense<0.000000e+00> : vector<2x8x8xf32>
    %877 = tpu.matmul %876, %858, %cst_343 {dimension_numbers = #tpu.dot_dimension_numbers<[2], [1], [1], [2], [0, 0, 0, 1, 1, 2], [0], [0]>} : vector<2x8x8xbf16>, vector<2x8x8xbf16>, vector<2x8x8xf32> -> vector<2x8x8xf32>
    "tpu.trace_stop"() : () -> ()
    %878 = vector.shape_cast %877 : vector<2x8x8xf32> to vector<16x8xf32>
    %c0_344 = arith.constant 0 : index
    %c8_345 = arith.constant 8 : index
    %879 = vector.load %arg40[%c0_344, %c8_345] : memref<16x32xf32, #tpu.memory_space<vmem>>, vector<16x8xf32>
    tpu.vector_store %arg40[%c0_344, %c8_345], %878 {strides = array<i32>} : memref<16x32xf32, #tpu.memory_space<vmem>>, vector<16x8xf32>,
    %880 = vector.extract_strided_slice %809 {offsets = [0, 16], sizes = [16, 8], strides = [1, 1]} : vector<16x32xf32> to vector<16x8xf32>
    %881 = vector.shape_cast %880 : vector<16x8xf32> to vector<2x8x8xf32>
    %882 = arith.truncf %881 : vector<2x8x8xf32> to vector<2x8x8xbf16>
    %883 = vector.extract_strided_slice %810 {offsets = [0, 16], sizes = [16, 8], strides = [1, 1]} : vector<16x32xf32> to vector<16x8xf32>
    %884 = vector.shape_cast %883 : vector<16x8xf32> to vector<2x8x8xf32>
    %885 = arith.truncf %884 : vector<2x8x8xf32> to vector<2x8x8xbf16>
    %886 = vector.extract_strided_slice %811 {offsets = [0, 16], sizes = [16, 8], strides = [1, 1]} : vector<16x32xf32> to vector<16x8xf32>
    %887 = vector.shape_cast %886 : vector<16x8xf32> to vector<2x8x8xf32>
    %888 = arith.truncf %887 : vector<2x8x8xf32> to vector<2x8x8xbf16>
    "tpu.trace_start"() <{level = 10 : i32, message = "bqd,bkd->bqk"}> : () -> ()
    %cst_346 = arith.constant dense<0.000000e+00> : vector<2x8x8xf32>
    %889 = tpu.matmul %882, %885, %cst_346 {dimension_numbers = #tpu.dot_dimension_numbers<[2], [2], [1], [1], [0, 0, 0, 1, 1, 1], [0], [0]>} : vector<2x8x8xbf16>, vector<2x8x8xbf16>, vector<2x8x8xf32> -> vector<2x8x8xf32>
    "tpu.trace_stop"() : () -> ()
    %cst_347 = arith.constant 0.353553385 : f32
    %890 = vector.broadcast %cst_347 : f32 to vector<2x8x8xf32>
    %891 = arith.mulf %889, %890 : vector<2x8x8xf32>
    %cst_348 = arith.constant -1.000000e+30 : f32
    %892 = vector.shape_cast %819 : vector<1x8x8xi1> to vector<1x8x8xi1>
    %893 = vector.broadcast %892 : vector<1x8x8xi1> to vector<2x8x8xi1>
    %894 = vector.broadcast %cst_348 : f32 to vector<2x8x8xf32>
    %895 = arith.select %893, %891, %894 : vector<2x8x8xi1>, vector<2x8x8xf32>
    %cst_349 = arith.constant dense<0xFF800000> : vector<2x8xf32>
    %896 = vector.multi_reduction <maximumf>, %895, %cst_349 [2] : vector<2x8x8xf32> to vector<2x8xf32>
    %897 = vector.shape_cast %896 : vector<2x8xf32> to vector<2x8x1xf32>
    %898 = vector.broadcast %897 : vector<2x8x1xf32> to vector<2x8x8xf32>
    %899 = arith.subf %895, %898 : vector<2x8x8xf32>
    %900 = math.exp %899 : vector<2x8x8xf32>
    %cst_350 = arith.constant dense<0.000000e+00> : vector<2x8xf32>
    %901 = vector.multi_reduction <add>, %900, %cst_350 [2] : vector<2x8x8xf32> to vector<2x8xf32>
    %902 = vector.shape_cast %901 : vector<2x8xf32> to vector<2x8x1xf32>
    %903 = tpu.reciprocal %902 {approx = true} : vector<2x8x1xf32> -> vector<2x8x1xf32>
    %904 = vector.broadcast %903 : vector<2x8x1xf32> to vector<2x8x8xf32>
    %905 = arith.mulf %900, %904 : vector<2x8x8xf32>
    %906 = arith.truncf %905 : vector<2x8x8xf32> to vector<2x8x8xbf16>
    "tpu.trace_start"() <{level = 10 : i32, message = "bqk,bkd->bqd"}> : () -> ()
    %cst_351 = arith.constant dense<0.000000e+00> : vector<2x8x8xf32>
    %907 = tpu.matmul %906, %888, %cst_351 {dimension_numbers = #tpu.dot_dimension_numbers<[2], [1], [1], [2], [0, 0, 0, 1, 1, 2], [0], [0]>} : vector<2x8x8xbf16>, vector<2x8x8xbf16>, vector<2x8x8xf32> -> vector<2x8x8xf32>
    "tpu.trace_stop"() : () -> ()
    %908 = vector.shape_cast %907 : vector<2x8x8xf32> to vector<16x8xf32>
    %c0_352 = arith.constant 0 : index
    %c16_353 = arith.constant 16 : index
    %909 = vector.load %arg40[%c0_352, %c16_353] : memref<16x32xf32, #tpu.memory_space<vmem>>, vector<16x8xf32>
    tpu.vector_store %arg40[%c0_352, %c16_353], %908 {strides = array<i32>} : memref<16x32xf32, #tpu.memory_space<vmem>>, vector<16x8xf32>,
    %910 = vector.extract_strided_slice %809 {offsets = [0, 24], sizes = [16, 8], strides = [1, 1]} : vector<16x32xf32> to vector<16x8xf32>
    %911 = vector.shape_cast %910 : vector<16x8xf32> to vector<2x8x8xf32>
    %912 = arith.truncf %911 : vector<2x8x8xf32> to vector<2x8x8xbf16>
    %913 = vector.extract_strided_slice %810 {offsets = [0, 24], sizes = [16, 8], strides = [1, 1]} : vector<16x32xf32> to vector<16x8xf32>
    %914 = vector.shape_cast %913 : vector<16x8xf32> to vector<2x8x8xf32>
    %915 = arith.truncf %914 : vector<2x8x8xf32> to vector<2x8x8xbf16>
    %916 = vector.extract_strided_slice %811 {offsets = [0, 24], sizes = [16, 8], strides = [1, 1]} : vector<16x32xf32> to vector<16x8xf32>
    %917 = vector.shape_cast %916 : vector<16x8xf32> to vector<2x8x8xf32>
    %918 = arith.truncf %917 : vector<2x8x8xf32> to vector<2x8x8xbf16>
    "tpu.trace_start"() <{level = 10 : i32, message = "bqd,bkd->bqk"}> : () -> ()
    %cst_354 = arith.constant dense<0.000000e+00> : vector<2x8x8xf32>
    %919 = tpu.matmul %912, %915, %cst_354 {dimension_numbers = #tpu.dot_dimension_numbers<[2], [2], [1], [1], [0, 0, 0, 1, 1, 1], [0], [0]>} : vector<2x8x8xbf16>, vector<2x8x8xbf16>, vector<2x8x8xf32> -> vector<2x8x8xf32>
    "tpu.trace_stop"() : () -> ()
    %cst_355 = arith.constant 0.353553385 : f32
    %920 = vector.broadcast %cst_355 : f32 to vector<2x8x8xf32>
    %921 = arith.mulf %919, %920 : vector<2x8x8xf32>
    %cst_356 = arith.constant -1.000000e+30 : f32
    %922 = vector.shape_cast %819 : vector<1x8x8xi1> to vector<1x8x8xi1>
    %923 = vector.broadcast %922 : vector<1x8x8xi1> to vector<2x8x8xi1>
    %924 = vector.broadcast %cst_356 : f32 to vector<2x8x8xf32>
    %925 = arith.select %923, %921, %924 : vector<2x8x8xi1>, vector<2x8x8xf32>
    %cst_357 = arith.constant dense<0xFF800000> : vector<2x8xf32>
    %926 = vector.multi_reduction <maximumf>, %925, %cst_357 [2] : vector<2x8x8xf32> to vector<2x8xf32>
    %927 = vector.shape_cast %926 : vector<2x8xf32> to vector<2x8x1xf32>
    %928 = vector.broadcast %927 : vector<2x8x1xf32> to vector<2x8x8xf32>
    %929 = arith.subf %925, %928 : vector<2x8x8xf32>
    %930 = math.exp %929 : vector<2x8x8xf32>
    %cst_358 = arith.constant dense<0.000000e+00> : vector<2x8xf32>
    %931 = vector.multi_reduction <add>, %930, %cst_358 [2] : vector<2x8x8xf32> to vector<2x8xf32>
    %932 = vector.shape_cast %931 : vector<2x8xf32> to vector<2x8x1xf32>
    %933 = tpu.reciprocal %932 {approx = true} : vector<2x8x1xf32> -> vector<2x8x1xf32>
    %934 = vector.broadcast %933 : vector<2x8x1xf32> to vector<2x8x8xf32>
    %935 = arith.mulf %930, %934 : vector<2x8x8xf32>
    %936 = arith.truncf %935 : vector<2x8x8xf32> to vector<2x8x8xbf16>
    "tpu.trace_start"() <{level = 10 : i32, message = "bqk,bkd->bqd"}> : () -> ()
    %cst_359 = arith.constant dense<0.000000e+00> : vector<2x8x8xf32>
    %937 = tpu.matmul %936, %918, %cst_359 {dimension_numbers = #tpu.dot_dimension_numbers<[2], [1], [1], [2], [0, 0, 0, 1, 1, 2], [0], [0]>} : vector<2x8x8xbf16>, vector<2x8x8xbf16>, vector<2x8x8xf32> -> vector<2x8x8xf32>
    "tpu.trace_stop"() : () -> ()
    %938 = vector.shape_cast %937 : vector<2x8x8xf32> to vector<16x8xf32>
    %c0_360 = arith.constant 0 : index
    %c24_361 = arith.constant 24 : index
    %939 = vector.load %arg40[%c0_360, %c24_361] : memref<16x32xf32, #tpu.memory_space<vmem>>, vector<16x8xf32>
    tpu.vector_store %arg40[%c0_360, %c24_361], %938 {strides = array<i32>} : memref<16x32xf32, #tpu.memory_space<vmem>>, vector<16x8xf32>,
    %c0_362 = arith.constant 0 : index
    %c0_363 = arith.constant 0 : index
    %940 = vector.load %arg40[%c0_362, %c0_363] : memref<16x32xf32, #tpu.memory_space<vmem>>, vector<16x32xf32>
    %941 = arith.truncf %940 : vector<16x32xf32> to vector<16x32xbf16>
    %cst_364 = arith.constant dense<0.000000e+00> : vector<16x32xf32>
    %942 = tpu.matmul %941, %813, %cst_364 {dimension_numbers = #tpu.dot_dimension_numbers<[1], [0], [0], [1], [0, 0, 1, 1], [], []>} : vector<16x32xbf16>, vector<32x32xbf16>, vector<16x32xf32> -> vector<16x32xf32>
    %943 = vector.broadcast %815 : vector<1x32xf32> to vector<16x32xf32>
    %944 = arith.addf %942, %943 : vector<16x32xf32>
    %945 = arith.addf %800, %944 : vector<16x32xf32>
    %c1_365 = arith.constant 1 : index
    %c0_366 = arith.constant 0 : index
    %c0_367 = arith.constant 0 : index
    %946 = vector.load %arg27[%c1_365, %c0_366, %c0_367] : memref<2x1x32xf32, #tpu.memory_space<vmem>>, vector<1x1x32xf32>
    %947 = vector.shape_cast %946 : vector<1x1x32xf32> to vector<1x32xf32>
    %c1_368 = arith.constant 1 : index
    %c0_369 = arith.constant 0 : index
    %c0_370 = arith.constant 0 : index
    %948 = vector.load %arg26[%c1_368, %c0_369, %c0_370] : memref<2x1x32xf32, #tpu.memory_space<vmem>>, vector<1x1x32xf32>
    %949 = vector.shape_cast %948 : vector<1x1x32xf32> to vector<1x32xf32>
    %cst_371 = arith.constant dense<0.000000e+00> : vector<16xf32>
    %950 = vector.multi_reduction <add>, %945, %cst_371 [1] : vector<16x32xf32> to vector<16xf32>
    %951 = vector.shape_cast %950 : vector<16xf32> to vector<16x1xf32>
    %cst_372 = arith.constant 3.200000e+01 : f32
    %952 = vector.broadcast %cst_372 : f32 to vector<16x1xf32>
    %953 = arith.divf %951, %952 : vector<16x1xf32>
    %954 = vector.broadcast %953 : vector<16x1xf32> to vector<16x32xf32>
    %955 = arith.subf %945, %954 : vector<16x32xf32>
    %956 = arith.mulf %955, %955 : vector<16x32xf32>
    %cst_373 = arith.constant dense<0.000000e+00> : vector<16xf32>
    %957 = vector.multi_reduction <add>, %956, %cst_373 [1] : vector<16x32xf32> to vector<16xf32>
    %958 = vector.shape_cast %957 : vector<16xf32> to vector<16x1xf32>
    %cst_374 = arith.constant 3.200000e+01 : f32
    %959 = vector.broadcast %cst_374 : f32 to vector<16x1xf32>
    %960 = arith.divf %958, %959 : vector<16x1xf32>
    %961 = vector.broadcast %953 : vector<16x1xf32> to vector<16x32xf32>
    %962 = arith.subf %945, %961 : vector<16x32xf32>
    %cst_375 = arith.constant 9.99999974E-6 : f32
    %963 = vector.broadcast %cst_375 : f32 to vector<16x1xf32>
    %964 = arith.addf %960, %963 : vector<16x1xf32>
    %965 = math.rsqrt %964 : vector<16x1xf32>
    %966 = vector.broadcast %965 : vector<16x1xf32> to vector<16x32xf32>
    %967 = arith.mulf %962, %966 : vector<16x32xf32>
    %968 = vector.broadcast %947 : vector<1x32xf32> to vector<16x32xf32>
    %969 = arith.mulf %967, %968 : vector<16x32xf32>
    %970 = vector.broadcast %949 : vector<1x32xf32> to vector<16x32xf32>
    %971 = arith.addf %969, %970 : vector<16x32xf32>
    %c1_376 = arith.constant 1 : index
    %c0_377 = arith.constant 0 : index
    %c0_378 = arith.constant 0 : index
    %972 = vector.load %arg25[%c1_376, %c0_377, %c0_378] : memref<2x32x32xbf16, #tpu.memory_space<vmem>>, vector<1x32x32xbf16>
    %973 = vector.shape_cast %972 : vector<1x32x32xbf16> to vector<32x32xbf16>
    %974 = arith.truncf %971 : vector<16x32xf32> to vector<16x32xbf16>
    %cst_379 = arith.constant dense<0.000000e+00> : vector<16x32xf32>
    %975 = tpu.matmul %974, %973, %cst_379 {dimension_numbers = #tpu.dot_dimension_numbers<[1], [0], [0], [1], [0, 0, 1, 1], [], []>} : vector<16x32xbf16>, vector<32x32xbf16>, vector<16x32xf32> -> vector<16x32xf32>
    %c1_380 = arith.constant 1 : index
    %c0_381 = arith.constant 0 : index
    %c0_382 = arith.constant 0 : index
    %976 = vector.load %arg23[%c1_380, %c0_381, %c0_382] : memref<2x1x32xf32, #tpu.memory_space<vmem>>, vector<1x1x32xf32>
    %977 = vector.shape_cast %976 : vector<1x1x32xf32> to vector<1x32xf32>
    %978 = vector.broadcast %977 : vector<1x32xf32> to vector<16x32xf32>
    %979 = arith.addf %975, %978 : vector<16x32xf32>
    %c1_383 = arith.constant 1 : index
    %c0_384 = arith.constant 0 : index
    %c0_385 = arith.constant 0 : index
    %980 = vector.load %arg24[%c1_383, %c0_384, %c0_385] : memref<2x32x128xbf16, #tpu.memory_space<vmem>>, vector<1x32x128xbf16>
    %981 = vector.shape_cast %980 : vector<1x32x128xbf16> to vector<32x128xbf16>
    %cst_386 = arith.constant dense<0.000000e+00> : vector<16x128xf32>
    %982 = tpu.matmul %410, %981, %cst_386 {dimension_numbers = #tpu.dot_dimension_numbers<[1], [0], [0], [1], [0, 0, 1, 1], [], []>} : vector<16x32xbf16>, vector<32x128xbf16>, vector<16x128xf32> -> vector<16x128xf32>
    %c1_387 = arith.constant 1 : index
    %c0_388 = arith.constant 0 : index
    %c0_389 = arith.constant 0 : index
    %983 = vector.load %arg22[%c1_387, %c0_388, %c0_389] : memref<2x1x128xf32, #tpu.memory_space<vmem>>, vector<1x1x128xf32>
    %984 = vector.shape_cast %983 : vector<1x1x128xf32> to vector<1x128xf32>
    %985 = vector.broadcast %984 : vector<1x128xf32> to vector<16x128xf32>
    %986 = arith.addf %982, %985 : vector<16x128xf32>
    %987 = vector.extract_strided_slice %986 {offsets = [0, 0], sizes = [16, 32], strides = [1, 1]} : vector<16x128xf32> to vector<16x32xf32>
    %988 = vector.extract_strided_slice %986 {offsets = [0, 32], sizes = [16, 32], strides = [1, 1]} : vector<16x128xf32> to vector<16x32xf32>
    %c1_390 = arith.constant 1 : index
    %c0_391 = arith.constant 0 : index
    %c0_392 = arith.constant 0 : index
    %989 = vector.load %arg35[%c1_390, %c0_391, %c0_392] : memref<2x32x32xbf16, #tpu.memory_space<vmem>>, vector<1x32x32xbf16>
    %990 = vector.shape_cast %989 : vector<1x32x32xbf16> to vector<32x32xbf16>
    %c1_393 = arith.constant 1 : index
    %c0_394 = arith.constant 0 : index
    %c0_395 = arith.constant 0 : index
    %991 = vector.load %arg20[%c1_393, %c0_394, %c0_395] : memref<2x1x32xf32, #tpu.memory_space<vmem>>, vector<1x1x32xf32>
    %992 = vector.shape_cast %991 : vector<1x1x32xf32> to vector<1x32xf32>
    %993 = vector.extract_strided_slice %979 {offsets = [0, 0], sizes = [16, 8], strides = [1, 1]} : vector<16x32xf32> to vector<16x8xf32>
    %994 = vector.shape_cast %993 : vector<16x8xf32> to vector<2x8x8xf32>
    %995 = arith.truncf %994 : vector<2x8x8xf32> to vector<2x8x8xbf16>
    %996 = vector.extract_strided_slice %987 {offsets = [0, 0], sizes = [16, 8], strides = [1, 1]} : vector<16x32xf32> to vector<16x8xf32>
    %997 = vector.shape_cast %996 : vector<16x8xf32> to vector<2x8x8xf32>
    %998 = arith.truncf %997 : vector<2x8x8xf32> to vector<2x8x8xbf16>
    %999 = vector.extract_strided_slice %988 {offsets = [0, 0], sizes = [16, 8], strides = [1, 1]} : vector<16x32xf32> to vector<16x8xf32>
    %1000 = vector.shape_cast %999 : vector<16x8xf32> to vector<2x8x8xf32>
    %1001 = arith.truncf %1000 : vector<2x8x8xf32> to vector<2x8x8xbf16>
    "tpu.trace_start"() <{level = 10 : i32, message = "bqd,bkd->bqk"}> : () -> ()
    %cst_396 = arith.constant dense<0.000000e+00> : vector<2x8x8xf32>
    %1002 = tpu.matmul %995, %998, %cst_396 {dimension_numbers = #tpu.dot_dimension_numbers<[2], [2], [1], [1], [0, 0, 0, 1, 1, 1], [0], [0]>} : vector<2x8x8xbf16>, vector<2x8x8xbf16>, vector<2x8x8xf32> -> vector<2x8x8xf32>
    "tpu.trace_stop"() : () -> ()
    %cst_397 = arith.constant 0.353553385 : f32
    %1003 = vector.broadcast %cst_397 : f32 to vector<2x8x8xf32>
    %1004 = arith.mulf %1002, %1003 : vector<2x8x8xf32>
    %cst_398 = arith.constant dense<0xFF800000> : vector<2x8xf32>
    %1005 = vector.multi_reduction <maximumf>, %1004, %cst_398 [2] : vector<2x8x8xf32> to vector<2x8xf32>
    %1006 = vector.shape_cast %1005 : vector<2x8xf32> to vector<2x8x1xf32>
    %1007 = vector.broadcast %1006 : vector<2x8x1xf32> to vector<2x8x8xf32>
    %1008 = arith.subf %1004, %1007 : vector<2x8x8xf32>
    %1009 = math.exp %1008 : vector<2x8x8xf32>
    %cst_399 = arith.constant dense<0.000000e+00> : vector<2x8xf32>
    %1010 = vector.multi_reduction <add>, %1009, %cst_399 [2] : vector<2x8x8xf32> to vector<2x8xf32>
    %1011 = vector.shape_cast %1010 : vector<2x8xf32> to vector<2x8x1xf32>
    %1012 = tpu.reciprocal %1011 {approx = true} : vector<2x8x1xf32> -> vector<2x8x1xf32>
    %1013 = vector.broadcast %1012 : vector<2x8x1xf32> to vector<2x8x8xf32>
    %1014 = arith.mulf %1009, %1013 : vector<2x8x8xf32>
    %1015 = arith.truncf %1014 : vector<2x8x8xf32> to vector<2x8x8xbf16>
    "tpu.trace_start"() <{level = 10 : i32, message = "bqk,bkd->bqd"}> : () -> ()
    %cst_400 = arith.constant dense<0.000000e+00> : vector<2x8x8xf32>
    %1016 = tpu.matmul %1015, %1001, %cst_400 {dimension_numbers = #tpu.dot_dimension_numbers<[2], [1], [1], [2], [0, 0, 0, 1, 1, 2], [0], [0]>} : vector<2x8x8xbf16>, vector<2x8x8xbf16>, vector<2x8x8xf32> -> vector<2x8x8xf32>
    "tpu.trace_stop"() : () -> ()
    %1017 = vector.shape_cast %1016 : vector<2x8x8xf32> to vector<16x8xf32>
    %c0_401 = arith.constant 0 : index
    %c0_402 = arith.constant 0 : index
    %1018 = vector.load %arg40[%c0_401, %c0_402] : memref<16x32xf32, #tpu.memory_space<vmem>>, vector<16x8xf32>
    tpu.vector_store %arg40[%c0_401, %c0_402], %1017 {strides = array<i32>} : memref<16x32xf32, #tpu.memory_space<vmem>>, vector<16x8xf32>,
    %1019 = vector.extract_strided_slice %979 {offsets = [0, 8], sizes = [16, 8], strides = [1, 1]} : vector<16x32xf32> to vector<16x8xf32>
    %1020 = vector.shape_cast %1019 : vector<16x8xf32> to vector<2x8x8xf32>
    %1021 = arith.truncf %1020 : vector<2x8x8xf32> to vector<2x8x8xbf16>
    %1022 = vector.extract_strided_slice %987 {offsets = [0, 8], sizes = [16, 8], strides = [1, 1]} : vector<16x32xf32> to vector<16x8xf32>
    %1023 = vector.shape_cast %1022 : vector<16x8xf32> to vector<2x8x8xf32>
    %1024 = arith.truncf %1023 : vector<2x8x8xf32> to vector<2x8x8xbf16>
    %1025 = vector.extract_strided_slice %988 {offsets = [0, 8], sizes = [16, 8], strides = [1, 1]} : vector<16x32xf32> to vector<16x8xf32>
    %1026 = vector.shape_cast %1025 : vector<16x8xf32> to vector<2x8x8xf32>
    %1027 = arith.truncf %1026 : vector<2x8x8xf32> to vector<2x8x8xbf16>
    "tpu.trace_start"() <{level = 10 : i32, message = "bqd,bkd->bqk"}> : () -> ()
    %cst_403 = arith.constant dense<0.000000e+00> : vector<2x8x8xf32>
    %1028 = tpu.matmul %1021, %1024, %cst_403 {dimension_numbers = #tpu.dot_dimension_numbers<[2], [2], [1], [1], [0, 0, 0, 1, 1, 1], [0], [0]>} : vector<2x8x8xbf16>, vector<2x8x8xbf16>, vector<2x8x8xf32> -> vector<2x8x8xf32>
    "tpu.trace_stop"() : () -> ()
    %cst_404 = arith.constant 0.353553385 : f32
    %1029 = vector.broadcast %cst_404 : f32 to vector<2x8x8xf32>
    %1030 = arith.mulf %1028, %1029 : vector<2x8x8xf32>
    %cst_405 = arith.constant dense<0xFF800000> : vector<2x8xf32>
    %1031 = vector.multi_reduction <maximumf>, %1030, %cst_405 [2] : vector<2x8x8xf32> to vector<2x8xf32>
    %1032 = vector.shape_cast %1031 : vector<2x8xf32> to vector<2x8x1xf32>
    %1033 = vector.broadcast %1032 : vector<2x8x1xf32> to vector<2x8x8xf32>
    %1034 = arith.subf %1030, %1033 : vector<2x8x8xf32>
    %1035 = math.exp %1034 : vector<2x8x8xf32>
    %cst_406 = arith.constant dense<0.000000e+00> : vector<2x8xf32>
    %1036 = vector.multi_reduction <add>, %1035, %cst_406 [2] : vector<2x8x8xf32> to vector<2x8xf32>
    %1037 = vector.shape_cast %1036 : vector<2x8xf32> to vector<2x8x1xf32>
    %1038 = tpu.reciprocal %1037 {approx = true} : vector<2x8x1xf32> -> vector<2x8x1xf32>
    %1039 = vector.broadcast %1038 : vector<2x8x1xf32> to vector<2x8x8xf32>
    %1040 = arith.mulf %1035, %1039 : vector<2x8x8xf32>
    %1041 = arith.truncf %1040 : vector<2x8x8xf32> to vector<2x8x8xbf16>
    "tpu.trace_start"() <{level = 10 : i32, message = "bqk,bkd->bqd"}> : () -> ()
    %cst_407 = arith.constant dense<0.000000e+00> : vector<2x8x8xf32>
    %1042 = tpu.matmul %1041, %1027, %cst_407 {dimension_numbers = #tpu.dot_dimension_numbers<[2], [1], [1], [2], [0, 0, 0, 1, 1, 2], [0], [0]>} : vector<2x8x8xbf16>, vector<2x8x8xbf16>, vector<2x8x8xf32> -> vector<2x8x8xf32>
    "tpu.trace_stop"() : () -> ()
    %1043 = vector.shape_cast %1042 : vector<2x8x8xf32> to vector<16x8xf32>
    %c0_408 = arith.constant 0 : index
    %c8_409 = arith.constant 8 : index
    %1044 = vector.load %arg40[%c0_408, %c8_409] : memref<16x32xf32, #tpu.memory_space<vmem>>, vector<16x8xf32>
    tpu.vector_store %arg40[%c0_408, %c8_409], %1043 {strides = array<i32>} : memref<16x32xf32, #tpu.memory_space<vmem>>, vector<16x8xf32>,
    %1045 = vector.extract_strided_slice %979 {offsets = [0, 16], sizes = [16, 8], strides = [1, 1]} : vector<16x32xf32> to vector<16x8xf32>
    %1046 = vector.shape_cast %1045 : vector<16x8xf32> to vector<2x8x8xf32>
    %1047 = arith.truncf %1046 : vector<2x8x8xf32> to vector<2x8x8xbf16>
    %1048 = vector.extract_strided_slice %987 {offsets = [0, 16], sizes = [16, 8], strides = [1, 1]} : vector<16x32xf32> to vector<16x8xf32>
    %1049 = vector.shape_cast %1048 : vector<16x8xf32> to vector<2x8x8xf32>
    %1050 = arith.truncf %1049 : vector<2x8x8xf32> to vector<2x8x8xbf16>
    %1051 = vector.extract_strided_slice %988 {offsets = [0, 16], sizes = [16, 8], strides = [1, 1]} : vector<16x32xf32> to vector<16x8xf32>
    %1052 = vector.shape_cast %1051 : vector<16x8xf32> to vector<2x8x8xf32>
    %1053 = arith.truncf %1052 : vector<2x8x8xf32> to vector<2x8x8xbf16>
    "tpu.trace_start"() <{level = 10 : i32, message = "bqd,bkd->bqk"}> : () -> ()
    %cst_410 = arith.constant dense<0.000000e+00> : vector<2x8x8xf32>
    %1054 = tpu.matmul %1047, %1050, %cst_410 {dimension_numbers = #tpu.dot_dimension_numbers<[2], [2], [1], [1], [0, 0, 0, 1, 1, 1], [0], [0]>} : vector<2x8x8xbf16>, vector<2x8x8xbf16>, vector<2x8x8xf32> -> vector<2x8x8xf32>
    "tpu.trace_stop"() : () -> ()
    %cst_411 = arith.constant 0.353553385 : f32
    %1055 = vector.broadcast %cst_411 : f32 to vector<2x8x8xf32>
    %1056 = arith.mulf %1054, %1055 : vector<2x8x8xf32>
    %cst_412 = arith.constant dense<0xFF800000> : vector<2x8xf32>
    %1057 = vector.multi_reduction <maximumf>, %1056, %cst_412 [2] : vector<2x8x8xf32> to vector<2x8xf32>
    %1058 = vector.shape_cast %1057 : vector<2x8xf32> to vector<2x8x1xf32>
    %1059 = vector.broadcast %1058 : vector<2x8x1xf32> to vector<2x8x8xf32>
    %1060 = arith.subf %1056, %1059 : vector<2x8x8xf32>
    %1061 = math.exp %1060 : vector<2x8x8xf32>
    %cst_413 = arith.constant dense<0.000000e+00> : vector<2x8xf32>
    %1062 = vector.multi_reduction <add>, %1061, %cst_413 [2] : vector<2x8x8xf32> to vector<2x8xf32>
    %1063 = vector.shape_cast %1062 : vector<2x8xf32> to vector<2x8x1xf32>
    %1064 = tpu.reciprocal %1063 {approx = true} : vector<2x8x1xf32> -> vector<2x8x1xf32>
    %1065 = vector.broadcast %1064 : vector<2x8x1xf32> to vector<2x8x8xf32>
    %1066 = arith.mulf %1061, %1065 : vector<2x8x8xf32>
    %1067 = arith.truncf %1066 : vector<2x8x8xf32> to vector<2x8x8xbf16>
    "tpu.trace_start"() <{level = 10 : i32, message = "bqk,bkd->bqd"}> : () -> ()
    %cst_414 = arith.constant dense<0.000000e+00> : vector<2x8x8xf32>
    %1068 = tpu.matmul %1067, %1053, %cst_414 {dimension_numbers = #tpu.dot_dimension_numbers<[2], [1], [1], [2], [0, 0, 0, 1, 1, 2], [0], [0]>} : vector<2x8x8xbf16>, vector<2x8x8xbf16>, vector<2x8x8xf32> -> vector<2x8x8xf32>
    "tpu.trace_stop"() : () -> ()
    %1069 = vector.shape_cast %1068 : vector<2x8x8xf32> to vector<16x8xf32>
    %c0_415 = arith.constant 0 : index
    %c16_416 = arith.constant 16 : index
    %1070 = vector.load %arg40[%c0_415, %c16_416] : memref<16x32xf32, #tpu.memory_space<vmem>>, vector<16x8xf32>
    tpu.vector_store %arg40[%c0_415, %c16_416], %1069 {strides = array<i32>} : memref<16x32xf32, #tpu.memory_space<vmem>>, vector<16x8xf32>,
    %1071 = vector.extract_strided_slice %979 {offsets = [0, 24], sizes = [16, 8], strides = [1, 1]} : vector<16x32xf32> to vector<16x8xf32>
    %1072 = vector.shape_cast %1071 : vector<16x8xf32> to vector<2x8x8xf32>
    %1073 = arith.truncf %1072 : vector<2x8x8xf32> to vector<2x8x8xbf16>
    %1074 = vector.extract_strided_slice %987 {offsets = [0, 24], sizes = [16, 8], strides = [1, 1]} : vector<16x32xf32> to vector<16x8xf32>
    %1075 = vector.shape_cast %1074 : vector<16x8xf32> to vector<2x8x8xf32>
    %1076 = arith.truncf %1075 : vector<2x8x8xf32> to vector<2x8x8xbf16>
    %1077 = vector.extract_strided_slice %988 {offsets = [0, 24], sizes = [16, 8], strides = [1, 1]} : vector<16x32xf32> to vector<16x8xf32>
    %1078 = vector.shape_cast %1077 : vector<16x8xf32> to vector<2x8x8xf32>
    %1079 = arith.truncf %1078 : vector<2x8x8xf32> to vector<2x8x8xbf16>
    "tpu.trace_start"() <{level = 10 : i32, message = "bqd,bkd->bqk"}> : () -> ()
    %cst_417 = arith.constant dense<0.000000e+00> : vector<2x8x8xf32>
    %1080 = tpu.matmul %1073, %1076, %cst_417 {dimension_numbers = #tpu.dot_dimension_numbers<[2], [2], [1], [1], [0, 0, 0, 1, 1, 1], [0], [0]>} : vector<2x8x8xbf16>, vector<2x8x8xbf16>, vector<2x8x8xf32> -> vector<2x8x8xf32>
    "tpu.trace_stop"() : () -> ()
    %cst_418 = arith.constant 0.353553385 : f32
    %1081 = vector.broadcast %cst_418 : f32 to vector<2x8x8xf32>
    %1082 = arith.mulf %1080, %1081 : vector<2x8x8xf32>
    %cst_419 = arith.constant dense<0xFF800000> : vector<2x8xf32>
    %1083 = vector.multi_reduction <maximumf>, %1082, %cst_419 [2] : vector<2x8x8xf32> to vector<2x8xf32>
    %1084 = vector.shape_cast %1083 : vector<2x8xf32> to vector<2x8x1xf32>
    %1085 = vector.broadcast %1084 : vector<2x8x1xf32> to vector<2x8x8xf32>
    %1086 = arith.subf %1082, %1085 : vector<2x8x8xf32>
    %1087 = math.exp %1086 : vector<2x8x8xf32>
    %cst_420 = arith.constant dense<0.000000e+00> : vector<2x8xf32>
    %1088 = vector.multi_reduction <add>, %1087, %cst_420 [2] : vector<2x8x8xf32> to vector<2x8xf32>
    %1089 = vector.shape_cast %1088 : vector<2x8xf32> to vector<2x8x1xf32>
    %1090 = tpu.reciprocal %1089 {approx = true} : vector<2x8x1xf32> -> vector<2x8x1xf32>
    %1091 = vector.broadcast %1090 : vector<2x8x1xf32> to vector<2x8x8xf32>
    %1092 = arith.mulf %1087, %1091 : vector<2x8x8xf32>
    %1093 = arith.truncf %1092 : vector<2x8x8xf32> to vector<2x8x8xbf16>
    "tpu.trace_start"() <{level = 10 : i32, message = "bqk,bkd->bqd"}> : () -> ()
    %cst_421 = arith.constant dense<0.000000e+00> : vector<2x8x8xf32>
    %1094 = tpu.matmul %1093, %1079, %cst_421 {dimension_numbers = #tpu.dot_dimension_numbers<[2], [1], [1], [2], [0, 0, 0, 1, 1, 2], [0], [0]>} : vector<2x8x8xbf16>, vector<2x8x8xbf16>, vector<2x8x8xf32> -> vector<2x8x8xf32>
    "tpu.trace_stop"() : () -> ()
    %1095 = vector.shape_cast %1094 : vector<2x8x8xf32> to vector<16x8xf32>
    %c0_422 = arith.constant 0 : index
    %c24_423 = arith.constant 24 : index
    %1096 = vector.load %arg40[%c0_422, %c24_423] : memref<16x32xf32, #tpu.memory_space<vmem>>, vector<16x8xf32>
    tpu.vector_store %arg40[%c0_422, %c24_423], %1095 {strides = array<i32>} : memref<16x32xf32, #tpu.memory_space<vmem>>, vector<16x8xf32>,
    %c0_424 = arith.constant 0 : index
    %c0_425 = arith.constant 0 : index
    %1097 = vector.load %arg40[%c0_424, %c0_425] : memref<16x32xf32, #tpu.memory_space<vmem>>, vector<16x32xf32>
    %1098 = arith.truncf %1097 : vector<16x32xf32> to vector<16x32xbf16>
    %cst_426 = arith.constant dense<0.000000e+00> : vector<16x32xf32>
    %1099 = tpu.matmul %1098, %990, %cst_426 {dimension_numbers = #tpu.dot_dimension_numbers<[1], [0], [0], [1], [0, 0, 1, 1], [], []>} : vector<16x32xbf16>, vector<32x32xbf16>, vector<16x32xf32> -> vector<16x32xf32>
    %1100 = vector.broadcast %992 : vector<1x32xf32> to vector<16x32xf32>
    %1101 = arith.addf %1099, %1100 : vector<16x32xf32>
    %1102 = arith.addf %971, %1101 : vector<16x32xf32>
    %c1_427 = arith.constant 1 : index
    %c0_428 = arith.constant 0 : index
    %c0_429 = arith.constant 0 : index
    %1103 = vector.load %arg29[%c1_427, %c0_428, %c0_429] : memref<2x1x32xf32, #tpu.memory_space<vmem>>, vector<1x1x32xf32>
    %1104 = vector.shape_cast %1103 : vector<1x1x32xf32> to vector<1x32xf32>
    %c1_430 = arith.constant 1 : index
    %c0_431 = arith.constant 0 : index
    %c0_432 = arith.constant 0 : index
    %1105 = vector.load %arg28[%c1_430, %c0_431, %c0_432] : memref<2x1x32xf32, #tpu.memory_space<vmem>>, vector<1x1x32xf32>
    %1106 = vector.shape_cast %1105 : vector<1x1x32xf32> to vector<1x32xf32>
    %cst_433 = arith.constant dense<0.000000e+00> : vector<16xf32>
    %1107 = vector.multi_reduction <add>, %1102, %cst_433 [1] : vector<16x32xf32> to vector<16xf32>
    %1108 = vector.shape_cast %1107 : vector<16xf32> to vector<16x1xf32>
    %cst_434 = arith.constant 3.200000e+01 : f32
    %1109 = vector.broadcast %cst_434 : f32 to vector<16x1xf32>
    %1110 = arith.divf %1108, %1109 : vector<16x1xf32>
    %1111 = vector.broadcast %1110 : vector<16x1xf32> to vector<16x32xf32>
    %1112 = arith.subf %1102, %1111 : vector<16x32xf32>
    %1113 = arith.mulf %1112, %1112 : vector<16x32xf32>
    %cst_435 = arith.constant dense<0.000000e+00> : vector<16xf32>
    %1114 = vector.multi_reduction <add>, %1113, %cst_435 [1] : vector<16x32xf32> to vector<16xf32>
    %1115 = vector.shape_cast %1114 : vector<16xf32> to vector<16x1xf32>
    %cst_436 = arith.constant 3.200000e+01 : f32
    %1116 = vector.broadcast %cst_436 : f32 to vector<16x1xf32>
    %1117 = arith.divf %1115, %1116 : vector<16x1xf32>
    %1118 = vector.broadcast %1110 : vector<16x1xf32> to vector<16x32xf32>
    %1119 = arith.subf %1102, %1118 : vector<16x32xf32>
    %cst_437 = arith.constant 9.99999974E-6 : f32
    %1120 = vector.broadcast %cst_437 : f32 to vector<16x1xf32>
    %1121 = arith.addf %1117, %1120 : vector<16x1xf32>
    %1122 = math.rsqrt %1121 : vector<16x1xf32>
    %1123 = vector.broadcast %1122 : vector<16x1xf32> to vector<16x32xf32>
    %1124 = arith.mulf %1119, %1123 : vector<16x32xf32>
    %1125 = vector.broadcast %1104 : vector<1x32xf32> to vector<16x32xf32>
    %1126 = arith.mulf %1124, %1125 : vector<16x32xf32>
    %1127 = vector.broadcast %1106 : vector<1x32xf32> to vector<16x32xf32>
    %1128 = arith.addf %1126, %1127 : vector<16x32xf32>
    %c1_438 = arith.constant 1 : index
    %c0_439 = arith.constant 0 : index
    %c0_440 = arith.constant 0 : index
    %1129 = vector.load %arg32[%c1_438, %c0_439, %c0_440] : memref<2x32x64xbf16, #tpu.memory_space<vmem>>, vector<1x32x64xbf16>
    %1130 = vector.shape_cast %1129 : vector<1x32x64xbf16> to vector<32x64xbf16>
    %c1_441 = arith.constant 1 : index
    %c0_442 = arith.constant 0 : index
    %c0_443 = arith.constant 0 : index
    %1131 = vector.load %arg17[%c1_441, %c0_442, %c0_443] : memref<2x1x64xf32, #tpu.memory_space<vmem>>, vector<1x1x64xf32>
    %1132 = vector.shape_cast %1131 : vector<1x1x64xf32> to vector<1x64xf32>
    %c1_444 = arith.constant 1 : index
    %c0_445 = arith.constant 0 : index
    %c0_446 = arith.constant 0 : index
    %1133 = vector.load %arg33[%c1_444, %c0_445, %c0_446] : memref<2x64x32xbf16, #tpu.memory_space<vmem>>, vector<1x64x32xbf16>
    %1134 = vector.shape_cast %1133 : vector<1x64x32xbf16> to vector<64x32xbf16>
    %c1_447 = arith.constant 1 : index
    %c0_448 = arith.constant 0 : index
    %c0_449 = arith.constant 0 : index
    %1135 = vector.load %arg18[%c1_447, %c0_448, %c0_449] : memref<2x1x32xf32, #tpu.memory_space<vmem>>, vector<1x1x32xf32>
    %1136 = vector.shape_cast %1135 : vector<1x1x32xf32> to vector<1x32xf32>
    %1137 = arith.truncf %1128 : vector<16x32xf32> to vector<16x32xbf16>
    %cst_450 = arith.constant dense<0.000000e+00> : vector<16x64xf32>
    %1138 = tpu.matmul %1137, %1130, %cst_450 {dimension_numbers = #tpu.dot_dimension_numbers<[1], [0], [0], [1], [0, 0, 1, 1], [], []>} : vector<16x32xbf16>, vector<32x64xbf16>, vector<16x64xf32> -> vector<16x64xf32>
    %1139 = vector.broadcast %1132 : vector<1x64xf32> to vector<16x64xf32>
    %1140 = arith.addf %1138, %1139 : vector<16x64xf32>
    %cst_451 = arith.constant 0.000000e+00 : f32
    %1141 = vector.broadcast %cst_451 : f32 to vector<16x64xf32>
    %1142 = arith.maximumf %1140, %1141 : vector<16x64xf32>
    %1143 = arith.truncf %1142 : vector<16x64xf32> to vector<16x64xbf16>
    %cst_452 = arith.constant dense<0.000000e+00> : vector<16x32xf32>
    %1144 = tpu.matmul %1143, %1134, %cst_452 {dimension_numbers = #tpu.dot_dimension_numbers<[1], [0], [0], [1], [0, 0, 1, 1], [], []>} : vector<16x64xbf16>, vector<64x32xbf16>, vector<16x32xf32> -> vector<16x32xf32>
    %1145 = vector.broadcast %1136 : vector<1x32xf32> to vector<16x32xf32>
    %1146 = arith.addf %1144, %1145 : vector<16x32xf32>
    %1147 = arith.addf %1128, %1146 : vector<16x32xf32>
    %c1_453 = arith.constant 1 : index
    %c0_454 = arith.constant 0 : index
    %c0_455 = arith.constant 0 : index
    %1148 = vector.load %arg31[%c1_453, %c0_454, %c0_455] : memref<2x1x32xf32, #tpu.memory_space<vmem>>, vector<1x1x32xf32>
    %1149 = vector.shape_cast %1148 : vector<1x1x32xf32> to vector<1x32xf32>
    %c1_456 = arith.constant 1 : index
    %c0_457 = arith.constant 0 : index
    %c0_458 = arith.constant 0 : index
    %1150 = vector.load %arg30[%c1_456, %c0_457, %c0_458] : memref<2x1x32xf32, #tpu.memory_space<vmem>>, vector<1x1x32xf32>
    %1151 = vector.shape_cast %1150 : vector<1x1x32xf32> to vector<1x32xf32>
    %cst_459 = arith.constant dense<0.000000e+00> : vector<16xf32>
    %1152 = vector.multi_reduction <add>, %1147, %cst_459 [1] : vector<16x32xf32> to vector<16xf32>
    %1153 = vector.shape_cast %1152 : vector<16xf32> to vector<16x1xf32>
    %cst_460 = arith.constant 3.200000e+01 : f32
    %1154 = vector.broadcast %cst_460 : f32 to vector<16x1xf32>
    %1155 = arith.divf %1153, %1154 : vector<16x1xf32>
    %1156 = vector.broadcast %1155 : vector<16x1xf32> to vector<16x32xf32>
    %1157 = arith.subf %1147, %1156 : vector<16x32xf32>
    %1158 = arith.mulf %1157, %1157 : vector<16x32xf32>
    %cst_461 = arith.constant dense<0.000000e+00> : vector<16xf32>
    %1159 = vector.multi_reduction <add>, %1158, %cst_461 [1] : vector<16x32xf32> to vector<16xf32>
    %1160 = vector.shape_cast %1159 : vector<16xf32> to vector<16x1xf32>
    %cst_462 = arith.constant 3.200000e+01 : f32
    %1161 = vector.broadcast %cst_462 : f32 to vector<16x1xf32>
    %1162 = arith.divf %1160, %1161 : vector<16x1xf32>
    %1163 = vector.broadcast %1155 : vector<16x1xf32> to vector<16x32xf32>
    %1164 = arith.subf %1147, %1163 : vector<16x32xf32>
    %cst_463 = arith.constant 9.99999974E-6 : f32
    %1165 = vector.broadcast %cst_463 : f32 to vector<16x1xf32>
    %1166 = arith.addf %1162, %1165 : vector<16x1xf32>
    %1167 = math.rsqrt %1166 : vector<16x1xf32>
    %1168 = vector.broadcast %1167 : vector<16x1xf32> to vector<16x32xf32>
    %1169 = arith.mulf %1164, %1168 : vector<16x32xf32>
    %1170 = vector.broadcast %1149 : vector<1x32xf32> to vector<16x32xf32>
    %1171 = arith.mulf %1169, %1170 : vector<16x32xf32>
    %1172 = vector.broadcast %1151 : vector<1x32xf32> to vector<16x32xf32>
    %1173 = arith.addf %1171, %1172 : vector<16x32xf32>
    %c0_464 = arith.constant 0 : index
    %c0_465 = arith.constant 0 : index
    %1174 = vector.load %arg37[%c0_464, %c0_465] : memref<32x128xbf16, #tpu.memory_space<vmem>>, vector<32x128xbf16>
    %1175 = arith.truncf %1173 : vector<16x32xf32> to vector<16x32xbf16>
    %cst_466 = arith.constant dense<0.000000e+00> : vector<16x128xf32>
    %1176 = tpu.matmul %1175, %1174, %cst_466 {dimension_numbers = #tpu.dot_dimension_numbers<[1], [0], [0], [1], [0, 0, 1, 1], [], []>} : vector<16x32xbf16>, vector<32x128xbf16>, vector<16x128xf32> -> vector<16x128xf32>
    %c0_467 = arith.constant 0 : index
    %c0_468 = arith.constant 0 : index
    %1177 = vector.load %arg38[%c0_467, %c0_468] : memref<1x128xf32, #tpu.memory_space<vmem>>, vector<1x128xf32>
    %1178 = vector.broadcast %1177 : vector<1x128xf32> to vector<16x128xf32>
    %1179 = arith.addf %1176, %1178 : vector<16x128xf32>
    %cst_469 = arith.constant dense<0xFF800000> : vector<16xf32>
    %1180 = vector.multi_reduction <maximumf>, %1179, %cst_469 [1] : vector<16x128xf32> to vector<16xf32>
    %1181 = vector.shape_cast %1180 : vector<16xf32> to vector<16x1xf32>
    %1182 = vector.broadcast %1181 : vector<16x1xf32> to vector<16x128xf32>
    %1183 = arith.subf %1179, %1182 : vector<16x128xf32>
    %1184 = math.exp %1183 : vector<16x128xf32>
    %cst_470 = arith.constant dense<0.000000e+00> : vector<16xf32>
    %1185 = vector.multi_reduction <add>, %1184, %cst_470 [1] : vector<16x128xf32> to vector<16xf32>
    %1186 = vector.shape_cast %1185 : vector<16xf32> to vector<16x1xf32>
    %1187 = tpu.reciprocal %1186 {approx = true} : vector<16x1xf32> -> vector<16x1xf32>
    %1188 = vector.broadcast %1187 : vector<16x1xf32> to vector<16x128xf32>
    %1189 = arith.mulf %1184, %1188 : vector<16x128xf32>
    %c0_471 = arith.constant 0 : index
    %c0_472 = arith.constant 0 : index
    %1190 = vector.load %arg39[%c0_471, %c0_472] : memref<16x128xf32, #tpu.memory_space<vmem>>, vector<16x128xf32>
    tpu.vector_store %arg39[%c0_471, %c0_472], %1189 {strides = array<i32>} : memref<16x128xf32, #tpu.memory_space<vmem>>, vector<16x128xf32>,
    return
  }
}

</mosaic_0001>

<bundles_post_ra>
// kernel: transformer_forward.1
= control target key start
LH: loop header
LB: loop body
LE: loop exit
PB: predicated region body
PF: predicated region fallthrough
CT: control target
= control target key end

     0   :  { %s10443_s6 = smov 1   ;;  %s10444_s10 = smov 2   ;;  %s12253_s0 = inlined_call_operand.smem [shape: u32[40], index: -1, kind: input, shape index: {}] }
   0x1   :  { %s10524_s5 = sld [smem:[%s12253_s0]]   ;;  %s10445_s14 = smov 3  }
   0x2   :  { %s10529_s9 = sld [smem:[%s12253_s0 + %s10443_s6]]   ;;  %s10446_s18 = smov 4  }
   0x3   :  { %s10534_s13 = sld [smem:[%s12253_s0 + %s10444_s10]]   ;;  %s10447_s22 = smov 5  }
   0x4   :  { %s10539_s17 = sld [smem:[%s12253_s0 + %s10445_s14]]   ;;  %s10448_s26 = smov 6  }
   0x5   :  { %s10544_s21 = sld [smem:[%s12253_s0 + %s10446_s18]]   ;;  %s10449_s30 = smov 7  }
   0x6   :  { %s10549_s25 = sld [smem:[%s12253_s0 + %s10447_s22]]   ;;  %s10450_s4 = smov 8  }
   0x7   :  { %12276 = sst [smem:[#allocation37_spill]] %s10524_s5  ;;  %s10451_s10 = smov 9  }
   0x8   :  { %12277 = sst [smem:[#allocation38_spill]] %s10529_s9  ;;  %s10452_s15 = smov 10  }
   0x9   :  { %12278 = sst [smem:[#allocation39_spill]] %s10534_s13  ;;  %s10453_s20 = smov 11  }
   0xa   :  { %12279 = sst [smem:[#allocation40_spill]] %s10539_s17  ;;  %s10455_s1 = smov 13  }
   0xb   :  { %12280 = sst [smem:[#allocation41_spill]] %s10544_s21  ;;  %s10456_s7 = smov 14  }
   0xc   :  { %12281 = sst [smem:[#allocation42_spill]] %s10549_s25  ;;  %s10458_s22 = smov 16  }
   0xd   :  { %s10554_s29 = sld [smem:[%s12253_s0 + %s10448_s26]]   ;;  %s10454_s26 = smov 12  }
   0xe   :  { %s10559_s3 = sld [smem:[%s12253_s0 + %s10449_s30]]   ;;  %s10459_s28 = smov 17  }
   0xf   :  { %s10564_s8 = sld [smem:[%s12253_s0 + %s10450_s4]]  }
  0x10   :  { %s10569_s14 = sld [smem:[%s12253_s0 + %s10451_s10]]  }
  0x11   :  { %s10574_s19 = sld [smem:[%s12253_s0 + %s10452_s15]]   ;;  %s10457_s15 = smov 15  }
  0x12   :  { %s10579_s24 = sld [smem:[%s12253_s0 + %s10453_s20]]  }
  0x13   :  { %12282 = sst [smem:[#allocation43_spill]] %s10554_s29 }
  0x14   :  { %12283 = sst [smem:[#allocation44_spill]] %s10559_s3 }
  0x15   :  { %s10584_s30 = sld [smem:[%s12253_s0 + %s10454_s26]]  }
  0x16   :  { %s10589_s6 = sld [smem:[%s12253_s0 + %s10455_s1]]  }
  0x17   :  { %12284 = sst [smem:[#allocation45_spill]] %s10574_s19 }
  0x18   :  { %12285 = sst [smem:[#allocation46_spill]] %s10579_s24 }
  0x19   :  { %s10594_s12 = sld [smem:[%s12253_s0 + %s10456_s7]]   ;;  %s10460_s7 = smov 18  }
  0x1a   :  { %s10599_s20 = sld [smem:[%s12253_s0 + %s10457_s15]]   ;;  %s10461_s15 = smov 19  }
  0x1b   :  { %12286 = sst [smem:[#allocation47_spill]] %s10584_s30 }
  0x1c   :  { %12287 = sst [smem:[#allocation48_spill]] %s10589_s6 }
  0x1d   :  { %s10604_s27 = sld [smem:[%s12253_s0 + %s10458_s22]]   ;;  %s10462_s22 = smov 20  }
  0x1e   :  { %s10609_s4 = sld [smem:[%s12253_s0 + %s10459_s28]]   ;;  %s10463_s28 = smov 21  }
  0x1f   :  { %12288 = sst [smem:[#allocation49_spill]] %s10594_s12 }
  0x20   :  { %12289 = sst [smem:[#allocation50_spill]] %s10599_s20 }
  0x21   :  { %s10614_s17 = sld [smem:[%s12253_s0 + %s10460_s7]]   ;;  %s10464_s7 = smov 22  }
  0x22   :  { %s10619_s9 = sld [smem:[%s12253_s0 + %s10461_s15]]   ;;  %s10465_s15 = smov 23  }
  0x23   :  { %12290 = sst [smem:[#allocation51_spill]] %s10604_s27 }
  0x24   :  { %s10624_s24 = sld [smem:[%s12253_s0 + %s10462_s22]]   ;;  %s10466_s22 = smov 24  }
  0x25   :  { %s10629_s30 = sld [smem:[%s12253_s0 + %s10463_s28]]   ;;  %s10467_s28 = smov 25  }
  0x26   :  { %s10634_s29 = sld [smem:[%s12253_s0 + %s10464_s7]]   ;;  %s10468_s7 = smov 26  }
  0x27   :  { %s10639_s25 = sld [smem:[%s12253_s0 + %s10465_s15]]   ;;  %s10469_s15 = smov 27  }
  0x28   :  { %s10644_s19 = sld [smem:[%s12253_s0 + %s10466_s22]]   ;;  %s10470_s22 = smov 28  }
  0x29   :  { %s10649_s12 = sld [smem:[%s12253_s0 + %s10467_s28]]   ;;  %s10471_s28 = smov 29  }
  0x2a   :  { %s10654_s6 = sld [smem:[%s12253_s0 + %s10468_s7]]   ;;  %s10472_s7 = smov 30  }
  0x2b   :  { %s10659_s3 = sld [smem:[%s12253_s0 + %s10469_s15]]   ;;  %s10473_s15 = smov 31  }
  0x2c   :  { %s10674_s20 = sld [smem:[%s12253_s0 + %s10472_s7]]   ;;  %s10476_s7 = smov 34  }
  0x2d   :  { %s10679_s21 = sld [smem:[%s12253_s0 + %s10473_s15]]   ;;  %s10477_s15 = smov 35  }
  0x2e   :  { %12291 = sst [smem:[#allocation52_spill]] %s10644_s19 }
  0x2f   :  { %12292 = sst [smem:[#allocation53_spill]] %s10649_s12 }
  0x30   :  { %s10664_s19 = sld [smem:[%s12253_s0 + %s10470_s22]]   ;;  %s10474_s22 = smov 32  }
  0x31   :  { %s10669_s12 = sld [smem:[%s12253_s0 + %s10471_s28]]   ;;  %s10475_s28 = smov 33  }
  0x32   :  { %s10684_s27 = sld [smem:[%s12253_s0 + %s10474_s22]]   ;;  %s10478_s22 = smov 36  }
  0x33   :  { %12293 = sst [smem:[#allocation54_spill]] %s10679_s21 }
  0x34   :  { %s10689_s13 = sld [smem:[%s12253_s0 + %s10475_s28]]   ;;  %s10479_s28 = smov 37  }
  0x35   :  { %s10694_s5 = sld [smem:[%s12253_s0 + %s10476_s7]]   ;;  %s10480_s7 = smov 38  }
  0x36   :  { %s10699_s21 = sld [smem:[%s12253_s0 + %s10477_s15]]   ;;  %s10481_s15 = smov 39  }
  0x38   :  { %12294 = sst [smem:[#allocation55_spill]] %s10684_s27 }
  0x39   :  { %s10704_s27 = sld [smem:[%s12253_s0 + %s10478_s22]]  }
  0x3a   :  { %12295 = sst [smem:[#allocation56_spill]] %s10689_s13 }
  0x3b   :  { %12296 = sst [smem:[#allocation57_spill]] %s10694_s5 }
  0x3c   :  { %12297 = sst [smem:[#allocation58_spill]] %s10699_s21 }
  0x3d   :  { %s10709_s13 = sld [smem:[%s12253_s0 + %s10479_s28]]  }
  0x3e   :  { %s10714_s5 = sld [smem:[%s12253_s0 + %s10480_s7]]  }
  0x3f   :  { %s10719_s21 = sld [smem:[%s12253_s0 + %s10481_s15]]  }
  0x40   :  { %84 = vsyncpa [#allocation4], 0 }
  0x41   :  { %85 = vsyncpa [#allocation6], 0 }
  0x42   :  { %86 = vsyncpa [#allocation9], 0 }
  0x43   :  { %87 = vsyncpa [#allocation12], 0 }
  0x44   :  { %88 = vsyncpa [#allocation15], 0 }
  0x45   :  { %89 = vsyncpa [#allocation18], 0 }
  0x46   :  { %90 = vsyncpa [#allocation21], 0 }
  0x47   :  { %91 = vsyncpa [#allocation24], 0 }
  0x48   :  { %92 = vsyncpa [#allocation27], 0  ;;  %s10482_s22 = smov [#allocation5]   ;;  %s10483_s26 = smov [#allocation8]  }
  0x49   :  { %s126_s23 = sshll.u32 %s10482_s22, 4  ;;  %s164_s28 = sshll.u32 %s10483_s26, 4  ;;  %s127_s23 = int_to_ptr.vmem [resolvable:$true] %s126_s23  ;;  %s10721_s28 = int_to_ptr.vmem [resolvable:$true] %s164_s28 }
  0x4a   :  { %s10073_s0 = scalar_lea.hbm %s10569_s14, 32 }
  0x4b   :  { %p10074_p0 = scmp.ne.s32.totalorder %s10569_s14, %s10073_s0  ;;  %p10077_p1 = scmp.lt.u32.totalorder %s10073_s0, %s10569_s14 }
  0x4d   :  { %p10079_p2 = pnand %p10077_p1, %p10074_p0 }
  0x4f   :  { %10082 = shalt.err (!%p10079_p2)
}
  0x50   :  { %s10083_s1 = scalar_lea.vmem %s127_s23, 32  ;;  %p10088_p4 = scmp.lt.s32.totalorder %s127_s23, %s127_s23 }
  0x51   :  { %p10084_p3 = scmp.ne.s32.totalorder %s127_s23, %s10083_s1  ;;  %p10089_p5 = scmp.lt.s32.totalorder %s10083_s1, %s10083_s1 }
  0x53   :  { %p10090_p6 = por %p10089_p5, %p10088_p4 }
  0x55   :  { %p10091_p7 = pnand %p10090_p6, %p10084_p3 }
  0x57   :  { %10094 = shalt.err (!%p10091_p7)
}
  0x58   :  { %s10484_s2 = smov 16   ;;  %s10485_s7 = smov 1  }
  0x59   :  { %132 = dma.hbm_to_vmem [thread:$0]  %s10569_s14, 32, %s127_s23, [#allocation6], %s10484_s2, %s10484_s2, %s10485_s7  }
  0x5a   :  { %s10095_s10 = scalar_lea.hbm %s10614_s17, 32 }
  0x5b   :  { %p10096_p8 = scmp.ne.s32.totalorder %s10614_s17, %s10095_s10  ;;  %p10099_p9 = scmp.lt.u32.totalorder %s10095_s10, %s10614_s17 }
  0x5d   :  { %p10101_p10 = pnand %p10099_p9, %p10096_p8 }
  0x5f   :  { %10104 = shalt.err (!%p10101_p10)
}
  0x60   :  { %s10105_s11 = scalar_lea.vmem %s10721_s28, 32  ;;  %p10110_p12 = scmp.lt.s32.totalorder %s10721_s28, %s10721_s28 }
  0x61   :  { %p10106_p11 = scmp.ne.s32.totalorder %s10721_s28, %s10105_s11  ;;  %p10111_p13 = scmp.lt.s32.totalorder %s10105_s11, %s10105_s11 }
  0x63   :  { %p10112_p0 = por %p10111_p13, %p10110_p12 }
  0x65   :  { %p10113_p1 = pnand %p10112_p0, %p10106_p11 }
  0x67   :  { %10116 = shalt.err (!%p10113_p1)
}
  0x68   :  { %170 = dma.hbm_to_vmem [thread:$0]  %s10614_s17, 32, %s10721_s28, [#allocation9], %s10484_s2, %s10484_s2, %s10485_s7  }
  0x69   :  { %s10486_s14 = smov [#allocation11]   ;;  %s10487_s16 = smov [#allocation14]  }
  0x6a   :  { %s188_s15 = sshll.u32 %s10486_s14, 4  ;;  %s212_s18 = sshll.u32 %s10487_s16, 4  ;;  %s189_s15 = int_to_ptr.vmem [resolvable:$true] %s188_s15  ;;  %s10742_s18 = int_to_ptr.vmem [resolvable:$true] %s212_s18 }
  0x6b   :  { %s10117_s22 = scalar_lea.hbm %s10624_s24, 32 }
  0x6c   :  { %p10118_p2 = scmp.ne.s32.totalorder %s10624_s24, %s10117_s22  ;;  %p10121_p3 = scmp.lt.u32.totalorder %s10117_s22, %s10624_s24 }
  0x6e   :  { %p10123_p4 = pnand %p10121_p3, %p10118_p2 }
  0x70   :  { %10126 = shalt.err (!%p10123_p4)
}
  0x71   :  { %s10127_s23 = scalar_lea.vmem %s189_s15, 32  ;;  %p10132_p6 = scmp.lt.s32.totalorder %s189_s15, %s189_s15 }
  0x72   :  { %p10128_p5 = scmp.ne.s32.totalorder %s189_s15, %s10127_s23  ;;  %p10133_p7 = scmp.lt.s32.totalorder %s10127_s23, %s10127_s23 }
  0x74   :  { %p10134_p8 = por %p10133_p7, %p10132_p6 }
  0x76   :  { %p10135_p9 = pnand %p10134_p8, %p10128_p5 }
  0x78   :  { %10138 = shalt.err (!%p10135_p9)
}
  0x79   :  { %194 = dma.hbm_to_vmem [thread:$0]  %s10624_s24, 32, %s189_s15, [#allocation12], %s10484_s2, %s10484_s2, %s10485_s7  }
  0x7a   :  { %s10139_s17 = scalar_lea.hbm %s10634_s29, 32 }
  0x7b   :  { %p10140_p10 = scmp.ne.s32.totalorder %s10634_s29, %s10139_s17  ;;  %p10143_p11 = scmp.lt.u32.totalorder %s10139_s17, %s10634_s29 }
  0x7d   :  { %p10145_p12 = pnand %p10143_p11, %p10140_p10 }
  0x7f   :  { %10148 = shalt.err (!%p10145_p12)
}
  0x80   :  { %s10149_s26 = scalar_lea.vmem %s10742_s18, 32  ;;  %p10154_p0 = scmp.lt.s32.totalorder %s10742_s18, %s10742_s18 }
  0x81   :  { %p10150_p13 = scmp.ne.s32.totalorder %s10742_s18, %s10149_s26  ;;  %p10155_p1 = scmp.lt.s32.totalorder %s10149_s26, %s10149_s26 }
  0x83   :  { %p10156_p2 = por %p10155_p1, %p10154_p0 }
  0x85   :  { %p10157_p3 = pnand %p10156_p2, %p10150_p13 }
  0x87   :  { %10160 = shalt.err (!%p10157_p3)
}
  0x88   :  { %218 = dma.hbm_to_vmem [thread:$0]  %s10634_s29, 32, %s10742_s18, [#allocation15], %s10484_s2, %s10484_s2, %s10485_s7  }
  0x89   :  { %s10488_s24 = smov [#allocation17]   ;;  %s10489_s0 = smov [#allocation20]  }
  0x8a   :  { %s240_s28 = sshll.u32 %s10488_s24, 4  ;;  %s264_s1 = sshll.u32 %s10489_s0, 4  ;;  %s241_s28 = int_to_ptr.vmem [resolvable:$true] %s240_s28  ;;  %s10763_s1 = int_to_ptr.vmem [resolvable:$true] %s264_s1 }
  0x8b   :  { %s10161_s10 = scalar_lea.hbm %s10654_s6, 32 }
  0x8c   :  { %p10162_p4 = scmp.ne.s32.totalorder %s10654_s6, %s10161_s10  ;;  %p10165_p5 = scmp.lt.u32.totalorder %s10161_s10, %s10654_s6 }
  0x8e   :  { %p10167_p6 = pnand %p10165_p5, %p10162_p4 }
  0x90   :  { %10170 = shalt.err (!%p10167_p6)
}
  0x91   :  { %s10171_s11 = scalar_lea.vmem %s241_s28, 32  ;;  %p10176_p8 = scmp.lt.s32.totalorder %s241_s28, %s241_s28 }
  0x92   :  { %p10172_p7 = scmp.ne.s32.totalorder %s241_s28, %s10171_s11  ;;  %p10177_p9 = scmp.lt.s32.totalorder %s10171_s11, %s10171_s11 }
  0x94   :  { %p10178_p10 = por %p10177_p9, %p10176_p8 }
  0x96   :  { %p10179_p11 = pnand %p10178_p10, %p10172_p7 }
  0x98   :  { %10182 = shalt.err (!%p10179_p11)
}
  0x99   :  { %246 = dma.hbm_to_vmem [thread:$0]  %s10654_s6, 32, %s241_s28, [#allocation18], %s10484_s2, %s10484_s2, %s10485_s7  }
  0x9a   :  { %s10183_s29 = scalar_lea.hbm %s10664_s19, 32 }
  0x9b   :  { %p10184_p12 = scmp.ne.s32.totalorder %s10664_s19, %s10183_s29  ;;  %p10187_p13 = scmp.lt.u32.totalorder %s10183_s29, %s10664_s19 }
  0x9d   :  { %p10189_p0 = pnand %p10187_p13, %p10184_p12 }
  0x9f   :  { %10192 = shalt.err (!%p10189_p0)
}
  0xa0   :  { %s10193_s14 = scalar_lea.vmem %s10763_s1, 32  ;;  %p10198_p2 = scmp.lt.s32.totalorder %s10763_s1, %s10763_s1 }
  0xa1   :  { %p10194_p1 = scmp.ne.s32.totalorder %s10763_s1, %s10193_s14  ;;  %p10199_p3 = scmp.lt.s32.totalorder %s10193_s14, %s10193_s14 }
  0xa3   :  { %p10200_p4 = por %p10199_p3, %p10198_p2 }
  0xa5   :  { %p10201_p5 = pnand %p10200_p4, %p10194_p1 }
  0xa7   :  { %10204 = shalt.err (!%p10201_p5)
}
  0xa8   :  { %270 = dma.hbm_to_vmem [thread:$0]  %s10664_s19, 32, %s10763_s1, [#allocation21], %s10484_s2, %s10484_s2, %s10485_s7  }
  0xa9   :  { %s10490_s6 = smov [#allocation23]   ;;  %s10491_s16 = smov [#allocation3]  }
  0xaa   :  { %s288_s15 = sshll.u32 %s10490_s6, 4  ;;  %s114_s18 = sshll.u32 %s10491_s16, 4  ;;  %s289_s15 = int_to_ptr.vmem [resolvable:$true] %s288_s15  ;;  %s10784_s18 = int_to_ptr.vmem [resolvable:$true] %s114_s18 }
  0xab   :  { %s10205_s22 = scalar_lea.hbm %s10674_s20, 32 }
  0xac   :  { %p10206_p6 = scmp.ne.s32.totalorder %s10674_s20, %s10205_s22  ;;  %p10209_p7 = scmp.lt.u32.totalorder %s10205_s22, %s10674_s20 }
  0xae   :  { %p10211_p8 = pnand %p10209_p7, %p10206_p6 }
  0xb0   :  { %10214 = shalt.err (!%p10211_p8)
}
  0xb1   :  { %s10215_s23 = scalar_lea.vmem %s289_s15, 32  ;;  %p10220_p10 = scmp.lt.s32.totalorder %s289_s15, %s289_s15 }
  0xb2   :  { %p10216_p9 = scmp.ne.s32.totalorder %s289_s15, %s10215_s23  ;;  %p10221_p11 = scmp.lt.s32.totalorder %s10215_s23, %s10215_s23 }
  0xb4   :  { %p10222_p12 = por %p10221_p11, %p10220_p10 }
  0xb6   :  { %p10223_p13 = pnand %p10222_p12, %p10216_p9 }
  0xb8   :  { %10226 = shalt.err (!%p10223_p13)
}
  0xb9   :  { %294 = dma.hbm_to_vmem [thread:$0]  %s10674_s20, 32, %s289_s15, [#allocation24], %s10484_s2, %s10484_s2, %s10485_s7  }
  0xba   :  { %s10227_s19 = scalar_lea.hbm %s10564_s8, 32 }
  0xbb   :  { %p10228_p0 = scmp.ne.s32.totalorder %s10564_s8, %s10227_s19  ;;  %p10231_p1 = scmp.lt.u32.totalorder %s10227_s19, %s10564_s8 }
  0xbd   :  { %p10233_p2 = pnand %p10231_p1, %p10228_p0 }
  0xbf   :  { %10236 = shalt.err (!%p10233_p2)
}
  0xc0   :  { %s10237_s17 = scalar_lea.vmem %s10784_s18, 32  ;;  %p10242_p4 = scmp.lt.s32.totalorder %s10784_s18, %s10784_s18 }
  0xc1   :  { %p10238_p3 = scmp.ne.s32.totalorder %s10784_s18, %s10237_s17  ;;  %p10243_p5 = scmp.lt.s32.totalorder %s10237_s17, %s10237_s17 }
  0xc3   :  { %p10244_p6 = por %p10243_p5, %p10242_p4 }
  0xc5   :  { %p10245_p7 = pnand %p10244_p6, %p10238_p3 }
  0xc7   :  { %10248 = shalt.err (!%p10245_p7)
}
  0xc8   :  { %120 = dma.hbm_to_vmem [thread:$0]  %s10564_s8, 32, %s10784_s18, [#allocation4], %s10484_s2, %s10484_s2, %s10485_s7  }
  0xc9   :  { %s10492_s20 = smov [#allocation7]   ;;  %s10493_s24 = smov [#allocation10]  }
  0xca   :  { %s152_s26 = sshll.u32 %s10492_s20, 4  ;;  %s176_s28 = sshll.u32 %s10493_s24, 4  ;;  %s153_s26 = int_to_ptr.vmem [resolvable:$true] %s152_s26  ;;  %s10805_s28 = int_to_ptr.vmem [resolvable:$true] %s176_s28 }
  0xcb   :  { %s10249_s0 = scalar_lea.hbm %s10609_s4, 32 }
  0xcc   :  { %p10250_p8 = scmp.ne.s32.totalorder %s10609_s4, %s10249_s0  ;;  %p10253_p9 = scmp.lt.u32.totalorder %s10249_s0, %s10609_s4 }
  0xce   :  { %p10255_p10 = pnand %p10253_p9, %p10250_p8 }
  0xd0   :  { %10258 = shalt.err (!%p10255_p10)
}
  0xd1   :  { %s10259_s1 = scalar_lea.vmem %s153_s26, 32  ;;  %p10264_p12 = scmp.lt.s32.totalorder %s153_s26, %s153_s26 }
  0xd2   :  { %p10260_p11 = scmp.ne.s32.totalorder %s153_s26, %s10259_s1  ;;  %p10265_p13 = scmp.lt.s32.totalorder %s10259_s1, %s10259_s1 }
  0xd4   :  { %p10266_p0 = por %p10265_p13, %p10264_p12 }
  0xd6   :  { %p10267_p1 = pnand %p10266_p0, %p10260_p11 }
  0xd8   :  { %10270 = shalt.err (!%p10267_p1)
}
  0xd9   :  { %158 = dma.hbm_to_vmem [thread:$0]  %s10609_s4, 32, %s153_s26, [#allocation6], %s10484_s2, %s10484_s2, %s10485_s7  }
  0xda   :  { %s10271_s8 = scalar_lea.hbm %s10619_s9, 32 }
  0xdb   :  { %p10272_p2 = scmp.ne.s32.totalorder %s10619_s9, %s10271_s8  ;;  %p10275_p3 = scmp.lt.u32.totalorder %s10271_s8, %s10619_s9 }
  0xdd   :  { %p10277_p4 = pnand %p10275_p3, %p10272_p2 }
  0xdf   :  { %10280 = shalt.err (!%p10277_p4)
}
  0xe0   :  { %s10281_s10 = scalar_lea.vmem %s10805_s28, 32  ;;  %p10286_p6 = scmp.lt.s32.totalorder %s10805_s28, %s10805_s28 }
  0xe1   :  { %p10282_p5 = scmp.ne.s32.totalorder %s10805_s28, %s10281_s10  ;;  %p10287_p7 = scmp.lt.s32.totalorder %s10281_s10, %s10281_s10 }
  0xe3   :  { %p10288_p8 = por %p10287_p7, %p10286_p6 }
  0xe5   :  { %p10289_p9 = pnand %p10288_p8, %p10282_p5 }
  0xe7   :  { %10292 = shalt.err (!%p10289_p9)
}
  0xe8   :  { %182 = dma.hbm_to_vmem [thread:$0]  %s10619_s9, 32, %s10805_s28, [#allocation9], %s10484_s2, %s10484_s2, %s10485_s7  }
  0xe9   :  { %s10494_s4 = smov [#allocation13]   ;;  %s10495_s29 = smov [#allocation16]  }
  0xea   :  { %s200_s11 = sshll.u32 %s10494_s4, 4  ;;  %s224_s14 = sshll.u32 %s10495_s29, 4  ;;  %s201_s11 = int_to_ptr.vmem [resolvable:$true] %s200_s11  ;;  %s10826_s14 = int_to_ptr.vmem [resolvable:$true] %s224_s14 }
  0xeb   :  { %s10293_s6 = scalar_lea.hbm %s10629_s30, 32 }
  0xec   :  { %p10294_p10 = scmp.ne.s32.totalorder %s10629_s30, %s10293_s6  ;;  %p10297_p11 = scmp.lt.u32.totalorder %s10293_s6, %s10629_s30 }
  0xee   :  { %p10299_p12 = pnand %p10297_p11, %p10294_p10 }
  0xf0   :  { %10302 = shalt.err (!%p10299_p12)
}
  0xf1   :  { %s10303_s15 = scalar_lea.vmem %s201_s11, 32  ;;  %p10308_p0 = scmp.lt.s32.totalorder %s201_s11, %s201_s11 }
  0xf2   :  { %p10304_p13 = scmp.ne.s32.totalorder %s201_s11, %s10303_s15  ;;  %p10309_p1 = scmp.lt.s32.totalorder %s10303_s15, %s10303_s15 }
  0xf4   :  { %p10310_p2 = por %p10309_p1, %p10308_p0 }
  0xf6   :  { %p10311_p3 = pnand %p10310_p2, %p10304_p13 }
  0xf8   :  { %10314 = shalt.err (!%p10311_p3)
}
  0xf9   :  { %206 = dma.hbm_to_vmem [thread:$0]  %s10629_s30, 32, %s201_s11, [#allocation12], %s10484_s2, %s10484_s2, %s10485_s7  }
  0xfa   :  { %s10315_s9 = scalar_lea.hbm %s10639_s25, 32 }
  0xfb   :  { %p10316_p4 = scmp.ne.s32.totalorder %s10639_s25, %s10315_s9  ;;  %p10319_p5 = scmp.lt.u32.totalorder %s10315_s9, %s10639_s25 }
  0xfd   :  { %p10321_p6 = pnand %p10319_p5, %p10316_p4 }
  0xff   :  { %10324 = shalt.err (!%p10321_p6)
}
 0x100   :  { %s10325_s16 = scalar_lea.vmem %s10826_s14, 32  ;;  %p10330_p8 = scmp.lt.s32.totalorder %s10826_s14, %s10826_s14 }
 0x101   :  { %p10326_p7 = scmp.ne.s32.totalorder %s10826_s14, %s10325_s16  ;;  %p10331_p9 = scmp.lt.s32.totalorder %s10325_s16, %s10325_s16 }
 0x103   :  { %p10332_p10 = por %p10331_p9, %p10330_p8 }
 0x105   :  { %p10333_p11 = pnand %p10332_p10, %p10326_p7 }
 0x107   :  { %10336 = shalt.err (!%p10333_p11)
}
 0x108   :  { %230 = dma.hbm_to_vmem [thread:$0]  %s10639_s25, 32, %s10826_s14, [#allocation15], %s10484_s2, %s10484_s2, %s10485_s7  }
 0x109   :  { %s10496_s30 = smov [#allocation19]   ;;  %s10497_s22 = smov [#allocation22]  }
 0x10a   :  { %s252_s18 = sshll.u32 %s10496_s30, 4  ;;  %s276_s23 = sshll.u32 %s10497_s22, 4  ;;  %s253_s18 = int_to_ptr.vmem [resolvable:$true] %s252_s18  ;;  %s10847_s23 = int_to_ptr.vmem [resolvable:$true] %s276_s23 }
 0x10b   :  { %s10337_s19 = scalar_lea.hbm %s10659_s3, 32 }
 0x10c   :  { %p10338_p12 = scmp.ne.s32.totalorder %s10659_s3, %s10337_s19  ;;  %p10341_p13 = scmp.lt.u32.totalorder %s10337_s19, %s10659_s3 }
 0x10e   :  { %p10343_p0 = pnand %p10341_p13, %p10338_p12 }
 0x110   :  { %10346 = shalt.err (!%p10343_p0)
}
 0x111   :  { %s10347_s17 = scalar_lea.vmem %s253_s18, 32  ;;  %p10352_p2 = scmp.lt.s32.totalorder %s253_s18, %s253_s18 }
 0x112   :  { %p10348_p1 = scmp.ne.s32.totalorder %s253_s18, %s10347_s17  ;;  %p10353_p3 = scmp.lt.s32.totalorder %s10347_s17, %s10347_s17 }
 0x114   :  { %p10354_p4 = por %p10353_p3, %p10352_p2 }
 0x116   :  { %p10355_p5 = pnand %p10354_p4, %p10348_p1 }
 0x118   :  { %10358 = shalt.err (!%p10355_p5)
}
 0x119   :  { %258 = dma.hbm_to_vmem [thread:$0]  %s10659_s3, 32, %s253_s18, [#allocation18], %s10484_s2, %s10484_s2, %s10485_s7  }
 0x11a   :  { %s10359_s25 = scalar_lea.hbm %s10669_s12, 32 }
 0x11b   :  { %p10360_p6 = scmp.ne.s32.totalorder %s10669_s12, %s10359_s25  ;;  %p10363_p7 = scmp.lt.u32.totalorder %s10359_s25, %s10669_s12 }
 0x11d   :  { %p10365_p8 = pnand %p10363_p7, %p10360_p6 }
 0x11f   :  { %10368 = shalt.err (!%p10365_p8)
}
 0x120   :  { %s10369_s20 = scalar_lea.vmem %s10847_s23, 32  ;;  %p10374_p10 = scmp.lt.s32.totalorder %s10847_s23, %s10847_s23 }
 0x121   :  { %p10370_p9 = scmp.ne.s32.totalorder %s10847_s23, %s10369_s20  ;;  %p10375_p11 = scmp.lt.s32.totalorder %s10369_s20, %s10369_s20 }
 0x123   :  { %p10376_p12 = por %p10375_p11, %p10374_p10 }
 0x125   :  { %p10377_p13 = pnand %p10376_p12, %p10370_p9 }
 0x127   :  { %10380 = shalt.err (!%p10377_p13)
}
 0x128   :  { %s12298_s3 = sld [smem:[#allocation54_spill]]  ;;  %s10498_s26 = smov [#allocation25]  }
 0x129   :  { %282 = dma.hbm_to_vmem [thread:$0]  %s10669_s12, 32, %s10847_s23, [#allocation21], %s10484_s2, %s10484_s2, %s10485_s7  }
 0x12a   :  { %s300_s24 = sshll.u32 %s10498_s26, 4  ;;  %s10499_s28 = smov [#allocation26]   ;;  %s301_s24 = int_to_ptr.vmem [resolvable:$true] %s300_s24 }
 0x12b   :  { %s325_s0 = sshll.u32 %s10499_s28, 4  ;;  %s326_s0 = int_to_ptr.vmem [resolvable:$true] %s325_s0 }
 0x12e   :  { %s10381_s1 = scalar_lea.hbm %s12298_s3, 32 }
 0x12f   :  { %p10382_p0 = scmp.ne.s32.totalorder %s12298_s3, %s10381_s1  ;;  %p10385_p1 = scmp.lt.u32.totalorder %s10381_s1, %s12298_s3 }
 0x131   :  { %p10387_p2 = pnand %p10385_p1, %p10382_p0 }
 0x133   :  { %10390 = shalt.err (!%p10387_p2)
}
 0x134   :  { %s10391_s8 = scalar_lea.vmem %s301_s24, 32  ;;  %p10396_p4 = scmp.lt.s32.totalorder %s301_s24, %s301_s24 }
 0x135   :  { %p10392_p3 = scmp.ne.s32.totalorder %s301_s24, %s10391_s8  ;;  %p10397_p5 = scmp.lt.s32.totalorder %s10391_s8, %s10391_s8 }
 0x137   :  { %p10398_p6 = por %p10397_p5, %p10396_p4 }
 0x139   :  { %p10399_p7 = pnand %p10398_p6, %p10392_p3 }
 0x13b   :  { %10402 = shalt.err (!%p10399_p7)
}
 0x13c   :  { %306 = dma.hbm_to_vmem [thread:$0]  %s12298_s3, 32, %s301_s24, [#allocation24], %s10484_s2, %s10484_s2, %s10485_s7  }
 0x13d   :  { %s10403_s12 = scalar_lea.hbm %s10714_s5, 16 }
 0x13e   :  { %p10404_p8 = scmp.ne.s32.totalorder %s10714_s5, %s10403_s12  ;;  %p10407_p9 = scmp.lt.u32.totalorder %s10403_s12, %s10714_s5 }
 0x140   :  { %p10409_p10 = pnand %p10407_p9, %p10404_p8 }
 0x142   :  { %10412 = shalt.err (!%p10409_p10)
}
 0x143   :  { %s10413_s10 = scalar_lea.vmem %s326_s0, 16  ;;  %s10417_s4 = scalar_lea.vmem %s326_s0, 32 }
 0x144   :  { %p10414_p11 = scmp.ne.s32.totalorder %s326_s0, %s10413_s10  ;;  %p10418_p12 = scmp.lt.s32.totalorder %s326_s0, %s326_s0 }
 0x145   :  { %p10419_p13 = scmp.lt.s32.totalorder %s10417_s4, %s10413_s10 }
 0x147   :  { %p10420_p0 = por %p10419_p13, %p10418_p12 }
 0x149   :  { %p10421_p1 = pnand %p10420_p0, %p10414_p11 }
 0x14b   :  { %10424 = shalt.err (!%p10421_p1)
}
 0x14c   :  { %328 = dma.hbm_to_vmem [thread:$0]  %s10714_s5, 16, %s326_s0, [#allocation27]  }
 0x14d   :  { %10425 = dma.done.wait [#allocation4], 32  }
 0x14e   :  { %10426 = vsyncadd [#allocation4], 4294967264 }
 0x14f   :  { %10427 = dma.done.wait [#allocation6], 64  }
 0x150   :  { %10428 = vsyncadd [#allocation6], 4294967232 }
 0x151   :  { %10429 = dma.done.wait [#allocation9], 64  }
 0x152   :  { %10430 = vsyncadd [#allocation9], 4294967232 }
 0x153   :  { %10431 = dma.done.wait [#allocation12], 64  }
 0x154   :  { %10432 = vsyncadd [#allocation12], 4294967232 }
 0x155   :  { %10433 = dma.done.wait [#allocation15], 64  }
 0x156   :  { %10434 = vsyncadd [#allocation15], 4294967232 }
 0x157   :  { %10435 = dma.done.wait [#allocation18], 64  }
 0x158   :  { %10436 = vsyncadd [#allocation18], 4294967232 }
 0x159   :  { %10437 = dma.done.wait [#allocation21], 64  }
 0x15a   :  { %10438 = vsyncadd [#allocation21], 4294967232 }
 0x15b   :  { %10439 = dma.done.wait [#allocation24], 64  }
 0x15c   :  { %10440 = vsyncadd [#allocation24], 4294967232 }
 0x15d   :  { %10441 = dma.done.wait [#allocation27], 16  }
 0x15e   :  { %10442 = vsyncadd [#allocation27], 4294967280  ;;  %s12299_s7 = sld [smem:[#allocation37_spill]]  ;;  %s12300_s5 = sld [smem:[#allocation39_spill]]  ;;  %v10500_v0 = vmov 0   ;;  %v10501_v1 = vmov 0.0   ;;  %v389_v8 = vlaneseq }
 0x15f   :  { %9768 = vset.pattern.permute.xlu0 %v10500_v0  ;;  %8895 = vmatprep.subr.bf16.mxu0 %v10501_v1  ;;  %vm10502_vm0 = vmmov 0   ;;  %s12301_s11 = sld [smem:[#allocation51_spill]]  ;;  %s12302_s29 = sld [smem:[#allocation41_spill]]  ;;  %vm428_vm3 = vcmask 523264   ;;  %vm501_vm4 = vcmask 261120   ;;  %vm556_vm5 = vcmask 64512  }
 0x160   :  { %8907 = vmatprep.subr.bf16.mxu1 %v10501_v1  ;;  %9769 = vset.pattern.permute.xlu1 %v10500_v0  ;;  %v10896_v9 = vand.u32 127, %v389_v8  ;;  %v8335_v27 = vld [vmem:[#allocation3] ss:$0 sm:$0xff]  ;;  %s10503_s14 = smov 96   ;;  %s10504_s6 = smov 64   ;;  %vm683_vm6 = vcmask 1043456  }
 0x161   :  { %8903 = vmatprep.mubr.msk.bf16.mxu0 %vm10502_vm0, %v10501_v1  ;;  %8911 = vmatprep.mubr.msk.bf16.mxu1 %vm10502_vm0, %v10501_v1  ;;  %s10505_s15 = smov 88   ;;  %s10506_s9 = smov 120   ;;  %vm1007_vm7 = vcmask 130112   ;;  %vm1240_vm8 = vcmask 195712   ;;  %vm1473_vm9 = vcmask 261312  }
 0x162   :  { %s10507_s16 = smov 56   ;;  %s10508_s30 = smov 80  }
 0x163   :  { %s10509_s18 = smov 112   ;;  %s10510_s22 = smov 48  }
 0x164   :  { %v379_v2 = vld [vmem:[%s12299_s7] sm:$0xff]  ;;  %v380_v4 = vld [vmem:[%s12299_s7 + $0x8] sm:$0xff]  ;;  %v9772_v6 = vld [vmem:[%s12300_s5 + $0x10] sm:$0xff]   ;;  %s10511_s23 = smov 72   ;;  %s10512_s19 = smov 104  }
 0x165   :  { %392 = vperm.xlu0 %9768, %v379_v2   ;;  %v9770_v3 = vld [vmem:[%s12300_s5] sm:$0xff]   ;;  %v9771_v5 = vld [vmem:[%s12300_s5 + $0x8] sm:$0xff]   ;;  %v9773_v7 = vld [vmem:[%s12300_s5 + $0x18] sm:$0xff]   ;;  %s10513_s17 = smov 40   ;;  %s10514_s25 = smov 8  }
 0x166   :  { %8896 = vmatpush3.bf16.msra.mxu0 %v9770_v3  ;;  %v9774_v15 = vld [vmem:[%s12301_s11] sm:$0xff]   ;;  %v9775_v16 = vld [vmem:[%s12301_s11 + $0x8] sm:$0xff]   ;;  %s12303_s20 = sld [smem:[#allocation50_spill]]  ;;  %s10515_s3 = smov 24  }
 0x167   :  { %8897 = vmatprep.subr.bf16.mxu0 %v10501_v1  ;;  %8908 = vmatpush3.bf16.msra.mxu1 %v9774_v15  ;;  %v378_v20 = vld [vmem:[%s12302_s29] sm:$0xff]  ;;  %s12304_s26 = sld [smem:[#allocation44_spill]]  ;;  %s12305_s24 = sld [smem:[#allocation48_spill]] }
 0x168   :  { %8909 = vmatprep.subr.bf16.mxu1 %v10501_v1  ;;  %s12306_s28 = sld [smem:[#allocation49_spill]]  ;;  %s12307_s0 = sld [smem:[#allocation45_spill]] }
 0x169   :  { %395 = vperm.xlu0 %9768, %v380_v4   ;;  %s12308_s1 = sld [smem:[#allocation42_spill]]  ;;  %s12309_s8 = sld [smem:[#allocation43_spill]] }
 0x16a   :  { %8898 = vmatpush3.bf16.msra.mxu0 %v9771_v5  ;;  %s12310_s12 = sld [smem:[#allocation47_spill]]  ;;  %s12311_s10 = sld [smem:[#allocation46_spill]] }
 0x16b   :  { %8899 = vmatprep.subr.bf16.mxu0 %v10501_v1  ;;  %8910 = vmatpush3.bf16.msra.mxu1 %v9775_v16  ;;  %s12312_s4 = sld [smem:[#allocation38_spill]]  ;;  %s12313_s7 = sld [smem:[#allocation40_spill]] }
 0x16c   :  { %8915 = vmatprep.subr.bf16.mxu1 %v10501_v1  ;;  %s12316_s5 = sld [smem:[#allocation57_spill]] }
 0x16e   :  { %8900 = vmatpush3.bf16.msra.mxu0 %v9772_v6 }
 0x16f   :  { %8901 = vmatprep.subr.bf16.mxu0 %v10501_v1 }
 0x172   :  { %8902 = vmatpush3.bf16.msra.mxu0 %v9773_v7 }
 0x173   :  { %8921 = vmatprep.subr.bf16.mxu0 %v10501_v1 }
 0x1e4   :  { %v393_v10 = vpop.permute.xlu0 %392 }
 0x1e5   :  { %vm397_vm1 = vcmp.eq.s32.totalorder %v393_v10, %v10896_v9 }
 0x1e6   :  { %v8328_v12 = vsel %vm397_vm1, 1.0, %v10501_v1 }
 0x1e8   :  { %v396_v11 = vpop.permute.xlu0 %395 }
 0x1e9   :  { %vm398_vm2 = vcmp.eq.s32.totalorder %v396_v11, %v10896_v9 }
 0x1ea   :  { %v8329_v13 = vsel %vm398_vm2, 1.0, %v10501_v1 }
 0x1eb   :  { %v403_v14 = vpack.c.bf16 %v8329_v13, %v8328_v12 }
 0x1ed   :  { %8904 = vmatmul.mubr.msk.bf16.vlgmr.msra.gmra.mrb[0].mxu0 %vm428_vm3, %v403_v14 }
 0x1ee   :  { %8923 = vmatprep.mubr.msk.bf16.mxu0 %vm10502_vm0, %v10501_v1 }
 0x2c0   :  { %v466_v17 = vpop.f32.mrb[0].mxu0 }
 0x2c1   :  { %v473_v18 = vmul.f32 5.656854, %v466_v17  ;;  %v8905_v19 = vpop.f32.mrb[1].mxu0 }
 0x2c2   :  { %v469_v21 = vpop.f32.mrb[2].mxu0 }
 0x2c3   :  { %v474_v22 = vmul.f32 5.656854, %v469_v21  ;;  %v8906_v23 = vpop.f32.mrb[3].mxu0  ;;  %v10910_v24 = vadd.f32 %v473_v18, %v378_v20 }
 0x2c5   :  { %v10912_v25 = vadd.f32 %v474_v22, %v378_v20 }
 0x2c7   :  { %v481_v26 = vpack.c.bf16 %v10912_v25, %v10910_v24 }
 0x2c9   :  { %8912 = vmatmul.mubr.msk.bf16.vlgmr.msra.gmra.mrb[0].mxu1 %vm501_vm4, %v481_v26 }
 0x2ca   :  { %8917 = vmatprep.mubr.msk.bf16.mxu1 %vm10502_vm0, %v10501_v1 }
 0x39c   :  { %v539_v28 = vpop.f32.mrb[0].mxu1 }
 0x39d   :  { %v540_v29 = vadd.f32 %v8335_v27, %v539_v28  ;;  %v8913_v30 = vpop.f32.mrb[1].mxu1 }
 0x39e   :  { %v542_v31 = vpop.f32.mrb[2].mxu1 }
 0x39f   :  { %v10919_v32 = vpack.c.bf16 %v540_v29, %v540_v29  ;;  %v543_v33 = vadd.f32 %v8335_v27, %v542_v31  ;;  %v8914_v34 = vpop.f32.mrb[3].mxu1 }
 0x3a1   :  { %554 = vrot.lane.b32.xlu1 %v10919_v32, %s10503_s14  ;;  %v10923_v35 = vpack.c.bf16 %v543_v33, %v543_v33 }
 0x3a5   :  { %604 = vrot.lane.b32.xlu1 %v10923_v35, %s10503_s14 }
 0x413   :  { %v555_v36 = vpop.permute.xlu1 %554 }
 0x414   :  { %v561_v37 = vsel %vm556_vm5, %v555_v36, 0 }
 0x415   :  { %8916 = vmatpush3.bf16.xpose.msra.mxu1 %v561_v37 }
 0x416   :  { %8927 = vmatprep.subr.bf16.mxu1 %v10501_v1 }
 0x417   :  { %v605_v38 = vpop.permute.xlu1 %604 }
 0x418   :  { %v610_v39 = vsel %vm556_vm5, %v605_v38, 0 }
 0x419   :  { %8922 = vmatpush3.bf16.xpose.msra.mxu0 %v610_v39 }
 0x41a   :  { %8933 = vmatprep.subr.bf16.mxu0 %v10501_v1 }
 0x41c   :  { %8918 = vmatmul.mubr.msk.bf16.vlgmr.msra.gmra.mrb[4].mxu1 %vm556_vm5, %v10919_v32 }
 0x41d   :  { %8929 = vmatprep.mubr.msk.bf16.mxu1 %vm10502_vm0, %v10501_v1 }
 0x420   :  { %8924 = vmatmul.mubr.msk.bf16.vlgmr.msra.gmra.mrb[4].mxu0 %vm556_vm5, %v10923_v35 }
 0x421   :  { %8935 = vmatprep.mubr.msk.bf16.mxu0 %vm10502_vm0, %v10501_v1 }
 0x4ef   :  { %v597_v40 = vpop.f32.mrb[4].mxu1 }
 0x4f0   :  { %v652_v41 = vmul.f32 0.35355338, %v597_v40  ;;  %v8919_v42 = vpop.f32.mrb[5].mxu1 }
 0x4f1   :  { %v600_v43 = vpop.f32.mrb[6].mxu1 }
 0x4f2   :  { %v8920_v44 = vpop.f32.mrb[7].mxu1  ;;  %v654_v45 = vsel %vm556_vm5, %v652_v41, -inf }
 0x4f3   :  { %v646_v46 = vpop.f32.mrb[4].mxu0  ;;  %655 = vmax.xlane.f32.xlu0 %v654_v45 }
 0x4f4   :  { %v653_v47 = vmul.f32 0.35355338, %v646_v46  ;;  %v8925_v48 = vpop.f32.mrb[5].mxu0 }
 0x4f5   :  { %v649_v49 = vpop.f32.mrb[6].mxu0 }
 0x4f6   :  { %v8926_v50 = vpop.f32.mrb[7].mxu0  ;;  %v657_v51 = vsel %vm556_vm5, %v653_v47, -inf }
 0x4f7   :  { %658 = vmax.xlane.f32.xlu1 %v657_v51 }
 0x508   :  { %678 = vrot.lane.b32.xlu1 %v10919_v32, %s10504_s6 }
 0x50c   :  { %779 = vrot.lane.b32.xlu1 %v10919_v32, %s10505_s15 }
 0x510   :  { %829 = vrot.lane.b32.xlu1 %v10923_v35, %s10505_s15 }
 0x514   :  { %827 = vrot.lane.b32.xlu1 %v10923_v35, %s10506_s9 }
 0x580   :  { %v656_v52 = vpop.xlane.xlu0 %655 }
 0x581   :  { %v660_v53 = vsub.f32 %v652_v41, %v656_v52 }
 0x583   :  { %v662_v54 = vmul.f32 1.442695, %v660_v53 }
 0x584   :  { %v659_v55 = vpop.xlane.xlu1 %658 }
 0x585   :  { %9832 = vpow2.f32 %v662_v54  ;;  %v661_v56 = vsub.f32 %v653_v47, %v659_v55 }
 0x587   :  { %v664_v57 = vmul.f32 1.442695, %v661_v56 }
 0x588   :  { %v679_v58 = vpop.permute.xlu1 %678 }
 0x589   :  { %9834 = vpow2.f32 %v664_v57  ;;  %v685_v59 = vsel %vm683_vm6, %v679_v58, 0 }
 0x58a   :  { %8928 = vmatpush3.bf16.msra.mxu1 %v685_v59 }
 0x58b   :  { %8939 = vmatprep.subr.bf16.mxu1 %v10501_v1 }
 0x58c   :  { %v780_v6 = vpop.permute.xlu1 %779 }
 0x58d   :  { %v785_v12 = vsel %vm556_vm5, %v780_v6, 0 }
 0x58f   :  { %v9833_v60 = vpop.eup %9832 }
 0x590   :  { %v666_v61 = vsel %vm556_vm5, %v9833_v60, 0.0  ;;  %v830_v14 = vpop.permute.xlu1 %829 }
 0x591   :  { %667 = vadd.xlane.f32.xlu0 %v666_v61  ;;  %v835_v16 = vsel %vm556_vm5, %v830_v14, 0 }
 0x593   :  { %v9835_v62 = vpop.eup %9834 }
 0x594   :  { %v669_v63 = vsel %vm556_vm5, %v9835_v62, 0.0  ;;  %v828_v18 = vpop.permute.xlu1 %827 }
 0x595   :  { %670 = vadd.xlane.f32.xlu0 %v669_v63 }
 0x5ab   :  { %727 = vrot.lane.b32.xlu0 %v10923_v35, %s10504_s6 }
 0x5af   :  { %777 = vrot.lane.b32.xlu0 %v10919_v32, %s10506_s9 }
 0x61e   :  { %v668_v0 = vpop.xlane.xlu0 %667 }
 0x61f   :  { %9836 = vrcp.f32 %v668_v0 }
 0x622   :  { %v671_v2 = vpop.xlane.xlu0 %670 }
 0x623   :  { %9838 = vrcp.f32 %v671_v2 }
 0x626   :  { %v728_v3 = vpop.permute.xlu0 %727 }
 0x627   :  { %v733_v4 = vsel %vm683_vm6, %v728_v3, 0 }
 0x628   :  { %8934 = vmatpush3.bf16.msra.mxu0 %v733_v4 }
 0x629   :  { %v9837_v5 = vpop.eup %9836  ;;  %8945 = vmatprep.subr.bf16.mxu0 %v10501_v1 }
 0x62a   :  { %v674_v7 = vmul.f32 %v9837_v5, %v9833_v60  ;;  %v778_v17 = vpop.permute.xlu0 %777 }
 0x62c   :  { %v676_v10 = vpack.c.bf16 %v674_v7, %v674_v7 }
 0x62d   :  { %v9839_v11 = vpop.eup %9838 }
 0x62e   :  { %8930 = vmatmul.mubr.msk.bf16.vlgmr.msra.gmra.mrb[8].mxu1 %vm556_vm5, %v676_v10  ;;  %v675_v13 = vmul.f32 %v9839_v11, %v9835_v62 }
 0x62f   :  { %8940 = vmatpush3.bf16.xpose.msra.mxu1 %v785_v12  ;;  %8941 = vmatprep.mubr.msk.bf16.mxu1 %vm10502_vm0, %v10501_v1 }
 0x630   :  { %v677_v15 = vpack.c.bf16 %v675_v13, %v675_v13  ;;  %8951 = vmatprep.subr.bf16.mxu1 %v10501_v1 }
 0x632   :  { %8936 = vmatmul.mubr.msk.bf16.vlgmr.msra.gmra.mrb[8].mxu0 %vm556_vm5, %v677_v15 }
 0x633   :  { %8946 = vmatpush3.bf16.xpose.msra.mxu0 %v835_v16  ;;  %8947 = vmatprep.mubr.msk.bf16.mxu0 %vm10502_vm0, %v10501_v1 }
 0x634   :  { %8957 = vmatprep.subr.bf16.mxu0 %v10501_v1 }
 0x636   :  { %8942 = vmatmul.mubr.msk.bf16.vlgmr.msra.gmra.mrb[12].mxu1 %vm556_vm5, %v778_v17 }
 0x637   :  { %8953 = vmatprep.mubr.msk.bf16.mxu1 %vm10502_vm0, %v10501_v1 }
 0x63a   :  { %8948 = vmatmul.mubr.msk.bf16.vlgmr.msra.gmra.mrb[12].mxu0 %vm556_vm5, %v828_v18 }
 0x63b   :  { %8959 = vmatprep.mubr.msk.bf16.mxu0 %vm10502_vm0, %v10501_v1 }
 0x701   :  { %v721_v19 = vpop.f32.mrb[8].mxu1 }
 0x702   :  { %775 = vst.msk [vmem:[#allocation2] sm:$0xff] %vm556_vm5, %v721_v19  ;;  %v8931_v20 = vpop.f32.mrb[9].mxu1 }
 0x703   :  { %v724_v21 = vpop.f32.mrb[10].mxu1 }
 0x704   :  { %v8932_v22 = vpop.f32.mrb[11].mxu1 }
 0x705   :  { %v769_v23 = vpop.f32.mrb[8].mxu0 }
 0x706   :  { %776 = vst.msk [vmem:[#allocation2 + $0x8] sm:$0xff] %vm556_vm5, %v769_v23  ;;  %v8937_v26 = vpop.f32.mrb[9].mxu0 }
 0x707   :  { %v772_v27 = vpop.f32.mrb[10].mxu0 }
 0x708   :  { %v8938_v28 = vpop.f32.mrb[11].mxu0 }
 0x709   :  { %v821_v29 = vpop.f32.mrb[12].mxu1 }
 0x70a   :  { %v877_v30 = vmul.f32 0.35355338, %v821_v29  ;;  %v8943_v31 = vpop.f32.mrb[13].mxu1 }
 0x70b   :  { %v824_v33 = vpop.f32.mrb[14].mxu1 }
 0x70c   :  { %v8944_v34 = vpop.f32.mrb[15].mxu1  ;;  %v879_v36 = vsel %vm556_vm5, %v877_v30, -inf }
 0x70d   :  { %v871_v37 = vpop.f32.mrb[12].mxu0  ;;  %880 = vmax.xlane.f32.xlu0 %v879_v36 }
 0x70e   :  { %v878_v38 = vmul.f32 0.35355338, %v871_v37  ;;  %v8949_v39 = vpop.f32.mrb[13].mxu0 }
 0x70f   :  { %v874_v40 = vpop.f32.mrb[14].mxu0 }
 0x710   :  { %v8950_v41 = vpop.f32.mrb[15].mxu0  ;;  %v882_v42 = vsel %vm556_vm5, %v878_v38, -inf }
 0x711   :  { %883 = vmax.xlane.f32.xlu1 %v882_v42 }
 0x722   :  { %903 = vrot.lane.b32.xlu1 %v10919_v32, %s10507_s16 }
 0x726   :  { %1012 = vrot.lane.b32.xlu1 %v10919_v32, %s10508_s30 }
 0x72a   :  { %1062 = vrot.lane.b32.xlu1 %v10923_v35, %s10508_s30 }
 0x72e   :  { %1060 = vrot.lane.b32.xlu1 %v10923_v35, %s10509_s18 }
 0x79a   :  { %v881_v43 = vpop.xlane.xlu0 %880 }
 0x79b   :  { %v885_v44 = vsub.f32 %v877_v30, %v881_v43 }
 0x79d   :  { %v887_v45 = vmul.f32 1.442695, %v885_v44 }
 0x79e   :  { %v884_v46 = vpop.xlane.xlu1 %883 }
 0x79f   :  { %9840 = vpow2.f32 %v887_v45  ;;  %v886_v47 = vsub.f32 %v878_v38, %v884_v46 }
 0x7a1   :  { %v889_v48 = vmul.f32 1.442695, %v886_v47 }
 0x7a2   :  { %v904_v49 = vpop.permute.xlu1 %903 }
 0x7a3   :  { %9842 = vpow2.f32 %v889_v48  ;;  %v909_v50 = vsel %vm683_vm6, %v904_v49, 0 }
 0x7a4   :  { %8952 = vmatpush3.bf16.msra.mxu1 %v909_v50 }
 0x7a5   :  { %8963 = vmatprep.subr.bf16.mxu1 %v10501_v1 }
 0x7a6   :  { %v1013_v60 = vpop.permute.xlu1 %1012 }
 0x7a7   :  { %v1018_v0 = vsel %vm556_vm5, %v1013_v60, 0 }
 0x7a9   :  { %v9841_v51 = vpop.eup %9840 }
 0x7aa   :  { %v891_v52 = vsel %vm556_vm5, %v9841_v51, 0.0  ;;  %v1063_v3 = vpop.permute.xlu1 %1062 }
 0x7ab   :  { %892 = vadd.xlane.f32.xlu0 %v891_v52  ;;  %v1068_v5 = vsel %vm556_vm5, %v1063_v3, 0 }
 0x7ad   :  { %v9843_v53 = vpop.eup %9842 }
 0x7ae   :  { %v894_v54 = vsel %vm556_vm5, %v9843_v53, 0.0  ;;  %v1061_v7 = vpop.permute.xlu1 %1060 }
 0x7af   :  { %895 = vadd.xlane.f32.xlu0 %v894_v54 }
 0x7c5   :  { %951 = vrot.lane.b32.xlu0 %v10923_v35, %s10507_s16 }
 0x7c9   :  { %1010 = vrot.lane.b32.xlu0 %v10919_v32, %s10509_s18 }
 0x838   :  { %v893_v55 = vpop.xlane.xlu0 %892 }
 0x839   :  { %9844 = vrcp.f32 %v893_v55 }
 0x83c   :  { %v896_v56 = vpop.xlane.xlu0 %895 }
 0x83d   :  { %9846 = vrcp.f32 %v896_v56 }
 0x840   :  { %v952_v57 = vpop.permute.xlu0 %951 }
 0x841   :  { %v957_v58 = vsel %vm683_vm6, %v952_v57, 0 }
 0x842   :  { %8958 = vmatpush3.bf16.msra.mxu0 %v957_v58 }
 0x843   :  { %v9845_v59 = vpop.eup %9844  ;;  %8969 = vmatprep.subr.bf16.mxu0 %v10501_v1 }
 0x844   :  { %v899_v61 = vmul.f32 %v9845_v59, %v9841_v51  ;;  %v1011_v6 = vpop.permute.xlu0 %1010 }
 0x846   :  { %v901_v62 = vpack.c.bf16 %v899_v61, %v899_v61 }
 0x847   :  { %v9847_v63 = vpop.eup %9846 }
 0x848   :  { %8954 = vmatmul.mubr.msk.bf16.vlgmr.msra.gmra.mrb[16].mxu1 %vm556_vm5, %v901_v62  ;;  %v900_v2 = vmul.f32 %v9847_v63, %v9843_v53 }
 0x849   :  { %8964 = vmatpush3.bf16.xpose.msra.mxu1 %v1018_v0  ;;  %8965 = vmatprep.mubr.msk.bf16.mxu1 %vm10502_vm0, %v10501_v1 }
 0x84a   :  { %v902_v4 = vpack.c.bf16 %v900_v2, %v900_v2  ;;  %8975 = vmatprep.subr.bf16.mxu1 %v10501_v1 }
 0x84c   :  { %8960 = vmatmul.mubr.msk.bf16.vlgmr.msra.gmra.mrb[16].mxu0 %vm556_vm5, %v902_v4 }
 0x84d   :  { %8970 = vmatpush3.bf16.xpose.msra.mxu0 %v1068_v5  ;;  %8971 = vmatprep.mubr.msk.bf16.mxu0 %vm10502_vm0, %v10501_v1 }
 0x84e   :  { %8981 = vmatprep.subr.bf16.mxu0 %v10501_v1 }
 0x850   :  { %8966 = vmatmul.mubr.msk.bf16.vlgmr.msra.gmra.mrb[20].mxu1 %vm556_vm5, %v1011_v6 }
 0x851   :  { %8977 = vmatprep.mubr.msk.bf16.mxu1 %vm10502_vm0, %v10501_v1 }
 0x854   :  { %8972 = vmatmul.mubr.msk.bf16.vlgmr.msra.gmra.mrb[20].mxu0 %vm556_vm5, %v1061_v7 }
 0x855   :  { %8983 = vmatprep.mubr.msk.bf16.mxu0 %vm10502_vm0, %v10501_v1 }
 0x91b   :  { %v11013_v10 = vpop.f32.mrb[16].mxu1 }
 0x91c   :  { %v8955_v11 = vpop.f32.mrb[17].mxu1 }
 0x91d   :  { %v948_v12 = vpop.f32.mrb[18].mxu1 }
 0x91e   :  { %v8956_v13 = vpop.f32.mrb[19].mxu1 }
 0x91f   :  { %v11015_v14 = vpop.f32.mrb[16].mxu0 }
 0x920   :  { %v8961_v15 = vpop.f32.mrb[17].mxu0 }
 0x921   :  { %v996_v16 = vpop.f32.mrb[18].mxu0 }
 0x922   :  { %v8962_v17 = vpop.f32.mrb[19].mxu0 }
 0x923   :  { %v1054_v18 = vpop.f32.mrb[20].mxu1 }
 0x924   :  { %v1110_v19 = vmul.f32 0.35355338, %v1054_v18  ;;  %v8967_v20 = vpop.f32.mrb[21].mxu1 }
 0x925   :  { %v1057_v21 = vpop.f32.mrb[22].mxu1 }
 0x926   :  { %v8968_v22 = vpop.f32.mrb[23].mxu1  ;;  %v1112_v23 = vsel %vm556_vm5, %v1110_v19, -inf }
 0x927   :  { %v1104_v26 = vpop.f32.mrb[20].mxu0  ;;  %1113 = vmax.xlane.f32.xlu0 %v1112_v23 }
 0x928   :  { %v1111_v27 = vmul.f32 0.35355338, %v1104_v26  ;;  %v8973_v28 = vpop.f32.mrb[21].mxu0 }
 0x929   :  { %v1107_v29 = vpop.f32.mrb[22].mxu0 }
 0x92a   :  { %v8974_v30 = vpop.f32.mrb[23].mxu0  ;;  %v1115_v31 = vsel %vm556_vm5, %v1111_v27, -inf }
 0x92b   :  { %1116 = vmax.xlane.f32.xlu1 %v1115_v31 }
 0x93c   :  { %1136 = vrot.lane.b32.xlu1 %v10919_v32, %s10510_s22 }
 0x940   :  { %1245 = vrot.lane.b32.xlu1 %v10919_v32, %s10511_s23 }
 0x944   :  { %1295 = vrot.lane.b32.xlu1 %v10923_v35, %s10511_s23 }
 0x948   :  { %1293 = vrot.lane.b32.xlu1 %v10923_v35, %s10512_s19 }
 0x9b4   :  { %v1114_v33 = vpop.xlane.xlu0 %1113 }
 0x9b5   :  { %v1118_v34 = vsub.f32 %v1110_v19, %v1114_v33 }
 0x9b7   :  { %v1120_v36 = vmul.f32 1.442695, %v1118_v34 }
 0x9b8   :  { %v1117_v37 = vpop.xlane.xlu1 %1116 }
 0x9b9   :  { %9848 = vpow2.f32 %v1120_v36  ;;  %v1119_v38 = vsub.f32 %v1111_v27, %v1117_v37 }
 0x9bb   :  { %v1122_v39 = vmul.f32 1.442695, %v1119_v38 }
 0x9bc   :  { %v1137_v40 = vpop.permute.xlu1 %1136 }
 0x9bd   :  { %9850 = vpow2.f32 %v1122_v39  ;;  %v1142_v41 = vsel %vm683_vm6, %v1137_v40, 0 }
 0x9be   :  { %8976 = vmatpush3.bf16.msra.mxu1 %v1142_v41 }
 0x9bf   :  { %8987 = vmatprep.subr.bf16.mxu1 %v10501_v1 }
 0x9c0   :  { %v1246_v51 = vpop.permute.xlu1 %1245 }
 0x9c1   :  { %v1251_v55 = vsel %vm556_vm5, %v1246_v51, 0 }
 0x9c3   :  { %v9849_v42 = vpop.eup %9848 }
 0x9c4   :  { %v1124_v43 = vsel %vm556_vm5, %v9849_v42, 0.0  ;;  %v1296_v57 = vpop.permute.xlu1 %1295 }
 0x9c5   :  { %1125 = vadd.xlane.f32.xlu0 %v1124_v43  ;;  %v1301_v59 = vsel %vm556_vm5, %v1296_v57, 0 }
 0x9c7   :  { %v9851_v44 = vpop.eup %9850 }
 0x9c8   :  { %v1127_v45 = vsel %vm556_vm5, %v9851_v44, 0.0  ;;  %v1294_v61 = vpop.permute.xlu1 %1293 }
 0x9c9   :  { %1128 = vadd.xlane.f32.xlu0 %v1127_v45 }
 0x9df   :  { %1184 = vrot.lane.b32.xlu0 %v10923_v35, %s10510_s22 }
 0x9e3   :  { %1243 = vrot.lane.b32.xlu0 %v10919_v32, %s10512_s19 }
 0xa52   :  { %v1126_v46 = vpop.xlane.xlu0 %1125 }
 0xa53   :  { %9852 = vrcp.f32 %v1126_v46 }
 0xa56   :  { %v1129_v47 = vpop.xlane.xlu0 %1128 }
 0xa57   :  { %9854 = vrcp.f32 %v1129_v47 }
 0xa5a   :  { %v1185_v48 = vpop.permute.xlu0 %1184 }
 0xa5b   :  { %v1190_v49 = vsel %vm683_vm6, %v1185_v48, 0 }
 0xa5c   :  { %8982 = vmatpush3.bf16.msra.mxu0 %v1190_v49  ;;  %v9776_v49 = vld [vmem:[%s12303_s20] sm:$0xff]  }
 0xa5d   :  { %v9853_v50 = vpop.eup %9852  ;;  %8993 = vmatprep.subr.bf16.mxu0 %v10501_v1 }
 0xa5e   :  { %v1132_v52 = vmul.f32 %v9853_v50, %v9849_v42  ;;  %v1244_v60 = vpop.permute.xlu0 %1243  ;;  %v9777_v50 = vld [vmem:[%s12303_s20 + $0x8] sm:$0xff]  }
 0xa60   :  { %v1134_v53 = vpack.c.bf16 %v1132_v52, %v1132_v52 }
 0xa61   :  { %v9855_v54 = vpop.eup %9854 }
 0xa62   :  { %8978 = vmatmul.mubr.msk.bf16.vlgmr.msra.gmra.mrb[24].mxu1 %vm556_vm5, %v1134_v53  ;;  %v1133_v56 = vmul.f32 %v9855_v54, %v9851_v44 }
 0xa63   :  { %8988 = vmatpush3.bf16.xpose.msra.mxu1 %v1251_v55  ;;  %8989 = vmatprep.mubr.msk.bf16.mxu1 %vm10502_vm0, %v10501_v1 }
 0xa64   :  { %v1135_v58 = vpack.c.bf16 %v1133_v56, %v1133_v56  ;;  %8999 = vmatprep.subr.bf16.mxu1 %v10501_v1 }
 0xa66   :  { %8984 = vmatmul.mubr.msk.bf16.vlgmr.msra.gmra.mrb[24].mxu0 %vm556_vm5, %v1135_v58 }
 0xa67   :  { %8994 = vmatpush3.bf16.xpose.msra.mxu0 %v1301_v59  ;;  %8995 = vmatprep.mubr.msk.bf16.mxu0 %vm10502_vm0, %v10501_v1 }
 0xa68   :  { %9005 = vmatprep.subr.bf16.mxu0 %v10501_v1 }
 0xa6a   :  { %8990 = vmatmul.mubr.msk.bf16.vlgmr.msra.gmra.mrb[28].mxu1 %vm556_vm5, %v1244_v60 }
 0xa6b   :  { %9001 = vmatprep.mubr.msk.bf16.mxu1 %vm10502_vm0, %v10501_v1 }
 0xa6e   :  { %8996 = vmatmul.mubr.msk.bf16.vlgmr.msra.gmra.mrb[28].mxu0 %vm556_vm5, %v1294_v61 }
 0xa6f   :  { %9007 = vmatprep.mubr.msk.bf16.mxu0 %vm10502_vm0, %v10501_v1 }
 0xb35   :  { %v1178_v62 = vpop.f32.mrb[24].mxu1 }
 0xb36   :  { %v8979_v63 = vpop.f32.mrb[25].mxu1 }
 0xb37   :  { %v1181_v0 = vpop.f32.mrb[26].mxu1 }
 0xb38   :  { %v8980_v2 = vpop.f32.mrb[27].mxu1  ;;  %v8355_v0 = vld [vmem:[%s12304_s26] ss:$0 sm:$0xff] }
 0xb39   :  { %v1226_v3 = vpop.f32.mrb[24].mxu0 }
 0xb3a   :  { %v8985_v4 = vpop.f32.mrb[25].mxu0 }
 0xb3b   :  { %v1229_v5 = vpop.f32.mrb[26].mxu0 }
 0xb3c   :  { %v8986_v6 = vpop.f32.mrb[27].mxu0 }
 0xb3d   :  { %v1287_v7 = vpop.f32.mrb[28].mxu1 }
 0xb3e   :  { %v1343_v11 = vmul.f32 0.35355338, %v1287_v7  ;;  %v8991_v12 = vpop.f32.mrb[29].mxu1 }
 0xb3f   :  { %v1290_v13 = vpop.f32.mrb[30].mxu1 }
 0xb40   :  { %v8992_v15 = vpop.f32.mrb[31].mxu1  ;;  %v1345_v16 = vsel %vm556_vm5, %v1343_v11, -inf }
 0xb41   :  { %v1337_v17 = vpop.f32.mrb[28].mxu0  ;;  %1346 = vmax.xlane.f32.xlu0 %v1345_v16 }
 0xb42   :  { %v1344_v18 = vmul.f32 0.35355338, %v1337_v17  ;;  %v8997_v19 = vpop.f32.mrb[29].mxu0 }
 0xb43   :  { %v1340_v20 = vpop.f32.mrb[30].mxu0 }
 0xb44   :  { %v8998_v21 = vpop.f32.mrb[31].mxu0  ;;  %v1348_v22 = vsel %vm556_vm5, %v1344_v18, -inf }
 0xb45   :  { %1349 = vmax.xlane.f32.xlu1 %v1348_v22 }
 0xb56   :  { %1369 = vrot.lane.b32.xlu1 %v10919_v32, %s10513_s17 }
 0xb5a   :  { %1001 = vrot.lane.b32.xlu1 %v11013_v10, %s10514_s25 }
 0xb5e   :  { %1003 = vrot.lane.b32.xlu1 %v11015_v14, %s10514_s25 }
 0xb62   :  { %1236 = vrot.lane.b32.xlu1 %v1226_v3, %s10484_s2 }
 0xbce   :  { %v1347_v23 = vpop.xlane.xlu0 %1346 }
 0xbcf   :  { %v1351_v26 = vsub.f32 %v1343_v11, %v1347_v23 }
 0xbd1   :  { %v1353_v27 = vmul.f32 1.442695, %v1351_v26  ;;  %v9778_v26 = vld [vmem:[%s12305_s24] sm:$0xff]  }
 0xbd2   :  { %v1350_v28 = vpop.xlane.xlu1 %1349 }
 0xbd3   :  { %9856 = vpow2.f32 %v1353_v27  ;;  %v1352_v29 = vsub.f32 %v1344_v18, %v1350_v28  ;;  %v9779_v27 = vld [vmem:[%s12305_s24 + $0x8] sm:$0xff]   ;;  %v9780_v28 = vld [vmem:[%s12306_s28] sm:$0xff]  }
 0xbd5   :  { %v1355_v30 = vmul.f32 1.442695, %v1352_v29  ;;  %v9781_v29 = vld [vmem:[%s12306_s28 + $0x8] sm:$0xff]  }
 0xbd6   :  { %v1370_v31 = vpop.permute.xlu1 %1369 }
 0xbd7   :  { %9858 = vpow2.f32 %v1355_v30  ;;  %v1375_v32 = vsel %vm683_vm6, %v1370_v31, 0 }
 0xbd8   :  { %9000 = vmatpush3.bf16.msra.mxu1 %v1375_v32 }
 0xbd9   :  { %9011 = vmatprep.subr.bf16.mxu1 %v10501_v1 }
 0xbda   :  { %v1002_v10 = vpop.permute.xlu1 %1001 }
 0xbdb   :  { %1008 = vst.msk [vmem:[#allocation2] sm:$0xff] %vm1007_vm7, %v1002_v10 }
 0xbdd   :  { %v9857_v14 = vpop.eup %9856 }
 0xbde   :  { %v1004_v33 = vpop.permute.xlu1 %1003  ;;  %v1357_v34 = vsel %vm556_vm5, %v9857_v14, 0.0 }
 0xbdf   :  { %1009 = vst.msk [vmem:[#allocation2 + $0x8] sm:$0xff] %vm1007_vm7, %v1004_v33  ;;  %1358 = vadd.xlane.f32.xlu0 %v1357_v34 }
 0xbe1   :  { %v9859_v36 = vpop.eup %9858 }
 0xbe2   :  { %v1237_v37 = vpop.permute.xlu1 %1236  ;;  %v1360_v38 = vsel %vm556_vm5, %v9859_v36, 0.0 }
 0xbe3   :  { %1242 = vst.msk [vmem:[#allocation2 + $0x8] sm:$0xff] %vm1240_vm8, %v1237_v37  ;;  %1361 = vadd.xlane.f32.xlu0 %v1360_v38  ;;  %v8359_v37 = vld [vmem:[%s12307_s0] ss:$0 sm:$0xff] }
 0xbf9   :  { %1417 = vrot.lane.b32.xlu0 %v10923_v35, %s10513_s17 }
 0xbfd   :  { %1234 = vrot.lane.b32.xlu0 %v1178_v62, %s10484_s2 }
 0xc6c   :  { %v1359_v39 = vpop.xlane.xlu0 %1358 }
 0xc6d   :  { %9860 = vrcp.f32 %v1359_v39 }
 0xc70   :  { %v1362_v40 = vpop.xlane.xlu0 %1361 }
 0xc71   :  { %9862 = vrcp.f32 %v1362_v40 }
 0xc74   :  { %v1418_v41 = vpop.permute.xlu0 %1417 }
 0xc75   :  { %v1423_v42 = vsel %vm683_vm6, %v1418_v41, 0  ;;  %v8360_v41 = vld [vmem:[#allocation5] ss:$0 sm:$0xff] }
 0xc76   :  { %9006 = vmatpush3.bf16.msra.mxu0 %v1423_v42 }
 0xc77   :  { %v9861_v43 = vpop.eup %9860  ;;  %9019 = vmatprep.subr.bf16.mxu0 %v10501_v1 }
 0xc78   :  { %v1235_v44 = vpop.permute.xlu0 %1234  ;;  %v1365_v45 = vmul.f32 %v9861_v43, %v9857_v14 }
 0xc79   :  { %1241 = vst.msk [vmem:[#allocation2] sm:$0xff] %vm1240_vm8, %v1235_v44 }
 0xc7a   :  { %v1367_v35 = vpack.c.bf16 %v1365_v45, %v1365_v45 }
 0xc7b   :  { %v9863_v46 = vpop.eup %9862 }
 0xc7c   :  { %9002 = vmatmul.mubr.msk.bf16.vlgmr.msra.gmra.mrb[32].mxu1 %vm556_vm5, %v1367_v35  ;;  %v1366_v47 = vmul.f32 %v9863_v46, %v9859_v36  ;;  %v9782_v35 = vld [vmem:[%s12306_s28 + $0x10] sm:$0xff]   ;;  %v9783_v46 = vld [vmem:[%s12306_s28 + $0x18] sm:$0xff]  }
 0xc7d   :  { %9015 = vmatprep.mubr.msk.bf16.mxu1 %vm10502_vm0, %v10501_v1  ;;  %9012 = vmatpush3.bf16.msra.mxu1 %v9776_v49 }
 0xc7e   :  { %v1368_v48 = vpack.c.bf16 %v1366_v47, %v1366_v47  ;;  %9013 = vmatprep.subr.bf16.mxu1 %v10501_v1  ;;  %v8361_v47 = vld [vmem:[%s12308_s1] ss:$0 sm:$0xff] }
 0xc80   :  { %9008 = vmatmul.mubr.msk.bf16.vlgmr.msra.gmra.mrb[32].mxu0 %vm556_vm5, %v1368_v48 }
 0xc81   :  { %9023 = vmatprep.mubr.msk.bf16.mxu0 %vm10502_vm0, %v10501_v1  ;;  %9014 = vmatpush3.bf16.msra.mxu1 %v9777_v50 }
 0xc82   :  { %9027 = vmatprep.subr.bf16.mxu1 %v10501_v1  ;;  %9020 = vmatpush3.bf16.msra.mxu0 %v9778_v26 }
 0xc83   :  { %9021 = vmatprep.subr.bf16.mxu0 %v10501_v1 }
 0xc86   :  { %9022 = vmatpush3.bf16.msra.mxu0 %v9779_v27 }
 0xc87   :  { %9039 = vmatprep.subr.bf16.mxu0 %v10501_v1 }
 0xd4f   :  { %v1411_v51 = vpop.f32.mrb[32].mxu1 }
 0xd50   :  { %1467 = vrot.lane.b32.xlu0 %v1411_v51, %s10515_s3  ;;  %v9003_v52 = vpop.f32.mrb[33].mxu1 }
 0xd51   :  { %v1414_v53 = vpop.f32.mrb[34].mxu1 }
 0xd52   :  { %v9004_v54 = vpop.f32.mrb[35].mxu1 }
 0xd53   :  { %v1459_v55 = vpop.f32.mrb[32].mxu0 }
 0xd54   :  { %1469 = vrot.lane.b32.xlu1 %v1459_v55, %s10515_s3  ;;  %v9009_v56 = vpop.f32.mrb[33].mxu0 }
 0xd55   :  { %v1462_v57 = vpop.f32.mrb[34].mxu0 }
 0xd56   :  { %v9010_v58 = vpop.f32.mrb[35].mxu0  ;;  %v8365_v57 = vld [vmem:[%s12309_s8] ss:$0 sm:$0xff] }
 0xdc2   :  { %v1468_v59 = vpop.permute.xlu0 %1467 }
 0xdc3   :  { %1474 = vst.msk [vmem:[#allocation2] sm:$0xff] %vm1473_vm9, %v1468_v59 }
 0xdc6   :  { %v1470_v60 = vpop.permute.xlu1 %1469 }
 0xdc7   :  { %1475 = vst.msk [vmem:[#allocation2 + $0x8] sm:$0xff] %vm1473_vm9, %v1470_v60 }
 0xdca   :  { %v1476_v61 = vld [vmem:[#allocation2] sm:$0xff] }
 0xdce   :  { %v1477_v62 = vld [vmem:[#allocation2 + $0x8] sm:$0xff] }
 0xdcf   :  { %v1478_v63 = vpack.c.bf16 %v1477_v62, %v1476_v61 }
 0xdd1   :  { %9016 = vmatmul.mubr.msk.bf16.vlgmr.msra.gmra.mrb[36].mxu1 %vm501_vm4, %v1478_v63 }
 0xdd2   :  { %9035 = vmatprep.mubr.msk.bf16.mxu1 %vm10502_vm0, %v10501_v1  ;;  %9028 = vmatpush3.bf16.msra.mxu1 %v9780_v28  ;;  %v8371_v28 = vld [vmem:[%s12310_s12] ss:$0 sm:$0xff] }
 0xdd3   :  { %9029 = vmatprep.subr.bf16.mxu1 %v10501_v1 }
 0xdd6   :  { %9030 = vmatpush3.bf16.msra.mxu1 %v9781_v29 }
 0xdd7   :  { %9031 = vmatprep.subr.bf16.mxu1 %v10501_v1 }
 0xdda   :  { %9032 = vmatpush3.bf16.msra.mxu1 %v9782_v35 }
 0xddb   :  { %9033 = vmatprep.subr.bf16.mxu1 %v10501_v1 }
 0xdde   :  { %9034 = vmatpush3.bf16.msra.mxu1 %v9783_v46 }
 0xddf   :  { %9053 = vmatprep.subr.bf16.mxu1 %v10501_v1 }
 0xea4   :  { %v1534_v2 = vpop.f32.mrb[36].mxu1 }
 0xea5   :  { %v1535_v3 = vadd.f32 %v8355_v0, %v1534_v2  ;;  %v9017_v4 = vpop.f32.mrb[37].mxu1 }
 0xea6   :  { %v1537_v5 = vpop.f32.mrb[38].mxu1 }
 0xea7   :  { %v1538_v6 = vadd.f32 %v8355_v0, %v1537_v5  ;;  %v9018_v7 = vpop.f32.mrb[39].mxu1  ;;  %v1541_v11 = vadd.f32 %v1535_v3, %v10910_v24 }
 0xea9   :  { %v1545_v12 = vsel %vm501_vm4, %v1541_v11, 0.0  ;;  %v1542_v13 = vadd.f32 %v1538_v6, %v10912_v25 }
 0xeaa   :  { %1546 = vadd.xlane.f32.xlu0 %v1545_v12 }
 0xeab   :  { %v1548_v15 = vsel %vm501_vm4, %v1542_v13, 0.0 }
 0xeac   :  { %1549 = vadd.xlane.f32.xlu1 %v1548_v15 }
 0xf37   :  { %v1547_v16 = vpop.xlane.xlu0 %1546 }
 0xf38   :  { %v1552_v17 = vmul.f32 0.03125, %v1547_v16 }
 0xf39   :  { %v1550_v18 = vpop.xlane.xlu1 %1549 }
 0xf3a   :  { %v1554_v19 = vsub.f32 %v1541_v11, %v1552_v17  ;;  %v1553_v20 = vmul.f32 0.03125, %v1550_v18 }
 0xf3c   :  { %v1555_v21 = vsub.f32 %v1542_v13, %v1553_v20  ;;  %v1556_v22 = vmul.f32 %v1554_v19, %v1554_v19  ;;  %v9785_v20 = vld [vmem:[%s12301_s11 + $0x18] sm:$0xff]  }
 0xf3e   :  { %v1558_v24 = vsel %vm501_vm4, %v1556_v22, 0.0  ;;  %v1557_v23 = vmul.f32 %v1555_v21, %v1555_v21 }
 0xf3f   :  { %1559 = vadd.xlane.f32.xlu0 %v1558_v24 }
 0xf40   :  { %v1561_v25 = vsel %vm501_vm4, %v1557_v23, 0.0 }
 0xf43   :  { %1562 = vadd.xlane.f32.xlu0 %v1561_v25 }
 0xfcc   :  { %v1560_v30 = vpop.xlane.xlu0 %1559 }
 0xfcd   :  { %v1564_v31 = vmul.f32 0.03125, %v1560_v30 }
 0xfcf   :  { %v1566_v32 = vadd.f32 1e-05, %v1564_v31 }
 0xfd0   :  { %v1563_v10 = vpop.xlane.xlu0 %1562 }
 0xfd1   :  { %9864 = vrsqrt.f32 %v1566_v32  ;;  %v1565_v14 = vmul.f32 0.03125, %v1563_v10  ;;  %v8372_v10 = vld [vmem:[%s12311_s10] ss:$0 sm:$0xff] }
 0xfd3   :  { %v1567_v33 = vadd.f32 1e-05, %v1565_v14 }
 0xfd5   :  { %9866 = vrsqrt.f32 %v1567_v33 }
 0xfdb   :  { %v9865_v34 = vpop.eup %9864 }
 0xfdc   :  { %v1570_v36 = vmul.f32 %v9865_v34, %v1554_v19  ;;  %v9784_v19 = vld [vmem:[%s12301_s11 + $0x10] sm:$0xff]   ;;  %s12317_s11 = sld [smem:[#allocation52_spill]] }
 0xfde   :  { %v1578_v39 = vmul.f32 %v8359_v37, %v1570_v36 }
 0xfdf   :  { %v9867_v38 = vpop.eup %9866 }
 0xfe0   :  { %v1571_v40 = vmul.f32 %v9867_v38, %v1555_v21  ;;  %v1586_v43 = vadd.f32 %v8360_v41, %v1578_v39 }
 0xfe2   :  { %v1579_v42 = vmul.f32 %v8359_v37, %v1571_v40  ;;  %v8377_v37 = vld [vmem:[#allocation3 + $0x1] ss:$0 sm:$0xff] }
 0xfe4   :  { %v1587_v44 = vadd.f32 %v8360_v41, %v1579_v42 }
 0xfe6   :  { %v1602_v45 = vpack.c.bf16 %v1587_v44, %v1586_v43 }
 0xfe8   :  { %9024 = vmatmul.mubr.msk.bf16.vlgmr.msra.gmra.mrb[36].mxu0 %vm501_vm4, %v1602_v45 }
 0xfe9   :  { %9043 = vmatprep.mubr.msk.bf16.mxu0 %vm10502_vm0, %v10501_v1  ;;  %9040 = vmatpush3.bf16.msra.mxu0 %v9784_v19 }
 0xfea   :  { %9041 = vmatprep.subr.bf16.mxu0 %v10501_v1 }
 0xfed   :  { %9042 = vmatpush3.bf16.msra.mxu0 %v9785_v20 }
 0xfee   :  { %9047 = vmatprep.subr.bf16.mxu0 %v10501_v1 }
0x10bb   :  { %v1658_v48 = vpop.f32.mrb[36].mxu0 }
0x10bc   :  { %v1659_v49 = vadd.f32 %v8361_v47, %v1658_v48  ;;  %v9025_v50 = vpop.f32.mrb[37].mxu0 }
0x10bd   :  { %v1661_v51 = vpop.f32.mrb[38].mxu0 }
0x10be   :  { %v1662_v52 = vadd.f32 %v8361_v47, %v1661_v51  ;;  %v9026_v53 = vpop.f32.mrb[39].mxu0  ;;  %v1665_v54 = vmax.f32 %v1659_v49, 0.0 }
0x10c0   :  { %v1666_v55 = vmax.f32 %v1662_v52, 0.0 }
0x10c2   :  { %v1667_v56 = vpack.c.bf16 %v1666_v55, %v1665_v54 }
0x10c4   :  { %9036 = vmatmul.mubr.msk.bf16.vlgmr.msra.gmra.mrb[40].mxu1 %vm428_vm3, %v1667_v56 }
0x10c5   :  { %9055 = vmatprep.mubr.msk.bf16.mxu1 %vm10502_vm0, %v10501_v1 }
0x1197   :  { %v1735_v58 = vpop.f32.mrb[40].mxu1 }
0x1198   :  { %v1736_v59 = vadd.f32 %v8365_v57, %v1735_v58  ;;  %v9037_v60 = vpop.f32.mrb[41].mxu1 }
0x1199   :  { %v1738_v61 = vpop.f32.mrb[42].mxu1 }
0x119a   :  { %v1739_v62 = vadd.f32 %v8365_v57, %v1738_v61  ;;  %v9038_v63 = vpop.f32.mrb[43].mxu1  ;;  %v1742_v0 = vadd.f32 %v1736_v59, %v1586_v43 }
0x119c   :  { %v1746_v2 = vsel %vm501_vm4, %v1742_v0, 0.0  ;;  %v1743_v3 = vadd.f32 %v1739_v62, %v1587_v44 }
0x119d   :  { %1747 = vadd.xlane.f32.xlu1 %v1746_v2 }
0x119e   :  { %v1749_v4 = vsel %vm501_vm4, %v1743_v3, 0.0 }
0x119f   :  { %1750 = vadd.xlane.f32.xlu0 %v1749_v4 }
0x122a   :  { %v1748_v5 = vpop.xlane.xlu1 %1747 }
0x122b   :  { %v1752_v6 = vmul.f32 0.03125, %v1748_v5 }
0x122c   :  { %v1751_v7 = vpop.xlane.xlu0 %1750 }
0x122d   :  { %v1754_v11 = vsub.f32 %v1742_v0, %v1752_v6  ;;  %v1753_v12 = vmul.f32 0.03125, %v1751_v7 }
0x122f   :  { %v1755_v13 = vsub.f32 %v1743_v3, %v1753_v12  ;;  %v1756_v15 = vmul.f32 %v1754_v11, %v1754_v11 }
0x1231   :  { %v1758_v16 = vsel %vm501_vm4, %v1756_v15, 0.0  ;;  %v1757_v17 = vmul.f32 %v1755_v13, %v1755_v13 }
0x1232   :  { %1759 = vadd.xlane.f32.xlu1 %v1758_v16 }
0x1233   :  { %v1761_v18 = vsel %vm501_vm4, %v1757_v17, 0.0 }
0x1234   :  { %1762 = vadd.xlane.f32.xlu0 %v1761_v18 }
0x12bf   :  { %v1760_v21 = vpop.xlane.xlu1 %1759 }
0x12c0   :  { %v1764_v22 = vmul.f32 0.03125, %v1760_v21 }
0x12c1   :  { %v1763_v24 = vpop.xlane.xlu0 %1762 }
0x12c2   :  { %v1766_v23 = vadd.f32 1e-05, %v1764_v22  ;;  %v1765_v25 = vmul.f32 0.03125, %v1763_v24 }
0x12c4   :  { %9868 = vrsqrt.f32 %v1766_v23  ;;  %v1767_v26 = vadd.f32 1e-05, %v1765_v25 }
0x12c6   :  { %9870 = vrsqrt.f32 %v1767_v26 }
0x12ce   :  { %v9869_v27 = vpop.eup %9868 }
0x12cf   :  { %v1770_v29 = vmul.f32 %v9869_v27, %v1754_v11 }
0x12d0   :  { %v9871_v30 = vpop.eup %9870 }
0x12d1   :  { %v1778_v31 = vmul.f32 %v8371_v28, %v1770_v29  ;;  %v1771_v32 = vmul.f32 %v9871_v30, %v1755_v13 }
0x12d3   :  { %v1779_v14 = vmul.f32 %v8371_v28, %v1771_v32  ;;  %v11130_v33 = vadd.f32 %v8372_v10, %v1778_v31 }
0x12d5   :  { %v11132_v34 = vadd.f32 %v8372_v10, %v1779_v14 }
0x12d7   :  { %v1793_v36 = vpack.c.bf16 %v11132_v34, %v11130_v33 }
0x12d9   :  { %9044 = vmatmul.mubr.msk.bf16.vlgmr.msra.gmra.mrb[40].mxu0 %vm501_vm4, %v1793_v36 }
0x12da   :  { %9049 = vmatprep.mubr.msk.bf16.mxu0 %vm10502_vm0, %v10501_v1 }
0x13ac   :  { %v1851_v38 = vpop.f32.mrb[40].mxu0 }
0x13ad   :  { %v1852_v39 = vadd.f32 %v8377_v37, %v1851_v38  ;;  %v9045_v40 = vpop.f32.mrb[41].mxu0 }
0x13ae   :  { %v1854_v41 = vpop.f32.mrb[42].mxu0 }
0x13af   :  { %v11139_v42 = vpack.c.bf16 %v1852_v39, %v1852_v39  ;;  %v1855_v43 = vadd.f32 %v8377_v37, %v1854_v41  ;;  %v9046_v44 = vpop.f32.mrb[43].mxu0 }
0x13b1   :  { %v11141_v45 = vpack.c.bf16 %v1855_v43, %v1855_v43  ;;  %1868 = vrot.lane.b32.xlu1 %v11139_v42, %s10503_s14 }
0x13b3   :  { %1917 = vrot.lane.b32.xlu0 %v11141_v45, %s10503_s14 }
0x1423   :  { %v1869_v35 = vpop.permute.xlu1 %1868 }
0x1424   :  { %v1874_v46 = vsel %vm556_vm5, %v1869_v35, 0 }
0x1425   :  { %9048 = vmatpush3.bf16.xpose.msra.mxu0 %v1874_v46  ;;  %v1918_v47 = vpop.permute.xlu0 %1917 }
0x1426   :  { %v1923_v48 = vsel %vm556_vm5, %v1918_v47, 0  ;;  %9059 = vmatprep.subr.bf16.mxu0 %v10501_v1 }
0x1427   :  { %9054 = vmatpush3.bf16.xpose.msra.mxu1 %v1923_v48 }
0x1428   :  { %9065 = vmatprep.subr.bf16.mxu1 %v10501_v1 }
0x142c   :  { %9050 = vmatmul.mubr.msk.bf16.vlgmr.msra.gmra.mrb[44].mxu0 %vm556_vm5, %v11139_v42 }
0x142d   :  { %9061 = vmatprep.mubr.msk.bf16.mxu0 %vm10502_vm0, %v10501_v1 }
0x142e   :  { %9056 = vmatmul.mubr.msk.bf16.vlgmr.msra.gmra.mrb[44].mxu1 %vm556_vm5, %v11141_v45 }
0x142f   :  { %9067 = vmatprep.mubr.msk.bf16.mxu1 %vm10502_vm0, %v10501_v1 }
0x14ff   :  { %v1910_v49 = vpop.f32.mrb[44].mxu0 }
0x1500   :  { %v1965_v50 = vmul.f32 0.35355338, %v1910_v49  ;;  %v9051_v51 = vpop.f32.mrb[45].mxu0 }
0x1501   :  { %v1913_v52 = vpop.f32.mrb[46].mxu0  ;;  %v1959_v53 = vpop.f32.mrb[44].mxu1 }
0x1502   :  { %v1966_v54 = vmul.f32 0.35355338, %v1959_v53  ;;  %v9052_v55 = vpop.f32.mrb[47].mxu0  ;;  %v9057_v56 = vpop.f32.mrb[45].mxu1  ;;  %v1967_v57 = vsel %vm556_vm5, %v1965_v50, -inf }
0x1503   :  { %1968 = vmax.xlane.f32.xlu1 %v1967_v57  ;;  %v1962_v58 = vpop.f32.mrb[46].mxu1 }
0x1504   :  { %v9058_v59 = vpop.f32.mrb[47].mxu1  ;;  %v1970_v60 = vsel %vm556_vm5, %v1966_v54, -inf }
0x1505   :  { %1971 = vmax.xlane.f32.xlu0 %v1970_v60 }
0x1514   :  { %1991 = vrot.lane.b32.xlu1 %v11139_v42, %s10504_s6 }
0x1590   :  { %v1969_v61 = vpop.xlane.xlu1 %1968 }
0x1591   :  { %v1973_v62 = vsub.f32 %v1965_v50, %v1969_v61 }
0x1592   :  { %v1972_v63 = vpop.xlane.xlu0 %1971 }
0x1593   :  { %v1975_v0 = vmul.f32 1.442695, %v1973_v62  ;;  %v1974_v2 = vsub.f32 %v1966_v54, %v1972_v63 }
0x1594   :  { %v1992_v3 = vpop.permute.xlu1 %1991 }
0x1595   :  { %9872 = vpow2.f32 %v1975_v0  ;;  %v1977_v4 = vmul.f32 1.442695, %v1974_v2  ;;  %v1997_v5 = vsel %vm683_vm6, %v1992_v3, 0 }
0x1596   :  { %9060 = vmatpush3.bf16.msra.mxu0 %v1997_v5 }
0x1597   :  { %9874 = vpow2.f32 %v1977_v4  ;;  %9071 = vmatprep.subr.bf16.mxu0 %v10501_v1 }
0x159f   :  { %v9873_v6 = vpop.eup %9872 }
0x15a0   :  { %v1979_v7 = vsel %vm556_vm5, %v9873_v6, 0.0 }
0x15a1   :  { %v9875_v11 = vpop.eup %9874  ;;  %1980 = vadd.xlane.f32.xlu1 %v1979_v7 }
0x15a2   :  { %v1982_v12 = vsel %vm556_vm5, %v9875_v11, 0.0 }
0x15a3   :  { %1983 = vadd.xlane.f32.xlu0 %v1982_v12 }
0x15b2   :  { %2091 = vrot.lane.b32.xlu1 %v11139_v42, %s10505_s15 }
0x15b6   :  { %2141 = vrot.lane.b32.xlu1 %v11141_v45, %s10505_s15 }
0x15b9   :  { %2039 = vrot.lane.b32.xlu0 %v11141_v45, %s10504_s6 }
0x15ba   :  { %2139 = vrot.lane.b32.xlu1 %v11141_v45, %s10506_s9 }
0x15bd   :  { %2089 = vrot.lane.b32.xlu0 %v11139_v42, %s10506_s9 }
0x162e   :  { %v1981_v13 = vpop.xlane.xlu1 %1980 }
0x162f   :  { %9876 = vrcp.f32 %v1981_v13 }
0x1630   :  { %v1984_v15 = vpop.xlane.xlu0 %1983 }
0x1631   :  { %9878 = vrcp.f32 %v1984_v15 }
0x1632   :  { %v2092_v18 = vpop.permute.xlu1 %2091 }
0x1633   :  { %v2097_v25 = vsel %vm556_vm5, %v2092_v18, 0 }
0x1634   :  { %v2040_v16 = vpop.permute.xlu0 %2039 }
0x1635   :  { %v2045_v17 = vsel %vm683_vm6, %v2040_v16, 0 }
0x1636   :  { %9066 = vmatpush3.bf16.msra.mxu1 %v2045_v17  ;;  %v2142_v23 = vpop.permute.xlu1 %2141 }
0x1637   :  { %9077 = vmatprep.subr.bf16.mxu1 %v10501_v1  ;;  %v2147_v27 = vsel %vm556_vm5, %v2142_v23, 0 }
0x1638   :  { %v2090_v28 = vpop.permute.xlu0 %2089 }
0x1639   :  { %v9877_v19 = vpop.eup %9876 }
0x163a   :  { %v1987_v20 = vmul.f32 %v9877_v19, %v9873_v6  ;;  %v2140_v29 = vpop.permute.xlu1 %2139 }
0x163b   :  { %v9879_v21 = vpop.eup %9878 }
0x163c   :  { %v1989_v22 = vpack.c.bf16 %v1987_v20, %v1987_v20  ;;  %v1988_v24 = vmul.f32 %v9879_v21, %v9875_v11 }
0x163e   :  { %9062 = vmatmul.mubr.msk.bf16.vlgmr.msra.gmra.mrb[48].mxu0 %vm556_vm5, %v1989_v22  ;;  %v1990_v26 = vpack.c.bf16 %v1988_v24, %v1988_v24 }
0x163f   :  { %9072 = vmatpush3.bf16.xpose.msra.mxu0 %v2097_v25  ;;  %9073 = vmatprep.mubr.msk.bf16.mxu0 %vm10502_vm0, %v10501_v1 }
0x1640   :  { %9068 = vmatmul.mubr.msk.bf16.vlgmr.msra.gmra.mrb[48].mxu1 %vm556_vm5, %v1990_v26  ;;  %9083 = vmatprep.subr.bf16.mxu0 %v10501_v1 }
0x1641   :  { %9078 = vmatpush3.bf16.xpose.msra.mxu1 %v2147_v27  ;;  %9079 = vmatprep.mubr.msk.bf16.mxu1 %vm10502_vm0, %v10501_v1 }
0x1642   :  { %9089 = vmatprep.subr.bf16.mxu1 %v10501_v1 }
0x1646   :  { %9074 = vmatmul.mubr.msk.bf16.vlgmr.msra.gmra.mrb[52].mxu0 %vm556_vm5, %v2090_v28 }
0x1647   :  { %9085 = vmatprep.mubr.msk.bf16.mxu0 %vm10502_vm0, %v10501_v1 }
0x1648   :  { %9080 = vmatmul.mubr.msk.bf16.vlgmr.msra.gmra.mrb[52].mxu1 %vm556_vm5, %v2140_v29 }
0x1649   :  { %9091 = vmatprep.mubr.msk.bf16.mxu1 %vm10502_vm0, %v10501_v1 }
0x1711   :  { %v2033_v30 = vpop.f32.mrb[48].mxu0 }
0x1712   :  { %2087 = vst.msk [vmem:[#allocation2] sm:$0xff] %vm556_vm5, %v2033_v30  ;;  %v9063_v31 = vpop.f32.mrb[49].mxu0 }
0x1713   :  { %v2036_v32 = vpop.f32.mrb[50].mxu0  ;;  %v2081_v10 = vpop.f32.mrb[48].mxu1 }
0x1714   :  { %2088 = vst.msk [vmem:[#allocation2 + $0x8] sm:$0xff] %vm556_vm5, %v2081_v10  ;;  %v9064_v14 = vpop.f32.mrb[51].mxu0  ;;  %v9069_v36 = vpop.f32.mrb[49].mxu1 }
0x1715   :  { %v2084_v37 = vpop.f32.mrb[50].mxu1 }
0x1716   :  { %v9070_v38 = vpop.f32.mrb[51].mxu1 }
0x1719   :  { %v2133_v39 = vpop.f32.mrb[52].mxu0 }
0x171a   :  { %v2189_v40 = vmul.f32 0.35355338, %v2133_v39  ;;  %v9075_v41 = vpop.f32.mrb[53].mxu0 }
0x171b   :  { %v2136_v43 = vpop.f32.mrb[54].mxu0  ;;  %v2183_v44 = vpop.f32.mrb[52].mxu1 }
0x171c   :  { %v2190_v35 = vmul.f32 0.35355338, %v2183_v44  ;;  %v9076_v46 = vpop.f32.mrb[55].mxu0  ;;  %v9081_v47 = vpop.f32.mrb[53].mxu1  ;;  %v2191_v48 = vsel %vm556_vm5, %v2189_v40, -inf }
0x171d   :  { %2192 = vmax.xlane.f32.xlu0 %v2191_v48  ;;  %v2186_v49 = vpop.f32.mrb[54].mxu1 }
0x171e   :  { %v9082_v50 = vpop.f32.mrb[55].mxu1  ;;  %v2194_v51 = vsel %vm556_vm5, %v2190_v35, -inf }
0x171f   :  { %2195 = vmax.xlane.f32.xlu1 %v2194_v51 }
0x1730   :  { %2215 = vrot.lane.b32.xlu1 %v11139_v42, %s10507_s16 }
0x1734   :  { %2323 = vrot.lane.b32.xlu1 %v11139_v42, %s10508_s30 }
0x1738   :  { %2373 = vrot.lane.b32.xlu1 %v11141_v45, %s10508_s30 }
0x173c   :  { %2371 = vrot.lane.b32.xlu1 %v11141_v45, %s10509_s18 }
0x17aa   :  { %v2193_v52 = vpop.xlane.xlu0 %2192 }
0x17ab   :  { %v2197_v53 = vsub.f32 %v2189_v40, %v2193_v52 }
0x17ac   :  { %v2196_v54 = vpop.xlane.xlu1 %2195 }
0x17ad   :  { %v2199_v55 = vmul.f32 1.442695, %v2197_v53  ;;  %v2198_v56 = vsub.f32 %v2190_v35, %v2196_v54 }
0x17af   :  { %9880 = vpow2.f32 %v2199_v55  ;;  %v2201_v57 = vmul.f32 1.442695, %v2198_v56 }
0x17b0   :  { %v2216_v58 = vpop.permute.xlu1 %2215 }
0x17b1   :  { %9882 = vpow2.f32 %v2201_v57  ;;  %v2221_v59 = vsel %vm683_vm6, %v2216_v58, 0 }
0x17b2   :  { %9084 = vmatpush3.bf16.msra.mxu0 %v2221_v59 }
0x17b3   :  { %9095 = vmatprep.subr.bf16.mxu0 %v10501_v1 }
0x17b4   :  { %v2324_v6 = vpop.permute.xlu1 %2323 }
0x17b5   :  { %v2329_v13 = vsel %vm556_vm5, %v2324_v6, 0 }
0x17b8   :  { %v2374_v16 = vpop.permute.xlu1 %2373 }
0x17b9   :  { %v9881_v60 = vpop.eup %9880  ;;  %v2379_v18 = vsel %vm556_vm5, %v2374_v16, 0 }
0x17ba   :  { %v2203_v61 = vsel %vm556_vm5, %v9881_v60, 0.0 }
0x17bb   :  { %v9883_v62 = vpop.eup %9882  ;;  %2204 = vadd.xlane.f32.xlu0 %v2203_v61 }
0x17bc   :  { %v2206_v63 = vsel %vm556_vm5, %v9883_v62, 0.0  ;;  %v2372_v20 = vpop.permute.xlu1 %2371 }
0x17bf   :  { %2207 = vadd.xlane.f32.xlu0 %v2206_v63 }
0x17d5   :  { %2263 = vrot.lane.b32.xlu0 %v11141_v45, %s10507_s16 }
0x17d9   :  { %2321 = vrot.lane.b32.xlu0 %v11139_v42, %s10509_s18 }
0x1848   :  { %v2205_v0 = vpop.xlane.xlu0 %2204 }
0x1849   :  { %9884 = vrcp.f32 %v2205_v0 }
0x184c   :  { %v2208_v2 = vpop.xlane.xlu0 %2207 }
0x184d   :  { %9886 = vrcp.f32 %v2208_v2 }
0x1850   :  { %v2264_v3 = vpop.permute.xlu0 %2263 }
0x1851   :  { %v2269_v4 = vsel %vm683_vm6, %v2264_v3, 0 }
0x1852   :  { %9090 = vmatpush3.bf16.msra.mxu1 %v2269_v4 }
0x1853   :  { %v9885_v5 = vpop.eup %9884  ;;  %9101 = vmatprep.subr.bf16.mxu1 %v10501_v1 }
0x1854   :  { %v2211_v7 = vmul.f32 %v9885_v5, %v9881_v60  ;;  %v2322_v19 = vpop.permute.xlu0 %2321 }
0x1856   :  { %v2213_v11 = vpack.c.bf16 %v2211_v7, %v2211_v7 }
0x1857   :  { %v9887_v12 = vpop.eup %9886 }
0x1858   :  { %9086 = vmatmul.mubr.msk.bf16.vlgmr.msra.gmra.mrb[56].mxu0 %vm556_vm5, %v2213_v11  ;;  %v2212_v15 = vmul.f32 %v9887_v12, %v9883_v62 }
0x1859   :  { %9096 = vmatpush3.bf16.xpose.msra.mxu0 %v2329_v13  ;;  %9097 = vmatprep.mubr.msk.bf16.mxu0 %vm10502_vm0, %v10501_v1 }
0x185a   :  { %v2214_v17 = vpack.c.bf16 %v2212_v15, %v2212_v15  ;;  %9107 = vmatprep.subr.bf16.mxu0 %v10501_v1 }
0x185c   :  { %9092 = vmatmul.mubr.msk.bf16.vlgmr.msra.gmra.mrb[56].mxu1 %vm556_vm5, %v2214_v17 }
0x185d   :  { %9102 = vmatpush3.bf16.xpose.msra.mxu1 %v2379_v18  ;;  %9103 = vmatprep.mubr.msk.bf16.mxu1 %vm10502_vm0, %v10501_v1 }
0x185e   :  { %9113 = vmatprep.subr.bf16.mxu1 %v10501_v1 }
0x1860   :  { %9098 = vmatmul.mubr.msk.bf16.vlgmr.msra.gmra.mrb[60].mxu0 %vm556_vm5, %v2322_v19 }
0x1861   :  { %9109 = vmatprep.mubr.msk.bf16.mxu0 %vm10502_vm0, %v10501_v1 }
0x1864   :  { %9104 = vmatmul.mubr.msk.bf16.vlgmr.msra.gmra.mrb[60].mxu1 %vm556_vm5, %v2372_v20 }
0x1865   :  { %9115 = vmatprep.mubr.msk.bf16.mxu1 %vm10502_vm0, %v10501_v1 }
0x192b   :  { %v11233_v21 = vpop.f32.mrb[56].mxu0 }
0x192c   :  { %v9087_v22 = vpop.f32.mrb[57].mxu0 }
0x192d   :  { %v2260_v24 = vpop.f32.mrb[58].mxu0 }
0x192e   :  { %v9088_v23 = vpop.f32.mrb[59].mxu0 }
0x192f   :  { %v11235_v25 = vpop.f32.mrb[56].mxu1 }
0x1930   :  { %v9093_v26 = vpop.f32.mrb[57].mxu1 }
0x1931   :  { %v2308_v27 = vpop.f32.mrb[58].mxu1 }
0x1932   :  { %v9094_v28 = vpop.f32.mrb[59].mxu1 }
0x1933   :  { %v2365_v29 = vpop.f32.mrb[60].mxu0 }
0x1934   :  { %v2421_v30 = vmul.f32 0.35355338, %v2365_v29  ;;  %v9099_v31 = vpop.f32.mrb[61].mxu0 }
0x1935   :  { %v2368_v32 = vpop.f32.mrb[62].mxu0 }
0x1936   :  { %v9100_v10 = vpop.f32.mrb[63].mxu0  ;;  %v2423_v14 = vsel %vm556_vm5, %v2421_v30, -inf }
0x1937   :  { %2424 = vmax.xlane.f32.xlu0 %v2423_v14  ;;  %v2415_v36 = vpop.f32.mrb[60].mxu1 }
0x1938   :  { %v2422_v37 = vmul.f32 0.35355338, %v2415_v36  ;;  %v9105_v38 = vpop.f32.mrb[61].mxu1 }
0x1939   :  { %v2418_v39 = vpop.f32.mrb[62].mxu1 }
0x193a   :  { %v9106_v40 = vpop.f32.mrb[63].mxu1  ;;  %v2426_v41 = vsel %vm556_vm5, %v2422_v37, -inf }
0x193b   :  { %2427 = vmax.xlane.f32.xlu1 %v2426_v41 }
0x194c   :  { %2447 = vrot.lane.b32.xlu1 %v11139_v42, %s10510_s22 }
0x1950   :  { %2555 = vrot.lane.b32.xlu1 %v11139_v42, %s10511_s23 }
0x1954   :  { %2605 = vrot.lane.b32.xlu1 %v11141_v45, %s10511_s23 }
0x1958   :  { %2603 = vrot.lane.b32.xlu1 %v11141_v45, %s10512_s19 }
0x19c4   :  { %v2425_v43 = vpop.xlane.xlu0 %2424 }
0x19c5   :  { %v2429_v44 = vsub.f32 %v2421_v30, %v2425_v43 }
0x19c7   :  { %v2431_v35 = vmul.f32 1.442695, %v2429_v44 }
0x19c8   :  { %v2428_v46 = vpop.xlane.xlu1 %2427 }
0x19c9   :  { %9888 = vpow2.f32 %v2431_v35  ;;  %v2430_v47 = vsub.f32 %v2422_v37, %v2428_v46 }
0x19cb   :  { %v2433_v48 = vmul.f32 1.442695, %v2430_v47 }
0x19cc   :  { %v2448_v49 = vpop.permute.xlu1 %2447 }
0x19cd   :  { %9890 = vpow2.f32 %v2433_v48  ;;  %v2453_v50 = vsel %vm683_vm6, %v2448_v49, 0 }
0x19ce   :  { %9108 = vmatpush3.bf16.msra.mxu0 %v2453_v50 }
0x19cf   :  { %9119 = vmatprep.subr.bf16.mxu0 %v10501_v1 }
0x19d0   :  { %v2556_v60 = vpop.permute.xlu1 %2555 }
0x19d1   :  { %v2561_v0 = vsel %vm556_vm5, %v2556_v60, 0 }
0x19d3   :  { %v9889_v51 = vpop.eup %9888 }
0x19d4   :  { %v2435_v52 = vsel %vm556_vm5, %v9889_v51, 0.0  ;;  %v2606_v3 = vpop.permute.xlu1 %2605 }
0x19d5   :  { %2436 = vadd.xlane.f32.xlu0 %v2435_v52  ;;  %v2611_v5 = vsel %vm556_vm5, %v2606_v3, 0 }
0x19d7   :  { %v9891_v53 = vpop.eup %9890 }
0x19d8   :  { %v2438_v54 = vsel %vm556_vm5, %v9891_v53, 0.0  ;;  %v2604_v7 = vpop.permute.xlu1 %2603 }
0x19d9   :  { %2439 = vadd.xlane.f32.xlu0 %v2438_v54 }
0x19ef   :  { %2495 = vrot.lane.b32.xlu0 %v11141_v45, %s10510_s22 }
0x19f3   :  { %2553 = vrot.lane.b32.xlu0 %v11139_v42, %s10512_s19 }
0x1a62   :  { %v2437_v55 = vpop.xlane.xlu0 %2436 }
0x1a63   :  { %9892 = vrcp.f32 %v2437_v55 }
0x1a66   :  { %v2440_v56 = vpop.xlane.xlu0 %2439 }
0x1a67   :  { %9894 = vrcp.f32 %v2440_v56 }
0x1a6a   :  { %v2496_v57 = vpop.permute.xlu0 %2495 }
0x1a6b   :  { %v2501_v58 = vsel %vm683_vm6, %v2496_v57, 0 }
0x1a6c   :  { %9114 = vmatpush3.bf16.msra.mxu1 %v2501_v58  ;;  %v9786_v58 = vld [vmem:[%s12303_s20 + $0x10] sm:$0xff]  }
0x1a6d   :  { %v9893_v59 = vpop.eup %9892  ;;  %9125 = vmatprep.subr.bf16.mxu1 %v10501_v1 }
0x1a6e   :  { %v2443_v61 = vmul.f32 %v9893_v59, %v9889_v51  ;;  %v2554_v6 = vpop.permute.xlu0 %2553  ;;  %v9787_v59 = vld [vmem:[%s12303_s20 + $0x18] sm:$0xff]   ;;  %s12319_s20 = sld [smem:[#allocation58_spill]] }
0x1a70   :  { %v2445_v62 = vpack.c.bf16 %v2443_v61, %v2443_v61 }
0x1a71   :  { %v9895_v63 = vpop.eup %9894 }
0x1a72   :  { %9110 = vmatmul.mubr.msk.bf16.vlgmr.msra.gmra.mrb[64].mxu0 %vm556_vm5, %v2445_v62  ;;  %v2444_v2 = vmul.f32 %v9895_v63, %v9891_v53 }
0x1a73   :  { %9120 = vmatpush3.bf16.xpose.msra.mxu0 %v2561_v0  ;;  %9121 = vmatprep.mubr.msk.bf16.mxu0 %vm10502_vm0, %v10501_v1 }
0x1a74   :  { %v2446_v4 = vpack.c.bf16 %v2444_v2, %v2444_v2  ;;  %9131 = vmatprep.subr.bf16.mxu0 %v10501_v1 }
0x1a76   :  { %9116 = vmatmul.mubr.msk.bf16.vlgmr.msra.gmra.mrb[64].mxu1 %vm556_vm5, %v2446_v4 }
0x1a77   :  { %9126 = vmatpush3.bf16.xpose.msra.mxu1 %v2611_v5  ;;  %9127 = vmatprep.mubr.msk.bf16.mxu1 %vm10502_vm0, %v10501_v1 }
0x1a78   :  { %9137 = vmatprep.subr.bf16.mxu1 %v10501_v1 }
0x1a7a   :  { %9122 = vmatmul.mubr.msk.bf16.vlgmr.msra.gmra.mrb[68].mxu0 %vm556_vm5, %v2554_v6 }
0x1a7b   :  { %9133 = vmatprep.mubr.msk.bf16.mxu0 %vm10502_vm0, %v10501_v1 }
0x1a7e   :  { %9128 = vmatmul.mubr.msk.bf16.vlgmr.msra.gmra.mrb[68].mxu1 %vm556_vm5, %v2604_v7 }
0x1a7f   :  { %9139 = vmatprep.mubr.msk.bf16.mxu1 %vm10502_vm0, %v10501_v1 }
0x1b45   :  { %v2489_v11 = vpop.f32.mrb[64].mxu0 }
0x1b46   :  { %v9111_v12 = vpop.f32.mrb[65].mxu0 }
0x1b47   :  { %v2492_v13 = vpop.f32.mrb[66].mxu0 }
0x1b48   :  { %v9112_v15 = vpop.f32.mrb[67].mxu0  ;;  %v8402_v13 = vld [vmem:[%s12304_s26 + $0x1] ss:$0 sm:$0xff]  ;;  %s12320_s26 = sld [smem:[#allocation55_spill]] }
0x1b49   :  { %v2537_v16 = vpop.f32.mrb[64].mxu1 }
0x1b4a   :  { %v9117_v17 = vpop.f32.mrb[65].mxu1 }
0x1b4b   :  { %v2540_v18 = vpop.f32.mrb[66].mxu1 }
0x1b4c   :  { %v9118_v19 = vpop.f32.mrb[67].mxu1 }
0x1b4d   :  { %v2597_v20 = vpop.f32.mrb[68].mxu0 }
0x1b4e   :  { %v2653_v22 = vmul.f32 0.35355338, %v2597_v20  ;;  %v9123_v24 = vpop.f32.mrb[69].mxu0 }
0x1b4f   :  { %v2600_v23 = vpop.f32.mrb[70].mxu0 }
0x1b50   :  { %v9124_v26 = vpop.f32.mrb[71].mxu0  ;;  %v2655_v27 = vsel %vm556_vm5, %v2653_v22, -inf }
0x1b51   :  { %2656 = vmax.xlane.f32.xlu0 %v2655_v27  ;;  %v2647_v28 = vpop.f32.mrb[68].mxu1  ;;  %v3105_v27 = vld [vmem:[%s12312_s4] sm:$0xff] }
0x1b52   :  { %v2654_v29 = vmul.f32 0.35355338, %v2647_v28  ;;  %v9129_v30 = vpop.f32.mrb[69].mxu1 }
0x1b53   :  { %v2650_v31 = vpop.f32.mrb[70].mxu1 }
0x1b54   :  { %v9130_v32 = vpop.f32.mrb[71].mxu1  ;;  %v2658_v10 = vsel %vm556_vm5, %v2654_v29, -inf }
0x1b55   :  { %2659 = vmax.xlane.f32.xlu1 %v2658_v10 }
0x1b66   :  { %2679 = vrot.lane.b32.xlu1 %v11139_v42, %s10513_s17 }
0x1b6a   :  { %2313 = vrot.lane.b32.xlu1 %v11233_v21, %s10514_s25 }
0x1b6e   :  { %2315 = vrot.lane.b32.xlu1 %v11235_v25, %s10514_s25 }
0x1b72   :  { %2547 = vrot.lane.b32.xlu1 %v2537_v16, %s10484_s2 }
0x1bde   :  { %v2657_v14 = vpop.xlane.xlu0 %2656 }
0x1bdf   :  { %v2661_v36 = vsub.f32 %v2653_v22, %v2657_v14 }
0x1be1   :  { %v2663_v37 = vmul.f32 1.442695, %v2661_v36 }
0x1be2   :  { %v2660_v38 = vpop.xlane.xlu1 %2659 }
0x1be3   :  { %9896 = vpow2.f32 %v2663_v37  ;;  %v2662_v39 = vsub.f32 %v2654_v29, %v2660_v38  ;;  %v3106_v37 = vld [vmem:[%s12312_s4 + $0x8] sm:$0xff]  ;;  %v9788_v38 = vld [vmem:[%s12305_s24 + $0x10] sm:$0xff]  }
0x1be5   :  { %v2665_v40 = vmul.f32 1.442695, %v2662_v39  ;;  %v9789_v39 = vld [vmem:[%s12305_s24 + $0x18] sm:$0xff]   ;;  %s12321_s24 = sld [smem:[#allocation56_spill]] }
0x1be6   :  { %v2680_v41 = vpop.permute.xlu1 %2679 }
0x1be7   :  { %9898 = vpow2.f32 %v2665_v40  ;;  %v2685_v43 = vsel %vm683_vm6, %v2680_v41, 0  ;;  %v9794_v40 = vld [vmem:[%s12306_s28 + $0x20] sm:$0xff]   ;;  %v9795_v41 = vld [vmem:[%s12306_s28 + $0x28] sm:$0xff]  }
0x1be8   :  { %9132 = vmatpush3.bf16.msra.mxu0 %v2685_v43 }
0x1be9   :  { %9143 = vmatprep.subr.bf16.mxu0 %v10501_v1 }
0x1bea   :  { %v2314_v42 = vpop.permute.xlu1 %2313 }
0x1beb   :  { %2319 = vst.msk [vmem:[#allocation2] sm:$0xff] %vm1007_vm7, %v2314_v42 }
0x1bed   :  { %v9897_v21 = vpop.eup %9896 }
0x1bee   :  { %v2316_v25 = vpop.permute.xlu1 %2315  ;;  %v2667_v44 = vsel %vm556_vm5, %v9897_v21, 0.0 }
0x1bef   :  { %2320 = vst.msk [vmem:[#allocation2 + $0x8] sm:$0xff] %vm1007_vm7, %v2316_v25  ;;  %2668 = vadd.xlane.f32.xlu0 %v2667_v44 }
0x1bf1   :  { %v9899_v35 = vpop.eup %9898 }
0x1bf2   :  { %v2548_v46 = vpop.permute.xlu1 %2547  ;;  %v2670_v47 = vsel %vm556_vm5, %v9899_v35, 0.0 }
0x1bf3   :  { %2552 = vst.msk [vmem:[#allocation2 + $0x8] sm:$0xff] %vm1240_vm8, %v2548_v46  ;;  %2671 = vadd.xlane.f32.xlu0 %v2670_v47 }
0x1c09   :  { %2727 = vrot.lane.b32.xlu0 %v11141_v45, %s10513_s17 }
0x1c0d   :  { %2545 = vrot.lane.b32.xlu0 %v2489_v11, %s10484_s2 }
0x1c7c   :  { %v2669_v48 = vpop.xlane.xlu0 %2668 }
0x1c7d   :  { %9900 = vrcp.f32 %v2669_v48  ;;  %v8407_v48 = vld [vmem:[%s12307_s0 + $0x1] ss:$0 sm:$0xff] }
0x1c80   :  { %v2672_v49 = vpop.xlane.xlu0 %2671 }
0x1c81   :  { %9902 = vrcp.f32 %v2672_v49 }
0x1c84   :  { %v2728_v50 = vpop.permute.xlu0 %2727 }
0x1c85   :  { %v2733_v51 = vsel %vm683_vm6, %v2728_v50, 0 }
0x1c86   :  { %9138 = vmatpush3.bf16.msra.mxu1 %v2733_v51 }
0x1c87   :  { %v9901_v52 = vpop.eup %9900  ;;  %9151 = vmatprep.subr.bf16.mxu1 %v10501_v1 }
0x1c88   :  { %v2546_v53 = vpop.permute.xlu0 %2545  ;;  %v2675_v54 = vmul.f32 %v9901_v52, %v9897_v21  ;;  %v8408_v52 = vld [vmem:[#allocation5 + $0x1] ss:$0 sm:$0xff] }
0x1c89   :  { %2551 = vst.msk [vmem:[#allocation2] sm:$0xff] %vm1240_vm8, %v2546_v53 }
0x1c8a   :  { %v2677_v45 = vpack.c.bf16 %v2675_v54, %v2675_v54 }
0x1c8b   :  { %v9903_v55 = vpop.eup %9902 }
0x1c8c   :  { %9134 = vmatmul.mubr.msk.bf16.vlgmr.msra.gmra.mrb[72].mxu0 %vm556_vm5, %v2677_v45  ;;  %v2676_v56 = vmul.f32 %v9903_v55, %v9899_v35  ;;  %v9790_v55 = vld [vmem:[%s12313_s7] sm:$0xff]  }
0x1c8d   :  { %9147 = vmatprep.mubr.msk.bf16.mxu0 %vm10502_vm0, %v10501_v1  ;;  %9144 = vmatpush3.bf16.msra.mxu0 %v9786_v58 }
0x1c8e   :  { %v2678_v57 = vpack.c.bf16 %v2676_v56, %v2676_v56  ;;  %9145 = vmatprep.subr.bf16.mxu0 %v10501_v1 }
0x1c90   :  { %9140 = vmatmul.mubr.msk.bf16.vlgmr.msra.gmra.mrb[72].mxu1 %vm556_vm5, %v2678_v57  ;;  %v9791_v57 = vld [vmem:[%s12313_s7 + $0x8] sm:$0xff]  }
0x1c91   :  { %9155 = vmatprep.mubr.msk.bf16.mxu1 %vm10502_vm0, %v10501_v1  ;;  %9146 = vmatpush3.bf16.msra.mxu0 %v9787_v59 }
0x1c92   :  { %9159 = vmatprep.subr.bf16.mxu0 %v10501_v1  ;;  %9152 = vmatpush3.bf16.msra.mxu1 %v9788_v38 }
0x1c93   :  { %9153 = vmatprep.subr.bf16.mxu1 %v10501_v1 }
0x1c96   :  { %9154 = vmatpush3.bf16.msra.mxu1 %v9789_v39 }
0x1c97   :  { %9171 = vmatprep.subr.bf16.mxu1 %v10501_v1 }
0x1d5f   :  { %v2721_v60 = vpop.f32.mrb[72].mxu0 }
0x1d60   :  { %2777 = vrot.lane.b32.xlu0 %v2721_v60, %s10515_s3  ;;  %v9135_v61 = vpop.f32.mrb[73].mxu0  ;;  %v9792_v60 = vld [vmem:[%s12313_s7 + $0x10] sm:$0xff]  }
0x1d61   :  { %v2724_v62 = vpop.f32.mrb[74].mxu0  ;;  %v9793_v61 = vld [vmem:[%s12313_s7 + $0x18] sm:$0xff]  }
0x1d62   :  { %v9136_v63 = vpop.f32.mrb[75].mxu0 }
0x1d63   :  { %v2769_v0 = vpop.f32.mrb[72].mxu1 }
0x1d64   :  { %2779 = vrot.lane.b32.xlu1 %v2769_v0, %s10515_s3  ;;  %v9141_v2 = vpop.f32.mrb[73].mxu1 }
0x1d65   :  { %v2772_v3 = vpop.f32.mrb[74].mxu1  ;;  %v9796_v2 = vld [vmem:[%s12306_s28 + $0x30] sm:$0xff]  }
0x1d66   :  { %v9142_v4 = vpop.f32.mrb[75].mxu1  ;;  %v9797_v3 = vld [vmem:[%s12306_s28 + $0x38] sm:$0xff]  }
0x1d67   :  { %v8423_v4 = vld [vmem:[%s12308_s1 + $0x1] ss:$0 sm:$0xff] }
0x1dd2   :  { %v2778_v5 = vpop.permute.xlu0 %2777 }
0x1dd3   :  { %2783 = vst.msk [vmem:[#allocation2] sm:$0xff] %vm1473_vm9, %v2778_v5 }
0x1dd6   :  { %v2780_v6 = vpop.permute.xlu1 %2779 }
0x1dd7   :  { %2784 = vst.msk [vmem:[#allocation2 + $0x8] sm:$0xff] %vm1473_vm9, %v2780_v6 }
0x1dda   :  { %v2785_v7 = vld [vmem:[#allocation2] sm:$0xff] }
0x1dde   :  { %v2786_v11 = vld [vmem:[#allocation2 + $0x8] sm:$0xff] }
0x1ddf   :  { %v2787_v12 = vpack.c.bf16 %v2786_v11, %v2785_v7 }
0x1de1   :  { %9148 = vmatmul.mubr.msk.bf16.vlgmr.msra.gmra.mrb[76].mxu0 %vm501_vm4, %v2787_v12 }
0x1de2   :  { %9167 = vmatprep.mubr.msk.bf16.mxu0 %vm10502_vm0, %v10501_v1  ;;  %9160 = vmatpush3.bf16.msra.mxu0 %v9794_v40 }
0x1de3   :  { %9161 = vmatprep.subr.bf16.mxu0 %v10501_v1 }
0x1de6   :  { %9162 = vmatpush3.bf16.msra.mxu0 %v9795_v41 }
0x1de7   :  { %9163 = vmatprep.subr.bf16.mxu0 %v10501_v1 }
0x1dea   :  { %9164 = vmatpush3.bf16.msra.mxu0 %v9796_v2 }
0x1deb   :  { %9165 = vmatprep.subr.bf16.mxu0 %v10501_v1 }
0x1dee   :  { %9166 = vmatpush3.bf16.msra.mxu0 %v9797_v3 }
0x1def   :  { %9183 = vmatprep.subr.bf16.mxu0 %v10501_v1 }
0x1eb4   :  { %v2843_v15 = vpop.f32.mrb[76].mxu0 }
0x1eb5   :  { %v2844_v16 = vadd.f32 %v8402_v13, %v2843_v15  ;;  %v9149_v17 = vpop.f32.mrb[77].mxu0 }
0x1eb6   :  { %v2846_v18 = vpop.f32.mrb[78].mxu0  ;;  %v9798_v17 = vld [vmem:[%s10704_s27] sm:$0xff]  }
0x1eb7   :  { %v2850_v19 = vadd.f32 %v2844_v16, %v11130_v33  ;;  %v2847_v20 = vadd.f32 %v8402_v13, %v2846_v18  ;;  %v9150_v22 = vpop.f32.mrb[79].mxu0 }
0x1eb9   :  { %v2851_v24 = vadd.f32 %v2847_v20, %v11132_v34  ;;  %v2856_v23 = vsel %vm501_vm4, %v2850_v19, 0.0 }
0x1eba   :  { %2857 = vadd.xlane.f32.xlu0 %v2856_v23 }
0x1ebb   :  { %v2859_v26 = vsel %vm501_vm4, %v2851_v24, 0.0 }
0x1ebc   :  { %2860 = vadd.xlane.f32.xlu1 %v2859_v26 }
0x1ecd   :  { %3116 = vperm.xlu1 %9769, %v3105_v27  }
0x1f47   :  { %v2858_v28 = vpop.xlane.xlu0 %2857 }
0x1f48   :  { %v2862_v29 = vmul.f32 0.03125, %v2858_v28  ;;  %v10072_v28 = vld [vmem:[%s12302_s29] sm:$0xff]  ;;  %s12318_s29 = sld [smem:[#allocation53_spill]] }
0x1f49   :  { %v2861_v30 = vpop.xlane.xlu1 %2860 }
0x1f4a   :  { %v2864_v31 = vsub.f32 %v2850_v19, %v2862_v29  ;;  %v2863_v33 = vmul.f32 0.03125, %v2861_v30  ;;  %v9799_v19 = vld [vmem:[%s10704_s27 + $0x8] sm:$0xff]  }
0x1f4c   :  { %v2865_v32 = vsub.f32 %v2851_v24, %v2863_v33  ;;  %v2866_v10 = vmul.f32 %v2864_v31, %v2864_v31 }
0x1f4d   :  { %v3117_v59 = vpop.permute.xlu1 %3116 }
0x1f4e   :  { %v2868_v34 = vsel %vm501_vm4, %v2866_v10, 0.0  ;;  %v2867_v14 = vmul.f32 %v2865_v32, %v2865_v32  ;;  %vm3121_vm11 = vcmp.eq.s32.totalorder %v3117_v59, %v10896_v9 }
0x1f4f   :  { %2869 = vadd.xlane.f32.xlu0 %v2868_v34  ;;  %v8437_v63 = vsel %vm3121_vm11, 1.0, %v10501_v1 }
0x1f50   :  { %v2871_v36 = vsel %vm501_vm4, %v2867_v14, 0.0  ;;  %v8444_v14 = vld [vmem:[#allocation13] ss:$0 sm:$0xff] }
0x1f53   :  { %2872 = vadd.xlane.f32.xlu0 %v2871_v36 }
0x1f69   :  { %3119 = vperm.xlu0 %9768, %v3106_v37  }
0x1fdc   :  { %v2870_v43 = vpop.xlane.xlu0 %2869 }
0x1fdd   :  { %v2874_v42 = vmul.f32 0.03125, %v2870_v43 }
0x1fdf   :  { %v2876_v21 = vadd.f32 1e-05, %v2874_v42 }
0x1fe0   :  { %v2873_v25 = vpop.xlane.xlu0 %2872 }
0x1fe1   :  { %9904 = vrsqrt.f32 %v2876_v21  ;;  %v2875_v44 = vmul.f32 0.03125, %v2873_v25 }
0x1fe3   :  { %v2877_v35 = vadd.f32 1e-05, %v2875_v44 }
0x1fe5   :  { %9906 = vrsqrt.f32 %v2877_v35 }
0x1fe8   :  { %v3120_v58 = vpop.permute.xlu0 %3119 }
0x1fe9   :  { %vm3122_vm10 = vcmp.eq.s32.totalorder %v3120_v58, %v10896_v9 }
0x1fea   :  { %v8438_v62 = vsel %vm3122_vm10, 1.0, %v10501_v1 }
0x1feb   :  { %v9905_v46 = vpop.eup %9904  ;;  %v3127_v0 = vpack.c.bf16 %v8438_v62, %v8437_v63 }
0x1fec   :  { %v2880_v47 = vmul.f32 %v9905_v46, %v2864_v31  ;;  %v3274_v46 = vshrl.u32 %v389_v8, 7 }
0x1fee   :  { %v2888_v50 = vmul.f32 %v8407_v48, %v2880_v47  ;;  %vm11402_vm12 = vcmp.le.s32.totalorder %v10896_v9, %v3274_v46 }
0x1fef   :  { %v9907_v49 = vpop.eup %9906 }
0x1ff0   :  { %v2881_v51 = vmul.f32 %v9907_v49, %v2865_v32  ;;  %v11330_v54 = vadd.f32 %v8408_v52, %v2888_v50 }
0x1ff2   :  { %v2889_v53 = vmul.f32 %v8407_v48, %v2881_v51 }
0x1ff4   :  { %v11332_v45 = vadd.f32 %v8408_v52, %v2889_v53 }
0x1ff6   :  { %v2916_v56 = vpack.c.bf16 %v11332_v45, %v11330_v54 }
0x1ff8   :  { %9156 = vmatmul.mubr.msk.bf16.vlgmr.msra.gmra.mrb[76].mxu1 %vm501_vm4, %v2916_v56 }
0x1ff9   :  { %9172 = vmatpush3.bf16.msra.mxu1 %v9790_v55  ;;  %9179 = vmatprep.mubr.msk.bf16.mxu1 %vm10502_vm0, %v10501_v1 }
0x1ffa   :  { %9173 = vmatprep.subr.bf16.mxu1 %v10501_v1 }
0x1ffd   :  { %9174 = vmatpush3.bf16.msra.mxu1 %v9791_v57 }
0x1ffe   :  { %9175 = vmatprep.subr.bf16.mxu1 %v10501_v1 }
0x2001   :  { %9176 = vmatpush3.bf16.msra.mxu1 %v9792_v60 }
0x2002   :  { %9177 = vmatprep.subr.bf16.mxu1 %v10501_v1 }
0x2005   :  { %9178 = vmatpush3.bf16.msra.mxu1 %v9793_v61 }
0x2006   :  { %9191 = vmatprep.subr.bf16.mxu1 %v10501_v1 }
0x2008   :  { %9180 = vmatmul.mubr.msk.bf16.vlgmr.msra.gmra.mrb[80].mxu1 %vm428_vm3, %v3127_v0 }
0x2009   :  { %9193 = vmatprep.mubr.msk.bf16.mxu1 %vm10502_vm0, %v10501_v1 }
0x20cb   :  { %v2972_v5 = vpop.f32.mrb[76].mxu1 }
0x20cc   :  { %v2973_v6 = vadd.f32 %v8423_v4, %v2972_v5  ;;  %v9157_v7 = vpop.f32.mrb[77].mxu1 }
0x20cd   :  { %v2975_v11 = vpop.f32.mrb[78].mxu1 }
0x20ce   :  { %v2976_v12 = vadd.f32 %v8423_v4, %v2975_v11  ;;  %v9158_v13 = vpop.f32.mrb[79].mxu1  ;;  %v2979_v15 = vmax.f32 %v2973_v6, 0.0 }
0x20d0   :  { %v2980_v16 = vmax.f32 %v2976_v12, 0.0 }
0x20d2   :  { %v2981_v18 = vpack.c.bf16 %v2980_v16, %v2979_v15 }
0x20d4   :  { %9168 = vmatmul.mubr.msk.bf16.vlgmr.msra.gmra.mrb[80].mxu0 %vm428_vm3, %v2981_v18 }
0x20d5   :  { %9184 = vmatpush3.bf16.msra.mxu0 %v9798_v17  ;;  %9187 = vmatprep.mubr.msk.bf16.mxu0 %vm10502_vm0, %v10501_v1 }
0x20d6   :  { %9185 = vmatprep.subr.bf16.mxu0 %v10501_v1 }
0x20d9   :  { %9186 = vmatpush3.bf16.msra.mxu0 %v9799_v19 }
0x20da   :  { %9197 = vmatprep.subr.bf16.mxu0 %v10501_v1 }
0x20db   :  { %v3189_v20 = vpop.f32.mrb[80].mxu1 }
0x20dc   :  { %v3196_v22 = vmul.f32 5.656854, %v3189_v20  ;;  %v9181_v24 = vpop.f32.mrb[81].mxu1 }
0x20dd   :  { %v3192_v23 = vpop.f32.mrb[82].mxu1 }
0x20de   :  { %v3197_v26 = vmul.f32 5.656854, %v3192_v23  ;;  %v9182_v27 = vpop.f32.mrb[83].mxu1  ;;  %v11367_v29 = vadd.f32 %v10072_v28, %v3196_v22 }
0x20e0   :  { %v11369_v30 = vadd.f32 %v10072_v28, %v3197_v26 }
0x20e2   :  { %v3204_v31 = vpack.c.bf16 %v11369_v30, %v11367_v29 }
0x20e4   :  { %9188 = vmatmul.mubr.msk.bf16.vlgmr.msra.gmra.mrb[84].mxu0 %vm501_vm4, %v3204_v31 }
0x20e5   :  { %9199 = vmatprep.mubr.msk.bf16.mxu0 %vm10502_vm0, %v10501_v1 }
0x21a7   :  { %v11376_v33 = vpop.f32.mrb[80].mxu0 }
0x21a8   :  { %v9169_v32 = vpop.f32.mrb[81].mxu0 }
0x21a9   :  { %v11378_v10 = vpop.f32.mrb[82].mxu0 }
0x21aa   :  { %v9170_v34 = vpop.f32.mrb[83].mxu0 }
0x21b7   :  { %v3261_v36 = vpop.f32.mrb[84].mxu0 }
0x21b8   :  { %v3262_v37 = vadd.f32 %v8444_v14, %v3261_v36  ;;  %v9189_v38 = vpop.f32.mrb[85].mxu0 }
0x21b9   :  { %v3264_v39 = vpop.f32.mrb[86].mxu0 }
0x21ba   :  { %v11380_v40 = vpack.c.bf16 %v3262_v37, %v3262_v37  ;;  %v3265_v41 = vadd.f32 %v8444_v14, %v3264_v39  ;;  %v9190_v43 = vpop.f32.mrb[87].mxu0 }
0x21bc   :  { %3279 = vrot.lane.b32.xlu1 %v11380_v40, %s10503_s14  ;;  %v11384_v42 = vpack.c.bf16 %v3265_v41, %v3265_v41 }
0x21c0   :  { %3328 = vrot.lane.b32.xlu1 %v11384_v42, %s10503_s14 }
0x222e   :  { %v3280_v21 = vpop.permute.xlu1 %3279 }
0x222f   :  { %v3285_v25 = vsel %vm556_vm5, %v3280_v21, 0 }
0x2230   :  { %9192 = vmatpush3.bf16.xpose.msra.mxu1 %v3285_v25 }
0x2231   :  { %9203 = vmatprep.subr.bf16.mxu1 %v10501_v1 }
0x2232   :  { %v3329_v44 = vpop.permute.xlu1 %3328 }
0x2233   :  { %v3334_v35 = vsel %vm556_vm5, %v3329_v44, 0 }
0x2234   :  { %9198 = vmatpush3.bf16.xpose.msra.mxu0 %v3334_v35 }
0x2235   :  { %9209 = vmatprep.subr.bf16.mxu0 %v10501_v1 }
0x2237   :  { %9194 = vmatmul.mubr.msk.bf16.vlgmr.msra.gmra.mrb[84].mxu1 %vm556_vm5, %v11380_v40 }
0x2238   :  { %9205 = vmatprep.mubr.msk.bf16.mxu1 %vm10502_vm0, %v10501_v1 }
0x223b   :  { %9200 = vmatmul.mubr.msk.bf16.vlgmr.msra.gmra.mrb[88].mxu0 %vm556_vm5, %v11384_v42 }
0x223c   :  { %9211 = vmatprep.mubr.msk.bf16.mxu0 %vm10502_vm0, %v10501_v1 }
0x230a   :  { %v3321_v48 = vpop.f32.mrb[84].mxu1 }
0x230b   :  { %v3376_v49 = vmul.f32 0.35355338, %v3321_v48  ;;  %v9195_v50 = vpop.f32.mrb[85].mxu1 }
0x230c   :  { %v3324_v51 = vpop.f32.mrb[86].mxu1 }
0x230d   :  { %v3380_v52 = vsel %vm11402_vm12, %v3376_v49, -1e+30  ;;  %v9196_v53 = vpop.f32.mrb[87].mxu1 }
0x230e   :  { %v3370_v55 = vpop.f32.mrb[88].mxu0  ;;  %v3382_v56 = vsel %vm556_vm5, %v3380_v52, -inf }
0x230f   :  { %v3377_v57 = vmul.f32 0.35355338, %v3370_v55  ;;  %v9201_v58 = vpop.f32.mrb[89].mxu0  ;;  %3383 = vmax.xlane.f32.xlu0 %v3382_v56 }
0x2310   :  { %v3373_v8 = vpop.f32.mrb[90].mxu0 }
0x2311   :  { %v3381_v9 = vsel %vm11402_vm12, %v3377_v57, -1e+30  ;;  %v9202_v59 = vpop.f32.mrb[91].mxu0 }
0x2312   :  { %v3385_v60 = vsel %vm556_vm5, %v3381_v9, -inf }
0x2313   :  { %3386 = vmax.xlane.f32.xlu1 %v3385_v60 }
0x2324   :  { %3406 = vrot.lane.b32.xlu1 %v11380_v40, %s10504_s6 }
0x2328   :  { %3506 = vrot.lane.b32.xlu1 %v11380_v40, %s10505_s15 }
0x232c   :  { %3556 = vrot.lane.b32.xlu1 %v11384_v42, %s10505_s15 }
0x2330   :  { %3554 = vrot.lane.b32.xlu1 %v11384_v42, %s10506_s9 }
0x239c   :  { %v3384_v61 = vpop.xlane.xlu0 %3383 }
0x239d   :  { %v3388_v62 = vsub.f32 %v3380_v52, %v3384_v61 }
0x239f   :  { %v3390_v63 = vmul.f32 1.442695, %v3388_v62 }
0x23a0   :  { %v3387_v0 = vpop.xlane.xlu1 %3386 }
0x23a1   :  { %9908 = vpow2.f32 %v3390_v63  ;;  %v3389_v2 = vsub.f32 %v3381_v9, %v3387_v0 }
0x23a3   :  { %v3392_v3 = vmul.f32 1.442695, %v3389_v2 }
0x23a4   :  { %v3407_v4 = vpop.permute.xlu1 %3406 }
0x23a5   :  { %9910 = vpow2.f32 %v3392_v3  ;;  %v3412_v5 = vsel %vm683_vm6, %v3407_v4, 0 }
0x23a6   :  { %9204 = vmatpush3.bf16.msra.mxu1 %v3412_v5 }
0x23a7   :  { %9215 = vmatprep.subr.bf16.mxu1 %v10501_v1 }
0x23a8   :  { %v3507_v19 = vpop.permute.xlu1 %3506 }
0x23a9   :  { %v3512_v23 = vsel %vm556_vm5, %v3507_v19, 0 }
0x23ab   :  { %v9909_v6 = vpop.eup %9908 }
0x23ac   :  { %v3394_v7 = vsel %vm556_vm5, %v9909_v6, 0.0  ;;  %v3557_v27 = vpop.permute.xlu1 %3556 }
0x23ad   :  { %3395 = vadd.xlane.f32.xlu0 %v3394_v7  ;;  %v3562_v31 = vsel %vm556_vm5, %v3557_v27, 0 }
0x23af   :  { %v9911_v11 = vpop.eup %9910 }
0x23b0   :  { %v3397_v12 = vsel %vm556_vm5, %v9911_v11, 0.0  ;;  %v3555_v34 = vpop.permute.xlu1 %3554 }
0x23b1   :  { %3398 = vadd.xlane.f32.xlu0 %v3397_v12 }
0x23c7   :  { %3454 = vrot.lane.b32.xlu0 %v11384_v42, %s10504_s6 }
0x23cb   :  { %3504 = vrot.lane.b32.xlu0 %v11380_v40, %s10506_s9 }
0x243a   :  { %v3396_v13 = vpop.xlane.xlu0 %3395 }
0x243b   :  { %9912 = vrcp.f32 %v3396_v13 }
0x243e   :  { %v3399_v15 = vpop.xlane.xlu0 %3398 }
0x243f   :  { %9914 = vrcp.f32 %v3399_v15 }
0x2442   :  { %v3455_v16 = vpop.permute.xlu0 %3454 }
0x2443   :  { %v3460_v17 = vsel %vm683_vm6, %v3455_v16, 0 }
0x2444   :  { %9210 = vmatpush3.bf16.msra.mxu0 %v3460_v17 }
0x2445   :  { %v9913_v18 = vpop.eup %9912  ;;  %9221 = vmatprep.subr.bf16.mxu0 %v10501_v1 }
0x2446   :  { %v3402_v20 = vmul.f32 %v9913_v18, %v9909_v6  ;;  %v3505_v32 = vpop.permute.xlu0 %3504 }
0x2448   :  { %v3404_v22 = vpack.c.bf16 %v3402_v20, %v3402_v20 }
0x2449   :  { %v9915_v24 = vpop.eup %9914 }
0x244a   :  { %9206 = vmatmul.mubr.msk.bf16.vlgmr.msra.gmra.mrb[88].mxu1 %vm556_vm5, %v3404_v22  ;;  %v3403_v26 = vmul.f32 %v9915_v24, %v9911_v11 }
0x244b   :  { %9216 = vmatpush3.bf16.xpose.msra.mxu1 %v3512_v23  ;;  %9217 = vmatprep.mubr.msk.bf16.mxu1 %vm10502_vm0, %v10501_v1 }
0x244c   :  { %v3405_v28 = vpack.c.bf16 %v3403_v26, %v3403_v26  ;;  %9227 = vmatprep.subr.bf16.mxu1 %v10501_v1 }
0x244e   :  { %9212 = vmatmul.mubr.msk.bf16.vlgmr.msra.gmra.mrb[92].mxu0 %vm556_vm5, %v3405_v28 }
0x244f   :  { %9222 = vmatpush3.bf16.xpose.msra.mxu0 %v3562_v31  ;;  %9223 = vmatprep.mubr.msk.bf16.mxu0 %vm10502_vm0, %v10501_v1 }
0x2450   :  { %9233 = vmatprep.subr.bf16.mxu0 %v10501_v1 }
0x2452   :  { %9218 = vmatmul.mubr.msk.bf16.vlgmr.msra.gmra.mrb[92].mxu1 %vm556_vm5, %v3505_v32 }
0x2453   :  { %9229 = vmatprep.mubr.msk.bf16.mxu1 %vm10502_vm0, %v10501_v1 }
0x2456   :  { %9224 = vmatmul.mubr.msk.bf16.vlgmr.msra.gmra.mrb[96].mxu0 %vm556_vm5, %v3555_v34 }
0x2457   :  { %9235 = vmatprep.mubr.msk.bf16.mxu0 %vm10502_vm0, %v10501_v1 }
0x251d   :  { %v3448_v14 = vpop.f32.mrb[88].mxu1 }
0x251e   :  { %3502 = vst.msk [vmem:[#allocation2] sm:$0xff] %vm556_vm5, %v3448_v14  ;;  %v9207_v36 = vpop.f32.mrb[89].mxu1 }
0x251f   :  { %v3451_v37 = vpop.f32.mrb[90].mxu1 }
0x2520   :  { %v9208_v38 = vpop.f32.mrb[91].mxu1 }
0x2521   :  { %v3496_v39 = vpop.f32.mrb[92].mxu0 }
0x2522   :  { %3503 = vst.msk [vmem:[#allocation2 + $0x8] sm:$0xff] %vm556_vm5, %v3496_v39  ;;  %v9213_v41 = vpop.f32.mrb[93].mxu0 }
0x2523   :  { %v3499_v43 = vpop.f32.mrb[94].mxu0 }
0x2524   :  { %v9214_v21 = vpop.f32.mrb[95].mxu0 }
0x2525   :  { %v3548_v25 = vpop.f32.mrb[92].mxu1 }
0x2526   :  { %v3604_v44 = vmul.f32 0.35355338, %v3548_v25  ;;  %v9219_v35 = vpop.f32.mrb[93].mxu1 }
0x2527   :  { %v3551_v46 = vpop.f32.mrb[94].mxu1 }
0x2528   :  { %v3606_v48 = vsel %vm11402_vm12, %v3604_v44, -1e+30  ;;  %v9220_v49 = vpop.f32.mrb[95].mxu1 }
0x2529   :  { %v3598_v50 = vpop.f32.mrb[96].mxu0  ;;  %v3608_v51 = vsel %vm556_vm5, %v3606_v48, -inf }
0x252a   :  { %v3605_v52 = vmul.f32 0.35355338, %v3598_v50  ;;  %v9225_v53 = vpop.f32.mrb[97].mxu0  ;;  %3609 = vmax.xlane.f32.xlu0 %v3608_v51 }
0x252b   :  { %v3601_v55 = vpop.f32.mrb[98].mxu0 }
0x252c   :  { %v3607_v56 = vsel %vm11402_vm12, %v3605_v52, -1e+30  ;;  %v9226_v57 = vpop.f32.mrb[99].mxu0 }
0x252d   :  { %v3611_v58 = vsel %vm556_vm5, %v3607_v56, -inf }
0x252e   :  { %3612 = vmax.xlane.f32.xlu1 %v3611_v58 }
0x253f   :  { %3632 = vrot.lane.b32.xlu1 %v11380_v40, %s10507_s16 }
0x2543   :  { %3740 = vrot.lane.b32.xlu1 %v11380_v40, %s10508_s30 }
0x2547   :  { %3790 = vrot.lane.b32.xlu1 %v11384_v42, %s10508_s30 }
0x254b   :  { %3788 = vrot.lane.b32.xlu1 %v11384_v42, %s10509_s18 }
0x25b7   :  { %v3610_v8 = vpop.xlane.xlu0 %3609 }
0x25b8   :  { %v3614_v9 = vsub.f32 %v3606_v48, %v3610_v8 }
0x25ba   :  { %v3616_v59 = vmul.f32 1.442695, %v3614_v9 }
0x25bb   :  { %v3613_v60 = vpop.xlane.xlu1 %3612 }
0x25bc   :  { %9916 = vpow2.f32 %v3616_v59  ;;  %v3615_v61 = vsub.f32 %v3607_v56, %v3613_v60 }
0x25be   :  { %v3618_v62 = vmul.f32 1.442695, %v3615_v61 }
0x25bf   :  { %v3633_v63 = vpop.permute.xlu1 %3632 }
0x25c0   :  { %9918 = vpow2.f32 %v3618_v62  ;;  %v3638_v0 = vsel %vm683_vm6, %v3633_v63, 0 }
0x25c1   :  { %9228 = vmatpush3.bf16.msra.mxu1 %v3638_v0 }
0x25c2   :  { %9239 = vmatprep.subr.bf16.mxu1 %v10501_v1 }
0x25c3   :  { %v3741_v15 = vpop.permute.xlu1 %3740 }
0x25c4   :  { %v3746_v19 = vsel %vm556_vm5, %v3741_v15, 0 }
0x25c6   :  { %v9917_v2 = vpop.eup %9916 }
0x25c7   :  { %v3620_v3 = vsel %vm556_vm5, %v9917_v2, 0.0  ;;  %v3791_v22 = vpop.permute.xlu1 %3790 }
0x25c8   :  { %3621 = vadd.xlane.f32.xlu0 %v3620_v3  ;;  %v3796_v23 = vsel %vm556_vm5, %v3791_v22, 0 }
0x25ca   :  { %v9919_v4 = vpop.eup %9918 }
0x25cb   :  { %v3623_v5 = vsel %vm556_vm5, %v9919_v4, 0.0  ;;  %v3789_v27 = vpop.permute.xlu1 %3788 }
0x25cc   :  { %3624 = vadd.xlane.f32.xlu0 %v3623_v5 }
0x25e2   :  { %3680 = vrot.lane.b32.xlu0 %v11384_v42, %s10507_s16 }
0x25e6   :  { %3738 = vrot.lane.b32.xlu0 %v11380_v40, %s10509_s18 }
0x2655   :  { %v3622_v6 = vpop.xlane.xlu0 %3621 }
0x2656   :  { %9920 = vrcp.f32 %v3622_v6 }
0x2659   :  { %v3625_v7 = vpop.xlane.xlu0 %3624 }
0x265a   :  { %9922 = vrcp.f32 %v3625_v7 }
0x265d   :  { %v3681_v11 = vpop.permute.xlu0 %3680 }
0x265e   :  { %v3686_v12 = vsel %vm683_vm6, %v3681_v11, 0 }
0x265f   :  { %9234 = vmatpush3.bf16.msra.mxu0 %v3686_v12 }
0x2660   :  { %v9921_v13 = vpop.eup %9920  ;;  %9245 = vmatprep.subr.bf16.mxu0 %v10501_v1 }
0x2661   :  { %v3628_v16 = vmul.f32 %v9921_v13, %v9917_v2  ;;  %v3739_v26 = vpop.permute.xlu0 %3738 }
0x2663   :  { %v3630_v17 = vpack.c.bf16 %v3628_v16, %v3628_v16 }
0x2664   :  { %v9923_v18 = vpop.eup %9922 }
0x2665   :  { %9230 = vmatmul.mubr.msk.bf16.vlgmr.msra.gmra.mrb[96].mxu1 %vm556_vm5, %v3630_v17  ;;  %v3629_v20 = vmul.f32 %v9923_v18, %v9919_v4 }
0x2666   :  { %9240 = vmatpush3.bf16.xpose.msra.mxu1 %v3746_v19  ;;  %9241 = vmatprep.mubr.msk.bf16.mxu1 %vm10502_vm0, %v10501_v1 }
0x2667   :  { %v3631_v24 = vpack.c.bf16 %v3629_v20, %v3629_v20  ;;  %9251 = vmatprep.subr.bf16.mxu1 %v10501_v1 }
0x2669   :  { %9236 = vmatmul.mubr.msk.bf16.vlgmr.msra.gmra.mrb[100].mxu0 %vm556_vm5, %v3631_v24 }
0x266a   :  { %9246 = vmatpush3.bf16.xpose.msra.mxu0 %v3796_v23  ;;  %9247 = vmatprep.mubr.msk.bf16.mxu0 %vm10502_vm0, %v10501_v1 }
0x266b   :  { %9257 = vmatprep.subr.bf16.mxu0 %v10501_v1 }
0x266d   :  { %9242 = vmatmul.mubr.msk.bf16.vlgmr.msra.gmra.mrb[100].mxu1 %vm556_vm5, %v3739_v26 }
0x266e   :  { %9253 = vmatprep.mubr.msk.bf16.mxu1 %vm10502_vm0, %v10501_v1 }
0x2671   :  { %9248 = vmatmul.mubr.msk.bf16.vlgmr.msra.gmra.mrb[104].mxu0 %vm556_vm5, %v3789_v27 }
0x2672   :  { %9259 = vmatprep.mubr.msk.bf16.mxu0 %vm10502_vm0, %v10501_v1 }
0x2738   :  { %v11488_v28 = vpop.f32.mrb[96].mxu1 }
0x2739   :  { %v9231_v31 = vpop.f32.mrb[97].mxu1 }
0x273a   :  { %v3677_v32 = vpop.f32.mrb[98].mxu1 }
0x273b   :  { %v9232_v34 = vpop.f32.mrb[99].mxu1 }
0x273c   :  { %v11490_v14 = vpop.f32.mrb[100].mxu0 }
0x273d   :  { %v9237_v36 = vpop.f32.mrb[101].mxu0 }
0x273e   :  { %v3725_v37 = vpop.f32.mrb[102].mxu0 }
0x273f   :  { %v9238_v38 = vpop.f32.mrb[103].mxu0 }
0x2740   :  { %v3782_v39 = vpop.f32.mrb[100].mxu1 }
0x2741   :  { %v3838_v41 = vmul.f32 0.35355338, %v3782_v39  ;;  %v9243_v43 = vpop.f32.mrb[101].mxu1 }
0x2742   :  { %v3785_v21 = vpop.f32.mrb[102].mxu1 }
0x2743   :  { %v3840_v25 = vsel %vm11402_vm12, %v3838_v41, -1e+30  ;;  %v9244_v44 = vpop.f32.mrb[103].mxu1 }
0x2744   :  { %v3832_v35 = vpop.f32.mrb[104].mxu0  ;;  %v3842_v46 = vsel %vm556_vm5, %v3840_v25, -inf }
0x2745   :  { %v3839_v48 = vmul.f32 0.35355338, %v3832_v35  ;;  %v9249_v49 = vpop.f32.mrb[105].mxu0  ;;  %3843 = vmax.xlane.f32.xlu0 %v3842_v46 }
0x2746   :  { %v3835_v50 = vpop.f32.mrb[106].mxu0 }
0x2747   :  { %v3841_v51 = vsel %vm11402_vm12, %v3839_v48, -1e+30  ;;  %v9250_v52 = vpop.f32.mrb[107].mxu0 }
0x2748   :  { %v3845_v53 = vsel %vm556_vm5, %v3841_v51, -inf }
0x2749   :  { %3846 = vmax.xlane.f32.xlu1 %v3845_v53 }
0x275a   :  { %3866 = vrot.lane.b32.xlu1 %v11380_v40, %s10510_s22 }
0x275e   :  { %3974 = vrot.lane.b32.xlu1 %v11380_v40, %s10511_s23 }
0x2762   :  { %4024 = vrot.lane.b32.xlu1 %v11384_v42, %s10511_s23 }
0x2766   :  { %4022 = vrot.lane.b32.xlu1 %v11384_v42, %s10512_s19 }
0x27d2   :  { %v3844_v55 = vpop.xlane.xlu0 %3843 }
0x27d3   :  { %v3848_v56 = vsub.f32 %v3840_v25, %v3844_v55 }
0x27d5   :  { %v3850_v57 = vmul.f32 1.442695, %v3848_v56 }
0x27d6   :  { %v3847_v58 = vpop.xlane.xlu1 %3846 }
0x27d7   :  { %9924 = vpow2.f32 %v3850_v57  ;;  %v3849_v8 = vsub.f32 %v3841_v51, %v3847_v58 }
0x27d9   :  { %v3852_v9 = vmul.f32 1.442695, %v3849_v8 }
0x27da   :  { %v3867_v59 = vpop.permute.xlu1 %3866 }
0x27db   :  { %9926 = vpow2.f32 %v3852_v9  ;;  %v3872_v60 = vsel %vm683_vm6, %v3867_v59, 0 }
0x27dc   :  { %9252 = vmatpush3.bf16.msra.mxu1 %v3872_v60 }
0x27dd   :  { %9263 = vmatprep.subr.bf16.mxu1 %v10501_v1 }
0x27de   :  { %v3975_v7 = vpop.permute.xlu1 %3974 }
0x27df   :  { %v3980_v15 = vsel %vm556_vm5, %v3975_v7, 0 }
0x27e1   :  { %v9925_v61 = vpop.eup %9924 }
0x27e2   :  { %v3854_v62 = vsel %vm556_vm5, %v9925_v61, 0.0  ;;  %v4025_v17 = vpop.permute.xlu1 %4024 }
0x27e3   :  { %3855 = vadd.xlane.f32.xlu0 %v3854_v62  ;;  %v4030_v19 = vsel %vm556_vm5, %v4025_v17, 0 }
0x27e5   :  { %v9927_v63 = vpop.eup %9926 }
0x27e6   :  { %v3857_v0 = vsel %vm556_vm5, %v9927_v63, 0.0  ;;  %v4023_v22 = vpop.permute.xlu1 %4022 }
0x27e7   :  { %3858 = vadd.xlane.f32.xlu0 %v3857_v0 }
0x27fd   :  { %3914 = vrot.lane.b32.xlu0 %v11384_v42, %s10510_s22 }
0x2801   :  { %3972 = vrot.lane.b32.xlu0 %v11380_v40, %s10512_s19 }
0x2870   :  { %v3856_v2 = vpop.xlane.xlu0 %3855 }
0x2871   :  { %9928 = vrcp.f32 %v3856_v2 }
0x2874   :  { %v3859_v3 = vpop.xlane.xlu0 %3858 }
0x2875   :  { %9930 = vrcp.f32 %v3859_v3 }
0x2878   :  { %v3915_v4 = vpop.permute.xlu0 %3914 }
0x2879   :  { %v3920_v5 = vsel %vm683_vm6, %v3915_v4, 0 }
0x287a   :  { %9258 = vmatpush3.bf16.msra.mxu0 %v3920_v5 }
0x287b   :  { %v9929_v6 = vpop.eup %9928  ;;  %9269 = vmatprep.subr.bf16.mxu0 %v10501_v1 }
0x287c   :  { %v3862_v11 = vmul.f32 %v9929_v6, %v9925_v61  ;;  %v3973_v20 = vpop.permute.xlu0 %3972 }
0x287e   :  { %v3864_v12 = vpack.c.bf16 %v3862_v11, %v3862_v11 }
0x287f   :  { %v9931_v13 = vpop.eup %9930 }
0x2880   :  { %9254 = vmatmul.mubr.msk.bf16.vlgmr.msra.gmra.mrb[104].mxu1 %vm556_vm5, %v3864_v12  ;;  %v3863_v16 = vmul.f32 %v9931_v13, %v9927_v63  ;;  %v9800_v13 = vld [vmem:[%s12316_s5] sm:$0xff]  }
0x2881   :  { %9264 = vmatpush3.bf16.xpose.msra.mxu1 %v3980_v15  ;;  %9265 = vmatprep.mubr.msk.bf16.mxu1 %vm10502_vm0, %v10501_v1  ;;  %v9801_v15 = vld [vmem:[%s12316_s5 + $0x8] sm:$0xff]  }
0x2882   :  { %v3865_v18 = vpack.c.bf16 %v3863_v16, %v3863_v16  ;;  %9275 = vmatprep.subr.bf16.mxu1 %v10501_v1 }
0x2884   :  { %9260 = vmatmul.mubr.msk.bf16.vlgmr.msra.gmra.mrb[108].mxu0 %vm556_vm5, %v3865_v18 }
0x2885   :  { %9270 = vmatpush3.bf16.xpose.msra.mxu0 %v4030_v19  ;;  %9271 = vmatprep.mubr.msk.bf16.mxu0 %vm10502_vm0, %v10501_v1 }
0x2886   :  { %9281 = vmatprep.subr.bf16.mxu0 %v10501_v1 }
0x2888   :  { %9266 = vmatmul.mubr.msk.bf16.vlgmr.msra.gmra.mrb[108].mxu1 %vm556_vm5, %v3973_v20 }
0x2889   :  { %9277 = vmatprep.mubr.msk.bf16.mxu1 %vm10502_vm0, %v10501_v1 }
0x288c   :  { %9272 = vmatmul.mubr.msk.bf16.vlgmr.msra.gmra.mrb[112].mxu0 %vm556_vm5, %v4023_v22 }
0x288d   :  { %9283 = vmatprep.mubr.msk.bf16.mxu0 %vm10502_vm0, %v10501_v1 }
0x2953   :  { %v3908_v24 = vpop.f32.mrb[104].mxu1 }
0x2954   :  { %v9255_v23 = vpop.f32.mrb[105].mxu1 }
0x2955   :  { %v3911_v26 = vpop.f32.mrb[106].mxu1 }
0x2956   :  { %v9256_v27 = vpop.f32.mrb[107].mxu1  ;;  %v8427_v26 = vld [vmem:[%s12309_s8 + $0x1] ss:$0 sm:$0xff] }
0x2957   :  { %v3956_v31 = vpop.f32.mrb[108].mxu0  ;;  %v3050_v27 = vadd.f32 %v8427_v26, %v11376_v33 }
0x2958   :  { %v9261_v32 = vpop.f32.mrb[109].mxu0 }
0x2959   :  { %v3959_v34 = vpop.f32.mrb[110].mxu0 }
0x295a   :  { %v9262_v36 = vpop.f32.mrb[111].mxu0  ;;  %v3053_v34 = vadd.f32 %v8427_v26, %v11378_v10  ;;  %v9804_v26 = vld [vmem:[%s12318_s29] sm:$0xff]  }
0x295b   :  { %v4016_v37 = vpop.f32.mrb[108].mxu1 }
0x295c   :  { %v4072_v38 = vmul.f32 0.35355338, %v4016_v37  ;;  %v9267_v39 = vpop.f32.mrb[109].mxu1  ;;  %v3057_v36 = vadd.f32 %v3053_v34, %v11332_v45 }
0x295d   :  { %v4019_v41 = vpop.f32.mrb[110].mxu1 }
0x295e   :  { %v4074_v43 = vsel %vm11402_vm12, %v4072_v38, -1e+30  ;;  %v9268_v21 = vpop.f32.mrb[111].mxu1  ;;  %v3065_v37 = vsel %vm501_vm4, %v3057_v36, 0.0 }
0x295f   :  { %v4066_v25 = vpop.f32.mrb[112].mxu0  ;;  %v4076_v44 = vsel %vm556_vm5, %v4074_v43, -inf }
0x2960   :  { %v4073_v35 = vmul.f32 0.35355338, %v4066_v25  ;;  %v9273_v46 = vpop.f32.mrb[113].mxu0  ;;  %4077 = vmax.xlane.f32.xlu0 %v4076_v44 }
0x2961   :  { %v4069_v48 = vpop.f32.mrb[114].mxu0 }
0x2962   :  { %v4075_v49 = vsel %vm11402_vm12, %v4073_v35, -1e+30  ;;  %v9274_v50 = vpop.f32.mrb[115].mxu0  ;;  %v8464_v35 = vld [vmem:[#allocation10] ss:$0 sm:$0xff] }
0x2963   :  { %v4079_v51 = vsel %vm556_vm5, %v4075_v49, -inf }
0x2964   :  { %4080 = vmax.xlane.f32.xlu1 %v4079_v51 }
0x2975   :  { %4100 = vrot.lane.b32.xlu1 %v11380_v40, %s10513_s17 }
0x2979   :  { %3730 = vrot.lane.b32.xlu1 %v11488_v28, %s10514_s25 }
0x297d   :  { %3732 = vrot.lane.b32.xlu1 %v11490_v14, %s10514_s25 }
0x2981   :  { %3966 = vrot.lane.b32.xlu1 %v3956_v31, %s10484_s2  ;;  %v3056_v31 = vadd.f32 %v3050_v27, %v11330_v54  ;;  %v9805_v27 = vld [vmem:[%s12318_s29 + $0x8] sm:$0xff]  }
0x2983   :  { %v3062_v32 = vsel %vm501_vm4, %v3056_v31, 0.0 }
0x29ed   :  { %v4078_v52 = vpop.xlane.xlu0 %4077 }
0x29ee   :  { %v4082_v53 = vsub.f32 %v4074_v43, %v4078_v52 }
0x29f0   :  { %v4084_v55 = vmul.f32 1.442695, %v4082_v53 }
0x29f1   :  { %v4081_v56 = vpop.xlane.xlu1 %4080 }
0x29f2   :  { %9932 = vpow2.f32 %v4084_v55  ;;  %v4083_v57 = vsub.f32 %v4075_v49, %v4081_v56 }
0x29f4   :  { %v4086_v58 = vmul.f32 1.442695, %v4083_v57 }
0x29f5   :  { %v4101_v8 = vpop.permute.xlu1 %4100 }
0x29f6   :  { %9934 = vpow2.f32 %v4086_v58  ;;  %v4106_v9 = vsel %vm683_vm6, %v4101_v8, 0 }
0x29f7   :  { %9276 = vmatpush3.bf16.msra.mxu1 %v4106_v9 }
0x29f8   :  { %9287 = vmatprep.subr.bf16.mxu1 %v10501_v1 }
0x29f9   :  { %v3731_v40 = vpop.permute.xlu1 %3730 }
0x29fa   :  { %3736 = vst.msk [vmem:[#allocation2] sm:$0xff] %vm1007_vm7, %v3731_v40 }
0x29fc   :  { %v9933_v28 = vpop.eup %9932 }
0x29fd   :  { %v3733_v14 = vpop.permute.xlu1 %3732  ;;  %v4088_v59 = vsel %vm556_vm5, %v9933_v28, 0.0 }
0x29fe   :  { %3737 = vst.msk [vmem:[#allocation2 + $0x8] sm:$0xff] %vm1007_vm7, %v3733_v14  ;;  %4089 = vadd.xlane.f32.xlu0 %v4088_v59  ;;  %v9803_v14 = vld [vmem:[%s12317_s11 + $0x8] sm:$0xff]  }
0x2a00   :  { %v9935_v60 = vpop.eup %9934 }
0x2a01   :  { %v3967_v61 = vpop.permute.xlu1 %3966  ;;  %v4091_v62 = vsel %vm556_vm5, %v9935_v60, 0.0 }
0x2a02   :  { %3971 = vst.msk [vmem:[#allocation2 + $0x8] sm:$0xff] %vm1240_vm8, %v3967_v61  ;;  %4092 = vadd.xlane.f32.xlu0 %v4091_v62 }
0x2a18   :  { %4148 = vrot.lane.b32.xlu0 %v11384_v42, %s10513_s17 }
0x2a1c   :  { %3964 = vrot.lane.b32.xlu0 %v3908_v24, %s10484_s2 }
0x2a8b   :  { %v4090_v63 = vpop.xlane.xlu0 %4089 }
0x2a8c   :  { %9936 = vrcp.f32 %v4090_v63 }
0x2a8f   :  { %v4093_v0 = vpop.xlane.xlu0 %4092 }
0x2a90   :  { %9938 = vrcp.f32 %v4093_v0 }
0x2a93   :  { %v4149_v2 = vpop.permute.xlu0 %4148 }
0x2a94   :  { %v4154_v3 = vsel %vm683_vm6, %v4149_v2, 0 }
0x2a95   :  { %9282 = vmatpush3.bf16.msra.mxu0 %v4154_v3 }
0x2a96   :  { %v9937_v4 = vpop.eup %9936  ;;  %9295 = vmatprep.subr.bf16.mxu0 %v10501_v1 }
0x2a97   :  { %v3965_v5 = vpop.permute.xlu0 %3964  ;;  %v4096_v6 = vmul.f32 %v9937_v4, %v9933_v28  ;;  %v9802_v28 = vld [vmem:[%s12317_s11] sm:$0xff]  }
0x2a98   :  { %3970 = vst.msk [vmem:[#allocation2] sm:$0xff] %vm1240_vm8, %v3965_v5 }
0x2a99   :  { %v4098_v42 = vpack.c.bf16 %v4096_v6, %v4096_v6 }
0x2a9a   :  { %v9939_v7 = vpop.eup %9938 }
0x2a9b   :  { %9278 = vmatmul.mubr.msk.bf16.vlgmr.msra.gmra.mrb[112].mxu1 %vm556_vm5, %v4098_v42  ;;  %v4097_v11 = vmul.f32 %v9939_v7, %v9935_v60 }
0x2a9c   :  { %9291 = vmatprep.mubr.msk.bf16.mxu1 %vm10502_vm0, %v10501_v1  ;;  %9288 = vmatpush3.bf16.msra.mxu1 %v9800_v13 }
0x2a9d   :  { %v4099_v12 = vpack.c.bf16 %v4097_v11, %v4097_v11  ;;  %9289 = vmatprep.subr.bf16.mxu1 %v10501_v1 }
0x2a9f   :  { %9284 = vmatmul.mubr.msk.bf16.vlgmr.msra.gmra.mrb[116].mxu0 %vm556_vm5, %v4099_v12 }
0x2aa0   :  { %9299 = vmatprep.mubr.msk.bf16.mxu0 %vm10502_vm0, %v10501_v1  ;;  %9290 = vmatpush3.bf16.msra.mxu1 %v9801_v15  ;;  %v8435_v15 = vld [vmem:[%s12310_s12 + $0x1] ss:$0 sm:$0xff] }
0x2aa1   :  { %9303 = vmatprep.subr.bf16.mxu1 %v10501_v1  ;;  %9296 = vmatpush3.bf16.msra.mxu0 %v9804_v26 }
0x2aa2   :  { %9297 = vmatprep.subr.bf16.mxu0 %v10501_v1 }
0x2aa5   :  { %9298 = vmatpush3.bf16.msra.mxu0 %v9805_v27 }
0x2aa6   :  { %9311 = vmatprep.subr.bf16.mxu0 %v10501_v1 }
0x2b6e   :  { %v4142_v16 = vpop.f32.mrb[112].mxu1 }
0x2b6f   :  { %4198 = vrot.lane.b32.xlu0 %v4142_v16, %s10515_s3  ;;  %v9279_v17 = vpop.f32.mrb[113].mxu1 }
0x2b70   :  { %v4145_v18 = vpop.f32.mrb[114].mxu1 }
0x2b71   :  { %v9280_v19 = vpop.f32.mrb[115].mxu1 }
0x2b72   :  { %v4190_v20 = vpop.f32.mrb[116].mxu0  ;;  %v8436_v19 = vld [vmem:[%s12311_s10 + $0x1] ss:$0 sm:$0xff] }
0x2b73   :  { %4200 = vrot.lane.b32.xlu1 %v4190_v20, %s10515_s3  ;;  %v9285_v22 = vpop.f32.mrb[117].mxu0 }
0x2b74   :  { %v4193_v24 = vpop.f32.mrb[118].mxu0 }
0x2b75   :  { %v9286_v23 = vpop.f32.mrb[119].mxu0 }
0x2b8e   :  { %3063 = vadd.xlane.f32.xlu0 %v3062_v32 }
0x2b97   :  { %3066 = vadd.xlane.f32.xlu1 %v3065_v37 }
0x2be1   :  { %v4199_v38 = vpop.permute.xlu0 %4198 }
0x2be2   :  { %4204 = vst.msk [vmem:[#allocation2] sm:$0xff] %vm1473_vm9, %v4199_v38 }
0x2be5   :  { %v4201_v39 = vpop.permute.xlu1 %4200 }
0x2be6   :  { %4205 = vst.msk [vmem:[#allocation2 + $0x8] sm:$0xff] %vm1473_vm9, %v4201_v39 }
0x2be9   :  { %v4206_v41 = vld [vmem:[#allocation2] sm:$0xff] }
0x2bed   :  { %v4207_v33 = vld [vmem:[#allocation2 + $0x8] sm:$0xff] }
0x2bee   :  { %v4208_v43 = vpack.c.bf16 %v4207_v33, %v4206_v41  ;;  %v8468_v33 = vld [vmem:[#allocation19] ss:$0 sm:$0xff] }
0x2bf0   :  { %9292 = vmatmul.mubr.msk.bf16.vlgmr.msra.gmra.mrb[116].mxu1 %vm501_vm4, %v4208_v43 }
0x2bf1   :  { %9307 = vmatprep.mubr.msk.bf16.mxu1 %vm10502_vm0, %v10501_v1  ;;  %9304 = vmatpush3.bf16.msra.mxu1 %v9802_v28 }
0x2bf2   :  { %9305 = vmatprep.subr.bf16.mxu1 %v10501_v1 }
0x2bf5   :  { %9306 = vmatpush3.bf16.msra.mxu1 %v9803_v14 }
0x2bf6   :  { %9317 = vmatprep.subr.bf16.mxu1 %v10501_v1 }
0x2c1b   :  { %v3064_v54 = vpop.xlane.xlu0 %3063 }
0x2c1c   :  { %v3068_v10 = vmul.f32 0.03125, %v3064_v54 }
0x2c1e   :  { %v3070_v45 = vsub.f32 %v3056_v31, %v3068_v10 }
0x2c20   :  { %v3072_v21 = vmul.f32 %v3070_v45, %v3070_v45 }
0x2c22   :  { %v3074_v25 = vsel %vm501_vm4, %v3072_v21, 0.0 }
0x2c23   :  { %3075 = vadd.xlane.f32.xlu1 %v3074_v25 }
0x2c24   :  { %v3067_v44 = vpop.xlane.xlu1 %3066 }
0x2c25   :  { %v3069_v48 = vmul.f32 0.03125, %v3067_v44 }
0x2c27   :  { %v3071_v56 = vsub.f32 %v3057_v36, %v3069_v48 }
0x2c29   :  { %v3073_v9 = vmul.f32 %v3071_v56, %v3071_v56 }
0x2c2b   :  { %v3077_v40 = vsel %vm501_vm4, %v3073_v9, 0.0 }
0x2cc3   :  { %v4264_v46 = vpop.f32.mrb[116].mxu1 }
0x2cc4   :  { %v4265_v49 = vadd.f32 %v8464_v35, %v4264_v46  ;;  %v9293_v50 = vpop.f32.mrb[117].mxu1  ;;  %v8474_v46 = vld [vmem:[#allocation14] ss:$0 sm:$0xff] }
0x2cc5   :  { %v4267_v51 = vpop.f32.mrb[118].mxu1 }
0x2cc6   :  { %v4271_v52 = vadd.f32 %v4265_v49, %v11367_v29  ;;  %v4268_v53 = vadd.f32 %v8464_v35, %v4267_v51  ;;  %v9294_v55 = vpop.f32.mrb[119].mxu1  ;;  %v3076_v29 = vpop.xlane.xlu1 %3075 }
0x2cc8   :  { %v4272_v57 = vadd.f32 %v4268_v53, %v11369_v30  ;;  %v4275_v58 = vsel %vm501_vm4, %v4271_v52, 0.0  ;;  %v3080_v30 = vmul.f32 0.03125, %v3076_v29 }
0x2cc9   :  { %4276 = vadd.xlane.f32.xlu0 %v4275_v58 }
0x2cca   :  { %v4278_v8 = vsel %vm501_vm4, %v4272_v57, 0.0  ;;  %v3082_v61 = vadd.f32 1e-05, %v3080_v30 }
0x2ccc   :  { %9940 = vrsqrt.f32 %v3082_v61 }
0x2ccd   :  { %4279 = vadd.xlane.f32.xlu0 %v4278_v8  ;;  %v8470_v8 = vld [vmem:[#allocation16] ss:$0 sm:$0xff] }
0x2cd1   :  { %3078 = vadd.xlane.f32.xlu0 %v3077_v40 }
0x2cd6   :  { %v9941_v12 = vpop.eup %9940 }
0x2cd7   :  { %v3086_v13 = vmul.f32 %v9941_v12, %v3070_v45  ;;  %v8469_v45 = vld [vmem:[#allocation17] ss:$0 sm:$0xff] }
0x2cd9   :  { %v3094_v17 = vmul.f32 %v8435_v15, %v3086_v13 }
0x2cdb   :  { %v3102_v22 = vadd.f32 %v8436_v19, %v3094_v17 }
0x2d56   :  { %v4277_v59 = vpop.xlane.xlu0 %4276 }
0x2d57   :  { %v4281_v60 = vmul.f32 0.03125, %v4277_v59 }
0x2d59   :  { %v4283_v62 = vsub.f32 %v4271_v52, %v4281_v60 }
0x2d5a   :  { %v4280_v63 = vpop.xlane.xlu0 %4279 }
0x2d5b   :  { %v4282_v0 = vmul.f32 0.03125, %v4280_v63  ;;  %v4285_v2 = vmul.f32 %v4283_v62, %v4283_v62 }
0x2d5d   :  { %v4284_v3 = vsub.f32 %v4272_v57, %v4282_v0  ;;  %v4287_v4 = vsel %vm501_vm4, %v4285_v2, 0.0 }
0x2d5e   :  { %4288 = vadd.xlane.f32.xlu1 %v4287_v4  ;;  %v3079_v5 = vpop.xlane.xlu0 %3078 }
0x2d5f   :  { %v3081_v6 = vmul.f32 0.03125, %v3079_v5  ;;  %v4286_v42 = vmul.f32 %v4284_v3, %v4284_v3 }
0x2d61   :  { %v3083_v7 = vadd.f32 1e-05, %v3081_v6  ;;  %v4290_v11 = vsel %vm501_vm4, %v4286_v42, 0.0 }
0x2d62   :  { %4291 = vadd.xlane.f32.xlu0 %v4290_v11 }
0x2d63   :  { %9942 = vrsqrt.f32 %v3083_v7 }
0x2d6d   :  { %v9943_v16 = vpop.eup %9942 }
0x2d6e   :  { %v3087_v18 = vmul.f32 %v9943_v16, %v3071_v56 }
0x2d70   :  { %v3095_v20 = vmul.f32 %v8435_v15, %v3087_v18 }
0x2d72   :  { %v3103_v24 = vadd.f32 %v8436_v19, %v3095_v20 }
0x2d74   :  { %v11596_v23 = vpack.c.bf16 %v3103_v24, %v3102_v22 }
0x2d76   :  { %9308 = vmatmul.mubr.msk.bf16.vlgmr.msra.gmra.mrb[120].mxu1 %vm501_vm4, %v11596_v23 }
0x2d77   :  { %9319 = vmatprep.mubr.msk.bf16.mxu1 %vm10502_vm0, %v10501_v1 }
0x2deb   :  { %v4289_v31 = vpop.xlane.xlu1 %4288 }
0x2dec   :  { %v4293_v32 = vmul.f32 0.03125, %v4289_v31 }
0x2dee   :  { %v4295_v34 = vadd.f32 1e-05, %v4293_v32 }
0x2def   :  { %v4292_v36 = vpop.xlane.xlu0 %4291 }
0x2df0   :  { %9944 = vrsqrt.f32 %v4295_v34  ;;  %v4294_v37 = vmul.f32 0.03125, %v4292_v36 }
0x2df2   :  { %v4296_v38 = vadd.f32 1e-05, %v4294_v37 }
0x2df4   :  { %9946 = vrsqrt.f32 %v4296_v38 }
0x2dfa   :  { %v9945_v39 = vpop.eup %9944 }
0x2dfb   :  { %v4299_v41 = vmul.f32 %v9945_v39, %v4283_v62 }
0x2dfd   :  { %v4307_v54 = vmul.f32 %v8468_v33, %v4299_v41 }
0x2dfe   :  { %v9947_v43 = vpop.eup %9946 }
0x2dff   :  { %v4300_v10 = vmul.f32 %v9947_v43, %v4284_v3  ;;  %v11606_v25 = vadd.f32 %v8469_v45, %v4307_v54 }
0x2e01   :  { %v4308_v21 = vmul.f32 %v8468_v33, %v4300_v10 }
0x2e03   :  { %v11608_v44 = vadd.f32 %v8469_v45, %v4308_v21 }
0x2e05   :  { %v4321_v35 = vpack.c.bf16 %v11608_v44, %v11606_v25 }
0x2e07   :  { %9300 = vmatmul.mubr.msk.bf16.vlgmr.msra.gmra.mrb[120].mxu0 %vm501_vm4, %v4321_v35 }
0x2e08   :  { %9313 = vmatprep.mubr.msk.bf16.mxu0 %vm10502_vm0, %v10501_v1 }
0x2e49   :  { %v4445_v48 = vpop.f32.mrb[120].mxu1 }
0x2e4a   :  { %v4446_v49 = vadd.f32 %v8474_v46, %v4445_v48  ;;  %v9309_v50 = vpop.f32.mrb[121].mxu1 }
0x2e4b   :  { %v4448_v51 = vpop.f32.mrb[122].mxu1 }
0x2e4c   :  { %v11615_v52 = vpack.c.bf16 %v4446_v49, %v4446_v49  ;;  %v4449_v53 = vadd.f32 %v8474_v46, %v4448_v51  ;;  %v9310_v55 = vpop.f32.mrb[123].mxu1 }
0x2e4e   :  { %v11617_v56 = vpack.c.bf16 %v4449_v53, %v4449_v53  ;;  %v4465_v57 = vsel %vm556_vm5, %v11615_v52, 0 }
0x2e4f   :  { %9312 = vmatpush3.bf16.xpose.msra.mxu0 %v4465_v57 }
0x2e50   :  { %v4511_v58 = vsel %vm556_vm5, %v11617_v56, 0  ;;  %9323 = vmatprep.subr.bf16.mxu0 %v10501_v1 }
0x2e51   :  { %9318 = vmatpush3.bf16.xpose.msra.mxu1 %v4511_v58 }
0x2e52   :  { %9329 = vmatprep.subr.bf16.mxu1 %v10501_v1 }
0x2eda   :  { %v4378_v9 = vpop.f32.mrb[120].mxu0 }
0x2edb   :  { %v4379_v40 = vadd.f32 %v8470_v8, %v4378_v9  ;;  %v9301_v28 = vpop.f32.mrb[121].mxu0 }
0x2edc   :  { %v4381_v14 = vpop.f32.mrb[122].mxu0 }
0x2edd   :  { %v11625_v29 = vpack.c.bf16 %v4379_v40, %v4379_v40  ;;  %v4382_v30 = vadd.f32 %v8470_v8, %v4381_v14  ;;  %v9302_v59 = vpop.f32.mrb[123].mxu0 }
0x2edf   :  { %v11627_v60 = vpack.c.bf16 %v4382_v30, %v4382_v30  ;;  %9314 = vmatmul.mubr.msk.bf16.vlgmr.msra.gmra.mrb[124].mxu0 %vm556_vm5, %v11625_v29 }
0x2ee0   :  { %9325 = vmatprep.mubr.msk.bf16.mxu0 %vm10502_vm0, %v10501_v1 }
0x2ee1   :  { %9320 = vmatmul.mubr.msk.bf16.vlgmr.msra.gmra.mrb[124].mxu1 %vm556_vm5, %v11627_v60 }
0x2ee2   :  { %9331 = vmatprep.mubr.msk.bf16.mxu1 %vm10502_vm0, %v10501_v1 }
0x2fb2   :  { %v4501_v61 = vpop.f32.mrb[124].mxu0 }
0x2fb3   :  { %v4553_v62 = vmul.f32 0.35355338, %v4501_v61  ;;  %v9315_v63 = vpop.f32.mrb[125].mxu0 }
0x2fb4   :  { %v4504_v0 = vpop.f32.mrb[126].mxu0  ;;  %v4547_v2 = vpop.f32.mrb[124].mxu1 }
0x2fb5   :  { %v4554_v3 = vmul.f32 0.35355338, %v4547_v2  ;;  %v9316_v4 = vpop.f32.mrb[127].mxu0  ;;  %v9321_v5 = vpop.f32.mrb[125].mxu1  ;;  %v4555_v6 = vsel %vm556_vm5, %v4553_v62, -inf }
0x2fb6   :  { %4556 = vmax.xlane.f32.xlu1 %v4555_v6  ;;  %v4550_v42 = vpop.f32.mrb[126].mxu1 }
0x2fb7   :  { %v9322_v7 = vpop.f32.mrb[127].mxu1  ;;  %v4558_v11 = vsel %vm556_vm5, %v4554_v3, -inf }
0x2fb8   :  { %4559 = vmax.xlane.f32.xlu0 %v4558_v11 }
0x2fc7   :  { %4580 = vrot.lane.b32.xlu1 %v11615_v52, %s10503_s14 }
0x3043   :  { %v4557_v12 = vpop.xlane.xlu1 %4556 }
0x3044   :  { %v4561_v13 = vsub.f32 %v4553_v62, %v4557_v12 }
0x3045   :  { %v4560_v15 = vpop.xlane.xlu0 %4559 }
0x3046   :  { %v4563_v16 = vmul.f32 1.442695, %v4561_v13  ;;  %v4562_v17 = vsub.f32 %v4554_v3, %v4560_v15 }
0x3047   :  { %v4581_v18 = vpop.permute.xlu1 %4580 }
0x3048   :  { %9948 = vpow2.f32 %v4563_v16  ;;  %v4565_v19 = vmul.f32 1.442695, %v4562_v17  ;;  %v4586_v20 = vsel %vm683_vm6, %v4581_v18, 0 }
0x3049   :  { %9324 = vmatpush3.bf16.msra.mxu0 %v4586_v20 }
0x304a   :  { %9950 = vpow2.f32 %v4565_v19  ;;  %9335 = vmatprep.subr.bf16.mxu0 %v10501_v1 }
0x3052   :  { %v9949_v22 = vpop.eup %9948 }
0x3053   :  { %v4567_v24 = vsel %vm556_vm5, %v9949_v22, 0.0 }
0x3054   :  { %v9951_v26 = vpop.eup %9950  ;;  %4568 = vadd.xlane.f32.xlu1 %v4567_v24 }
0x3055   :  { %v4570_v27 = vsel %vm556_vm5, %v9951_v26, 0.0 }
0x3056   :  { %4571 = vadd.xlane.f32.xlu0 %v4570_v27 }
0x3065   :  { %4682 = vrot.lane.b32.xlu1 %v11615_v52, %s10506_s9 }
0x3069   :  { %4733 = vrot.lane.b32.xlu1 %v11617_v56, %s10506_s9 }
0x306c   :  { %4629 = vrot.lane.b32.xlu0 %v11617_v56, %s10503_s14 }
0x306d   :  { %4731 = vrot.lane.b32.xlu1 %v11627_v60, %s10506_s9 }
0x3070   :  { %4680 = vrot.lane.b32.xlu0 %v11625_v29, %s10506_s9 }
0x30e1   :  { %v4569_v31 = vpop.xlane.xlu1 %4568 }
0x30e2   :  { %9952 = vrcp.f32 %v4569_v31 }
0x30e3   :  { %v4572_v32 = vpop.xlane.xlu0 %4571 }
0x30e4   :  { %9954 = vrcp.f32 %v4572_v32 }
0x30e5   :  { %v4683_v37 = vpop.permute.xlu1 %4682 }
0x30e6   :  { %v4688_v10 = vsel %vm556_vm5, %v4683_v37, 0 }
0x30e7   :  { %v4630_v34 = vpop.permute.xlu0 %4629 }
0x30e8   :  { %v4635_v36 = vsel %vm683_vm6, %v4630_v34, 0 }
0x30e9   :  { %9330 = vmatpush3.bf16.msra.mxu1 %v4635_v36  ;;  %v4734_v54 = vpop.permute.xlu1 %4733 }
0x30ea   :  { %9341 = vmatprep.subr.bf16.mxu1 %v10501_v1  ;;  %v4739_v21 = vsel %vm556_vm5, %v4734_v54, 0 }
0x30eb   :  { %v4681_v35 = vpop.permute.xlu0 %4680 }
0x30ec   :  { %v9953_v38 = vpop.eup %9952 }
0x30ed   :  { %v4575_v39 = vmul.f32 %v9953_v38, %v9949_v22  ;;  %v4732_v46 = vpop.permute.xlu1 %4731 }
0x30ee   :  { %v9955_v41 = vpop.eup %9954 }
0x30ef   :  { %v4577_v33 = vpack.c.bf16 %v4575_v39, %v4575_v39  ;;  %v4576_v43 = vmul.f32 %v9955_v41, %v9951_v26 }
0x30f1   :  { %9326 = vmatmul.mubr.msk.bf16.vlgmr.msra.gmra.mrb[128].mxu0 %vm556_vm5, %v4577_v33  ;;  %v4578_v45 = vpack.c.bf16 %v4576_v43, %v4576_v43 }
0x30f2   :  { %9336 = vmatpush3.bf16.xpose.msra.mxu0 %v4688_v10  ;;  %9337 = vmatprep.mubr.msk.bf16.mxu0 %vm10502_vm0, %v10501_v1 }
0x30f3   :  { %9332 = vmatmul.mubr.msk.bf16.vlgmr.msra.gmra.mrb[128].mxu1 %vm556_vm5, %v4578_v45  ;;  %9347 = vmatprep.subr.bf16.mxu0 %v10501_v1 }
0x30f4   :  { %9342 = vmatpush3.bf16.xpose.msra.mxu1 %v4739_v21  ;;  %9343 = vmatprep.mubr.msk.bf16.mxu1 %vm10502_vm0, %v10501_v1 }
0x30f5   :  { %9353 = vmatprep.subr.bf16.mxu1 %v10501_v1 }
0x30f9   :  { %9338 = vmatmul.mubr.msk.bf16.vlgmr.msra.gmra.mrb[132].mxu0 %vm556_vm5, %v4681_v35 }
0x30fa   :  { %9349 = vmatprep.mubr.msk.bf16.mxu0 %vm10502_vm0, %v10501_v1 }
0x30fb   :  { %9344 = vmatmul.mubr.msk.bf16.vlgmr.msra.gmra.mrb[132].mxu1 %vm556_vm5, %v4732_v46 }
0x30fc   :  { %9355 = vmatprep.mubr.msk.bf16.mxu1 %vm10502_vm0, %v10501_v1 }
0x31c4   :  { %v4622_v48 = vpop.f32.mrb[128].mxu0 }
0x31c5   :  { %4677 = vst.msk [vmem:[#allocation2] sm:$0xff] %vm556_vm5, %v4622_v48  ;;  %v9327_v49 = vpop.f32.mrb[129].mxu0 }
0x31c6   :  { %v4625_v50 = vpop.f32.mrb[130].mxu0  ;;  %v4671_v51 = vpop.f32.mrb[128].mxu1 }
0x31c7   :  { %4678 = vst.msk [vmem:[#allocation2 + $0x8] sm:$0xff] %vm556_vm5, %v4671_v51  ;;  %v9328_v53 = vpop.f32.mrb[131].mxu0  ;;  %v9333_v55 = vpop.f32.mrb[129].mxu1 }
0x31c8   :  { %v4674_v57 = vpop.f32.mrb[130].mxu1 }
0x31c9   :  { %v9334_v58 = vpop.f32.mrb[131].mxu1 }
0x31cc   :  { %v4724_v8 = vpop.f32.mrb[132].mxu0 }
0x31cd   :  { %v4781_v9 = vmul.f32 0.35355338, %v4724_v8  ;;  %v9339_v40 = vpop.f32.mrb[133].mxu0 }
0x31ce   :  { %v4727_v28 = vpop.f32.mrb[134].mxu0  ;;  %v4775_v14 = vpop.f32.mrb[132].mxu1 }
0x31cf   :  { %v4782_v30 = vmul.f32 0.35355338, %v4775_v14  ;;  %v9340_v59 = vpop.f32.mrb[135].mxu0  ;;  %v9345_v61 = vpop.f32.mrb[133].mxu1  ;;  %v4783_v62 = vsel %vm556_vm5, %v4781_v9, -inf }
0x31d0   :  { %4784 = vmax.xlane.f32.xlu0 %v4783_v62  ;;  %v4778_v63 = vpop.f32.mrb[134].mxu1 }
0x31d1   :  { %v9346_v0 = vpop.f32.mrb[135].mxu1  ;;  %v4786_v2 = vsel %vm556_vm5, %v4782_v30, -inf }
0x31d2   :  { %4787 = vmax.xlane.f32.xlu1 %v4786_v2 }
0x31e3   :  { %4807 = vrot.lane.b32.xlu1 %v11615_v52, %s10505_s15 }
0x31e7   :  { %4915 = vrot.lane.b32.xlu1 %v11615_v52, %s10509_s18 }
0x31eb   :  { %4965 = vrot.lane.b32.xlu1 %v11617_v56, %s10509_s18 }
0x31ef   :  { %4963 = vrot.lane.b32.xlu1 %v11627_v60, %s10509_s18 }
0x325d   :  { %v4785_v3 = vpop.xlane.xlu0 %4784 }
0x325e   :  { %v4789_v4 = vsub.f32 %v4781_v9, %v4785_v3 }
0x325f   :  { %v4788_v5 = vpop.xlane.xlu1 %4787 }
0x3260   :  { %v4791_v6 = vmul.f32 1.442695, %v4789_v4  ;;  %v4790_v42 = vsub.f32 %v4782_v30, %v4788_v5 }
0x3262   :  { %9956 = vpow2.f32 %v4791_v6  ;;  %v4793_v7 = vmul.f32 1.442695, %v4790_v42 }
0x3263   :  { %v4808_v11 = vpop.permute.xlu1 %4807 }
0x3264   :  { %9958 = vpow2.f32 %v4793_v7  ;;  %v4813_v12 = vsel %vm683_vm6, %v4808_v11, 0 }
0x3265   :  { %9348 = vmatpush3.bf16.msra.mxu0 %v4813_v12 }
0x3266   :  { %9359 = vmatprep.subr.bf16.mxu0 %v10501_v1 }
0x3267   :  { %v4916_v26 = vpop.permute.xlu1 %4915 }
0x3268   :  { %v4921_v34 = vsel %vm556_vm5, %v4916_v26, 0 }
0x326b   :  { %v4966_v37 = vpop.permute.xlu1 %4965 }
0x326c   :  { %v9957_v13 = vpop.eup %9956  ;;  %v4971_v39 = vsel %vm556_vm5, %v4966_v37, 0 }
0x326d   :  { %v4795_v15 = vsel %vm556_vm5, %v9957_v13, 0.0 }
0x326e   :  { %v9959_v16 = vpop.eup %9958  ;;  %4796 = vadd.xlane.f32.xlu0 %v4795_v15 }
0x326f   :  { %v4798_v17 = vsel %vm556_vm5, %v9959_v16, 0.0  ;;  %v4964_v33 = vpop.permute.xlu1 %4963 }
0x3272   :  { %4799 = vadd.xlane.f32.xlu0 %v4798_v17 }
0x3288   :  { %4855 = vrot.lane.b32.xlu0 %v11617_v56, %s10505_s15 }
0x328c   :  { %4913 = vrot.lane.b32.xlu0 %v11625_v29, %s10509_s18 }
0x32fb   :  { %v4797_v18 = vpop.xlane.xlu0 %4796 }
0x32fc   :  { %9960 = vrcp.f32 %v4797_v18 }
0x32ff   :  { %v4800_v19 = vpop.xlane.xlu0 %4799 }
0x3300   :  { %9962 = vrcp.f32 %v4800_v19 }
0x3303   :  { %v4856_v20 = vpop.permute.xlu0 %4855 }
0x3304   :  { %v4861_v22 = vsel %vm683_vm6, %v4856_v20, 0 }
0x3305   :  { %9354 = vmatpush3.bf16.msra.mxu1 %v4861_v22 }
0x3306   :  { %v9961_v24 = vpop.eup %9960  ;;  %9365 = vmatprep.subr.bf16.mxu1 %v10501_v1 }
0x3307   :  { %v4803_v27 = vmul.f32 %v9961_v24, %v9957_v13  ;;  %v4914_v41 = vpop.permute.xlu0 %4913 }
0x3309   :  { %v4805_v31 = vpack.c.bf16 %v4803_v27, %v4803_v27 }
0x330a   :  { %v9963_v32 = vpop.eup %9962 }
0x330b   :  { %9350 = vmatmul.mubr.msk.bf16.vlgmr.msra.gmra.mrb[136].mxu0 %vm556_vm5, %v4805_v31  ;;  %v4804_v36 = vmul.f32 %v9963_v32, %v9959_v16 }
0x330c   :  { %9360 = vmatpush3.bf16.xpose.msra.mxu0 %v4921_v34  ;;  %9361 = vmatprep.mubr.msk.bf16.mxu0 %vm10502_vm0, %v10501_v1 }
0x330d   :  { %v4806_v38 = vpack.c.bf16 %v4804_v36, %v4804_v36  ;;  %9371 = vmatprep.subr.bf16.mxu0 %v10501_v1 }
0x330f   :  { %9356 = vmatmul.mubr.msk.bf16.vlgmr.msra.gmra.mrb[136].mxu1 %vm556_vm5, %v4806_v38 }
0x3310   :  { %9366 = vmatpush3.bf16.xpose.msra.mxu1 %v4971_v39  ;;  %9367 = vmatprep.mubr.msk.bf16.mxu1 %vm10502_vm0, %v10501_v1 }
0x3311   :  { %9377 = vmatprep.subr.bf16.mxu1 %v10501_v1 }
0x3313   :  { %9362 = vmatmul.mubr.msk.bf16.vlgmr.msra.gmra.mrb[140].mxu0 %vm556_vm5, %v4914_v41 }
0x3314   :  { %9373 = vmatprep.mubr.msk.bf16.mxu0 %vm10502_vm0, %v10501_v1 }
0x3317   :  { %9368 = vmatmul.mubr.msk.bf16.vlgmr.msra.gmra.mrb[140].mxu1 %vm556_vm5, %v4964_v33 }
0x3318   :  { %9379 = vmatprep.mubr.msk.bf16.mxu1 %vm10502_vm0, %v10501_v1 }
0x33de   :  { %v11711_v43 = vpop.f32.mrb[136].mxu0 }
0x33df   :  { %v9351_v54 = vpop.f32.mrb[137].mxu0 }
0x33e0   :  { %v4852_v10 = vpop.f32.mrb[138].mxu0 }
0x33e1   :  { %v9352_v45 = vpop.f32.mrb[139].mxu0 }
0x33e2   :  { %v11713_v21 = vpop.f32.mrb[136].mxu1 }
0x33e3   :  { %v9357_v35 = vpop.f32.mrb[137].mxu1 }
0x33e4   :  { %v4900_v46 = vpop.f32.mrb[138].mxu1 }
0x33e5   :  { %v9358_v48 = vpop.f32.mrb[139].mxu1 }
0x33e6   :  { %v4957_v49 = vpop.f32.mrb[140].mxu0 }
0x33e7   :  { %v5013_v50 = vmul.f32 0.35355338, %v4957_v49  ;;  %v9363_v51 = vpop.f32.mrb[141].mxu0 }
0x33e8   :  { %v4960_v53 = vpop.f32.mrb[142].mxu0 }
0x33e9   :  { %v9364_v55 = vpop.f32.mrb[143].mxu0  ;;  %v5015_v57 = vsel %vm556_vm5, %v5013_v50, -inf }
0x33ea   :  { %5016 = vmax.xlane.f32.xlu0 %v5015_v57  ;;  %v5007_v58 = vpop.f32.mrb[140].mxu1 }
0x33eb   :  { %v5014_v8 = vmul.f32 0.35355338, %v5007_v58  ;;  %v9369_v9 = vpop.f32.mrb[141].mxu1 }
0x33ec   :  { %v5010_v40 = vpop.f32.mrb[142].mxu1 }
0x33ed   :  { %v9370_v28 = vpop.f32.mrb[143].mxu1  ;;  %v5018_v14 = vsel %vm556_vm5, %v5014_v8, -inf }
0x33ee   :  { %5019 = vmax.xlane.f32.xlu1 %v5018_v14 }
0x33ff   :  { %5039 = vrot.lane.b32.xlu1 %v11615_v52, %s10508_s30 }
0x3403   :  { %5147 = vrot.lane.b32.xlu1 %v11615_v52, %s10512_s19 }
0x3407   :  { %5197 = vrot.lane.b32.xlu1 %v11617_v56, %s10512_s19 }
0x340b   :  { %5195 = vrot.lane.b32.xlu1 %v11627_v60, %s10512_s19 }
0x3477   :  { %v5017_v30 = vpop.xlane.xlu0 %5016 }
0x3478   :  { %v5021_v59 = vsub.f32 %v5013_v50, %v5017_v30 }
0x347a   :  { %v5023_v61 = vmul.f32 1.442695, %v5021_v59 }
0x347b   :  { %v5020_v62 = vpop.xlane.xlu1 %5019 }
0x347c   :  { %9964 = vpow2.f32 %v5023_v61  ;;  %v5022_v63 = vsub.f32 %v5014_v8, %v5020_v62 }
0x347e   :  { %v5025_v0 = vmul.f32 1.442695, %v5022_v63 }
0x347f   :  { %v5040_v2 = vpop.permute.xlu1 %5039 }
0x3480   :  { %9966 = vpow2.f32 %v5025_v0  ;;  %v5045_v3 = vsel %vm683_vm6, %v5040_v2, 0 }
0x3481   :  { %9372 = vmatpush3.bf16.msra.mxu0 %v5045_v3 }
0x3482   :  { %9383 = vmatprep.subr.bf16.mxu0 %v10501_v1 }
0x3483   :  { %v5148_v15 = vpop.permute.xlu1 %5147 }
0x3484   :  { %v5153_v19 = vsel %vm556_vm5, %v5148_v15, 0 }
0x3486   :  { %v9965_v4 = vpop.eup %9964 }
0x3487   :  { %v5027_v5 = vsel %vm556_vm5, %v9965_v4, 0.0  ;;  %v5198_v20 = vpop.permute.xlu1 %5197 }
0x3488   :  { %5028 = vadd.xlane.f32.xlu0 %v5027_v5  ;;  %v5203_v24 = vsel %vm556_vm5, %v5198_v20, 0 }
0x348a   :  { %v9967_v6 = vpop.eup %9966 }
0x348b   :  { %v5030_v60 = vsel %vm556_vm5, %v9967_v6, 0.0  ;;  %v5196_v27 = vpop.permute.xlu1 %5195 }
0x348c   :  { %5031 = vadd.xlane.f32.xlu0 %v5030_v60 }
0x34a2   :  { %5087 = vrot.lane.b32.xlu0 %v11617_v56, %s10508_s30 }
0x34a6   :  { %5145 = vrot.lane.b32.xlu0 %v11625_v29, %s10512_s19 }
0x3515   :  { %v5029_v42 = vpop.xlane.xlu0 %5028 }
0x3516   :  { %9968 = vrcp.f32 %v5029_v42 }
0x3519   :  { %v5032_v7 = vpop.xlane.xlu0 %5031 }
0x351a   :  { %9970 = vrcp.f32 %v5032_v7 }
0x351d   :  { %v5088_v11 = vpop.permute.xlu0 %5087 }
0x351e   :  { %v5093_v12 = vsel %vm683_vm6, %v5088_v11, 0 }
0x351f   :  { %9378 = vmatpush3.bf16.msra.mxu1 %v5093_v12  ;;  %v9806_v12 = vld [vmem:[%s12319_s20] sm:$0xff]  }
0x3520   :  { %v9969_v13 = vpop.eup %9968  ;;  %9389 = vmatprep.subr.bf16.mxu1 %v10501_v1 }
0x3521   :  { %v5035_v16 = vmul.f32 %v9969_v13, %v9965_v4  ;;  %v5146_v26 = vpop.permute.xlu0 %5145  ;;  %v9807_v13 = vld [vmem:[%s12319_s20 + $0x8] sm:$0xff]  }
0x3523   :  { %v5037_v17 = vpack.c.bf16 %v5035_v16, %v5035_v16 }
0x3524   :  { %v9971_v18 = vpop.eup %9970 }
0x3525   :  { %9374 = vmatmul.mubr.msk.bf16.vlgmr.msra.gmra.mrb[144].mxu0 %vm556_vm5, %v5037_v17  ;;  %v5036_v29 = vmul.f32 %v9971_v18, %v9967_v6 }
0x3526   :  { %9384 = vmatpush3.bf16.xpose.msra.mxu0 %v5153_v19  ;;  %9385 = vmatprep.mubr.msk.bf16.mxu0 %vm10502_vm0, %v10501_v1 }
0x3527   :  { %v5038_v22 = vpack.c.bf16 %v5036_v29, %v5036_v29  ;;  %9395 = vmatprep.subr.bf16.mxu0 %v10501_v1 }
0x3529   :  { %9380 = vmatmul.mubr.msk.bf16.vlgmr.msra.gmra.mrb[144].mxu1 %vm556_vm5, %v5038_v22 }
0x352a   :  { %9390 = vmatpush3.bf16.xpose.msra.mxu1 %v5203_v24  ;;  %9391 = vmatprep.mubr.msk.bf16.mxu1 %vm10502_vm0, %v10501_v1 }
0x352b   :  { %9401 = vmatprep.subr.bf16.mxu1 %v10501_v1 }
0x352d   :  { %9386 = vmatmul.mubr.msk.bf16.vlgmr.msra.gmra.mrb[148].mxu0 %vm556_vm5, %v5146_v26 }
0x352e   :  { %9397 = vmatprep.mubr.msk.bf16.mxu0 %vm10502_vm0, %v10501_v1 }
0x3531   :  { %9392 = vmatmul.mubr.msk.bf16.vlgmr.msra.gmra.mrb[148].mxu1 %vm556_vm5, %v5196_v27 }
0x3532   :  { %9403 = vmatprep.mubr.msk.bf16.mxu1 %vm10502_vm0, %v10501_v1 }
0x35f8   :  { %v5081_v31 = vpop.f32.mrb[144].mxu0 }
0x35f9   :  { %v9375_v32 = vpop.f32.mrb[145].mxu0 }
0x35fa   :  { %v5084_v34 = vpop.f32.mrb[146].mxu0 }
0x35fb   :  { %v9376_v36 = vpop.f32.mrb[147].mxu0  ;;  %v8494_v34 = vld [vmem:[#allocation11] ss:$0 sm:$0xff] }
0x35fc   :  { %v5129_v37 = vpop.f32.mrb[144].mxu1 }
0x35fd   :  { %v9381_v38 = vpop.f32.mrb[145].mxu1 }
0x35fe   :  { %v5132_v39 = vpop.f32.mrb[146].mxu1 }
0x35ff   :  { %v9382_v41 = vpop.f32.mrb[147].mxu1 }
0x3600   :  { %v5189_v33 = vpop.f32.mrb[148].mxu0 }
0x3601   :  { %v5245_v54 = vmul.f32 0.35355338, %v5189_v33  ;;  %v9387_v10 = vpop.f32.mrb[149].mxu0 }
0x3602   :  { %v5192_v45 = vpop.f32.mrb[150].mxu0 }
0x3603   :  { %v9388_v35 = vpop.f32.mrb[151].mxu0  ;;  %v5247_v46 = vsel %vm556_vm5, %v5245_v54, -inf }
0x3604   :  { %5248 = vmax.xlane.f32.xlu0 %v5247_v46  ;;  %v5239_v48 = vpop.f32.mrb[148].mxu1 }
0x3605   :  { %v5246_v49 = vmul.f32 0.35355338, %v5239_v48  ;;  %v9393_v50 = vpop.f32.mrb[149].mxu1 }
0x3606   :  { %v5242_v51 = vpop.f32.mrb[150].mxu1 }
0x3607   :  { %v9394_v53 = vpop.f32.mrb[151].mxu1  ;;  %v5250_v55 = vsel %vm556_vm5, %v5246_v49, -inf }
0x3608   :  { %5251 = vmax.xlane.f32.xlu1 %v5250_v55 }
0x3619   :  { %5271 = vrot.lane.b32.xlu1 %v11615_v52, %s10511_s23 }
0x361d   :  { %4905 = vrot.lane.b32.xlu1 %v11711_v43, %s10514_s25 }
0x3621   :  { %4907 = vrot.lane.b32.xlu1 %v11713_v21, %s10514_s25 }
0x3625   :  { %5139 = vrot.lane.b32.xlu1 %v5129_v37, %s10484_s2 }
0x3691   :  { %v5249_v57 = vpop.xlane.xlu0 %5248 }
0x3692   :  { %v5253_v58 = vsub.f32 %v5245_v54, %v5249_v57 }
0x3694   :  { %v5255_v8 = vmul.f32 1.442695, %v5253_v58  ;;  %v9808_v58 = vld [vmem:[%s12320_s26] sm:$0xff]  }
0x3695   :  { %v5252_v9 = vpop.xlane.xlu1 %5251 }
0x3696   :  { %9972 = vpow2.f32 %v5255_v8  ;;  %v5254_v40 = vsub.f32 %v5246_v49, %v5252_v9  ;;  %v9809_v8 = vld [vmem:[%s12320_s26 + $0x8] sm:$0xff]   ;;  %v9810_v9 = vld [vmem:[%s12321_s24] sm:$0xff]  }
0x3698   :  { %v5257_v28 = vmul.f32 1.442695, %v5254_v40  ;;  %v9811_v40 = vld [vmem:[%s12321_s24 + $0x8] sm:$0xff]  }
0x3699   :  { %v5272_v14 = vpop.permute.xlu1 %5271 }
0x369a   :  { %9974 = vpow2.f32 %v5257_v28  ;;  %v5277_v30 = vsel %vm683_vm6, %v5272_v14, 0 }
0x369b   :  { %9396 = vmatpush3.bf16.msra.mxu0 %v5277_v30 }
0x369c   :  { %9407 = vmatprep.subr.bf16.mxu0 %v10501_v1 }
0x369d   :  { %v4906_v52 = vpop.permute.xlu1 %4905 }
0x369e   :  { %4911 = vst.msk [vmem:[#allocation2] sm:$0xff] %vm1007_vm7, %v4906_v52 }
0x36a0   :  { %v9973_v43 = vpop.eup %9972 }
0x36a1   :  { %v4908_v21 = vpop.permute.xlu1 %4907  ;;  %v5259_v59 = vsel %vm556_vm5, %v9973_v43, 0.0 }
0x36a2   :  { %4912 = vst.msk [vmem:[#allocation2 + $0x8] sm:$0xff] %vm1007_vm7, %v4908_v21  ;;  %5260 = vadd.xlane.f32.xlu0 %v5259_v59 }
0x36a4   :  { %v9975_v61 = vpop.eup %9974 }
0x36a5   :  { %v5140_v62 = vpop.permute.xlu1 %5139  ;;  %v5262_v63 = vsel %vm556_vm5, %v9975_v61, 0.0 }
0x36a6   :  { %5144 = vst.msk [vmem:[#allocation2 + $0x8] sm:$0xff] %vm1240_vm8, %v5140_v62  ;;  %5263 = vadd.xlane.f32.xlu0 %v5262_v63  ;;  %v8498_v62 = vld [vmem:[#allocation22] ss:$0 sm:$0xff] }
0x36bc   :  { %5319 = vrot.lane.b32.xlu0 %v11617_v56, %s10511_s23 }
0x36c0   :  { %5137 = vrot.lane.b32.xlu0 %v5081_v31, %s10484_s2 }
0x372f   :  { %v5261_v0 = vpop.xlane.xlu0 %5260 }
0x3730   :  { %9976 = vrcp.f32 %v5261_v0 }
0x3733   :  { %v5264_v2 = vpop.xlane.xlu0 %5263 }
0x3734   :  { %9978 = vrcp.f32 %v5264_v2 }
0x3737   :  { %v5320_v3 = vpop.permute.xlu0 %5319 }
0x3738   :  { %v5325_v4 = vsel %vm683_vm6, %v5320_v3, 0  ;;  %v8499_v3 = vld [vmem:[#allocation20] ss:$0 sm:$0xff] }
0x3739   :  { %9402 = vmatpush3.bf16.msra.mxu1 %v5325_v4 }
0x373a   :  { %v9977_v5 = vpop.eup %9976  ;;  %9415 = vmatprep.subr.bf16.mxu1 %v10501_v1 }
0x373b   :  { %v5138_v6 = vpop.permute.xlu0 %5137  ;;  %v5267_v60 = vmul.f32 %v9977_v5, %v9973_v43 }
0x373c   :  { %5143 = vst.msk [vmem:[#allocation2] sm:$0xff] %vm1240_vm8, %v5138_v6 }
0x373d   :  { %v5269_v56 = vpack.c.bf16 %v5267_v60, %v5267_v60 }
0x373e   :  { %v9979_v42 = vpop.eup %9978 }
0x373f   :  { %9398 = vmatmul.mubr.msk.bf16.vlgmr.msra.gmra.mrb[152].mxu0 %vm556_vm5, %v5269_v56  ;;  %v5268_v7 = vmul.f32 %v9979_v42, %v9975_v61  ;;  %v9812_v56 = vld [vmem:[%s12321_s24 + $0x10] sm:$0xff]   ;;  %v9813_v42 = vld [vmem:[%s12321_s24 + $0x18] sm:$0xff]  }
0x3740   :  { %9411 = vmatprep.mubr.msk.bf16.mxu0 %vm10502_vm0, %v10501_v1  ;;  %9408 = vmatpush3.bf16.msra.mxu0 %v9806_v12 }
0x3741   :  { %v5270_v11 = vpack.c.bf16 %v5268_v7, %v5268_v7  ;;  %9409 = vmatprep.subr.bf16.mxu0 %v10501_v1  ;;  %v8500_v7 = vld [vmem:[#allocation7] ss:$0 sm:$0xff] }
0x3743   :  { %9404 = vmatmul.mubr.msk.bf16.vlgmr.msra.gmra.mrb[152].mxu1 %vm556_vm5, %v5270_v11 }
0x3744   :  { %9419 = vmatprep.mubr.msk.bf16.mxu1 %vm10502_vm0, %v10501_v1  ;;  %9410 = vmatpush3.bf16.msra.mxu0 %v9807_v13 }
0x3745   :  { %9423 = vmatprep.subr.bf16.mxu0 %v10501_v1  ;;  %9416 = vmatpush3.bf16.msra.mxu1 %v9808_v58 }
0x3746   :  { %9417 = vmatprep.subr.bf16.mxu1 %v10501_v1 }
0x3749   :  { %9418 = vmatpush3.bf16.msra.mxu1 %v9809_v8 }
0x374a   :  { %9435 = vmatprep.subr.bf16.mxu1 %v10501_v1 }
0x3812   :  { %v5313_v15 = vpop.f32.mrb[152].mxu0 }
0x3813   :  { %5369 = vrot.lane.b32.xlu0 %v5313_v15, %s10515_s3  ;;  %v9399_v16 = vpop.f32.mrb[153].mxu0 }
0x3814   :  { %v5316_v17 = vpop.f32.mrb[154].mxu0 }
0x3815   :  { %v9400_v18 = vpop.f32.mrb[155].mxu0 }
0x3816   :  { %v5361_v19 = vpop.f32.mrb[152].mxu1 }
0x3817   :  { %5371 = vrot.lane.b32.xlu1 %v5361_v19, %s10515_s3  ;;  %v9405_v29 = vpop.f32.mrb[153].mxu1 }
0x3818   :  { %v5364_v20 = vpop.f32.mrb[154].mxu1 }
0x3819   :  { %v9406_v22 = vpop.f32.mrb[155].mxu1  ;;  %v8504_v20 = vld [vmem:[#allocation8] ss:$0 sm:$0xff] }
0x3885   :  { %v5370_v24 = vpop.permute.xlu0 %5369 }
0x3886   :  { %5375 = vst.msk [vmem:[#allocation2] sm:$0xff] %vm1473_vm9, %v5370_v24 }
0x3889   :  { %v5372_v26 = vpop.permute.xlu1 %5371 }
0x388a   :  { %5376 = vst.msk [vmem:[#allocation2 + $0x8] sm:$0xff] %vm1473_vm9, %v5372_v26 }
0x388d   :  { %v5377_v27 = vld [vmem:[#allocation2] sm:$0xff] }
0x3891   :  { %v5378_v31 = vld [vmem:[#allocation2 + $0x8] sm:$0xff] }
0x3892   :  { %v5379_v32 = vpack.c.bf16 %v5378_v31, %v5377_v27 }
0x3894   :  { %9412 = vmatmul.mubr.msk.bf16.vlgmr.msra.gmra.mrb[156].mxu0 %vm501_vm4, %v5379_v32 }
0x3895   :  { %9431 = vmatprep.mubr.msk.bf16.mxu0 %vm10502_vm0, %v10501_v1  ;;  %9424 = vmatpush3.bf16.msra.mxu0 %v9810_v9  ;;  %v8510_v9 = vld [vmem:[#allocation25] ss:$0 sm:$0xff] }
0x3896   :  { %9425 = vmatprep.subr.bf16.mxu0 %v10501_v1 }
0x3899   :  { %9426 = vmatpush3.bf16.msra.mxu0 %v9811_v40 }
0x389a   :  { %9427 = vmatprep.subr.bf16.mxu0 %v10501_v1 }
0x389d   :  { %9428 = vmatpush3.bf16.msra.mxu0 %v9812_v56 }
0x389e   :  { %9429 = vmatprep.subr.bf16.mxu0 %v10501_v1 }
0x38a1   :  { %9430 = vmatpush3.bf16.msra.mxu0 %v9813_v42 }
0x38a2   :  { %9449 = vmatprep.subr.bf16.mxu0 %v10501_v1 }
0x3967   :  { %v5435_v36 = vpop.f32.mrb[156].mxu0 }
0x3968   :  { %v5436_v37 = vadd.f32 %v8494_v34, %v5435_v36  ;;  %v9413_v38 = vpop.f32.mrb[157].mxu0 }
0x3969   :  { %v5438_v39 = vpop.f32.mrb[158].mxu0 }
0x396a   :  { %v5442_v41 = vadd.f32 %v5436_v37, %v11606_v25  ;;  %v5439_v33 = vadd.f32 %v8494_v34, %v5438_v39  ;;  %v9414_v54 = vpop.f32.mrb[159].mxu0 }
0x396c   :  { %v5443_v10 = vadd.f32 %v5439_v33, %v11608_v44  ;;  %v5446_v45 = vsel %vm501_vm4, %v5442_v41, 0.0 }
0x396d   :  { %5447 = vadd.xlane.f32.xlu0 %v5446_v45 }
0x396e   :  { %v5449_v35 = vsel %vm501_vm4, %v5443_v10, 0.0 }
0x396f   :  { %5450 = vadd.xlane.f32.xlu1 %v5449_v35 }
0x39fa   :  { %v5448_v46 = vpop.xlane.xlu0 %5447 }
0x39fb   :  { %v5452_v48 = vmul.f32 0.03125, %v5448_v46 }
0x39fc   :  { %v5451_v49 = vpop.xlane.xlu1 %5450 }
0x39fd   :  { %v5454_v50 = vsub.f32 %v5442_v41, %v5452_v48  ;;  %v5453_v51 = vmul.f32 0.03125, %v5451_v49 }
0x39ff   :  { %v5455_v25 = vsub.f32 %v5443_v10, %v5453_v51  ;;  %v5456_v53 = vmul.f32 %v5454_v50, %v5454_v50  ;;  %v9815_v51 = vld [vmem:[%s10704_s27 + $0x18] sm:$0xff]  }
0x3a01   :  { %v5458_v55 = vsel %vm501_vm4, %v5456_v53, 0.0  ;;  %v5457_v44 = vmul.f32 %v5455_v25, %v5455_v25 }
0x3a02   :  { %5459 = vadd.xlane.f32.xlu0 %v5458_v55 }
0x3a03   :  { %v5461_v57 = vsel %vm501_vm4, %v5457_v44, 0.0 }
0x3a06   :  { %5462 = vadd.xlane.f32.xlu0 %v5461_v57 }
0x3a8f   :  { %v5460_v28 = vpop.xlane.xlu0 %5459 }
0x3a90   :  { %v5464_v14 = vmul.f32 0.03125, %v5460_v28 }
0x3a92   :  { %v5466_v30 = vadd.f32 1e-05, %v5464_v14 }
0x3a93   :  { %v5463_v52 = vpop.xlane.xlu0 %5462 }
0x3a94   :  { %9980 = vrsqrt.f32 %v5466_v30  ;;  %v5465_v43 = vmul.f32 0.03125, %v5463_v52  ;;  %v8511_v52 = vld [vmem:[#allocation23] ss:$0 sm:$0xff] }
0x3a96   :  { %v5467_v21 = vadd.f32 1e-05, %v5465_v43 }
0x3a98   :  { %9982 = vrsqrt.f32 %v5467_v21 }
0x3a9e   :  { %v9981_v59 = vpop.eup %9980 }
0x3a9f   :  { %v5470_v61 = vmul.f32 %v9981_v59, %v5454_v50  ;;  %v9814_v50 = vld [vmem:[%s10704_s27 + $0x10] sm:$0xff]  }
0x3aa1   :  { %v5478_v0 = vmul.f32 %v8498_v62, %v5470_v61 }
0x3aa2   :  { %v9983_v63 = vpop.eup %9982 }
0x3aa3   :  { %v5471_v2 = vmul.f32 %v9983_v63, %v5455_v25  ;;  %v5486_v5 = vadd.f32 %v8499_v3, %v5478_v0 }
0x3aa5   :  { %v5479_v4 = vmul.f32 %v8498_v62, %v5471_v2  ;;  %v8516_v62 = vld [vmem:[#allocation13 + $0x1] ss:$0 sm:$0xff] }
0x3aa7   :  { %v5487_v6 = vadd.f32 %v8499_v3, %v5479_v4 }
0x3aa9   :  { %v5502_v60 = vpack.c.bf16 %v5487_v6, %v5486_v5 }
0x3aab   :  { %9420 = vmatmul.mubr.msk.bf16.vlgmr.msra.gmra.mrb[156].mxu1 %vm501_vm4, %v5502_v60 }
0x3aac   :  { %9439 = vmatprep.mubr.msk.bf16.mxu1 %vm10502_vm0, %v10501_v1  ;;  %9436 = vmatpush3.bf16.msra.mxu1 %v9814_v50 }
0x3aad   :  { %9437 = vmatprep.subr.bf16.mxu1 %v10501_v1 }
0x3ab0   :  { %9438 = vmatpush3.bf16.msra.mxu1 %v9815_v51 }
0x3ab1   :  { %9443 = vmatprep.subr.bf16.mxu1 %v10501_v1 }
0x3b7e   :  { %v5558_v11 = vpop.f32.mrb[156].mxu1 }
0x3b7f   :  { %v5559_v12 = vadd.f32 %v8500_v7, %v5558_v11  ;;  %v9421_v13 = vpop.f32.mrb[157].mxu1 }
0x3b80   :  { %v5561_v15 = vpop.f32.mrb[158].mxu1 }
0x3b81   :  { %v5562_v16 = vadd.f32 %v8500_v7, %v5561_v15  ;;  %v9422_v17 = vpop.f32.mrb[159].mxu1  ;;  %v5565_v18 = vmax.f32 %v5559_v12, 0.0 }
0x3b83   :  { %v5566_v19 = vmax.f32 %v5562_v16, 0.0 }
0x3b85   :  { %v5567_v29 = vpack.c.bf16 %v5566_v19, %v5565_v18 }
0x3b87   :  { %9432 = vmatmul.mubr.msk.bf16.vlgmr.msra.gmra.mrb[160].mxu0 %vm428_vm3, %v5567_v29 }
0x3b88   :  { %9451 = vmatprep.mubr.msk.bf16.mxu0 %vm10502_vm0, %v10501_v1 }
0x3c5a   :  { %v5635_v22 = vpop.f32.mrb[160].mxu0 }
0x3c5b   :  { %v5636_v24 = vadd.f32 %v8504_v20, %v5635_v22  ;;  %v9433_v26 = vpop.f32.mrb[161].mxu0 }
0x3c5c   :  { %v5638_v27 = vpop.f32.mrb[162].mxu0 }
0x3c5d   :  { %v5642_v31 = vadd.f32 %v5636_v24, %v5486_v5  ;;  %v5639_v32 = vadd.f32 %v8504_v20, %v5638_v27  ;;  %v9434_v34 = vpop.f32.mrb[163].mxu0 }
0x3c5f   :  { %v5643_v36 = vadd.f32 %v5639_v32, %v5487_v6  ;;  %v5646_v37 = vsel %vm501_vm4, %v5642_v31, 0.0 }
0x3c60   :  { %5647 = vadd.xlane.f32.xlu1 %v5646_v37 }
0x3c61   :  { %v5649_v38 = vsel %vm501_vm4, %v5643_v36, 0.0 }
0x3c62   :  { %5650 = vadd.xlane.f32.xlu0 %v5649_v38 }
0x3ced   :  { %v5648_v39 = vpop.xlane.xlu1 %5647 }
0x3cee   :  { %v5652_v41 = vmul.f32 0.03125, %v5648_v39 }
0x3cef   :  { %v5651_v33 = vpop.xlane.xlu0 %5650 }
0x3cf0   :  { %v5654_v54 = vsub.f32 %v5642_v31, %v5652_v41  ;;  %v5653_v10 = vmul.f32 0.03125, %v5651_v33 }
0x3cf2   :  { %v5655_v45 = vsub.f32 %v5643_v36, %v5653_v10  ;;  %v5656_v35 = vmul.f32 %v5654_v54, %v5654_v54 }
0x3cf4   :  { %v5658_v46 = vsel %vm501_vm4, %v5656_v35, 0.0  ;;  %v5657_v48 = vmul.f32 %v5655_v45, %v5655_v45 }
0x3cf5   :  { %5659 = vadd.xlane.f32.xlu1 %v5658_v46 }
0x3cf6   :  { %v5661_v49 = vsel %vm501_vm4, %v5657_v48, 0.0 }
0x3cf7   :  { %5662 = vadd.xlane.f32.xlu0 %v5661_v49 }
0x3d82   :  { %v5660_v25 = vpop.xlane.xlu1 %5659 }
0x3d83   :  { %v5664_v53 = vmul.f32 0.03125, %v5660_v25 }
0x3d84   :  { %v5663_v55 = vpop.xlane.xlu0 %5662 }
0x3d85   :  { %v5666_v44 = vadd.f32 1e-05, %v5664_v53  ;;  %v5665_v57 = vmul.f32 0.03125, %v5663_v55 }
0x3d87   :  { %9984 = vrsqrt.f32 %v5666_v44  ;;  %v5667_v58 = vadd.f32 1e-05, %v5665_v57 }
0x3d89   :  { %9986 = vrsqrt.f32 %v5667_v58 }
0x3d91   :  { %v9985_v8 = vpop.eup %9984 }
0x3d92   :  { %v5670_v40 = vmul.f32 %v9985_v8, %v5654_v54 }
0x3d93   :  { %v9987_v28 = vpop.eup %9986 }
0x3d94   :  { %v5678_v14 = vmul.f32 %v8510_v9, %v5670_v40  ;;  %v5671_v30 = vmul.f32 %v9987_v28, %v5655_v45 }
0x3d96   :  { %v5679_v43 = vmul.f32 %v8510_v9, %v5671_v30  ;;  %v11822_v21 = vadd.f32 %v8511_v52, %v5678_v14 }
0x3d98   :  { %v11824_v59 = vadd.f32 %v8511_v52, %v5679_v43 }
0x3d9a   :  { %v5693_v61 = vpack.c.bf16 %v11824_v59, %v11822_v21 }
0x3d9c   :  { %9440 = vmatmul.mubr.msk.bf16.vlgmr.msra.gmra.mrb[160].mxu1 %vm501_vm4, %v5693_v61 }
0x3d9d   :  { %9445 = vmatprep.mubr.msk.bf16.mxu1 %vm10502_vm0, %v10501_v1 }
0x3e6f   :  { %v5751_v63 = vpop.f32.mrb[160].mxu1 }
0x3e70   :  { %v5752_v0 = vadd.f32 %v8516_v62, %v5751_v63  ;;  %v9441_v2 = vpop.f32.mrb[161].mxu1 }
0x3e71   :  { %v5754_v3 = vpop.f32.mrb[162].mxu1 }
0x3e72   :  { %v11831_v4 = vpack.c.bf16 %v5752_v0, %v5752_v0  ;;  %v5755_v5 = vadd.f32 %v8516_v62, %v5754_v3  ;;  %v9442_v6 = vpop.f32.mrb[163].mxu1 }
0x3e74   :  { %v11833_v60 = vpack.c.bf16 %v5755_v5, %v5755_v5  ;;  %5768 = vrot.lane.b32.xlu1 %v11831_v4, %s10503_s14 }
0x3e76   :  { %5817 = vrot.lane.b32.xlu0 %v11833_v60, %s10503_s14 }
0x3ee6   :  { %v5769_v56 = vpop.permute.xlu1 %5768 }
0x3ee7   :  { %v5774_v42 = vsel %vm556_vm5, %v5769_v56, 0 }
0x3ee8   :  { %9444 = vmatpush3.bf16.xpose.msra.mxu1 %v5774_v42  ;;  %v5818_v7 = vpop.permute.xlu0 %5817 }
0x3ee9   :  { %v5823_v11 = vsel %vm556_vm5, %v5818_v7, 0  ;;  %9455 = vmatprep.subr.bf16.mxu1 %v10501_v1 }
0x3eea   :  { %9450 = vmatpush3.bf16.xpose.msra.mxu0 %v5823_v11 }
0x3eeb   :  { %9461 = vmatprep.subr.bf16.mxu0 %v10501_v1 }
0x3eef   :  { %9446 = vmatmul.mubr.msk.bf16.vlgmr.msra.gmra.mrb[164].mxu1 %vm556_vm5, %v11831_v4 }
0x3ef0   :  { %9457 = vmatprep.mubr.msk.bf16.mxu1 %vm10502_vm0, %v10501_v1 }
0x3ef1   :  { %9452 = vmatmul.mubr.msk.bf16.vlgmr.msra.gmra.mrb[164].mxu0 %vm556_vm5, %v11833_v60 }
0x3ef2   :  { %9463 = vmatprep.mubr.msk.bf16.mxu0 %vm10502_vm0, %v10501_v1 }
0x3fc2   :  { %v5810_v12 = vpop.f32.mrb[164].mxu1 }
0x3fc3   :  { %v5865_v13 = vmul.f32 0.35355338, %v5810_v12  ;;  %v9447_v15 = vpop.f32.mrb[165].mxu1 }
0x3fc4   :  { %v5813_v16 = vpop.f32.mrb[166].mxu1  ;;  %v5859_v17 = vpop.f32.mrb[164].mxu0 }
0x3fc5   :  { %v5867_v18 = vsel %vm11402_vm12, %v5865_v13, -1e+30  ;;  %v5866_v19 = vmul.f32 0.35355338, %v5859_v17  ;;  %v9448_v29 = vpop.f32.mrb[167].mxu1  ;;  %v9453_v20 = vpop.f32.mrb[165].mxu0 }
0x3fc6   :  { %v5862_v22 = vpop.f32.mrb[166].mxu0  ;;  %v5869_v24 = vsel %vm556_vm5, %v5867_v18, -inf }
0x3fc7   :  { %v5868_v26 = vsel %vm11402_vm12, %v5866_v19, -1e+30  ;;  %v9454_v27 = vpop.f32.mrb[167].mxu0  ;;  %5870 = vmax.xlane.f32.xlu1 %v5869_v24 }
0x3fc8   :  { %v5872_v31 = vsel %vm556_vm5, %v5868_v26, -inf }
0x3fc9   :  { %5873 = vmax.xlane.f32.xlu0 %v5872_v31 }
0x3fd8   :  { %5893 = vrot.lane.b32.xlu1 %v11831_v4, %s10504_s6 }
0x4054   :  { %v5871_v32 = vpop.xlane.xlu1 %5870 }
0x4055   :  { %v5875_v34 = vsub.f32 %v5867_v18, %v5871_v32 }
0x4056   :  { %v5874_v36 = vpop.xlane.xlu0 %5873 }
0x4057   :  { %v5877_v37 = vmul.f32 1.442695, %v5875_v34  ;;  %v5876_v38 = vsub.f32 %v5868_v26, %v5874_v36 }
0x4058   :  { %v5894_v39 = vpop.permute.xlu1 %5893 }
0x4059   :  { %9988 = vpow2.f32 %v5877_v37  ;;  %v5879_v41 = vmul.f32 1.442695, %v5876_v38  ;;  %v5899_v33 = vsel %vm683_vm6, %v5894_v39, 0 }
0x405a   :  { %9456 = vmatpush3.bf16.msra.mxu1 %v5899_v33 }
0x405b   :  { %9990 = vpow2.f32 %v5879_v41  ;;  %9467 = vmatprep.subr.bf16.mxu1 %v10501_v1 }
0x4063   :  { %v9989_v54 = vpop.eup %9988 }
0x4064   :  { %v5881_v10 = vsel %vm556_vm5, %v9989_v54, 0.0 }
0x4065   :  { %v9991_v45 = vpop.eup %9990  ;;  %5882 = vadd.xlane.f32.xlu1 %v5881_v10 }
0x4066   :  { %v5884_v35 = vsel %vm556_vm5, %v9991_v45, 0.0 }
0x4067   :  { %5885 = vadd.xlane.f32.xlu0 %v5884_v35 }
0x4076   :  { %5993 = vrot.lane.b32.xlu1 %v11831_v4, %s10505_s15 }
0x407a   :  { %6043 = vrot.lane.b32.xlu1 %v11833_v60, %s10505_s15 }
0x407d   :  { %5941 = vrot.lane.b32.xlu0 %v11833_v60, %s10504_s6 }
0x407e   :  { %6041 = vrot.lane.b32.xlu1 %v11833_v60, %s10506_s9 }
0x4081   :  { %5991 = vrot.lane.b32.xlu0 %v11831_v4, %s10506_s9 }
0x40f2   :  { %v5883_v46 = vpop.xlane.xlu1 %5882 }
0x40f3   :  { %9992 = vrcp.f32 %v5883_v46 }
0x40f4   :  { %v5886_v48 = vpop.xlane.xlu0 %5885 }
0x40f5   :  { %9994 = vrcp.f32 %v5886_v48 }
0x40f6   :  { %v5994_v51 = vpop.permute.xlu1 %5993 }
0x40f7   :  { %v5999_v8 = vsel %vm556_vm5, %v5994_v51, 0 }
0x40f8   :  { %v5942_v49 = vpop.permute.xlu0 %5941 }
0x40f9   :  { %v5947_v50 = vsel %vm683_vm6, %v5942_v49, 0 }
0x40fa   :  { %9462 = vmatpush3.bf16.msra.mxu0 %v5947_v50  ;;  %v6044_v58 = vpop.permute.xlu1 %6043 }
0x40fb   :  { %9473 = vmatprep.subr.bf16.mxu0 %v10501_v1  ;;  %v6049_v40 = vsel %vm556_vm5, %v6044_v58, 0 }
0x40fc   :  { %v5992_v28 = vpop.permute.xlu0 %5991 }
0x40fd   :  { %v9993_v25 = vpop.eup %9992 }
0x40fe   :  { %v5889_v53 = vmul.f32 %v9993_v25, %v9989_v54  ;;  %v6042_v14 = vpop.permute.xlu1 %6041 }
0x40ff   :  { %v9995_v55 = vpop.eup %9994 }
0x4100   :  { %v5890_v44 = vmul.f32 %v9995_v55, %v9991_v45  ;;  %v5891_v57 = vpack.c.bf16 %v5889_v53, %v5889_v53 }
0x4102   :  { %9458 = vmatmul.mubr.msk.bf16.vlgmr.msra.gmra.mrb[168].mxu1 %vm556_vm5, %v5891_v57  ;;  %v5892_v9 = vpack.c.bf16 %v5890_v44, %v5890_v44 }
0x4103   :  { %9468 = vmatpush3.bf16.xpose.msra.mxu1 %v5999_v8  ;;  %9469 = vmatprep.mubr.msk.bf16.mxu1 %vm10502_vm0, %v10501_v1 }
0x4104   :  { %9464 = vmatmul.mubr.msk.bf16.vlgmr.msra.gmra.mrb[168].mxu0 %vm556_vm5, %v5892_v9  ;;  %9479 = vmatprep.subr.bf16.mxu1 %v10501_v1 }
0x4105   :  { %9474 = vmatpush3.bf16.xpose.msra.mxu0 %v6049_v40  ;;  %9475 = vmatprep.mubr.msk.bf16.mxu0 %vm10502_vm0, %v10501_v1 }
0x4106   :  { %9485 = vmatprep.subr.bf16.mxu0 %v10501_v1 }
0x410a   :  { %9470 = vmatmul.mubr.msk.bf16.vlgmr.msra.gmra.mrb[172].mxu1 %vm556_vm5, %v5992_v28 }
0x410b   :  { %9481 = vmatprep.mubr.msk.bf16.mxu1 %vm10502_vm0, %v10501_v1 }
0x410c   :  { %9476 = vmatmul.mubr.msk.bf16.vlgmr.msra.gmra.mrb[172].mxu0 %vm556_vm5, %v6042_v14 }
0x410d   :  { %9487 = vmatprep.mubr.msk.bf16.mxu0 %vm10502_vm0, %v10501_v1 }
0x41d5   :  { %v5935_v30 = vpop.f32.mrb[168].mxu1 }
0x41d6   :  { %5989 = vst.msk [vmem:[#allocation2] sm:$0xff] %vm556_vm5, %v5935_v30  ;;  %v9459_v52 = vpop.f32.mrb[169].mxu1 }
0x41d7   :  { %v5938_v43 = vpop.f32.mrb[170].mxu1  ;;  %v5983_v61 = vpop.f32.mrb[168].mxu0 }
0x41d8   :  { %5990 = vst.msk [vmem:[#allocation2 + $0x8] sm:$0xff] %vm556_vm5, %v5983_v61  ;;  %v9460_v62 = vpop.f32.mrb[171].mxu1  ;;  %v9465_v63 = vpop.f32.mrb[169].mxu0 }
0x41d9   :  { %v5986_v0 = vpop.f32.mrb[170].mxu0 }
0x41da   :  { %v9466_v2 = vpop.f32.mrb[171].mxu0 }
0x41dd   :  { %v6035_v3 = vpop.f32.mrb[172].mxu1 }
0x41de   :  { %v6091_v5 = vmul.f32 0.35355338, %v6035_v3  ;;  %v9471_v6 = vpop.f32.mrb[173].mxu1 }
0x41df   :  { %v6038_v56 = vpop.f32.mrb[174].mxu1  ;;  %v6085_v42 = vpop.f32.mrb[172].mxu0 }
0x41e0   :  { %v6093_v7 = vsel %vm11402_vm12, %v6091_v5, -1e+30  ;;  %v6092_v11 = vmul.f32 0.35355338, %v6085_v42  ;;  %v9472_v12 = vpop.f32.mrb[175].mxu1  ;;  %v9477_v13 = vpop.f32.mrb[173].mxu0 }
0x41e1   :  { %v6088_v15 = vpop.f32.mrb[174].mxu0  ;;  %v6095_v16 = vsel %vm556_vm5, %v6093_v7, -inf }
0x41e2   :  { %v6094_v17 = vsel %vm11402_vm12, %v6092_v11, -1e+30  ;;  %v9478_v18 = vpop.f32.mrb[175].mxu0  ;;  %6096 = vmax.xlane.f32.xlu0 %v6095_v16 }
0x41e3   :  { %v6098_v19 = vsel %vm556_vm5, %v6094_v17, -inf }
0x41e4   :  { %6099 = vmax.xlane.f32.xlu1 %v6098_v19 }
0x41f5   :  { %6119 = vrot.lane.b32.xlu1 %v11831_v4, %s10507_s16 }
0x41f9   :  { %6227 = vrot.lane.b32.xlu1 %v11831_v4, %s10508_s30 }
0x41fd   :  { %6277 = vrot.lane.b32.xlu1 %v11833_v60, %s10508_s30 }
0x4201   :  { %6275 = vrot.lane.b32.xlu1 %v11833_v60, %s10509_s18 }
0x426f   :  { %v6097_v29 = vpop.xlane.xlu0 %6096 }
0x4270   :  { %v6101_v20 = vsub.f32 %v6093_v7, %v6097_v29 }
0x4271   :  { %v6100_v22 = vpop.xlane.xlu1 %6099 }
0x4272   :  { %v6103_v24 = vmul.f32 1.442695, %v6101_v20  ;;  %v6102_v26 = vsub.f32 %v6094_v17, %v6100_v22 }
0x4274   :  { %9996 = vpow2.f32 %v6103_v24  ;;  %v6105_v27 = vmul.f32 1.442695, %v6102_v26 }
0x4275   :  { %v6120_v31 = vpop.permute.xlu1 %6119 }
0x4276   :  { %9998 = vpow2.f32 %v6105_v27  ;;  %v6125_v32 = vsel %vm683_vm6, %v6120_v31, 0 }
0x4277   :  { %9480 = vmatpush3.bf16.msra.mxu1 %v6125_v32 }
0x4278   :  { %9491 = vmatprep.subr.bf16.mxu1 %v10501_v1 }
0x4279   :  { %v6228_v45 = vpop.permute.xlu1 %6227 }
0x427a   :  { %v6233_v49 = vsel %vm556_vm5, %v6228_v45, 0 }
0x427d   :  { %v6278_v51 = vpop.permute.xlu1 %6277 }
0x427e   :  { %v9997_v34 = vpop.eup %9996  ;;  %v6283_v53 = vsel %vm556_vm5, %v6278_v51, 0 }
0x427f   :  { %v6107_v36 = vsel %vm556_vm5, %v9997_v34, 0.0 }
0x4280   :  { %v9999_v37 = vpop.eup %9998  ;;  %6108 = vadd.xlane.f32.xlu0 %v6107_v36 }
0x4281   :  { %v6110_v38 = vsel %vm556_vm5, %v9999_v37, 0.0  ;;  %v6276_v44 = vpop.permute.xlu1 %6275 }
0x4284   :  { %6111 = vadd.xlane.f32.xlu0 %v6110_v38 }
0x429a   :  { %6167 = vrot.lane.b32.xlu0 %v11833_v60, %s10507_s16 }
0x429e   :  { %6225 = vrot.lane.b32.xlu0 %v11831_v4, %s10509_s18 }
0x430d   :  { %v6109_v39 = vpop.xlane.xlu0 %6108 }
0x430e   :  { %10000 = vrcp.f32 %v6109_v39 }
0x4311   :  { %v6112_v41 = vpop.xlane.xlu0 %6111 }
0x4312   :  { %10002 = vrcp.f32 %v6112_v41 }
0x4315   :  { %v6168_v33 = vpop.permute.xlu0 %6167 }
0x4316   :  { %v6173_v54 = vsel %vm683_vm6, %v6168_v33, 0 }
0x4317   :  { %9486 = vmatpush3.bf16.msra.mxu0 %v6173_v54 }
0x4318   :  { %v10001_v10 = vpop.eup %10000  ;;  %9497 = vmatprep.subr.bf16.mxu0 %v10501_v1 }
0x4319   :  { %v6115_v35 = vmul.f32 %v10001_v10, %v9997_v34  ;;  %v6226_v55 = vpop.permute.xlu0 %6225 }
0x431b   :  { %v6117_v46 = vpack.c.bf16 %v6115_v35, %v6115_v35 }
0x431c   :  { %v10003_v48 = vpop.eup %10002 }
0x431d   :  { %v6116_v50 = vmul.f32 %v10003_v48, %v9999_v37  ;;  %9482 = vmatmul.mubr.msk.bf16.vlgmr.msra.gmra.mrb[176].mxu1 %vm556_vm5, %v6117_v46 }
0x431e   :  { %9492 = vmatpush3.bf16.xpose.msra.mxu1 %v6233_v49  ;;  %9493 = vmatprep.mubr.msk.bf16.mxu1 %vm10502_vm0, %v10501_v1 }
0x431f   :  { %v6118_v25 = vpack.c.bf16 %v6116_v50, %v6116_v50  ;;  %9503 = vmatprep.subr.bf16.mxu1 %v10501_v1 }
0x4321   :  { %9488 = vmatmul.mubr.msk.bf16.vlgmr.msra.gmra.mrb[176].mxu0 %vm556_vm5, %v6118_v25 }
0x4322   :  { %9498 = vmatpush3.bf16.xpose.msra.mxu0 %v6283_v53  ;;  %9499 = vmatprep.mubr.msk.bf16.mxu0 %vm10502_vm0, %v10501_v1 }
0x4323   :  { %9509 = vmatprep.subr.bf16.mxu0 %v10501_v1 }
0x4325   :  { %9494 = vmatmul.mubr.msk.bf16.vlgmr.msra.gmra.mrb[180].mxu1 %vm556_vm5, %v6226_v55 }
0x4326   :  { %9505 = vmatprep.mubr.msk.bf16.mxu1 %vm10502_vm0, %v10501_v1 }
0x4329   :  { %9500 = vmatmul.mubr.msk.bf16.vlgmr.msra.gmra.mrb[180].mxu0 %vm556_vm5, %v6276_v44 }
0x432a   :  { %9511 = vmatprep.mubr.msk.bf16.mxu0 %vm10502_vm0, %v10501_v1 }
0x43f0   :  { %v11933_v57 = vpop.f32.mrb[176].mxu1 }
0x43f1   :  { %v9483_v58 = vpop.f32.mrb[177].mxu1 }
0x43f2   :  { %v6164_v8 = vpop.f32.mrb[178].mxu1 }
0x43f3   :  { %v9484_v9 = vpop.f32.mrb[179].mxu1 }
0x43f4   :  { %v11935_v40 = vpop.f32.mrb[176].mxu0 }
0x43f5   :  { %v9489_v28 = vpop.f32.mrb[177].mxu0 }
0x43f6   :  { %v6212_v14 = vpop.f32.mrb[178].mxu0 }
0x43f7   :  { %v9490_v30 = vpop.f32.mrb[179].mxu0 }
0x43f8   :  { %v6269_v52 = vpop.f32.mrb[180].mxu1 }
0x43f9   :  { %v6325_v43 = vmul.f32 0.35355338, %v6269_v52  ;;  %v9495_v61 = vpop.f32.mrb[181].mxu1 }
0x43fa   :  { %v6272_v62 = vpop.f32.mrb[182].mxu1 }
0x43fb   :  { %v6327_v63 = vsel %vm11402_vm12, %v6325_v43, -1e+30  ;;  %v9496_v0 = vpop.f32.mrb[183].mxu1 }
0x43fc   :  { %v6319_v2 = vpop.f32.mrb[180].mxu0  ;;  %v6329_v3 = vsel %vm556_vm5, %v6327_v63, -inf }
0x43fd   :  { %v6326_v5 = vmul.f32 0.35355338, %v6319_v2  ;;  %v9501_v6 = vpop.f32.mrb[181].mxu0  ;;  %6330 = vmax.xlane.f32.xlu0 %v6329_v3 }
0x43fe   :  { %v6322_v56 = vpop.f32.mrb[182].mxu0 }
0x43ff   :  { %v6328_v42 = vsel %vm11402_vm12, %v6326_v5, -1e+30  ;;  %v9502_v7 = vpop.f32.mrb[183].mxu0 }
0x4400   :  { %v6332_v11 = vsel %vm556_vm5, %v6328_v42, -inf }
0x4401   :  { %6333 = vmax.xlane.f32.xlu1 %v6332_v11 }
0x4412   :  { %6353 = vrot.lane.b32.xlu1 %v11831_v4, %s10510_s22 }
0x4416   :  { %6461 = vrot.lane.b32.xlu1 %v11831_v4, %s10511_s23 }
0x441a   :  { %6511 = vrot.lane.b32.xlu1 %v11833_v60, %s10511_s23 }
0x441e   :  { %6509 = vrot.lane.b32.xlu1 %v11833_v60, %s10512_s19 }
0x448a   :  { %v6331_v12 = vpop.xlane.xlu0 %6330 }
0x448b   :  { %v6335_v13 = vsub.f32 %v6327_v63, %v6331_v12 }
0x448d   :  { %v6337_v15 = vmul.f32 1.442695, %v6335_v13 }
0x448e   :  { %v6334_v16 = vpop.xlane.xlu1 %6333 }
0x448f   :  { %10004 = vpow2.f32 %v6337_v15  ;;  %v6336_v17 = vsub.f32 %v6328_v42, %v6334_v16 }
0x4491   :  { %v6339_v18 = vmul.f32 1.442695, %v6336_v17 }
0x4492   :  { %v6354_v19 = vpop.permute.xlu1 %6353 }
0x4493   :  { %10006 = vpow2.f32 %v6339_v18  ;;  %v6359_v29 = vsel %vm683_vm6, %v6354_v19, 0 }
0x4494   :  { %9504 = vmatpush3.bf16.msra.mxu1 %v6359_v29 }
0x4495   :  { %9515 = vmatprep.subr.bf16.mxu1 %v10501_v1 }
0x4496   :  { %v6462_v37 = vpop.permute.xlu1 %6461 }
0x4497   :  { %v6467_v33 = vsel %vm556_vm5, %v6462_v37, 0  ;;  %v9817_v37 = vld [vmem:[%s12316_s5 + $0x18] sm:$0xff]  }
0x4499   :  { %v10005_v20 = vpop.eup %10004 }
0x449a   :  { %v6341_v22 = vsel %vm556_vm5, %v10005_v20, 0.0  ;;  %v6512_v10 = vpop.permute.xlu1 %6511 }
0x449b   :  { %6342 = vadd.xlane.f32.xlu0 %v6341_v22  ;;  %v6517_v35 = vsel %vm556_vm5, %v6512_v10, 0 }
0x449d   :  { %v10007_v24 = vpop.eup %10006 }
0x449e   :  { %v6344_v26 = vsel %vm556_vm5, %v10007_v24, 0.0  ;;  %v6510_v48 = vpop.permute.xlu1 %6509 }
0x449f   :  { %6345 = vadd.xlane.f32.xlu0 %v6344_v26 }
0x44b5   :  { %6401 = vrot.lane.b32.xlu0 %v11833_v60, %s10510_s22 }
0x44b9   :  { %6459 = vrot.lane.b32.xlu0 %v11831_v4, %s10512_s19 }
0x4528   :  { %v6343_v27 = vpop.xlane.xlu0 %6342 }
0x4529   :  { %10008 = vrcp.f32 %v6343_v27 }
0x452c   :  { %v6346_v31 = vpop.xlane.xlu0 %6345 }
0x452d   :  { %10010 = vrcp.f32 %v6346_v31 }
0x4530   :  { %v6402_v32 = vpop.permute.xlu0 %6401 }
0x4531   :  { %v6407_v34 = vsel %vm683_vm6, %v6402_v32, 0 }
0x4532   :  { %9510 = vmatpush3.bf16.msra.mxu0 %v6407_v34 }
0x4533   :  { %v10009_v36 = vpop.eup %10008  ;;  %9521 = vmatprep.subr.bf16.mxu0 %v10501_v1 }
0x4534   :  { %v6349_v38 = vmul.f32 %v10009_v36, %v10005_v20  ;;  %v6460_v46 = vpop.permute.xlu0 %6459  ;;  %v9816_v36 = vld [vmem:[%s12316_s5 + $0x10] sm:$0xff]  }
0x4536   :  { %v6351_v39 = vpack.c.bf16 %v6349_v38, %v6349_v38 }
0x4537   :  { %v10011_v41 = vpop.eup %10010 }
0x4538   :  { %v6350_v54 = vmul.f32 %v10011_v41, %v10007_v24  ;;  %9506 = vmatmul.mubr.msk.bf16.vlgmr.msra.gmra.mrb[184].mxu1 %vm556_vm5, %v6351_v39 }
0x4539   :  { %9516 = vmatpush3.bf16.xpose.msra.mxu1 %v6467_v33  ;;  %9517 = vmatprep.mubr.msk.bf16.mxu1 %vm10502_vm0, %v10501_v1 }
0x453a   :  { %v6352_v45 = vpack.c.bf16 %v6350_v54, %v6350_v54  ;;  %9527 = vmatprep.subr.bf16.mxu1 %v10501_v1 }
0x453c   :  { %9512 = vmatmul.mubr.msk.bf16.vlgmr.msra.gmra.mrb[184].mxu0 %vm556_vm5, %v6352_v45 }
0x453d   :  { %9522 = vmatpush3.bf16.xpose.msra.mxu0 %v6517_v35  ;;  %9523 = vmatprep.mubr.msk.bf16.mxu0 %vm10502_vm0, %v10501_v1 }
0x453e   :  { %9533 = vmatprep.subr.bf16.mxu0 %v10501_v1 }
0x4540   :  { %9518 = vmatmul.mubr.msk.bf16.vlgmr.msra.gmra.mrb[188].mxu1 %vm556_vm5, %v6460_v46 }
0x4541   :  { %9529 = vmatprep.mubr.msk.bf16.mxu1 %vm10502_vm0, %v10501_v1 }
0x4544   :  { %9524 = vmatmul.mubr.msk.bf16.vlgmr.msra.gmra.mrb[188].mxu0 %vm556_vm5, %v6510_v48 }
0x4545   :  { %9535 = vmatprep.mubr.msk.bf16.mxu0 %vm10502_vm0, %v10501_v1 }
0x460b   :  { %v6395_v49 = vpop.f32.mrb[184].mxu1 }
0x460c   :  { %v9507_v50 = vpop.f32.mrb[185].mxu1 }
0x460d   :  { %v6398_v51 = vpop.f32.mrb[186].mxu1 }
0x460e   :  { %v9508_v25 = vpop.f32.mrb[187].mxu1  ;;  %v9818_v51 = vld [vmem:[%s12317_s11 + $0x10] sm:$0xff]  }
0x460f   :  { %v6443_v53 = vpop.f32.mrb[184].mxu0 }
0x4610   :  { %v9513_v55 = vpop.f32.mrb[185].mxu0 }
0x4611   :  { %v6446_v44 = vpop.f32.mrb[186].mxu0  ;;  %v8540_v55 = vld [vmem:[#allocation10 + $0x1] ss:$0 sm:$0xff] }
0x4612   :  { %v9514_v58 = vpop.f32.mrb[187].mxu0 }
0x4613   :  { %v6503_v8 = vpop.f32.mrb[188].mxu1 }
0x4614   :  { %v6559_v9 = vmul.f32 0.35355338, %v6503_v8  ;;  %v9519_v28 = vpop.f32.mrb[189].mxu1 }
0x4615   :  { %v6506_v14 = vpop.f32.mrb[190].mxu1 }
0x4616   :  { %v6561_v30 = vsel %vm11402_vm12, %v6559_v9, -1e+30  ;;  %v9520_v52 = vpop.f32.mrb[191].mxu1 }
0x4617   :  { %v6553_v43 = vpop.f32.mrb[188].mxu0  ;;  %v6563_v61 = vsel %vm556_vm5, %v6561_v30, -inf }
0x4618   :  { %v6560_v62 = vmul.f32 0.35355338, %v6553_v43  ;;  %v9525_v63 = vpop.f32.mrb[189].mxu0  ;;  %6564 = vmax.xlane.f32.xlu0 %v6563_v61  ;;  %v8558_v61 = vld [vmem:[#allocation14 + $0x1] ss:$0 sm:$0xff] }
0x4619   :  { %v6556_v0 = vpop.f32.mrb[190].mxu0 }
0x461a   :  { %v6562_v2 = vsel %vm11402_vm12, %v6560_v62, -1e+30  ;;  %v9526_v3 = vpop.f32.mrb[191].mxu0 }
0x461b   :  { %v6566_v5 = vsel %vm556_vm5, %v6562_v2, -inf }
0x461c   :  { %6567 = vmax.xlane.f32.xlu1 %v6566_v5 }
0x462d   :  { %6587 = vrot.lane.b32.xlu1 %v11831_v4, %s10513_s17 }
0x4631   :  { %6217 = vrot.lane.b32.xlu1 %v11933_v57, %s10514_s25 }
0x4635   :  { %6219 = vrot.lane.b32.xlu1 %v11935_v40, %s10514_s25 }
0x4639   :  { %6453 = vrot.lane.b32.xlu1 %v6443_v53, %s10484_s2  ;;  %v9819_v53 = vld [vmem:[%s12317_s11 + $0x18] sm:$0xff]  }
0x46a5   :  { %v6565_v6 = vpop.xlane.xlu0 %6564 }
0x46a6   :  { %v6569_v56 = vsub.f32 %v6561_v30, %v6565_v6 }
0x46a8   :  { %v6571_v42 = vmul.f32 1.442695, %v6569_v56 }
0x46a9   :  { %v6568_v47 = vpop.xlane.xlu1 %6567 }
0x46aa   :  { %10012 = vpow2.f32 %v6571_v42  ;;  %v6570_v7 = vsub.f32 %v6562_v2, %v6568_v47 }
0x46ac   :  { %v6573_v11 = vmul.f32 1.442695, %v6570_v7 }
0x46ad   :  { %v6588_v12 = vpop.permute.xlu1 %6587 }
0x46ae   :  { %10014 = vpow2.f32 %v6573_v11  ;;  %v6593_v13 = vsel %vm683_vm6, %v6588_v12, 0 }
0x46af   :  { %9528 = vmatpush3.bf16.msra.mxu1 %v6593_v13 }
0x46b0   :  { %9539 = vmatprep.subr.bf16.mxu1 %v10501_v1 }
0x46b1   :  { %v6218_v4 = vpop.permute.xlu1 %6217 }
0x46b2   :  { %6223 = vst.msk [vmem:[#allocation2] sm:$0xff] %vm1007_vm7, %v6218_v4 }
0x46b4   :  { %v10013_v57 = vpop.eup %10012 }
0x46b5   :  { %v6220_v40 = vpop.permute.xlu1 %6219  ;;  %v6575_v15 = vsel %vm556_vm5, %v10013_v57, 0.0 }
0x46b6   :  { %6224 = vst.msk [vmem:[#allocation2 + $0x8] sm:$0xff] %vm1007_vm7, %v6220_v40  ;;  %6576 = vadd.xlane.f32.xlu0 %v6575_v15  ;;  %v9820_v40 = vld [vmem:[%s12318_s29 + $0x10] sm:$0xff]   ;;  %v9821_v15 = vld [vmem:[%s12318_s29 + $0x18] sm:$0xff]  }
0x46b8   :  { %v10015_v16 = vpop.eup %10014 }
0x46b9   :  { %v6454_v17 = vpop.permute.xlu1 %6453  ;;  %v6578_v18 = vsel %vm556_vm5, %v10015_v16, 0.0 }
0x46ba   :  { %6458 = vst.msk [vmem:[#allocation2 + $0x8] sm:$0xff] %vm1240_vm8, %v6454_v17  ;;  %6579 = vadd.xlane.f32.xlu0 %v6578_v18 }
0x46d0   :  { %6635 = vrot.lane.b32.xlu0 %v11833_v60, %s10513_s17 }
0x46d4   :  { %6451 = vrot.lane.b32.xlu0 %v6395_v49, %s10484_s2 }
0x4743   :  { %v6577_v19 = vpop.xlane.xlu0 %6576 }
0x4744   :  { %10016 = vrcp.f32 %v6577_v19 }
0x4747   :  { %v6580_v29 = vpop.xlane.xlu0 %6579 }
0x4748   :  { %10018 = vrcp.f32 %v6580_v29 }
0x474b   :  { %v6636_v20 = vpop.permute.xlu0 %6635 }
0x474c   :  { %v6641_v22 = vsel %vm683_vm6, %v6636_v20, 0 }
0x474d   :  { %9534 = vmatpush3.bf16.msra.mxu0 %v6641_v22 }
0x474e   :  { %v10017_v24 = vpop.eup %10016  ;;  %9547 = vmatprep.subr.bf16.mxu0 %v10501_v1 }
0x474f   :  { %v6583_v26 = vmul.f32 %v10017_v24, %v10013_v57  ;;  %v6452_v27 = vpop.permute.xlu0 %6451 }
0x4750   :  { %6457 = vst.msk [vmem:[#allocation2] sm:$0xff] %vm1240_vm8, %v6452_v27 }
0x4751   :  { %v6585_v60 = vpack.c.bf16 %v6583_v26, %v6583_v26  ;;  %v8544_v26 = vld [vmem:[#allocation19 + $0x1] ss:$0 sm:$0xff] }
0x4752   :  { %v10019_v31 = vpop.eup %10018 }
0x4753   :  { %v6584_v32 = vmul.f32 %v10019_v31, %v10015_v16  ;;  %9530 = vmatmul.mubr.msk.bf16.vlgmr.msra.gmra.mrb[192].mxu1 %vm556_vm5, %v6585_v60 }
0x4754   :  { %9543 = vmatprep.mubr.msk.bf16.mxu1 %vm10502_vm0, %v10501_v1  ;;  %9540 = vmatpush3.bf16.msra.mxu1 %v9816_v36 }
0x4755   :  { %v6586_v34 = vpack.c.bf16 %v6584_v32, %v6584_v32  ;;  %9541 = vmatprep.subr.bf16.mxu1 %v10501_v1  ;;  %v8545_v32 = vld [vmem:[#allocation17 + $0x1] ss:$0 sm:$0xff] }
0x4757   :  { %9536 = vmatmul.mubr.msk.bf16.vlgmr.msra.gmra.mrb[192].mxu0 %vm556_vm5, %v6586_v34 }
0x4758   :  { %9551 = vmatprep.mubr.msk.bf16.mxu0 %vm10502_vm0, %v10501_v1  ;;  %9542 = vmatpush3.bf16.msra.mxu1 %v9817_v37 }
0x4759   :  { %9555 = vmatprep.subr.bf16.mxu1 %v10501_v1  ;;  %9548 = vmatpush3.bf16.msra.mxu0 %v9820_v40 }
0x475a   :  { %9549 = vmatprep.subr.bf16.mxu0 %v10501_v1 }
0x475d   :  { %9550 = vmatpush3.bf16.msra.mxu0 %v9821_v15 }
0x475e   :  { %9563 = vmatprep.subr.bf16.mxu0 %v10501_v1 }
0x4826   :  { %v6629_v38 = vpop.f32.mrb[192].mxu1 }
0x4827   :  { %6685 = vrot.lane.b32.xlu0 %v6629_v38, %s10515_s3  ;;  %v9531_v39 = vpop.f32.mrb[193].mxu1 }
0x4828   :  { %v6632_v41 = vpop.f32.mrb[194].mxu1 }
0x4829   :  { %v9532_v33 = vpop.f32.mrb[195].mxu1 }
0x482a   :  { %v6677_v54 = vpop.f32.mrb[192].mxu0  ;;  %v8550_v33 = vld [vmem:[#allocation16 + $0x1] ss:$0 sm:$0xff] }
0x482b   :  { %6687 = vrot.lane.b32.xlu1 %v6677_v54, %s10515_s3  ;;  %v9537_v10 = vpop.f32.mrb[193].mxu0 }
0x482c   :  { %v6680_v45 = vpop.f32.mrb[194].mxu0 }
0x482d   :  { %v9538_v35 = vpop.f32.mrb[195].mxu0 }
0x4899   :  { %v6686_v46 = vpop.permute.xlu0 %6685 }
0x489a   :  { %6691 = vst.msk [vmem:[#allocation2] sm:$0xff] %vm1473_vm9, %v6686_v46 }
0x489d   :  { %v6688_v48 = vpop.permute.xlu1 %6687 }
0x489e   :  { %6692 = vst.msk [vmem:[#allocation2 + $0x8] sm:$0xff] %vm1473_vm9, %v6688_v48 }
0x48a1   :  { %v6693_v49 = vld [vmem:[#allocation2] sm:$0xff] }
0x48a5   :  { %v6694_v50 = vld [vmem:[#allocation2 + $0x8] sm:$0xff] }
0x48a6   :  { %v6695_v25 = vpack.c.bf16 %v6694_v50, %v6693_v49 }
0x48a8   :  { %9544 = vmatmul.mubr.msk.bf16.vlgmr.msra.gmra.mrb[196].mxu1 %vm501_vm4, %v6695_v25 }
0x48a9   :  { %9556 = vmatpush3.bf16.msra.mxu1 %v9818_v51  ;;  %9559 = vmatprep.mubr.msk.bf16.mxu1 %vm10502_vm0, %v10501_v1 }
0x48aa   :  { %9557 = vmatprep.subr.bf16.mxu1 %v10501_v1 }
0x48ad   :  { %9558 = vmatpush3.bf16.msra.mxu1 %v9819_v53 }
0x48ae   :  { %9569 = vmatprep.subr.bf16.mxu1 %v10501_v1 }
0x48b0   :  { %9560 = vmatmul.mubr.msk.bf16.vlgmr.msra.gmra.mrb[200].mxu1 %vm501_vm4, %v11596_v23 }
0x48b1   :  { %9571 = vmatprep.mubr.msk.bf16.mxu1 %vm10502_vm0, %v10501_v1 }
0x497b   :  { %v6751_v44 = vpop.f32.mrb[196].mxu1 }
0x497c   :  { %v6752_v58 = vadd.f32 %v8540_v55, %v6751_v44  ;;  %v9545_v8 = vpop.f32.mrb[197].mxu1 }
0x497d   :  { %v6754_v9 = vpop.f32.mrb[198].mxu1 }
0x497e   :  { %v6758_v28 = vadd.f32 %v6752_v58, %v11822_v21  ;;  %v6755_v14 = vadd.f32 %v8540_v55, %v6754_v9  ;;  %v9546_v30 = vpop.f32.mrb[199].mxu1 }
0x4980   :  { %v6759_v52 = vadd.f32 %v6755_v14, %v11824_v59  ;;  %v6764_v43 = vsel %vm501_vm4, %v6758_v28, 0.0 }
0x4981   :  { %6765 = vadd.xlane.f32.xlu0 %v6764_v43 }
0x4982   :  { %v6767_v23 = vsel %vm501_vm4, %v6759_v52, 0.0 }
0x4983   :  { %6768 = vadd.xlane.f32.xlu1 %v6767_v23  ;;  %v6935_v62 = vpop.f32.mrb[200].mxu1 }
0x4984   :  { %v6936_v63 = vadd.f32 %v8558_v61, %v6935_v62  ;;  %v9561_v0 = vpop.f32.mrb[201].mxu1 }
0x4985   :  { %v6938_v2 = vpop.f32.mrb[202].mxu1 }
0x4986   :  { %v6939_v3 = vadd.f32 %v8558_v61, %v6938_v2  ;;  %v9562_v5 = vpop.f32.mrb[203].mxu1  ;;  %v12043_v36 = vpack.c.bf16 %v6936_v63, %v6936_v63 }
0x4988   :  { %v12032_v6 = vpack.c.bf16 %v6939_v3, %v6939_v3  ;;  %v6957_v41 = vsel %vm556_vm5, %v12043_v36, 0 }
0x498a   :  { %v7003_v21 = vsel %vm556_vm5, %v12032_v6, 0 }
0x498b   :  { %9570 = vmatpush3.bf16.xpose.msra.mxu1 %v7003_v21 }
0x498c   :  { %9581 = vmatprep.subr.bf16.mxu1 %v10501_v1 }
0x4a0e   :  { %v6766_v59 = vpop.xlane.xlu0 %6765 }
0x4a0f   :  { %v6770_v56 = vmul.f32 0.03125, %v6766_v59 }
0x4a10   :  { %v6769_v42 = vpop.xlane.xlu1 %6768 }
0x4a11   :  { %v6772_v47 = vsub.f32 %v6758_v28, %v6770_v56  ;;  %v6771_v7 = vmul.f32 0.03125, %v6769_v42 }
0x4a13   :  { %v6773_v11 = vsub.f32 %v6759_v52, %v6771_v7  ;;  %v6774_v12 = vmul.f32 %v6772_v47, %v6772_v47 }
0x4a15   :  { %v6776_v13 = vsel %vm501_vm4, %v6774_v12, 0.0  ;;  %v6775_v4 = vmul.f32 %v6773_v11, %v6773_v11 }
0x4a16   :  { %6777 = vadd.xlane.f32.xlu0 %v6776_v13 }
0x4a17   :  { %v6779_v57 = vsel %vm501_vm4, %v6775_v4, 0.0 }
0x4a1a   :  { %6780 = vadd.xlane.f32.xlu0 %v6779_v57 }
0x4aa3   :  { %v6778_v16 = vpop.xlane.xlu0 %6777 }
0x4aa4   :  { %v6782_v17 = vmul.f32 0.03125, %v6778_v16 }
0x4aa6   :  { %v6784_v18 = vadd.f32 1e-05, %v6782_v17 }
0x4aa7   :  { %v6781_v19 = vpop.xlane.xlu0 %6780 }
0x4aa8   :  { %10020 = vrsqrt.f32 %v6784_v18  ;;  %v6783_v29 = vmul.f32 0.03125, %v6781_v19 }
0x4aaa   :  { %v6785_v20 = vadd.f32 1e-05, %v6783_v29 }
0x4aac   :  { %10022 = vrsqrt.f32 %v6785_v20 }
0x4ab2   :  { %v10021_v22 = vpop.eup %10020 }
0x4ab3   :  { %v6788_v24 = vmul.f32 %v10021_v22, %v6772_v47 }
0x4ab5   :  { %v6796_v60 = vmul.f32 %v8544_v26, %v6788_v24 }
0x4ab6   :  { %v10023_v27 = vpop.eup %10022 }
0x4ab7   :  { %v6789_v31 = vmul.f32 %v10023_v27, %v6773_v11  ;;  %v12045_v37 = vadd.f32 %v8545_v32, %v6796_v60 }
0x4ab9   :  { %v6797_v34 = vmul.f32 %v8544_v26, %v6789_v31 }
0x4abb   :  { %v12047_v38 = vadd.f32 %v8545_v32, %v6797_v34 }
0x4abd   :  { %v6811_v39 = vpack.c.bf16 %v12047_v38, %v12045_v37 }
0x4abf   :  { %9552 = vmatmul.mubr.msk.bf16.vlgmr.msra.gmra.mrb[196].mxu0 %vm501_vm4, %v6811_v39 }
0x4ac0   :  { %9564 = vmatpush3.bf16.xpose.msra.mxu0 %v6957_v41  ;;  %9565 = vmatprep.mubr.msk.bf16.mxu0 %vm10502_vm0, %v10501_v1 }
0x4ac1   :  { %9575 = vmatprep.subr.bf16.mxu0 %v10501_v1 }
0x4b92   :  { %v6869_v54 = vpop.f32.mrb[196].mxu0 }
0x4b93   :  { %v6870_v10 = vadd.f32 %v8550_v33, %v6869_v54  ;;  %v9553_v45 = vpop.f32.mrb[197].mxu0 }
0x4b94   :  { %v6872_v35 = vpop.f32.mrb[198].mxu0 }
0x4b95   :  { %v12057_v46 = vpack.c.bf16 %v6870_v10, %v6870_v10  ;;  %v6873_v48 = vadd.f32 %v8550_v33, %v6872_v35  ;;  %v9554_v49 = vpop.f32.mrb[199].mxu0 }
0x4b97   :  { %v12059_v50 = vpack.c.bf16 %v6873_v48, %v6873_v48  ;;  %9566 = vmatmul.mubr.msk.bf16.vlgmr.msra.gmra.mrb[200].mxu0 %vm556_vm5, %v12057_v46 }
0x4b98   :  { %9577 = vmatprep.mubr.msk.bf16.mxu0 %vm10502_vm0, %v10501_v1 }
0x4b99   :  { %9572 = vmatmul.mubr.msk.bf16.vlgmr.msra.gmra.mrb[204].mxu1 %vm556_vm5, %v12059_v50 }
0x4b9a   :  { %9583 = vmatprep.mubr.msk.bf16.mxu1 %vm10502_vm0, %v10501_v1 }
0x4c6a   :  { %v6993_v51 = vpop.f32.mrb[200].mxu0 }
0x4c6b   :  { %v7045_v25 = vmul.f32 0.35355338, %v6993_v51  ;;  %v9567_v53 = vpop.f32.mrb[201].mxu0 }
0x4c6c   :  { %v6996_v55 = vpop.f32.mrb[202].mxu0  ;;  %v7039_v44 = vpop.f32.mrb[204].mxu1 }
0x4c6d   :  { %v7046_v58 = vmul.f32 0.35355338, %v7039_v44  ;;  %v9568_v8 = vpop.f32.mrb[203].mxu0  ;;  %v9573_v9 = vpop.f32.mrb[205].mxu1  ;;  %v7047_v28 = vsel %vm556_vm5, %v7045_v25, -inf }
0x4c6e   :  { %7048 = vmax.xlane.f32.xlu1 %v7047_v28  ;;  %v7042_v14 = vpop.f32.mrb[206].mxu1 }
0x4c6f   :  { %v9574_v30 = vpop.f32.mrb[207].mxu1  ;;  %v7050_v52 = vsel %vm556_vm5, %v7046_v58, -inf }
0x4c70   :  { %7051 = vmax.xlane.f32.xlu0 %v7050_v52 }
0x4c7f   :  { %7072 = vrot.lane.b32.xlu1 %v12043_v36, %s10503_s14 }
0x4cfb   :  { %v7049_v43 = vpop.xlane.xlu1 %7048 }
0x4cfc   :  { %v7053_v61 = vsub.f32 %v7045_v25, %v7049_v43 }
0x4cfd   :  { %v7052_v23 = vpop.xlane.xlu0 %7051 }
0x4cfe   :  { %v7055_v62 = vmul.f32 1.442695, %v7053_v61  ;;  %v7054_v63 = vsub.f32 %v7046_v58, %v7052_v23 }
0x4cff   :  { %v7073_v0 = vpop.permute.xlu1 %7072 }
0x4d00   :  { %10024 = vpow2.f32 %v7055_v62  ;;  %v7057_v2 = vmul.f32 1.442695, %v7054_v63  ;;  %v7078_v3 = vsel %vm683_vm6, %v7073_v0, 0 }
0x4d01   :  { %9576 = vmatpush3.bf16.msra.mxu0 %v7078_v3 }
0x4d02   :  { %10026 = vpow2.f32 %v7057_v2  ;;  %9587 = vmatprep.subr.bf16.mxu0 %v10501_v1 }
0x4d0a   :  { %v10025_v5 = vpop.eup %10024 }
0x4d0b   :  { %v7059_v21 = vsel %vm556_vm5, %v10025_v5, 0.0 }
0x4d0c   :  { %v10027_v59 = vpop.eup %10026  ;;  %7060 = vadd.xlane.f32.xlu1 %v7059_v21 }
0x4d0d   :  { %v7062_v56 = vsel %vm556_vm5, %v10027_v59, 0.0 }
0x4d0e   :  { %7063 = vadd.xlane.f32.xlu0 %v7062_v56 }
0x4d1d   :  { %7174 = vrot.lane.b32.xlu1 %v12043_v36, %s10506_s9 }
0x4d21   :  { %7225 = vrot.lane.b32.xlu1 %v12032_v6, %s10506_s9 }
0x4d24   :  { %7121 = vrot.lane.b32.xlu0 %v12032_v6, %s10503_s14 }
0x4d25   :  { %7223 = vrot.lane.b32.xlu1 %v12059_v50, %s10506_s9 }
0x4d28   :  { %7172 = vrot.lane.b32.xlu0 %v12057_v46, %s10506_s9 }
0x4d99   :  { %v7061_v42 = vpop.xlane.xlu1 %7060 }
0x4d9a   :  { %10028 = vrcp.f32 %v7061_v42 }
0x4d9b   :  { %v7064_v47 = vpop.xlane.xlu0 %7063 }
0x4d9c   :  { %10030 = vrcp.f32 %v7064_v47 }
0x4d9d   :  { %v7175_v12 = vpop.permute.xlu1 %7174 }
0x4d9e   :  { %v7180_v17 = vsel %vm556_vm5, %v7175_v12, 0 }
0x4d9f   :  { %v7122_v7 = vpop.permute.xlu0 %7121 }
0x4da0   :  { %v7127_v11 = vsel %vm683_vm6, %v7122_v7, 0 }
0x4da1   :  { %9582 = vmatpush3.bf16.msra.mxu1 %v7127_v11  ;;  %v7226_v16 = vpop.permute.xlu1 %7225 }
0x4da2   :  { %9593 = vmatprep.subr.bf16.mxu1 %v10501_v1  ;;  %v7231_v19 = vsel %vm556_vm5, %v7226_v16, 0 }
0x4da3   :  { %v7173_v29 = vpop.permute.xlu0 %7172 }
0x4da4   :  { %v10029_v13 = vpop.eup %10028 }
0x4da5   :  { %v7067_v4 = vmul.f32 %v10029_v13, %v10025_v5  ;;  %v7224_v20 = vpop.permute.xlu1 %7223 }
0x4da6   :  { %v10031_v57 = vpop.eup %10030 }
0x4da7   :  { %v7068_v40 = vmul.f32 %v10031_v57, %v10027_v59  ;;  %v7069_v15 = vpack.c.bf16 %v7067_v4, %v7067_v4 }
0x4da9   :  { %9578 = vmatmul.mubr.msk.bf16.vlgmr.msra.gmra.mrb[204].mxu0 %vm556_vm5, %v7069_v15  ;;  %v7070_v18 = vpack.c.bf16 %v7068_v40, %v7068_v40 }
0x4daa   :  { %9588 = vmatpush3.bf16.xpose.msra.mxu0 %v7180_v17  ;;  %9589 = vmatprep.mubr.msk.bf16.mxu0 %vm10502_vm0, %v10501_v1 }
0x4dab   :  { %9584 = vmatmul.mubr.msk.bf16.vlgmr.msra.gmra.mrb[208].mxu1 %vm556_vm5, %v7070_v18  ;;  %9599 = vmatprep.subr.bf16.mxu0 %v10501_v1 }
0x4dac   :  { %9594 = vmatpush3.bf16.xpose.msra.mxu1 %v7231_v19  ;;  %9595 = vmatprep.mubr.msk.bf16.mxu1 %vm10502_vm0, %v10501_v1 }
0x4dad   :  { %9605 = vmatprep.subr.bf16.mxu1 %v10501_v1 }
0x4db1   :  { %9590 = vmatmul.mubr.msk.bf16.vlgmr.msra.gmra.mrb[208].mxu0 %vm556_vm5, %v7173_v29 }
0x4db2   :  { %9601 = vmatprep.mubr.msk.bf16.mxu0 %vm10502_vm0, %v10501_v1 }
0x4db3   :  { %9596 = vmatmul.mubr.msk.bf16.vlgmr.msra.gmra.mrb[212].mxu1 %vm556_vm5, %v7224_v20 }
0x4db4   :  { %9607 = vmatprep.mubr.msk.bf16.mxu1 %vm10502_vm0, %v10501_v1 }
0x4e7c   :  { %v7114_v22 = vpop.f32.mrb[204].mxu0 }
0x4e7d   :  { %7169 = vst.msk [vmem:[#allocation2] sm:$0xff] %vm556_vm5, %v7114_v22  ;;  %v9579_v24 = vpop.f32.mrb[205].mxu0 }
0x4e7e   :  { %v7117_v26 = vpop.f32.mrb[206].mxu0  ;;  %v7163_v27 = vpop.f32.mrb[208].mxu1 }
0x4e7f   :  { %7170 = vst.msk [vmem:[#allocation2 + $0x8] sm:$0xff] %vm556_vm5, %v7163_v27  ;;  %v9580_v60 = vpop.f32.mrb[207].mxu0  ;;  %v9585_v31 = vpop.f32.mrb[209].mxu1 }
0x4e80   :  { %v7166_v32 = vpop.f32.mrb[210].mxu1 }
0x4e81   :  { %v9586_v34 = vpop.f32.mrb[211].mxu1 }
0x4e84   :  { %v7216_v39 = vpop.f32.mrb[208].mxu0 }
0x4e85   :  { %v7273_v41 = vmul.f32 0.35355338, %v7216_v39  ;;  %v9591_v33 = vpop.f32.mrb[209].mxu0 }
0x4e86   :  { %v7219_v54 = vpop.f32.mrb[210].mxu0  ;;  %v7267_v10 = vpop.f32.mrb[212].mxu1 }
0x4e87   :  { %v7274_v45 = vmul.f32 0.35355338, %v7267_v10  ;;  %v9592_v35 = vpop.f32.mrb[211].mxu0  ;;  %v9597_v48 = vpop.f32.mrb[213].mxu1  ;;  %v7275_v49 = vsel %vm556_vm5, %v7273_v41, -inf }
0x4e88   :  { %7276 = vmax.xlane.f32.xlu0 %v7275_v49  ;;  %v7270_v51 = vpop.f32.mrb[214].mxu1 }
0x4e89   :  { %v9598_v25 = vpop.f32.mrb[215].mxu1  ;;  %v7278_v53 = vsel %vm556_vm5, %v7274_v45, -inf }
0x4e8a   :  { %7279 = vmax.xlane.f32.xlu1 %v7278_v53 }
0x4e9b   :  { %7299 = vrot.lane.b32.xlu1 %v12043_v36, %s10505_s15 }
0x4e9f   :  { %7407 = vrot.lane.b32.xlu1 %v12043_v36, %s10509_s18 }
0x4ea3   :  { %7457 = vrot.lane.b32.xlu1 %v12032_v6, %s10509_s18 }
0x4ea7   :  { %7455 = vrot.lane.b32.xlu1 %v12059_v50, %s10509_s18 }
0x4f15   :  { %v7277_v55 = vpop.xlane.xlu0 %7276 }
0x4f16   :  { %v7281_v44 = vsub.f32 %v7273_v41, %v7277_v55 }
0x4f17   :  { %v7280_v58 = vpop.xlane.xlu1 %7279 }
0x4f18   :  { %v7283_v8 = vmul.f32 1.442695, %v7281_v44  ;;  %v7282_v9 = vsub.f32 %v7274_v45, %v7280_v58 }
0x4f1a   :  { %10032 = vpow2.f32 %v7283_v8  ;;  %v7285_v28 = vmul.f32 1.442695, %v7282_v9 }
0x4f1b   :  { %v7300_v14 = vpop.permute.xlu1 %7299 }
0x4f1c   :  { %10034 = vpow2.f32 %v7285_v28  ;;  %v7305_v30 = vsel %vm683_vm6, %v7300_v14, 0 }
0x4f1d   :  { %9600 = vmatpush3.bf16.msra.mxu0 %v7305_v30 }
0x4f1e   :  { %9611 = vmatprep.subr.bf16.mxu0 %v10501_v1 }
0x4f1f   :  { %v7408_v5 = vpop.permute.xlu1 %7407 }
0x4f20   :  { %v7413_v42 = vsel %vm556_vm5, %v7408_v5, 0 }
0x4f23   :  { %v7458_v7 = vpop.permute.xlu1 %7457 }
0x4f24   :  { %v10033_v52 = vpop.eup %10032  ;;  %v7463_v12 = vsel %vm556_vm5, %v7458_v7, 0 }
0x4f25   :  { %v7287_v43 = vsel %vm556_vm5, %v10033_v52, 0.0 }
0x4f26   :  { %v10035_v61 = vpop.eup %10034  ;;  %7288 = vadd.xlane.f32.xlu0 %v7287_v43 }
0x4f27   :  { %v7290_v23 = vsel %vm556_vm5, %v10035_v61, 0.0  ;;  %v7456_v4 = vpop.permute.xlu1 %7455 }
0x4f2a   :  { %7291 = vadd.xlane.f32.xlu0 %v7290_v23 }
0x4f40   :  { %7347 = vrot.lane.b32.xlu0 %v12032_v6, %s10505_s15 }
0x4f44   :  { %7405 = vrot.lane.b32.xlu0 %v12057_v46, %s10509_s18 }
0x4fb3   :  { %v7289_v62 = vpop.xlane.xlu0 %7288 }
0x4fb4   :  { %10036 = vrcp.f32 %v7289_v62 }
0x4fb7   :  { %v7292_v63 = vpop.xlane.xlu0 %7291 }
0x4fb8   :  { %10038 = vrcp.f32 %v7292_v63 }
0x4fbb   :  { %v7348_v0 = vpop.permute.xlu0 %7347 }
0x4fbc   :  { %v7353_v2 = vsel %vm683_vm6, %v7348_v0, 0 }
0x4fbd   :  { %9606 = vmatpush3.bf16.msra.mxu1 %v7353_v2 }
0x4fbe   :  { %v10037_v3 = vpop.eup %10036  ;;  %9617 = vmatprep.subr.bf16.mxu1 %v10501_v1 }
0x4fbf   :  { %v7295_v21 = vmul.f32 %v10037_v3, %v10033_v52  ;;  %v7406_v13 = vpop.permute.xlu0 %7405 }
0x4fc1   :  { %v7297_v59 = vpack.c.bf16 %v7295_v21, %v7295_v21 }
0x4fc2   :  { %v10039_v56 = vpop.eup %10038 }
0x4fc3   :  { %v7296_v47 = vmul.f32 %v10039_v56, %v10035_v61  ;;  %9602 = vmatmul.mubr.msk.bf16.vlgmr.msra.gmra.mrb[212].mxu0 %vm556_vm5, %v7297_v59 }
0x4fc4   :  { %9612 = vmatpush3.bf16.xpose.msra.mxu0 %v7413_v42  ;;  %9613 = vmatprep.mubr.msk.bf16.mxu0 %vm10502_vm0, %v10501_v1 }
0x4fc5   :  { %v7298_v11 = vpack.c.bf16 %v7296_v47, %v7296_v47  ;;  %9623 = vmatprep.subr.bf16.mxu0 %v10501_v1 }
0x4fc7   :  { %9608 = vmatmul.mubr.msk.bf16.vlgmr.msra.gmra.mrb[216].mxu1 %vm556_vm5, %v7298_v11 }
0x4fc8   :  { %9618 = vmatpush3.bf16.xpose.msra.mxu1 %v7463_v12  ;;  %9619 = vmatprep.mubr.msk.bf16.mxu1 %vm10502_vm0, %v10501_v1 }
0x4fc9   :  { %9629 = vmatprep.subr.bf16.mxu1 %v10501_v1 }
0x4fcb   :  { %9614 = vmatmul.mubr.msk.bf16.vlgmr.msra.gmra.mrb[216].mxu0 %vm556_vm5, %v7406_v13 }
0x4fcc   :  { %9625 = vmatprep.mubr.msk.bf16.mxu0 %vm10502_vm0, %v10501_v1 }
0x4fcf   :  { %9620 = vmatmul.mubr.msk.bf16.vlgmr.msra.gmra.mrb[220].mxu1 %vm556_vm5, %v7456_v4 }
0x4fd0   :  { %9631 = vmatprep.mubr.msk.bf16.mxu1 %vm10502_vm0, %v10501_v1 }
0x5096   :  { %v12143_v57 = vpop.f32.mrb[212].mxu0 }
0x5097   :  { %v9603_v40 = vpop.f32.mrb[213].mxu0 }
0x5098   :  { %v7344_v15 = vpop.f32.mrb[214].mxu0 }
0x5099   :  { %v9604_v16 = vpop.f32.mrb[215].mxu0 }
0x509a   :  { %v12145_v17 = vpop.f32.mrb[216].mxu1 }
0x509b   :  { %v9609_v18 = vpop.f32.mrb[217].mxu1 }
0x509c   :  { %v7392_v19 = vpop.f32.mrb[218].mxu1 }
0x509d   :  { %v9610_v29 = vpop.f32.mrb[219].mxu1 }
0x509e   :  { %v7449_v20 = vpop.f32.mrb[216].mxu0 }
0x509f   :  { %v7505_v22 = vmul.f32 0.35355338, %v7449_v20  ;;  %v9615_v24 = vpop.f32.mrb[217].mxu0 }
0x50a0   :  { %v7452_v26 = vpop.f32.mrb[218].mxu0 }
0x50a1   :  { %v9616_v27 = vpop.f32.mrb[219].mxu0  ;;  %v7507_v60 = vsel %vm556_vm5, %v7505_v22, -inf }
0x50a2   :  { %7508 = vmax.xlane.f32.xlu0 %v7507_v60  ;;  %v7499_v31 = vpop.f32.mrb[220].mxu1 }
0x50a3   :  { %v7506_v32 = vmul.f32 0.35355338, %v7499_v31  ;;  %v9621_v34 = vpop.f32.mrb[221].mxu1 }
0x50a4   :  { %v7502_v39 = vpop.f32.mrb[222].mxu1 }
0x50a5   :  { %v9622_v41 = vpop.f32.mrb[223].mxu1  ;;  %v7510_v33 = vsel %vm556_vm5, %v7506_v32, -inf }
0x50a6   :  { %7511 = vmax.xlane.f32.xlu1 %v7510_v33 }
0x50b7   :  { %7531 = vrot.lane.b32.xlu1 %v12043_v36, %s10508_s30 }
0x50bb   :  { %7639 = vrot.lane.b32.xlu1 %v12043_v36, %s10512_s19 }
0x50bf   :  { %7689 = vrot.lane.b32.xlu1 %v12032_v6, %s10512_s19 }
0x50c3   :  { %7687 = vrot.lane.b32.xlu1 %v12059_v50, %s10512_s19 }
0x512f   :  { %v7509_v54 = vpop.xlane.xlu0 %7508 }
0x5130   :  { %v7513_v10 = vsub.f32 %v7505_v22, %v7509_v54 }
0x5132   :  { %v7515_v45 = vmul.f32 1.442695, %v7513_v10 }
0x5133   :  { %v7512_v35 = vpop.xlane.xlu1 %7511 }
0x5134   :  { %10040 = vpow2.f32 %v7515_v45  ;;  %v7514_v48 = vsub.f32 %v7506_v32, %v7512_v35 }
0x5136   :  { %v7517_v49 = vmul.f32 1.442695, %v7514_v48 }
0x5137   :  { %v7532_v51 = vpop.permute.xlu1 %7531 }
0x5138   :  { %10042 = vpow2.f32 %v7517_v49  ;;  %v7537_v25 = vsel %vm683_vm6, %v7532_v51, 0 }
0x5139   :  { %9624 = vmatpush3.bf16.msra.mxu0 %v7537_v25 }
0x513a   :  { %9635 = vmatprep.subr.bf16.mxu0 %v10501_v1 }
0x513b   :  { %v7640_v30 = vpop.permute.xlu1 %7639 }
0x513c   :  { %v7645_v23 = vsel %vm556_vm5, %v7640_v30, 0 }
0x513e   :  { %v10041_v53 = vpop.eup %10040 }
0x513f   :  { %v7519_v55 = vsel %vm556_vm5, %v10041_v53, 0.0 }
0x5140   :  { %7520 = vadd.xlane.f32.xlu0 %v7519_v55 }
0x5142   :  { %v10043_v44 = vpop.eup %10042 }
0x5143   :  { %v7522_v50 = vsel %vm556_vm5, %v10043_v44, 0.0 }
0x5144   :  { %7523 = vadd.xlane.f32.xlu0 %v7522_v50 }
0x515a   :  { %7579 = vrot.lane.b32.xlu0 %v12032_v6, %s10508_s30 }
0x515e   :  { %7637 = vrot.lane.b32.xlu0 %v12057_v46, %s10512_s19  ;;  %v7690_v46 = vpop.permute.xlu1 %7689 }
0x515f   :  { %v7695_v0 = vsel %vm556_vm5, %v7690_v46, 0 }
0x5162   :  { %v7688_v3 = vpop.permute.xlu1 %7687 }
0x51cd   :  { %v7521_v58 = vpop.xlane.xlu0 %7520 }
0x51ce   :  { %10044 = vrcp.f32 %v7521_v58 }
0x51d1   :  { %v7524_v8 = vpop.xlane.xlu0 %7523 }
0x51d2   :  { %10046 = vrcp.f32 %v7524_v8  ;;  %v9822_v8 = vld [vmem:[%s12319_s20 + $0x10] sm:$0xff]  }
0x51d5   :  { %v7580_v9 = vpop.permute.xlu0 %7579 }
0x51d6   :  { %v7585_v28 = vsel %vm683_vm6, %v7580_v9, 0  ;;  %v9823_v9 = vld [vmem:[%s12319_s20 + $0x18] sm:$0xff]  }
0x51d7   :  { %9630 = vmatpush3.bf16.msra.mxu1 %v7585_v28 }
0x51d8   :  { %v10045_v14 = vpop.eup %10044  ;;  %9641 = vmatprep.subr.bf16.mxu1 %v10501_v1 }
0x51d9   :  { %v7527_v52 = vmul.f32 %v10045_v14, %v10041_v53  ;;  %v7638_v2 = vpop.permute.xlu0 %7637 }
0x51db   :  { %v7529_v43 = vpack.c.bf16 %v7527_v52, %v7527_v52 }
0x51dc   :  { %v10047_v61 = vpop.eup %10046 }
0x51dd   :  { %v7528_v62 = vmul.f32 %v10047_v61, %v10043_v44  ;;  %9626 = vmatmul.mubr.msk.bf16.vlgmr.msra.gmra.mrb[220].mxu0 %vm556_vm5, %v7529_v43 }
0x51de   :  { %9636 = vmatpush3.bf16.xpose.msra.mxu0 %v7645_v23  ;;  %9637 = vmatprep.mubr.msk.bf16.mxu0 %vm10502_vm0, %v10501_v1 }
0x51df   :  { %v7530_v63 = vpack.c.bf16 %v7528_v62, %v7528_v62  ;;  %9647 = vmatprep.subr.bf16.mxu0 %v10501_v1 }
0x51e1   :  { %9632 = vmatmul.mubr.msk.bf16.vlgmr.msra.gmra.mrb[224].mxu1 %vm556_vm5, %v7530_v63 }
0x51e2   :  { %9642 = vmatpush3.bf16.xpose.msra.mxu1 %v7695_v0  ;;  %9643 = vmatprep.mubr.msk.bf16.mxu1 %vm10502_vm0, %v10501_v1 }
0x51e3   :  { %9653 = vmatprep.subr.bf16.mxu1 %v10501_v1 }
0x51e5   :  { %9638 = vmatmul.mubr.msk.bf16.vlgmr.msra.gmra.mrb[224].mxu0 %vm556_vm5, %v7638_v2 }
0x51e6   :  { %9649 = vmatprep.mubr.msk.bf16.mxu0 %vm10502_vm0, %v10501_v1 }
0x51e9   :  { %9644 = vmatmul.mubr.msk.bf16.vlgmr.msra.gmra.mrb[228].mxu1 %vm556_vm5, %v7688_v3 }
0x51ea   :  { %9655 = vmatprep.mubr.msk.bf16.mxu1 %vm10502_vm0, %v10501_v1 }
0x52b0   :  { %v7573_v5 = vpop.f32.mrb[220].mxu0 }
0x52b1   :  { %v9627_v21 = vpop.f32.mrb[221].mxu0 }
0x52b2   :  { %v7576_v59 = vpop.f32.mrb[222].mxu0 }
0x52b3   :  { %v9628_v56 = vpop.f32.mrb[223].mxu0 }
0x52b4   :  { %v7621_v42 = vpop.f32.mrb[224].mxu1 }
0x52b5   :  { %v9633_v47 = vpop.f32.mrb[225].mxu1 }
0x52b6   :  { %v7624_v7 = vpop.f32.mrb[226].mxu1 }
0x52b7   :  { %v9634_v11 = vpop.f32.mrb[227].mxu1 }
0x52b8   :  { %v7681_v12 = vpop.f32.mrb[224].mxu0 }
0x52b9   :  { %v7737_v13 = vmul.f32 0.35355338, %v7681_v12  ;;  %v9639_v4 = vpop.f32.mrb[225].mxu0 }
0x52ba   :  { %v7684_v40 = vpop.f32.mrb[226].mxu0 }
0x52bb   :  { %v9640_v15 = vpop.f32.mrb[227].mxu0  ;;  %v7739_v16 = vsel %vm556_vm5, %v7737_v13, -inf }
0x52bc   :  { %7740 = vmax.xlane.f32.xlu0 %v7739_v16  ;;  %v7731_v18 = vpop.f32.mrb[228].mxu1 }
0x52bd   :  { %v7738_v19 = vmul.f32 0.35355338, %v7731_v18  ;;  %v9645_v29 = vpop.f32.mrb[229].mxu1 }
0x52be   :  { %v7734_v20 = vpop.f32.mrb[230].mxu1 }
0x52bf   :  { %v9646_v22 = vpop.f32.mrb[231].mxu1  ;;  %v7742_v24 = vsel %vm556_vm5, %v7738_v19, -inf }
0x52c0   :  { %7743 = vmax.xlane.f32.xlu1 %v7742_v24  ;;  %v9824_v24 = vld [vmem:[%s12320_s26 + $0x10] sm:$0xff]  }
0x52d1   :  { %7763 = vrot.lane.b32.xlu1 %v12043_v36, %s10511_s23 }
0x52d5   :  { %7397 = vrot.lane.b32.xlu1 %v12143_v57, %s10514_s25 }
0x52d9   :  { %7399 = vrot.lane.b32.xlu1 %v12145_v17, %s10514_s25 }
0x52dd   :  { %7631 = vrot.lane.b32.xlu1 %v7621_v42, %s10484_s2 }
0x5349   :  { %v7741_v26 = vpop.xlane.xlu0 %7740 }
0x534a   :  { %v7745_v27 = vsub.f32 %v7737_v13, %v7741_v26  ;;  %v9825_v26 = vld [vmem:[%s12320_s26 + $0x18] sm:$0xff]  }
0x534c   :  { %v7747_v60 = vmul.f32 1.442695, %v7745_v27  ;;  %v9826_v27 = vld [vmem:[%s12321_s24 + $0x20] sm:$0xff]  }
0x534d   :  { %v7744_v31 = vpop.xlane.xlu1 %7743 }
0x534e   :  { %10048 = vpow2.f32 %v7747_v60  ;;  %v7746_v32 = vsub.f32 %v7738_v19, %v7744_v31  ;;  %v9827_v60 = vld [vmem:[%s12321_s24 + $0x28] sm:$0xff]  }
0x5350   :  { %v7749_v34 = vmul.f32 1.442695, %v7746_v32 }
0x5351   :  { %v7764_v39 = vpop.permute.xlu1 %7763 }
0x5352   :  { %10050 = vpow2.f32 %v7749_v34  ;;  %v7769_v41 = vsel %vm683_vm6, %v7764_v39, 0 }
0x5353   :  { %9648 = vmatpush3.bf16.msra.mxu0 %v7769_v41 }
0x5354   :  { %9659 = vmatprep.subr.bf16.mxu0 %v10501_v1 }
0x5355   :  { %v7398_v36 = vpop.permute.xlu1 %7397 }
0x5356   :  { %7403 = vst.msk [vmem:[#allocation2] sm:$0xff] %vm1007_vm7, %v7398_v36 }
0x5358   :  { %v10049_v57 = vpop.eup %10048 }
0x5359   :  { %v7400_v17 = vpop.permute.xlu1 %7399  ;;  %v7751_v33 = vsel %vm556_vm5, %v10049_v57, 0.0 }
0x535a   :  { %7404 = vst.msk [vmem:[#allocation2 + $0x8] sm:$0xff] %vm1007_vm7, %v7400_v17  ;;  %7752 = vadd.xlane.f32.xlu0 %v7751_v33  ;;  %v8586_v33 = vld [vmem:[#allocation22 + $0x1] ss:$0 sm:$0xff] }
0x535c   :  { %v10051_v54 = vpop.eup %10050 }
0x535d   :  { %v7632_v10 = vpop.permute.xlu1 %7631  ;;  %v7754_v45 = vsel %vm556_vm5, %v10051_v54, 0.0 }
0x535e   :  { %7636 = vst.msk [vmem:[#allocation2 + $0x8] sm:$0xff] %vm1240_vm8, %v7632_v10  ;;  %7755 = vadd.xlane.f32.xlu0 %v7754_v45 }
0x5374   :  { %7811 = vrot.lane.b32.xlu0 %v12032_v6, %s10511_s23 }
0x5378   :  { %7629 = vrot.lane.b32.xlu0 %v7573_v5, %s10484_s2  ;;  %v8582_v5 = vld [vmem:[#allocation11 + $0x1] ss:$0 sm:$0xff] }
0x53e7   :  { %v7753_v35 = vpop.xlane.xlu0 %7752 }
0x53e8   :  { %10052 = vrcp.f32 %v7753_v35  ;;  %v8587_v35 = vld [vmem:[#allocation20 + $0x1] ss:$0 sm:$0xff] }
0x53eb   :  { %v7756_v48 = vpop.xlane.xlu0 %7755 }
0x53ec   :  { %10054 = vrcp.f32 %v7756_v48 }
0x53ef   :  { %v7812_v49 = vpop.permute.xlu0 %7811 }
0x53f0   :  { %v7817_v51 = vsel %vm683_vm6, %v7812_v49, 0 }
0x53f1   :  { %9654 = vmatpush3.bf16.msra.mxu1 %v7817_v51 }
0x53f2   :  { %v10053_v25 = vpop.eup %10052  ;;  %9667 = vmatprep.subr.bf16.mxu1 %v10501_v1 }
0x53f3   :  { %v7759_v53 = vmul.f32 %v10053_v25, %v10049_v57  ;;  %v7630_v55 = vpop.permute.xlu0 %7629 }
0x53f4   :  { %7635 = vst.msk [vmem:[#allocation2] sm:$0xff] %vm1240_vm8, %v7630_v55  ;;  %v9829_v55 = vld [vmem:[%s12321_s24 + $0x38] sm:$0xff]  }
0x53f5   :  { %v7761_v6 = vpack.c.bf16 %v7759_v53, %v7759_v53  ;;  %v9828_v53 = vld [vmem:[%s12321_s24 + $0x30] sm:$0xff]  }
0x53f6   :  { %v10055_v44 = vpop.eup %10054 }
0x53f7   :  { %v7760_v50 = vmul.f32 %v10055_v44, %v10051_v54  ;;  %9650 = vmatmul.mubr.msk.bf16.vlgmr.msra.gmra.mrb[228].mxu0 %vm556_vm5, %v7761_v6  ;;  %v8600_v6 = vld [vmem:[#allocation7 + $0x1] ss:$0 sm:$0xff] }
0x53f8   :  { %9663 = vmatprep.mubr.msk.bf16.mxu0 %vm10502_vm0, %v10501_v1  ;;  %9660 = vmatpush3.bf16.msra.mxu0 %v9822_v8 }
0x53f9   :  { %v7762_v58 = vpack.c.bf16 %v7760_v50, %v7760_v50  ;;  %9661 = vmatprep.subr.bf16.mxu0 %v10501_v1 }
0x53fb   :  { %9656 = vmatmul.mubr.msk.bf16.vlgmr.msra.gmra.mrb[232].mxu1 %vm556_vm5, %v7762_v58 }
0x53fc   :  { %9671 = vmatprep.mubr.msk.bf16.mxu1 %vm10502_vm0, %v10501_v1  ;;  %9662 = vmatpush3.bf16.msra.mxu0 %v9823_v9 }
0x53fd   :  { %9675 = vmatprep.subr.bf16.mxu0 %v10501_v1  ;;  %9668 = vmatpush3.bf16.msra.mxu1 %v9824_v24  ;;  %v8610_v24 = vld [vmem:[#allocation25 + $0x1] ss:$0 sm:$0xff] }
0x53fe   :  { %9669 = vmatprep.subr.bf16.mxu1 %v10501_v1 }
0x5401   :  { %9670 = vmatpush3.bf16.msra.mxu1 %v9825_v26 }
0x5402   :  { %9687 = vmatprep.subr.bf16.mxu1 %v10501_v1 }
0x54ca   :  { %v7805_v28 = vpop.f32.mrb[228].mxu0 }
0x54cb   :  { %7861 = vrot.lane.b32.xlu0 %v7805_v28, %s10515_s3  ;;  %v9651_v14 = vpop.f32.mrb[229].mxu0 }
0x54cc   :  { %v7808_v30 = vpop.f32.mrb[230].mxu0 }
0x54cd   :  { %v9652_v52 = vpop.f32.mrb[231].mxu0 }
0x54ce   :  { %v7853_v43 = vpop.f32.mrb[232].mxu1 }
0x54cf   :  { %7863 = vrot.lane.b32.xlu1 %v7853_v43, %s10515_s3  ;;  %v9657_v61 = vpop.f32.mrb[233].mxu1  ;;  %v8604_v43 = vld [vmem:[#allocation8 + $0x1] ss:$0 sm:$0xff] }
0x54d0   :  { %v7856_v23 = vpop.f32.mrb[234].mxu1 }
0x54d1   :  { %v9658_v62 = vpop.f32.mrb[235].mxu1 }
0x553d   :  { %v7862_v46 = vpop.permute.xlu0 %7861 }
0x553e   :  { %7867 = vst.msk [vmem:[#allocation2] sm:$0xff] %vm1473_vm9, %v7862_v46 }
0x5541   :  { %v7864_v63 = vpop.permute.xlu1 %7863 }
0x5542   :  { %7868 = vst.msk [vmem:[#allocation2 + $0x8] sm:$0xff] %vm1473_vm9, %v7864_v63 }
0x5545   :  { %v7869_v0 = vld [vmem:[#allocation2] sm:$0xff] }
0x5549   :  { %v7870_v2 = vld [vmem:[#allocation2 + $0x8] sm:$0xff] }
0x554a   :  { %v7871_v3 = vpack.c.bf16 %v7870_v2, %v7869_v0 }
0x554c   :  { %9664 = vmatmul.mubr.msk.bf16.vlgmr.msra.gmra.mrb[232].mxu0 %vm501_vm4, %v7871_v3 }
0x554d   :  { %9683 = vmatprep.mubr.msk.bf16.mxu0 %vm10502_vm0, %v10501_v1  ;;  %9676 = vmatpush3.bf16.msra.mxu0 %v9826_v27 }
0x554e   :  { %9677 = vmatprep.subr.bf16.mxu0 %v10501_v1 }
0x5551   :  { %9678 = vmatpush3.bf16.msra.mxu0 %v9827_v60 }
0x5552   :  { %9679 = vmatprep.subr.bf16.mxu0 %v10501_v1 }
0x5555   :  { %9680 = vmatpush3.bf16.msra.mxu0 %v9828_v53 }
0x5556   :  { %9681 = vmatprep.subr.bf16.mxu0 %v10501_v1 }
0x5559   :  { %9682 = vmatpush3.bf16.msra.mxu0 %v9829_v55 }
0x561f   :  { %v7927_v21 = vpop.f32.mrb[232].mxu0 }
0x5620   :  { %v7928_v59 = vadd.f32 %v8582_v5, %v7927_v21  ;;  %v9665_v56 = vpop.f32.mrb[233].mxu0 }
0x5621   :  { %v7930_v42 = vpop.f32.mrb[234].mxu0 }
0x5622   :  { %v7934_v47 = vadd.f32 %v7928_v59, %v12045_v37  ;;  %v7931_v7 = vadd.f32 %v8582_v5, %v7930_v42  ;;  %v9666_v11 = vpop.f32.mrb[235].mxu0 }
0x5624   :  { %v7935_v12 = vadd.f32 %v7931_v7, %v12047_v38  ;;  %v7940_v13 = vsel %vm501_vm4, %v7934_v47, 0.0 }
0x5625   :  { %7941 = vadd.xlane.f32.xlu0 %v7940_v13 }
0x5626   :  { %v7943_v4 = vsel %vm501_vm4, %v7935_v12, 0.0 }
0x5627   :  { %7944 = vadd.xlane.f32.xlu1 %v7943_v4 }
0x56b2   :  { %v7942_v40 = vpop.xlane.xlu0 %7941 }
0x56b3   :  { %v7946_v15 = vmul.f32 0.03125, %v7942_v40 }
0x56b4   :  { %v7945_v16 = vpop.xlane.xlu1 %7944 }
0x56b5   :  { %v7948_v18 = vsub.f32 %v7934_v47, %v7946_v15  ;;  %v7947_v19 = vmul.f32 0.03125, %v7945_v16  ;;  %v9830_v15 = vld [vmem:[%s10709_s13] sm:$0xff]   ;;  %v9831_v16 = vld [vmem:[%s10709_s13 + $0x8] sm:$0xff]  }
0x56b7   :  { %v7949_v37 = vsub.f32 %v7935_v12, %v7947_v19  ;;  %v7950_v29 = vmul.f32 %v7948_v18, %v7948_v18 }
0x56b9   :  { %v7952_v20 = vsel %vm501_vm4, %v7950_v29, 0.0  ;;  %v7951_v38 = vmul.f32 %v7949_v37, %v7949_v37 }
0x56ba   :  { %7953 = vadd.xlane.f32.xlu0 %v7952_v20 }
0x56bb   :  { %v7955_v22 = vsel %vm501_vm4, %v7951_v38, 0.0 }
0x56be   :  { %7956 = vadd.xlane.f32.xlu0 %v7955_v22 }
0x5747   :  { %v7954_v31 = vpop.xlane.xlu0 %7953 }
0x5748   :  { %v7958_v32 = vmul.f32 0.03125, %v7954_v31 }
0x574a   :  { %v7960_v34 = vadd.f32 1e-05, %v7958_v32  ;;  %v8611_v32 = vld [vmem:[#allocation23 + $0x1] ss:$0 sm:$0xff] }
0x574b   :  { %v7957_v39 = vpop.xlane.xlu0 %7956 }
0x574c   :  { %10056 = vrsqrt.f32 %v7960_v34  ;;  %v7959_v41 = vmul.f32 0.03125, %v7957_v39 }
0x574e   :  { %v7961_v36 = vadd.f32 1e-05, %v7959_v41 }
0x5750   :  { %10058 = vrsqrt.f32 %v7961_v36  ;;  %v8612_v36 = vld [vmem:[#allocation26] ss:$0 sm:$0xff] }
0x5756   :  { %v10057_v57 = vpop.eup %10056 }
0x5757   :  { %v7964_v17 = vmul.f32 %v10057_v57, %v7948_v18 }
0x5759   :  { %v7972_v10 = vmul.f32 %v8586_v33, %v7964_v17 }
0x575a   :  { %v10059_v54 = vpop.eup %10058 }
0x575b   :  { %v7965_v45 = vmul.f32 %v10059_v54, %v7949_v37  ;;  %v7980_v49 = vadd.f32 %v8587_v35, %v7972_v10 }
0x575d   :  { %v7973_v48 = vmul.f32 %v8586_v33, %v7965_v45 }
0x575f   :  { %v7981_v51 = vadd.f32 %v8587_v35, %v7973_v48 }
0x5761   :  { %v8000_v25 = vpack.c.bf16 %v7981_v51, %v7980_v49 }
0x5763   :  { %9672 = vmatmul.mubr.msk.bf16.vlgmr.msra.gmra.mrb[236].mxu1 %vm501_vm4, %v8000_v25 }
0x5764   :  { %9691 = vmatprep.mubr.msk.bf16.mxu1 %vm10502_vm0, %v10501_v1  ;;  %9688 = vmatpush3.bf16.msra.mxu1 %v9830_v15 }
0x5765   :  { %9689 = vmatprep.subr.bf16.mxu1 %v10501_v1 }
0x5768   :  { %9690 = vmatpush3.bf16.msra.mxu1 %v9831_v16 }
0x5836   :  { %v8056_v44 = vpop.f32.mrb[236].mxu1 }
0x5837   :  { %v8057_v50 = vadd.f32 %v8600_v6, %v8056_v44  ;;  %v9673_v58 = vpop.f32.mrb[237].mxu1 }
0x5838   :  { %v8059_v8 = vpop.f32.mrb[238].mxu1 }
0x5839   :  { %v8060_v9 = vadd.f32 %v8600_v6, %v8059_v8  ;;  %v9674_v28 = vpop.f32.mrb[239].mxu1  ;;  %v8063_v14 = vmax.f32 %v8057_v50, 0.0 }
0x583b   :  { %v8064_v30 = vmax.f32 %v8060_v9, 0.0 }
0x583d   :  { %v8065_v52 = vpack.c.bf16 %v8064_v30, %v8063_v14 }
0x583f   :  { %9684 = vmatmul.mubr.msk.bf16.vlgmr.msra.gmra.mrb[236].mxu0 %vm428_vm3, %v8065_v52 }
0x5912   :  { %v8133_v61 = vpop.f32.mrb[236].mxu0 }
0x5913   :  { %v8134_v23 = vadd.f32 %v8604_v43, %v8133_v61  ;;  %v9685_v62 = vpop.f32.mrb[237].mxu0 }
0x5914   :  { %v8136_v46 = vpop.f32.mrb[238].mxu0 }
0x5915   :  { %v8140_v63 = vadd.f32 %v8134_v23, %v7980_v49  ;;  %v8137_v0 = vadd.f32 %v8604_v43, %v8136_v46  ;;  %v9686_v2 = vpop.f32.mrb[239].mxu0 }
0x5917   :  { %v8141_v3 = vadd.f32 %v8137_v0, %v7981_v51  ;;  %v8146_v5 = vsel %vm501_vm4, %v8140_v63, 0.0 }
0x5918   :  { %8147 = vadd.xlane.f32.xlu1 %v8146_v5 }
0x5919   :  { %v8149_v21 = vsel %vm501_vm4, %v8141_v3, 0.0 }
0x591a   :  { %8150 = vadd.xlane.f32.xlu0 %v8149_v21 }
0x59a5   :  { %v8148_v59 = vpop.xlane.xlu1 %8147 }
0x59a6   :  { %v8152_v56 = vmul.f32 0.03125, %v8148_v59 }
0x59a7   :  { %v8151_v42 = vpop.xlane.xlu0 %8150 }
0x59a8   :  { %v8154_v47 = vsub.f32 %v8140_v63, %v8152_v56  ;;  %v8153_v7 = vmul.f32 0.03125, %v8151_v42 }
0x59aa   :  { %v8155_v11 = vsub.f32 %v8141_v3, %v8153_v7  ;;  %v8156_v12 = vmul.f32 %v8154_v47, %v8154_v47 }
0x59ac   :  { %v8158_v13 = vsel %vm501_vm4, %v8156_v12, 0.0  ;;  %v8157_v4 = vmul.f32 %v8155_v11, %v8155_v11 }
0x59ad   :  { %8159 = vadd.xlane.f32.xlu1 %v8158_v13 }
0x59ae   :  { %v8161_v40 = vsel %vm501_vm4, %v8157_v4, 0.0 }
0x59af   :  { %8162 = vadd.xlane.f32.xlu0 %v8161_v40 }
0x5a3a   :  { %v8160_v18 = vpop.xlane.xlu1 %8159 }
0x5a3b   :  { %v8164_v19 = vmul.f32 0.03125, %v8160_v18 }
0x5a3c   :  { %v8163_v37 = vpop.xlane.xlu0 %8162 }
0x5a3d   :  { %v8166_v29 = vadd.f32 1e-05, %v8164_v19  ;;  %v8165_v20 = vmul.f32 0.03125, %v8163_v37 }
0x5a3f   :  { %10060 = vrsqrt.f32 %v8166_v29  ;;  %v8167_v38 = vadd.f32 1e-05, %v8165_v20 }
0x5a41   :  { %10062 = vrsqrt.f32 %v8167_v38 }
0x5a49   :  { %v10061_v22 = vpop.eup %10060 }
0x5a4a   :  { %v8170_v26 = vmul.f32 %v10061_v22, %v8154_v47 }
0x5a4b   :  { %v10063_v27 = vpop.eup %10062 }
0x5a4c   :  { %v8178_v60 = vmul.f32 %v8610_v24, %v8170_v26  ;;  %v8171_v31 = vmul.f32 %v10063_v27, %v8155_v11 }
0x5a4e   :  { %v8179_v34 = vmul.f32 %v8610_v24, %v8171_v31  ;;  %v8186_v39 = vadd.f32 %v8611_v32, %v8178_v60 }
0x5a50   :  { %v8187_v41 = vadd.f32 %v8611_v32, %v8179_v34 }
0x5a52   :  { %v8192_v1 = vpack.c.bf16 %v8187_v41, %v8186_v39 }
0x5a54   :  { %9692 = vmatmul.mubr.msk.bf16.vlgmr.msra.gmra.mrb[240].mxu1 %vm501_vm4, %v8192_v1 }
0x5b27   :  { %v8249_v57 = vpop.f32.mrb[240].mxu1 }
0x5b28   :  { %v8250_v17 = vadd.f32 %v8612_v36, %v8249_v57  ;;  %v9693_v33 = vpop.f32.mrb[241].mxu1 }
0x5b29   :  { %v8252_v54 = vpop.f32.mrb[242].mxu1 }
0x5b2a   :  { %v8253_v10 = vadd.f32 %v8612_v36, %v8252_v54  ;;  %8256 = vmax.xlane.f32.xlu1 %v8250_v17  ;;  %v9694_v45 = vpop.f32.mrb[243].mxu1 }
0x5b2c   :  { %8258 = vmax.xlane.f32.xlu0 %v8253_v10 }
0x5bb7   :  { %v8257_v35 = vpop.xlane.xlu1 %8256 }
0x5bb8   :  { %v8260_v48 = vsub.f32 %v8250_v17, %v8257_v35 }
0x5bb9   :  { %v8259_v49 = vpop.xlane.xlu0 %8258 }
0x5bba   :  { %v8262_v51 = vmul.f32 1.442695, %v8260_v48  ;;  %v8261_v25 = vsub.f32 %v8253_v10, %v8259_v49 }
0x5bbc   :  { %10064 = vpow2.f32 %v8262_v51  ;;  %v8264_v53 = vmul.f32 1.442695, %v8261_v25 }
0x5bbe   :  { %10066 = vpow2.f32 %v8264_v53 }
0x5bc6   :  { %v10065_v55 = vpop.eup %10064 }
0x5bc7   :  { %8266 = vadd.xlane.f32.xlu1 %v10065_v55 }
0x5bc8   :  { %v10067_v6 = vpop.eup %10066 }
0x5bc9   :  { %8268 = vadd.xlane.f32.xlu0 %v10067_v6 }
0x5c54   :  { %v8267_v44 = vpop.xlane.xlu1 %8266 }
0x5c55   :  { %10068 = vrcp.f32 %v8267_v44 }
0x5c56   :  { %v8269_v50 = vpop.xlane.xlu0 %8268 }
0x5c57   :  { %10070 = vrcp.f32 %v8269_v50 }
0x5c5f   :  { %v10069_v58 = vpop.eup %10068 }
0x5c60   :  { %v8272_v8 = vmul.f32 %v10069_v58, %v10065_v55 }
0x5c61   :  { %v10071_v9 = vpop.eup %10070 }
0x5c62   :  { %8274 = vst [vmem:[%s10719_s21] sm:$0xff] %v8272_v8  ;;  %v8273_v28 = vmul.f32 %v10071_v9, %v10067_v6 }
0x5c64   :  { %8275 = vst [vmem:[%s10719_s21 + $0x8] sm:$0xff] %v8273_v28 }
0x5c65   :  { %8280 = vsyncpa [#allocation4], 1 }
0x5c66   :  { %8281 = vsyncpa [#allocation6], 1 }
0x5c67   :  { %8282 = vsyncpa [#allocation9], 1 }
0x5c68   :  { %8283 = vsyncpa [#allocation12], 1 }
0x5c69   :  { %8284 = vsyncpa [#allocation15], 1 }
0x5c6a   :  { %8285 = vsyncpa [#allocation18], 1 }
0x5c6b   :  { %8286 = vsyncpa [#allocation21], 1 }
0x5c6c   :  { %8287 = vsyncpa [#allocation24], 1 }
0x5c6d   :  { %8288 = vsyncpa [#allocation27], 1 }

</bundles_post_ra>
